<compile_context>
chip_gen: v5e
topology: v5e:2x2
jax: 0.10.0
libtpu: 0.0.40
codegen_flags: <defaults>
</compile_context>

<pallas_src>
import math

import jax
import jax.numpy as jnp
from jax.experimental import pallas as pl
from jax.experimental.pallas import tpu as pltpu


def _leaky(v):
    # nn.LeakyReLU default negative_slope = 0.01
    return jnp.where(v >= 0, v, 0.01 * v)


def make_ae2_kernel(nx: int, nh: int, nz: int, nclasses: int):
    base = 2 * nz + nclasses   # lane offset of the 4 per-row loss features

    def ae2_kernel(
        # inputs (tiled over batch)
        x_ref, eps_ref,
        # fused x-projection: [Qh.Linear1 | Qy.(Linear1∘Linear2)]  (BN folded)
        wx_ref, bx_ref,
        # Qh second Linear (BN folded)
        w2_ref, b2_ref,
        # Qz|LVz fused, lane-padded to 128
        wzl_ref, bzl_ref,
        # Qy last Linear, lane-padded to 128 (bias pads = -1e30)
        wy3_ref, by3_ref,
        # clusterhead_embedding (rows aligned with q_y lanes)
        wc_ref, bc_ref,
        # Px decoder
        wp1_ref, bp1_ref, wp2_ref, bp2_ref, wp3_ref, bp3_ref,
        # outputs
        h_ref, rec_ref, slab_ref,
    ):
        f32 = jnp.float32
        bf16 = jnp.bfloat16

        xb = x_ref[...].astype(bf16)                     # (TM, nx)

        # ---- fused x-projection, then LeakyReLU over the full (TM, 2*nh) ----
        xh = _leaky(jnp.dot(xb, wx_ref[...], preferred_element_type=f32) + bx_ref[...])
        h1 = xh[:, :nh]          # Qh path
        a2 = xh[:, nh:]          # Qy path (Linear∘Linear folded, LeakyReLU applied)

        # ---- Qh second layer ----
        h = _leaky(jnp.dot(h1.astype(bf16), w2_ref[...], preferred_element_type=f32)
                   + b2_ref[...])
        h_ref[...] = h

        # ---- Qz | LVz (lane-padded fused matmul) ----
        zl = jnp.dot(h.astype(bf16), wzl_ref[...], preferred_element_type=f32) + bzl_ref[...]
        mu_z = zl[:, :nz]
        logvar_z = zl[:, nz:2 * nz]

        # ---- Qy last layer + softmax (padded logits lanes are -1e30 -> exp=0) ----
        logits = jnp.dot(a2.astype(bf16), wy3_ref[...], preferred_element_type=f32) + by3_ref[...]
        m = jnp.max(logits, axis=-1, keepdims=True)
        e = jnp.exp(logits - m)
        q_y = e / jnp.sum(e, axis=-1, keepdims=True)     # exact divide (q_y fidelity)

        # ---- clusterhead embedding ----
        c_y = jnp.dot(q_y.astype(bf16), wc_ref[...], preferred_element_type=f32) + bc_ref[...]

        # ---- reparameterization ----
        eps = eps_ref[:, :nz]
        std_z = jnp.exp(0.5 * logvar_z)
        z = mu_z + std_z * eps

        # ---- Px (decoder) ----
        p1 = _leaky(jnp.dot(z.astype(bf16), wp1_ref[...], preferred_element_type=f32)
                    + bp1_ref[...])
        p2 = _leaky(jnp.dot(p1.astype(bf16), wp2_ref[...], preferred_element_type=f32)
                    + bp2_ref[...])
        rec = jax.nn.sigmoid(
            jnp.dot(p2.astype(bf16), wp3_ref[...], preferred_element_type=f32) + bp3_ref[...])
        rec_ref[...] = rec

        # ---- per-row loss features (batch reductions finished in the wrapper) ----
        r_cat = jnp.max(q_y, axis=-1, keepdims=True)                     # (TM,1)
        r_rec = jnp.sum((rec - x_ref[...]) ** 2, axis=-1, keepdims=True) # re-read x (short live range)
        r_clu = jnp.sum((c_y - mu_z) ** 2, axis=-1, keepdims=True)
        r_z = jnp.sum(1.0 + logvar_z - jnp.exp(logvar_z), axis=-1, keepdims=True)

        # ---- single lane-dense (TM,128) slab, one full-width unmasked store ----
        # zl occupies lanes [0, 2nz), q_y occupies [2nz, 2nz+ncls), features next 4 lanes.
        lane = jax.lax.broadcasted_iota(jnp.int32, (zl.shape[0], 128), 1)
        feat = (jnp.where(lane == base, r_cat, 0.0)
                + jnp.where(lane == base + 1, r_rec, 0.0)
                + jnp.where(lane == base + 2, r_clu, 0.0)
                + jnp.where(lane == base + 3, r_z, 0.0))
        slab_ref[...] = zl + q_y + feat

    return ae2_kernel


def init_params(key, nx, nh, nz, nclasses):
    """Deterministic parameter init mimicking torch.nn.Linear defaults."""
    def linear(k, fan_in, fan_out):
        kw, kb = jax.random.split(k)
        bound = 1.0 / math.sqrt(fan_in)
        w = jax.random.uniform(kw, (fan_in, fan_out), jnp.float32, -bound, bound)
        b = jax.random.uniform(kb, (1, fan_out), jnp.float32, -bound, bound)
        return w, b

    keys = jax.random.split(key, 11)
    p = {}
    p["qh_w1"], p["qh_b1"] = linear(keys[0], nx, nh)
    p["qh_w2"], p["qh_b2"] = linear(keys[1], nh, nh)
    p["qz_w"], p["qz_b"] = linear(keys[2], nh, nz)
    p["lvz_w"], p["lvz_b"] = linear(keys[3], nh, nz)
    p["qy_w1"], p["qy_b1"] = linear(keys[4], nx, nh)
    p["qy_w2"], p["qy_b2"] = linear(keys[5], nh, nh)
    p["qy_w3"], p["qy_b3"] = linear(keys[6], nh, nclasses)
    p["ch_w"], p["ch_b"] = linear(keys[7], nclasses, nz)
    p["px_w1"], p["px_b1"] = linear(keys[8], nz, nh)
    p["px_w2"], p["px_b2"] = linear(keys[9], nh, nh)
    p["px_w3"], p["px_b3"] = linear(keys[10], nh, nx)

    # BatchNorm1d (eval mode) as per-feature affine scale/shift.
    # torch defaults: weight=1, bias=0, running_mean=0, running_var=1, eps=1e-5.
    bn_eps = 1e-5
    s = jnp.full((1, nh), 1.0 / math.sqrt(1.0 + bn_eps), jnp.float32)
    t = jnp.zeros((1, nh), jnp.float32)
    for name in ("qh_bn1", "qh_bn2", "qy_bn1", "qy_bn2"):
        p[name + "_s"] = s
        p[name + "_t"] = t
    return p


def fold_params(p, nx, nh, nz, nclasses):
    """Fold eval-mode BN into Linears, fold Qy's Linear-Linear pair, fuse the two
    x-projections, lane-pad the narrow heads, cast MXU operands to bf16."""
    def fold(w, b, s, t):
        return w * s, b * s + t

    # Qh (BN folded)
    w1, b1 = fold(p["qh_w1"], p["qh_b1"], p["qh_bn1_s"], p["qh_bn1_t"])
    w2, b2 = fold(p["qh_w2"], p["qh_b2"], p["qh_bn2_s"], p["qh_bn2_t"])

    # Qy: Linear->BN->Linear->BN has no nonlinearity in between -> fold to one affine (exact in eval).
    wy1, by1 = fold(p["qy_w1"], p["qy_b1"], p["qy_bn1_s"], p["qy_bn1_t"])
    wy2, by2 = fold(p["qy_w2"], p["qy_b2"], p["qy_bn2_s"], p["qy_bn2_t"])
    wy = wy1 @ wy2                       # (nx, nh)   f32 precompute
    by = by1 @ wy2 + by2                 # (1, nh)

    # Fused x-projection: [Qh layer-1 | folded Qy layer].
    wx = jnp.concatenate([w1, wy], axis=1)   # (nx, 2*nh)
    bx = jnp.concatenate([b1, by], axis=1)   # (1, 2*nh)

    # Qz|LVz fused and lane-padded to 128 columns: [mu_z | logvar_z | 0..].
    wzl = (jnp.zeros((nh, 128), jnp.float32)
           .at[:, :nz].set(p["qz_w"]).at[:, nz:2 * nz].set(p["lvz_w"]))
    bzl = (jnp.zeros((1, 128), jnp.float32)
           .at[:, :nz].set(p["qz_b"]).at[:, nz:2 * nz].set(p["lvz_b"]))

    # Qy last layer lane-padded so q_y lands at lanes [2*nz, 2*nz+nclasses).
    # Padded bias lanes = -1e30 (large NEGATIVE FINITE) so exp() zeroes them
    # without inf-inf NaN risk; padding with 0 would corrupt the softmax sum.
    lo = 2 * nz
    wy3 = jnp.zeros((nh, 128), jnp.float32).at[:, lo:lo + nclasses].set(p["qy_w3"])
    by3 = jnp.full((1, 128), -1e30, jnp.float32).at[:, lo:lo + nclasses].set(p["qy_b3"])

    # clusterhead embedding with rows aligned to the q_y lane layout (zero rows elsewhere).
    wc = jnp.zeros((128, nz), jnp.float32).at[lo:lo + nclasses, :].set(p["ch_w"])

    bf = lambda w: w.astype(jnp.bfloat16)    # MXU operands
    f32 = lambda b: b.astype(jnp.float32)    # biases added after f32 accumulation
    return [
        bf(wx), f32(bx), bf(w2), f32(b2),
        bf(wzl), f32(bzl), bf(wy3), f32(by3),
        bf(wc), f32(p["ch_b"]),
        bf(p["px_w1"]), f32(p["px_b1"]),
        bf(p["px_w2"]), f32(p["px_b2"]),
        bf(p["px_w3"]), f32(p["px_b3"]),
    ]


def ae2_forward(x_img, eps, params, *, tm=None):
    B = x_img.shape[0]
    x = x_img.reshape(B, -1).astype(jnp.float32)        # nn.Flatten()
    nx = x.shape[1]
    nz = eps.shape[1]
    nh = params["qh_w1"].shape[1]
    nclasses = params["qy_w3"].shape[1]
    assert 2 * nz + nclasses + 4 <= 128, "packed-slab layout needs 2*nz + nclasses + 4 <= 128"

    # Tile policy: never below 128 rows (full v5e MXU, half v6e/v7x MXU);
    # 256 for large batches; keep grid >= 2 when B >= 256 so v7x megacore has
    # two tiles to shard across its TensorCores.
    if tm is None:
        tm = 256 if B >= 512 else 128
    tm = max(8, (tm // 8) * 8)
    b_pad = -(-B // tm) * tm

    x_in = x if b_pad == B else jnp.zeros((b_pad, nx), jnp.float32).at[:B].set(x)
    # eps lane-padded to 128 -> dense input DMA (only lanes [0,nz) are read in-kernel).
    eps_in = jnp.zeros((b_pad, 128), jnp.float32).at[:B, :nz].set(eps.astype(jnp.float32))

    plist = fold_params(params, nx, nh, nz, nclasses)
    inputs = [x_in, eps_in] + plist
    grid = (b_pad // tm,)

    def tile_spec(feat):
        return pl.BlockSpec((tm, feat), lambda i: (i, 0))

    def resident_spec(arr):
        # Full-array block, constant index_map: DMA'd once, stays resident in VMEM.
        # TODO(synk): pipeline_mode=pl.Buffered(1) would drop the redundant 2nd
        # buffer for these constant-index blocks (frees ~param_bytes on v7x).
        return pl.BlockSpec(arr.shape, lambda i: (0, 0))

    in_specs = [tile_spec(nx), tile_spec(128)] + [resident_spec(a) for a in plist]
    out_specs = (tile_spec(nh), tile_spec(nx), tile_spec(128))
    out_shape = (
        jax.ShapeDtypeStruct((b_pad, nh), jnp.float32),    # h
        jax.ShapeDtypeStruct((b_pad, nx), jnp.float32),    # rec
        jax.ShapeDtypeStruct((b_pad, 128), jnp.float32),   # [mu_z|logvar_z|q_y|feats|0..]
    )

    # VMEM budget: resident params (x2 for the pipeline's 2nd buffer), double-
    # buffered IO tiles, plus the f32/bf16 intermediates created in the body
    # (xh, h1/h, a2, p1, p2, rec, slab pieces). Capped at ~85% of physical VMEM.
    param_bytes = sum(math.prod(a.shape) * a.dtype.itemsize for a in plist)
    io_tile_bytes = 2 * tm * (nx + 128 + nh + nx + 128) * 4
    inter_bytes = tm * (3 * 2 * nh + 6 * nh + 3 * nx + 6 * 128) * 4
    budget = 2 * param_bytes + io_tile_bytes + inter_bytes + (4 << 20)
    try:
        info = pltpu.get_tpu_info()
        cap_phys = int(getattr(info, "vmem_capacity_bytes", 0)) or (64 << 20)
    except Exception:
        cap_phys = 64 << 20            # conservative (v7x physical); v5e/v6e have 128 MiB
    cap = int(0.85 * cap_phys)
    vmem_limit = int(min(max(budget, 32 << 20), cap))

    h, rec, slab = pl.pallas_call(
        make_ae2_kernel(nx, nh, nz, nclasses),
        grid=grid,
        in_specs=in_specs,
        out_specs=out_specs,
        out_shape=out_shape,
        compiler_params=pltpu.CompilerParams(
            dimension_semantics=("parallel",),   # batch tiles independent (megacore-shardable)
            vmem_limit_bytes=vmem_limit,
        ),
    )(*inputs)

    # ---- unpack the packed slab / finish batch reductions in plain JAX ----
    h = h[:B]
    rec = rec[:B]
    mu_z = slab[:B, :nz]
    logvar_z = slab[:B, nz:2 * nz]
    q_y = slab[:B, 2 * nz:2 * nz + nclasses]
    base = 2 * nz + nclasses
    r_cat = slab[:B, base]
    r_rec = slab[:B, base + 1]
    r_clu = slab[:B, base + 2]
    r_z = slab[:B, base + 3]

    log_prior = math.log(1.0 / nclasses)   # OneHotCategorical(ones(nclasses)).logits
    loss_cat = -10.0 * jnp.mean(r_cat)
    qm = jnp.mean(q_y, axis=0)
    loss_l = 10.0 * jnp.sum(qm * (jnp.log(qm) - log_prior))
    loss_rec = jnp.mean(r_rec)
    loss_cluster = jnp.mean(r_clu)
    # AE2.loss_z uses the batch-mean mu (mu_z.mean(0)) inside the KLD:
    #   kld = -0.5*(1 + logvar - mu_bar^2 - exp(logvar)); loss_z = kld.sum(-1).mean()
    mu_bar = jnp.mean(mu_z, axis=0)
    loss_z = -0.5 * (jnp.mean(r_z) - jnp.sum(mu_bar ** 2))
    total = loss_cat + loss_l + loss_rec + loss_cluster + loss_z

    losses = {
        "loss_cat": loss_cat,
        "loss_l": loss_l,
        "loss_cluster": loss_cluster,
        "loss_rec": loss_rec,
        "loss_z": loss_z,
        "total_loss": total,
    }
    return {"x": x, "h": h, "mu_z": mu_z, "logvar_z": logvar_z,
            "q_y": q_y, "rec": rec, "losses": losses}


if __name__ == "__main__":
    # Small shapes consistent with the module (flattened image -> nx features).
    B, C, H, W = 256, 1, 16, 16
    nx = C * H * W          # 256   (module default is 28**2)
    nh = 256                # module default 1024
    nz = 16                 # module default 10
    nclasses = 16           # module default 10

    key = jax.random.PRNGKey(0)
    k_x, k_eps, k_p = jax.random.split(key, 3)
    x_img = jax.random.uniform(k_x, (B, C, H, W), jnp.float32)
    eps = jax.random.normal(k_eps, (B, nz), jnp.float32)   # torch.randn_like(mu_z)
    params = init_params(k_p, nx, nh, nz, nclasses)

    out = ae2_forward(x_img, eps, params)   # tm=128 -> grid=(2,): pipelined / megacore-ready
    out = jax.block_until_ready(out)
    assert out["rec"].shape == (B, nx) and out["q_y"].shape == (B, nclasses)
    assert bool(jnp.isfinite(out["losses"]["total_loss"]))
    print("KERNEL_OK")
</pallas_src>

<mosaic_0001>
module attributes {stable_mosaic.version = 11 : i64} {
  func.func @ae2_kernel(%arg0: i32, %arg1: memref<128x256xf32, #tpu.memory_space<vmem>>, %arg2: memref<128x128xf32, #tpu.memory_space<vmem>>, %arg3: memref<256x512xbf16, #tpu.memory_space<vmem>>, %arg4: memref<1x512xf32, #tpu.memory_space<vmem>>, %arg5: memref<256x256xbf16, #tpu.memory_space<vmem>>, %arg6: memref<1x256xf32, #tpu.memory_space<vmem>>, %arg7: memref<256x128xbf16, #tpu.memory_space<vmem>>, %arg8: memref<1x128xf32, #tpu.memory_space<vmem>>, %arg9: memref<256x128xbf16, #tpu.memory_space<vmem>>, %arg10: memref<1x128xf32, #tpu.memory_space<vmem>>, %arg11: memref<128x16xbf16, #tpu.memory_space<vmem>>, %arg12: memref<1x16xf32, #tpu.memory_space<vmem>>, %arg13: memref<16x256xbf16, #tpu.memory_space<vmem>>, %arg14: memref<1x256xf32, #tpu.memory_space<vmem>>, %arg15: memref<256x256xbf16, #tpu.memory_space<vmem>>, %arg16: memref<1x256xf32, #tpu.memory_space<vmem>>, %arg17: memref<256x256xbf16, #tpu.memory_space<vmem>>, %arg18: memref<1x256xf32, #tpu.memory_space<vmem>>, %arg19: memref<128x256xf32, #tpu.memory_space<vmem>>, %arg20: memref<128x256xf32, #tpu.memory_space<vmem>>, %arg21: memref<128x128xf32, #tpu.memory_space<vmem>>) attributes {dimension_semantics = [#tpu.dimension_semantics<parallel>], iteration_bounds = array<i64: 2>, scalar_prefetch = 0 : i64, scratch_operands = 0 : i64, tpu.core_type = #tpu.core_type<tc>, window_params = [{transform_indices = @transform_0, window_bounds = array<i64: 128, 256>}, {transform_indices = @transform_1, window_bounds = array<i64: 128, 128>}, {pipeline_mode = #tpu.pipeline_mode<synchronous>, transform_indices = @transform_2, window_bounds = array<i64: 256, 512>}, {pipeline_mode = #tpu.pipeline_mode<synchronous>, transform_indices = @transform_3, window_bounds = array<i64: 1, 512>}, {pipeline_mode = #tpu.pipeline_mode<synchronous>, transform_indices = @transform_4, window_bounds = array<i64: 256, 256>}, {pipeline_mode = #tpu.pipeline_mode<synchronous>, transform_indices = @transform_5, window_bounds = array<i64: 1, 256>}, {pipeline_mode = #tpu.pipeline_mode<synchronous>, transform_indices = @transform_6, window_bounds = array<i64: 256, 128>}, {pipeline_mode = #tpu.pipeline_mode<synchronous>, transform_indices = @transform_7, window_bounds = array<i64: 1, 128>}, {pipeline_mode = #tpu.pipeline_mode<synchronous>, transform_indices = @transform_8, window_bounds = array<i64: 256, 128>}, {pipeline_mode = #tpu.pipeline_mode<synchronous>, transform_indices = @transform_9, window_bounds = array<i64: 1, 128>}, {pipeline_mode = #tpu.pipeline_mode<synchronous>, transform_indices = @transform_10, window_bounds = array<i64: 128, 16>}, {pipeline_mode = #tpu.pipeline_mode<synchronous>, transform_indices = @transform_11, window_bounds = array<i64: 1, 16>}, {pipeline_mode = #tpu.pipeline_mode<synchronous>, transform_indices = @transform_12, window_bounds = array<i64: 16, 256>}, {pipeline_mode = #tpu.pipeline_mode<synchronous>, transform_indices = @transform_13, window_bounds = array<i64: 1, 256>}, {pipeline_mode = #tpu.pipeline_mode<synchronous>, transform_indices = @transform_14, window_bounds = array<i64: 256, 256>}, {pipeline_mode = #tpu.pipeline_mode<synchronous>, transform_indices = @transform_15, window_bounds = array<i64: 1, 256>}, {pipeline_mode = #tpu.pipeline_mode<synchronous>, transform_indices = @transform_16, window_bounds = array<i64: 256, 256>}, {pipeline_mode = #tpu.pipeline_mode<synchronous>, transform_indices = @transform_17, window_bounds = array<i64: 1, 256>}, {transform_indices = @transform_18, window_bounds = array<i64: 128, 256>}, {transform_indices = @transform_19, window_bounds = array<i64: 128, 256>}, {transform_indices = @transform_20, window_bounds = array<i64: 128, 128>}]} {
    %c0 = arith.constant 0 : index
    %c0_0 = arith.constant 0 : index
    %0 = vector.load %arg1[%c0, %c0_0] : memref<128x256xf32, #tpu.memory_space<vmem>>, vector<128x256xf32>
    %1 = arith.truncf %0 : vector<128x256xf32> to vector<128x256xbf16>
    %c0_1 = arith.constant 0 : index
    %c0_2 = arith.constant 0 : index
    %2 = vector.load %arg3[%c0_1, %c0_2] : memref<256x512xbf16, #tpu.memory_space<vmem>>, vector<256x512xbf16>
    %cst = arith.constant dense<0.000000e+00> : vector<128x512xf32>
    %3 = tpu.matmul %1, %2, %cst {dimension_numbers = #tpu.dot_dimension_numbers<[1], [0], [0], [1], [0, 0, 1, 1], [], []>} : vector<128x256xbf16>, vector<256x512xbf16>, vector<128x512xf32> -> vector<128x512xf32>
    %c0_3 = arith.constant 0 : index
    %c0_4 = arith.constant 0 : index
    %4 = vector.load %arg4[%c0_3, %c0_4] : memref<1x512xf32, #tpu.memory_space<vmem>>, vector<1x512xf32>
    %5 = vector.broadcast %4 : vector<1x512xf32> to vector<128x512xf32>
    %6 = arith.addf %3, %5 : vector<128x512xf32>
    %cst_5 = arith.constant 0.000000e+00 : f32
    %7 = vector.broadcast %cst_5 : f32 to vector<128x512xf32>
    %8 = arith.cmpf oge, %6, %7 : vector<128x512xf32>
    %cst_6 = arith.constant 0.00999999977 : f32
    %9 = vector.broadcast %cst_6 : f32 to vector<128x512xf32>
    %10 = arith.mulf %9, %6 : vector<128x512xf32>
    %11 = arith.select %8, %6, %10 : vector<128x512xi1>, vector<128x512xf32>
    %12 = vector.extract_strided_slice %11 {offsets = [0, 0], sizes = [128, 256], strides = [1, 1]} : vector<128x512xf32> to vector<128x256xf32>
    %13 = vector.extract_strided_slice %11 {offsets = [0, 256], sizes = [128, 256], strides = [1, 1]} : vector<128x512xf32> to vector<128x256xf32>
    %14 = arith.truncf %12 : vector<128x256xf32> to vector<128x256xbf16>
    %c0_7 = arith.constant 0 : index
    %c0_8 = arith.constant 0 : index
    %15 = vector.load %arg5[%c0_7, %c0_8] : memref<256x256xbf16, #tpu.memory_space<vmem>>, vector<256x256xbf16>
    %cst_9 = arith.constant dense<0.000000e+00> : vector<128x256xf32>
    %16 = tpu.matmul %14, %15, %cst_9 {dimension_numbers = #tpu.dot_dimension_numbers<[1], [0], [0], [1], [0, 0, 1, 1], [], []>} : vector<128x256xbf16>, vector<256x256xbf16>, vector<128x256xf32> -> vector<128x256xf32>
    %c0_10 = arith.constant 0 : index
    %c0_11 = arith.constant 0 : index
    %17 = vector.load %arg6[%c0_10, %c0_11] : memref<1x256xf32, #tpu.memory_space<vmem>>, vector<1x256xf32>
    %18 = vector.broadcast %17 : vector<1x256xf32> to vector<128x256xf32>
    %19 = arith.addf %16, %18 : vector<128x256xf32>
    %cst_12 = arith.constant 0.000000e+00 : f32
    %20 = vector.broadcast %cst_12 : f32 to vector<128x256xf32>
    %21 = arith.cmpf oge, %19, %20 : vector<128x256xf32>
    %cst_13 = arith.constant 0.00999999977 : f32
    %22 = vector.broadcast %cst_13 : f32 to vector<128x256xf32>
    %23 = arith.mulf %22, %19 : vector<128x256xf32>
    %24 = arith.select %21, %19, %23 : vector<128x256xi1>, vector<128x256xf32>
    %c0_14 = arith.constant 0 : index
    %c0_15 = arith.constant 0 : index
    %25 = vector.load %arg19[%c0_14, %c0_15] : memref<128x256xf32, #tpu.memory_space<vmem>>, vector<128x256xf32>
    tpu.vector_store %arg19[%c0_14, %c0_15], %24 {strides = array<i32>} : memref<128x256xf32, #tpu.memory_space<vmem>>, vector<128x256xf32>,
    %26 = arith.truncf %24 : vector<128x256xf32> to vector<128x256xbf16>
    %c0_16 = arith.constant 0 : index
    %c0_17 = arith.constant 0 : index
    %27 = vector.load %arg7[%c0_16, %c0_17] : memref<256x128xbf16, #tpu.memory_space<vmem>>, vector<256x128xbf16>
    %cst_18 = arith.constant dense<0.000000e+00> : vector<128x128xf32>
    %28 = tpu.matmul %26, %27, %cst_18 {dimension_numbers = #tpu.dot_dimension_numbers<[1], [0], [0], [1], [0, 0, 1, 1], [], []>} : vector<128x256xbf16>, vector<256x128xbf16>, vector<128x128xf32> -> vector<128x128xf32>
    %c0_19 = arith.constant 0 : index
    %c0_20 = arith.constant 0 : index
    %29 = vector.load %arg8[%c0_19, %c0_20] : memref<1x128xf32, #tpu.memory_space<vmem>>, vector<1x128xf32>
    %30 = vector.broadcast %29 : vector<1x128xf32> to vector<128x128xf32>
    %31 = arith.addf %28, %30 : vector<128x128xf32>
    %32 = vector.extract_strided_slice %31 {offsets = [0, 0], sizes = [128, 16], strides = [1, 1]} : vector<128x128xf32> to vector<128x16xf32>
    %33 = vector.extract_strided_slice %31 {offsets = [0, 16], sizes = [128, 16], strides = [1, 1]} : vector<128x128xf32> to vector<128x16xf32>
    %34 = arith.truncf %13 : vector<128x256xf32> to vector<128x256xbf16>
    %c0_21 = arith.constant 0 : index
    %c0_22 = arith.constant 0 : index
    %35 = vector.load %arg9[%c0_21, %c0_22] : memref<256x128xbf16, #tpu.memory_space<vmem>>, vector<256x128xbf16>
    %cst_23 = arith.constant dense<0.000000e+00> : vector<128x128xf32>
    %36 = tpu.matmul %34, %35, %cst_23 {dimension_numbers = #tpu.dot_dimension_numbers<[1], [0], [0], [1], [0, 0, 1, 1], [], []>} : vector<128x256xbf16>, vector<256x128xbf16>, vector<128x128xf32> -> vector<128x128xf32>
    %c0_24 = arith.constant 0 : index
    %c0_25 = arith.constant 0 : index
    %37 = vector.load %arg10[%c0_24, %c0_25] : memref<1x128xf32, #tpu.memory_space<vmem>>, vector<1x128xf32>
    %38 = vector.broadcast %37 : vector<1x128xf32> to vector<128x128xf32>
    %39 = arith.addf %36, %38 : vector<128x128xf32>
    %cst_26 = arith.constant dense<0xFF800000> : vector<128xf32>
    %40 = vector.multi_reduction <maximumf>, %39, %cst_26 [1] : vector<128x128xf32> to vector<128xf32>
    %41 = vector.shape_cast %40 : vector<128xf32> to vector<128x1xf32>
    %42 = vector.broadcast %41 : vector<128x1xf32> to vector<128x128xf32>
    %43 = arith.subf %39, %42 : vector<128x128xf32>
    %44 = math.exp %43 : vector<128x128xf32>
    %cst_27 = arith.constant dense<0.000000e+00> : vector<128xf32>
    %45 = vector.multi_reduction <add>, %44, %cst_27 [1] : vector<128x128xf32> to vector<128xf32>
    %46 = vector.shape_cast %45 : vector<128xf32> to vector<128x1xf32>
    %47 = vector.broadcast %46 : vector<128x1xf32> to vector<128x128xf32>
    %48 = arith.divf %44, %47 : vector<128x128xf32>
    %49 = arith.truncf %48 : vector<128x128xf32> to vector<128x128xbf16>
    %c0_28 = arith.constant 0 : index
    %c0_29 = arith.constant 0 : index
    %50 = vector.load %arg11[%c0_28, %c0_29] : memref<128x16xbf16, #tpu.memory_space<vmem>>, vector<128x16xbf16>
    %cst_30 = arith.constant dense<0.000000e+00> : vector<128x16xf32>
    %51 = tpu.matmul %49, %50, %cst_30 {dimension_numbers = #tpu.dot_dimension_numbers<[1], [0], [0], [1], [0, 0, 1, 1], [], []>} : vector<128x128xbf16>, vector<128x16xbf16>, vector<128x16xf32> -> vector<128x16xf32>
    %c0_31 = arith.constant 0 : index
    %c0_32 = arith.constant 0 : index
    %52 = vector.load %arg12[%c0_31, %c0_32] : memref<1x16xf32, #tpu.memory_space<vmem>>, vector<1x16xf32>
    %53 = vector.broadcast %52 : vector<1x16xf32> to vector<128x16xf32>
    %54 = arith.addf %51, %53 : vector<128x16xf32>
    %c0_33 = arith.constant 0 : index
    %c0_34 = arith.constant 0 : index
    %55 = vector.load %arg2[%c0_33, %c0_34] : memref<128x128xf32, #tpu.memory_space<vmem>>, vector<128x16xf32>
    %cst_35 = arith.constant 5.000000e-01 : f32
    %56 = vector.broadcast %cst_35 : f32 to vector<128x16xf32>
    %57 = arith.mulf %56, %33 : vector<128x16xf32>
    %58 = math.exp %57 : vector<128x16xf32>
    %59 = arith.mulf %58, %55 : vector<128x16xf32>
    %60 = arith.addf %32, %59 : vector<128x16xf32>
    %61 = arith.truncf %60 : vector<128x16xf32> to vector<128x16xbf16>
    %c0_36 = arith.constant 0 : index
    %c0_37 = arith.constant 0 : index
    %62 = vector.load %arg13[%c0_36, %c0_37] : memref<16x256xbf16, #tpu.memory_space<vmem>>, vector<16x256xbf16>
    %cst_38 = arith.constant dense<0.000000e+00> : vector<128x256xf32>
    %63 = tpu.matmul %61, %62, %cst_38 {dimension_numbers = #tpu.dot_dimension_numbers<[1], [0], [0], [1], [0, 0, 1, 1], [], []>} : vector<128x16xbf16>, vector<16x256xbf16>, vector<128x256xf32> -> vector<128x256xf32>
    %c0_39 = arith.constant 0 : index
    %c0_40 = arith.constant 0 : index
    %64 = vector.load %arg14[%c0_39, %c0_40] : memref<1x256xf32, #tpu.memory_space<vmem>>, vector<1x256xf32>
    %65 = vector.broadcast %64 : vector<1x256xf32> to vector<128x256xf32>
    %66 = arith.addf %63, %65 : vector<128x256xf32>
    %cst_41 = arith.constant 0.000000e+00 : f32
    %67 = vector.broadcast %cst_41 : f32 to vector<128x256xf32>
    %68 = arith.cmpf oge, %66, %67 : vector<128x256xf32>
    %cst_42 = arith.constant 0.00999999977 : f32
    %69 = vector.broadcast %cst_42 : f32 to vector<128x256xf32>
    %70 = arith.mulf %69, %66 : vector<128x256xf32>
    %71 = arith.select %68, %66, %70 : vector<128x256xi1>, vector<128x256xf32>
    %72 = arith.truncf %71 : vector<128x256xf32> to vector<128x256xbf16>
    %c0_43 = arith.constant 0 : index
    %c0_44 = arith.constant 0 : index
    %73 = vector.load %arg15[%c0_43, %c0_44] : memref<256x256xbf16, #tpu.memory_space<vmem>>, vector<256x256xbf16>
    %cst_45 = arith.constant dense<0.000000e+00> : vector<128x256xf32>
    %74 = tpu.matmul %72, %73, %cst_45 {dimension_numbers = #tpu.dot_dimension_numbers<[1], [0], [0], [1], [0, 0, 1, 1], [], []>} : vector<128x256xbf16>, vector<256x256xbf16>, vector<128x256xf32> -> vector<128x256xf32>
    %c0_46 = arith.constant 0 : index
    %c0_47 = arith.constant 0 : index
    %75 = vector.load %arg16[%c0_46, %c0_47] : memref<1x256xf32, #tpu.memory_space<vmem>>, vector<1x256xf32>
    %76 = vector.broadcast %75 : vector<1x256xf32> to vector<128x256xf32>
    %77 = arith.addf %74, %76 : vector<128x256xf32>
    %cst_48 = arith.constant 0.000000e+00 : f32
    %78 = vector.broadcast %cst_48 : f32 to vector<128x256xf32>
    %79 = arith.cmpf oge, %77, %78 : vector<128x256xf32>
    %cst_49 = arith.constant 0.00999999977 : f32
    %80 = vector.broadcast %cst_49 : f32 to vector<128x256xf32>
    %81 = arith.mulf %80, %77 : vector<128x256xf32>
    %82 = arith.select %79, %77, %81 : vector<128x256xi1>, vector<128x256xf32>
    %83 = arith.truncf %82 : vector<128x256xf32> to vector<128x256xbf16>
    %c0_50 = arith.constant 0 : index
    %c0_51 = arith.constant 0 : index
    %84 = vector.load %arg17[%c0_50, %c0_51] : memref<256x256xbf16, #tpu.memory_space<vmem>>, vector<256x256xbf16>
    %cst_52 = arith.constant dense<0.000000e+00> : vector<128x256xf32>
    %85 = tpu.matmul %83, %84, %cst_52 {dimension_numbers = #tpu.dot_dimension_numbers<[1], [0], [0], [1], [0, 0, 1, 1], [], []>} : vector<128x256xbf16>, vector<256x256xbf16>, vector<128x256xf32> -> vector<128x256xf32>
    %c0_53 = arith.constant 0 : index
    %c0_54 = arith.constant 0 : index
    %86 = vector.load %arg18[%c0_53, %c0_54] : memref<1x256xf32, #tpu.memory_space<vmem>>, vector<1x256xf32>
    %87 = vector.broadcast %86 : vector<1x256xf32> to vector<128x256xf32>
    %88 = arith.addf %85, %87 : vector<128x256xf32>
    %89 = arith.negf %88 : vector<128x256xf32>
    %90 = math.exp %89 : vector<128x256xf32>
    %cst_55 = arith.constant 1.000000e+00 : f32
    %91 = vector.broadcast %cst_55 : f32 to vector<128x256xf32>
    %92 = arith.addf %91, %90 : vector<128x256xf32>
    %93 = arith.divf %91, %92 : vector<128x256xf32>
    %c0_56 = arith.constant 0 : index
    %c0_57 = arith.constant 0 : index
    %94 = vector.load %arg20[%c0_56, %c0_57] : memref<128x256xf32, #tpu.memory_space<vmem>>, vector<128x256xf32>
    tpu.vector_store %arg20[%c0_56, %c0_57], %93 {strides = array<i32>} : memref<128x256xf32, #tpu.memory_space<vmem>>, vector<128x256xf32>,
    %cst_58 = arith.constant dense<0xFF800000> : vector<128xf32>
    %95 = vector.multi_reduction <maximumf>, %48, %cst_58 [1] : vector<128x128xf32> to vector<128xf32>
    %96 = vector.shape_cast %95 : vector<128xf32> to vector<128x1xf32>
    %c0_59 = arith.constant 0 : index
    %c0_60 = arith.constant 0 : index
    %97 = vector.load %arg1[%c0_59, %c0_60] : memref<128x256xf32, #tpu.memory_space<vmem>>, vector<128x256xf32>
    %98 = arith.subf %93, %97 : vector<128x256xf32>
    %99 = arith.mulf %98, %98 : vector<128x256xf32>
    %cst_61 = arith.constant dense<0.000000e+00> : vector<128xf32>
    %100 = vector.multi_reduction <add>, %99, %cst_61 [1] : vector<128x256xf32> to vector<128xf32>
    %101 = vector.shape_cast %100 : vector<128xf32> to vector<128x1xf32>
    %102 = arith.subf %54, %32 : vector<128x16xf32>
    %103 = arith.mulf %102, %102 : vector<128x16xf32>
    %cst_62 = arith.constant dense<0.000000e+00> : vector<128xf32>
    %104 = vector.multi_reduction <add>, %103, %cst_62 [1] : vector<128x16xf32> to vector<128xf32>
    %105 = vector.shape_cast %104 : vector<128xf32> to vector<128x1xf32>
    %cst_63 = arith.constant 1.000000e+00 : f32
    %106 = vector.broadcast %cst_63 : f32 to vector<128x16xf32>
    %107 = arith.addf %106, %33 : vector<128x16xf32>
    %108 = math.exp %33 : vector<128x16xf32>
    %109 = arith.subf %107, %108 : vector<128x16xf32>
    %cst_64 = arith.constant dense<0.000000e+00> : vector<128xf32>
    %110 = vector.multi_reduction <add>, %109, %cst_64 [1] : vector<128x16xf32> to vector<128xf32>
    %111 = vector.shape_cast %110 : vector<128xf32> to vector<128x1xf32>
    %112 = tpu.iota {dimensions = array<i32: 1>} : vector<128x128xi32>
    %c48_i32 = arith.constant 48 : i32
    %113 = vector.broadcast %c48_i32 : i32 to vector<128x128xi32>
    %114 = arith.cmpi eq, %112, %113 : vector<128x128xi32>
    %cst_65 = arith.constant 0.000000e+00 : f32
    %115 = vector.shape_cast %96 : vector<128x1xf32> to vector<128x1xf32>
    %116 = vector.broadcast %115 : vector<128x1xf32> to vector<128x128xf32>
    %117 = vector.broadcast %cst_65 : f32 to vector<128x128xf32>
    %118 = arith.select %114, %116, %117 : vector<128x128xi1>, vector<128x128xf32>
    %c49_i32 = arith.constant 49 : i32
    %119 = vector.broadcast %c49_i32 : i32 to vector<128x128xi32>
    %120 = arith.cmpi eq, %112, %119 : vector<128x128xi32>
    %cst_66 = arith.constant 0.000000e+00 : f32
    %121 = vector.shape_cast %101 : vector<128x1xf32> to vector<128x1xf32>
    %122 = vector.broadcast %121 : vector<128x1xf32> to vector<128x128xf32>
    %123 = vector.broadcast %cst_66 : f32 to vector<128x128xf32>
    %124 = arith.select %120, %122, %123 : vector<128x128xi1>, vector<128x128xf32>
    %125 = arith.addf %118, %124 : vector<128x128xf32>
    %c50_i32 = arith.constant 50 : i32
    %126 = vector.broadcast %c50_i32 : i32 to vector<128x128xi32>
    %127 = arith.cmpi eq, %112, %126 : vector<128x128xi32>
    %cst_67 = arith.constant 0.000000e+00 : f32
    %128 = vector.shape_cast %105 : vector<128x1xf32> to vector<128x1xf32>
    %129 = vector.broadcast %128 : vector<128x1xf32> to vector<128x128xf32>
    %130 = vector.broadcast %cst_67 : f32 to vector<128x128xf32>
    %131 = arith.select %127, %129, %130 : vector<128x128xi1>, vector<128x128xf32>
    %132 = arith.addf %125, %131 : vector<128x128xf32>
    %c51_i32 = arith.constant 51 : i32
    %133 = vector.broadcast %c51_i32 : i32 to vector<128x128xi32>
    %134 = arith.cmpi eq, %112, %133 : vector<128x128xi32>
    %cst_68 = arith.constant 0.000000e+00 : f32
    %135 = vector.shape_cast %111 : vector<128x1xf32> to vector<128x1xf32>
    %136 = vector.broadcast %135 : vector<128x1xf32> to vector<128x128xf32>
    %137 = vector.broadcast %cst_68 : f32 to vector<128x128xf32>
    %138 = arith.select %134, %136, %137 : vector<128x128xi1>, vector<128x128xf32>
    %139 = arith.addf %132, %138 : vector<128x128xf32>
    %140 = arith.addf %31, %48 : vector<128x128xf32>
    %141 = arith.addf %140, %139 : vector<128x128xf32>
    %c0_69 = arith.constant 0 : index
    %c0_70 = arith.constant 0 : index
    %142 = vector.load %arg21[%c0_69, %c0_70] : memref<128x128xf32, #tpu.memory_space<vmem>>, vector<128x128xf32>
    tpu.vector_store %arg21[%c0_69, %c0_70], %141 {strides = array<i32>} : memref<128x128xf32, #tpu.memory_space<vmem>>, vector<128x128xf32>,
    return
  }
  func.func @transform_0(%arg0: i32) -> (i32, i32) {
    %c0_i32 = arith.constant 0 : i32
    %c0_i32_0 = arith.constant 0 : i32
    return %arg0, %c0_i32 : i32, i32
  }
  func.func @transform_1(%arg0: i32) -> (i32, i32) {
    %c0_i32 = arith.constant 0 : i32
    %c0_i32_0 = arith.constant 0 : i32
    return %arg0, %c0_i32 : i32, i32
  }
  func.func @transform_2(%arg0: i32) -> (i32, i32) {
    %c0_i32 = arith.constant 0 : i32
    %c0_i32_0 = arith.constant 0 : i32
    %c0_i32_1 = arith.constant 0 : i32
    return %c0_i32, %c0_i32_0 : i32, i32
  }
  func.func @transform_3(%arg0: i32) -> (i32, i32) {
    %c0_i32 = arith.constant 0 : i32
    %c0_i32_0 = arith.constant 0 : i32
    %c0_i32_1 = arith.constant 0 : i32
    return %c0_i32, %c0_i32_0 : i32, i32
  }
  func.func @transform_4(%arg0: i32) -> (i32, i32) {
    %c0_i32 = arith.constant 0 : i32
    %c0_i32_0 = arith.constant 0 : i32
    %c0_i32_1 = arith.constant 0 : i32
    return %c0_i32, %c0_i32_0 : i32, i32
  }
  func.func @transform_5(%arg0: i32) -> (i32, i32) {
    %c0_i32 = arith.constant 0 : i32
    %c0_i32_0 = arith.constant 0 : i32
    %c0_i32_1 = arith.constant 0 : i32
    return %c0_i32, %c0_i32_0 : i32, i32
  }
  func.func @transform_6(%arg0: i32) -> (i32, i32) {
    %c0_i32 = arith.constant 0 : i32
    %c0_i32_0 = arith.constant 0 : i32
    %c0_i32_1 = arith.constant 0 : i32
    return %c0_i32, %c0_i32_0 : i32, i32
  }
  func.func @transform_7(%arg0: i32) -> (i32, i32) {
    %c0_i32 = arith.constant 0 : i32
    %c0_i32_0 = arith.constant 0 : i32
    %c0_i32_1 = arith.constant 0 : i32
    return %c0_i32, %c0_i32_0 : i32, i32
  }
  func.func @transform_8(%arg0: i32) -> (i32, i32) {
    %c0_i32 = arith.constant 0 : i32
    %c0_i32_0 = arith.constant 0 : i32
    %c0_i32_1 = arith.constant 0 : i32
    return %c0_i32, %c0_i32_0 : i32, i32
  }
  func.func @transform_9(%arg0: i32) -> (i32, i32) {
    %c0_i32 = arith.constant 0 : i32
    %c0_i32_0 = arith.constant 0 : i32
    %c0_i32_1 = arith.constant 0 : i32
    return %c0_i32, %c0_i32_0 : i32, i32
  }
  func.func @transform_10(%arg0: i32) -> (i32, i32) {
    %c0_i32 = arith.constant 0 : i32
    %c0_i32_0 = arith.constant 0 : i32
    %c0_i32_1 = arith.constant 0 : i32
    return %c0_i32, %c0_i32_0 : i32, i32
  }
  func.func @transform_11(%arg0: i32) -> (i32, i32) {
    %c0_i32 = arith.constant 0 : i32
    %c0_i32_0 = arith.constant 0 : i32
    %c0_i32_1 = arith.constant 0 : i32
    return %c0_i32, %c0_i32_0 : i32, i32
  }
  func.func @transform_12(%arg0: i32) -> (i32, i32) {
    %c0_i32 = arith.constant 0 : i32
    %c0_i32_0 = arith.constant 0 : i32
    %c0_i32_1 = arith.constant 0 : i32
    return %c0_i32, %c0_i32_0 : i32, i32
  }
  func.func @transform_13(%arg0: i32) -> (i32, i32) {
    %c0_i32 = arith.constant 0 : i32
    %c0_i32_0 = arith.constant 0 : i32
    %c0_i32_1 = arith.constant 0 : i32
    return %c0_i32, %c0_i32_0 : i32, i32
  }
  func.func @transform_14(%arg0: i32) -> (i32, i32) {
    %c0_i32 = arith.constant 0 : i32
    %c0_i32_0 = arith.constant 0 : i32
    %c0_i32_1 = arith.constant 0 : i32
    return %c0_i32, %c0_i32_0 : i32, i32
  }
  func.func @transform_15(%arg0: i32) -> (i32, i32) {
    %c0_i32 = arith.constant 0 : i32
    %c0_i32_0 = arith.constant 0 : i32
    %c0_i32_1 = arith.constant 0 : i32
    return %c0_i32, %c0_i32_0 : i32, i32
  }
  func.func @transform_16(%arg0: i32) -> (i32, i32) {
    %c0_i32 = arith.constant 0 : i32
    %c0_i32_0 = arith.constant 0 : i32
    %c0_i32_1 = arith.constant 0 : i32
    return %c0_i32, %c0_i32_0 : i32, i32
  }
  func.func @transform_17(%arg0: i32) -> (i32, i32) {
    %c0_i32 = arith.constant 0 : i32
    %c0_i32_0 = arith.constant 0 : i32
    %c0_i32_1 = arith.constant 0 : i32
    return %c0_i32, %c0_i32_0 : i32, i32
  }
  func.func @transform_18(%arg0: i32) -> (i32, i32) {
    %c0_i32 = arith.constant 0 : i32
    %c0_i32_0 = arith.constant 0 : i32
    return %arg0, %c0_i32 : i32, i32
  }
  func.func @transform_19(%arg0: i32) -> (i32, i32) {
    %c0_i32 = arith.constant 0 : i32
    %c0_i32_0 = arith.constant 0 : i32
    return %arg0, %c0_i32 : i32, i32
  }
  func.func @transform_20(%arg0: i32) -> (i32, i32) {
    %c0_i32 = arith.constant 0 : i32
    %c0_i32_0 = arith.constant 0 : i32
    return %arg0, %c0_i32 : i32, i32
  }
}

</mosaic_0001>

<bundles_post_ra>
// kernel: tpu_custom_call.1
= control target key start
LH: loop header
LB: loop body
LE: loop exit
PB: predicated region body
PF: predicated region fallthrough
CT: control target
= control target key end

     0   :  { %s11558_s0 = inlined_call_operand.hbm [shape: f32[256,256], index: 0, kind: input, shape index: {}]   ;;  %s11559_s1 = inlined_call_operand.hbm [shape: f32[256,128], index: 1, kind: input, shape index: {}]   ;;  %s11560_s2 = inlined_call_operand.hbm [shape: bf16[256,512], index: 2, kind: input, shape index: {}]   ;;  %s11561_s3 = inlined_call_operand.vmem [shape: f32[1,512], index: 3, kind: input, shape index: {}]   ;;  %s11562_s4 = inlined_call_operand.hbm [shape: bf16[256,256], index: 4, kind: input, shape index: {}]   ;;  %s11563_s5 = inlined_call_operand.vmem [shape: f32[1,256], index: 5, kind: input, shape index: {}]   ;;  %s11564_s6 = inlined_call_operand.hbm [shape: bf16[256,128], index: 6, kind: input, shape index: {}]   ;;  %s11565_s7 = inlined_call_operand.vmem [shape: f32[1,128], index: 7, kind: input, shape index: {}]   ;;  %s11566_s8 = inlined_call_operand.hbm [shape: bf16[256,128], index: 8, kind: input, shape index: {}]   ;;  %s11567_s9 = inlined_call_operand.vmem [shape: f32[1,128], index: 9, kind: input, shape index: {}]   ;;  %s11568_s10 = inlined_call_operand.vmem [shape: bf16[128,16], index: 10, kind: input, shape index: {}]   ;;  %s11569_s11 = inlined_call_operand.vmem [shape: f32[1,16], index: 11, kind: input, shape index: {}]   ;;  %s11570_s12 = inlined_call_operand.vmem [shape: bf16[16,256], index: 12, kind: input, shape index: {}]   ;;  %s11571_s13 = inlined_call_operand.vmem [shape: f32[1,256], index: 13, kind: input, shape index: {}]   ;;  %s11572_s14 = inlined_call_operand.hbm [shape: bf16[256,256], index: 14, kind: input, shape index: {}]   ;;  %s11573_s15 = inlined_call_operand.vmem [shape: f32[1,256], index: 15, kind: input, shape index: {}]   ;;  %s11574_s16 = inlined_call_operand.hbm [shape: bf16[256,256], index: 16, kind: input, shape index: {}]   ;;  %s11575_s17 = inlined_call_operand.vmem [shape: f32[1,256], index: 17, kind: input, shape index: {}]   ;;  %s11576_s18 = inlined_call_operand.hbm [shape: f32[256,256], index: 18, kind: output, shape index: {0}]   ;;  %s11577_s19 = inlined_call_operand.hbm [shape: f32[256,256], index: 19, kind: output, shape index: {1}]   ;;  %s11578_s20 = inlined_call_operand.hbm [shape: f32[256,128], index: 20, kind: output, shape index: {2}]  }
   0x1   :  { %11641 = sst [smem:[#allocation78_spill]] %s11558_s0 }
   0x2   :  { %11642 = sst [smem:[#allocation79_spill]] %s11559_s1 }
   0x3   :  { %11643 = sst [smem:[#allocation80_spill]] %s11560_s2 }
   0x4   :  { %11644 = sst [smem:[#allocation81_spill]] %s11561_s3 }
   0x5   :  { %11645 = sst [smem:[#allocation82_spill]] %s11562_s4 }
   0x6   :  { %11646 = sst [smem:[#allocation83_spill]] %s11564_s6 }
   0x7   :  { %11647 = sst [smem:[#allocation84_spill]] %s11566_s8 }
   0x8   :  { %11648 = sst [smem:[#allocation85_spill]] %s11569_s11 }
   0x9   :  { %11649 = sst [smem:[#allocation86_spill]] %s11571_s13 }
   0xa   :  { %11650 = sst [smem:[#allocation87_spill]] %s11572_s14 }
   0xb   :  { %11651 = sst [smem:[#allocation88_spill]] %s11573_s15 }
   0xc   :  { %11652 = sst [smem:[#allocation89_spill]] %s11574_s16 }
   0xd   :  { %11653 = sst [smem:[#allocation90_spill]] %s11575_s17 }
   0xe   :  { %11654 = sst [smem:[#allocation91_spill]] %s11576_s18 }
   0xf   :  { %11655 = sst [smem:[#allocation92_spill]] %s11577_s19 }
  0x10   :  { %11656 = sst [smem:[#allocation93_spill]] %s11578_s20 }
  0x11   :  { %26 = vsyncpa [#allocation3], 0 }
  0x12   :  { %28 = vsyncpa [#allocation3 + $0x1], 0 }
  0x13   :  { %29 = vsyncpa [#allocation6], 0 }
  0x14   :  { %31 = vsyncpa [#allocation6 + $0x1], 0 }
  0x15   :  { %32 = vsyncpa [#allocation9], 0 }
  0x16   :  { %33 = vsyncpa [#allocation12], 0 }
  0x17   :  { %34 = vsyncpa [#allocation15], 0 }
  0x18   :  { %35 = vsyncpa [#allocation4], 0 }
  0x19   :  { %37 = vsyncpa [#allocation4 + $0x1], 0 }
  0x1a   :  { %38 = vsyncpa [#allocation18], 0 }
  0x1b   :  { %40 = vsyncpa [#allocation18 + $0x1], 0  ;;  %s8286_s1 = smov 0   ;;  %s8288_s22 = smov 0  }
  0x1c   :  { %s8290_s23 = smov 0   ;;  %s8292_s24 = smov 0  }
  0x1d LB: > { %11657 = sst [smem:[#allocation28_spill]] %s8150_s1  ;;  %s8310_s27 = sadd.s32 4294967295, %s8162_s24   ;;  %s8162_s24 = sphi %s8292_s24, %s11894_s24   ;;  %s8158_s23 = sphi %s8290_s23, %s11896_s23   ;;  %s8154_s22 = sphi %s8288_s22, %s11898_s22   ;;  %s8150_s1 = sphi %s8286_s1, %s11897_s1  }
  0x1e   : > { %11658 = sst [smem:[#allocation29_spill]] %s8158_s23  ;;  %p6251_p0 = scmp.ge.s32.totalorder %s8162_s24, 1 }
  0x1f   : > { %s11659_s3 = sld [smem:[#allocation80_spill]]  ;;  %p67_p1 = scmp.eq.s32.totalorder %s8310_s27, 0 }
  0x20   : > { %p517_p2 = scmp.lt.s32.totalorder %s8162_s24, 3  ;;  %s8164_s4 = smov [#allocation7]  }
  0x21   : > { %s530_s29 = sshll.u32 %s8164_s4, 4  ;;  %s11661_s21 = sld [smem:[#allocation82_spill]]  ;;  %s531_s29 = int_to_ptr.vmem [resolvable:$true] %s530_s29 }
  0x22   : > { %p8315_p3 = pnand %p6251_p0, %p517_p2  ;;  %s11586_s4 = smov 256  }
  0x23   : > { %s11590_s18 = smov 16   ;;  %s11588_s30 = smov 128  }
  0x24   : > { %p7415_p4 = pneg %p8315_p3  ;;  %s11589_s0 = smov 8  }
  0x25   : > { %s528_s26 = sshll.u32 %s11659_s3, 4  ;;  %s8165_s3 = smov [#allocation8]   ;;  %s529_s26 = int_to_ptr.hbm [resolvable:$true] %s528_s26 }
  0x26   : > { %p8327_p6 = pnand %p7415_p4, %p67_p1  ;;  %s547_s20 = sshll.u32 %s8165_s3, 4  ;;  %s548_s20 = int_to_ptr.vmem [resolvable:$true] %s547_s20 }
  0x27   : > { %s545_s2 = sshll.u32 %s11661_s21, 4  ;;  %s11663_s8 = sld [smem:[#allocation84_spill]]  ;;  %s546_s2 = int_to_ptr.hbm [resolvable:$true] %s545_s2 }
  0x28   : > { %7418 = dma.hbm_to_vmem [thread:$0]  (!%p8327_p6), %s529_s26, 8192, %s531_s29, [#allocation6], %s11586_s4, %s11586_s4, %s11590_s18  }
  0x29   : > { %7421 = dma.hbm_to_vmem [thread:$0]  (!%p8327_p6), %s546_s2, 4096, %s548_s20, [#allocation9], %s11588_s30, %s11588_s30, %s11589_s0  }
  0x2a   : > { %s8170_s17 = smov [#allocation11]   ;;  %s11664_s6 = sld [smem:[#allocation83_spill]] }
  0x2b   : > { %s581_s15 = sshll.u32 %s8170_s17, 4  ;;  %s8171_s29 = smov 64   ;;  %s582_s15 = int_to_ptr.vmem [resolvable:$true] %s581_s15 }
  0x2c   : > { %s8172_s4 = smov 4   ;;  %s8173_s20 = smov [#allocation10]  }
  0x2d   : > { %s579_s3 = sshll.u32 %s11663_s8, 4  ;;  %s564_s19 = sshll.u32 %s8173_s20, 4  ;;  %s580_s3 = int_to_ptr.hbm [resolvable:$true] %s579_s3  ;;  %s565_s19 = int_to_ptr.vmem [resolvable:$true] %s564_s19 }
  0x2e   : > { %7427 = dma.hbm_to_vmem [thread:$0]  (!%p8327_p6), %s580_s3, 2048, %s582_s15, [#allocation12], %s8171_s29, %s8171_s29, %s8172_s4  }
  0x2f   : > { %s11665_s14 = sld [smem:[#allocation87_spill]]  ;;  %s8174_s3 = smov [#allocation13]  }
  0x30   : > { %s562_s26 = sshll.u32 %s11664_s6, 4  ;;  %s11666_s16 = sld [smem:[#allocation89_spill]]  ;;  %s563_s26 = int_to_ptr.hbm [resolvable:$true] %s562_s26 }
  0x31   : > { %7424 = dma.hbm_to_vmem [thread:$0]  (!%p8327_p6), %s563_s26, 2048, %s565_s19, [#allocation9], %s8171_s29, %s8171_s29, %s8172_s4  }
  0x32   : > { %s610_s20 = sshll.u32 %s8174_s3, 4  ;;  %s8175_s4 = smov [#allocation14]   ;;  %s611_s20 = int_to_ptr.vmem [resolvable:$true] %s610_s20 }
  0x33   : > { %s627_s26 = sshll.u32 %s8175_s4, 4  ;;  %s11587_s29 = sadd.s32 4294967294, %s8162_s24   ;;  %s628_s26 = int_to_ptr.vmem [resolvable:$true] %s627_s26 }
  0x34   : > { %s8369_s19 = sadd.s32 1, %s8162_s24   ;;  %s53_s21 = sadd.s32 1, %s8158_s23 }
  0x35   : > { %s608_s17 = sshll.u32 %s11665_s14, 4  ;;  %11667 = sst [smem:[#allocation30_spill]] %s8369_s19  ;;  %s609_s17 = int_to_ptr.hbm [resolvable:$true] %s608_s17 }
  0x36   : > { %s625_s15 = sshll.u32 %s11666_s16, 4  ;;  %s50_s2 = ssub.s32 %s8162_s24, %s8369_s19  ;;  %s626_s15 = int_to_ptr.hbm [resolvable:$true] %s625_s15 }
  0x37   : > { %7430 = dma.hbm_to_vmem [thread:$0]  (!%p8327_p6), %s609_s17, 4096, %s611_s20, [#allocation12], %s11588_s30, %s11588_s30, %s11589_s0  }
  0x38   : > { %7433 = dma.hbm_to_vmem [thread:$0]  (!%p8327_p6), %s626_s15, 4096, %s628_s26, [#allocation15], %s11588_s30, %s11588_s30, %s11589_s0  }
  0x39   : > { %p51_p7 = scmp.eq.s32.totalorder %s50_s2, 0  ;;  %p60_p8 = scmp.ne.s32.totalorder %s8158_s23, %s8154_s22 }
  0x3a   : > { %p61_p9 = scmp.eq.s32.totalorder %s8162_s24, 0  ;;  %p66_p10 = scmp.ne.s32.totalorder %s8154_s22, %s8150_s1 }
  0x3b   : > { %s8380_s17 = scalar_select %p51_p7, %s8158_s23, %s53_s21  }
  0x3c   : > { %p8382_p11 = por %p61_p9, %p60_p8  ;;  %p8388_p12 = por %p67_p1, %p66_p10 }
  0x3d   : > { %11668 = sst [smem:[#allocation31_spill]] %s8380_s17  ;;  %p452_p13 = scmp.eq.s32.totalorder %s8310_s27, 1 }
  0x3e   : > { %p458_p0 = scmp.eq.s32.totalorder %s11587_s29, 1  ;;  %p7457_p2 = scmp.lt.s32.totalorder %s8162_s24, 2 }
  0x3f   : > { %s8397_s13 = sand.u32 1, %s8158_s23   ;;  %p8399_p4 = por %p452_p13, %p60_p8 }
  0x40   : > { %p8403_p6 = por %p458_p0, %p66_p10  ;;  %s6259_s20 = sshll.u32 %s8397_s13, 8 }
  0x41   : > { %s7148_s4 = sshll.u32 %s8162_s24, 8  ;;  %s11674_s21 = sld [smem:[#allocation78_spill]] }
  0x42   : > { %s11672_s3 = scalar_select %p8403_p6, 1, 0 }
  0x43   : > { %s648_s30 = scalar_lea.vmem [#allocation2], %s6259_s20  ;;  %p8414_p7 = pnand %p7457_p2, %p8382_p11 }
  0x44   : > { %11673 = sst [smem:[#allocation32_spill]] %s11672_s3  ;;  %s657_s0 = sshll.u32 %s648_s30, 4  ;;  %s658_s0 = int_to_ptr.vmem [resolvable:$true] %s657_s0 }
  0x45   : > { %s667_s8 = sand.u32 1, %s8162_s24   ;;  %s6263_s14 = sshll.u32 %s8397_s13, 7 }
  0x46   : > { %s645_s16 = scalar_lea.sflag [#allocation3], %s8397_s13  ;;  %p7960_p9 = pneg %p8414_p7 }
  0x47   : > { %s654_s29 = scalar_lea.hbm %s11674_s21, %s7148_s4  ;;  %s7963_s25 = scalar_lea.hbm %s11674_s21, 512 }
  0x48   : > { %s655_s18 = sshll.u32 %s654_s29, 4  ;;  %s656_s18 = int_to_ptr.hbm [resolvable:$true] %s655_s18 }
  0x49   : > { %s7956_s17 = sshra.s32 %s656_s18, 4  ;;  %s7957_s17 = int_to_ptr.hbm [resolvable:$true] %s7956_s17 }
  0x4a   : > { %s7958_s23 = scalar_lea.hbm %s7957_s17, 256  ;;  %p7964_p11 = scmp.lt.s32.totalorder %s7957_s17, %s11674_s21 }
  0x4b   : > { %p7959_p8 = scmp.ne.s32.totalorder %s7957_s17, %s7958_s23  ;;  %p7965_p0 = scmp.lt.s32.totalorder %s7963_s25, %s7958_s23 }
  0x4d   : > { %p7961_p10 = pnand %p7960_p9, %p7959_p8  ;;  %p7966_p2 = por %p7965_p0, %p7964_p11 }
  0x4f   : > { %p7962_p13 = pneg %p7961_p10 }
  0x51   : > { %p7967_p5 = pnand %p7966_p2, %p7962_p13 }
  0x53   : > { %7970 = shalt.err (!%p7967_p5)
}
  0x54   : > { %s11676_s13 = smov 16   ;;  %s11677_s26 = smov 256  }
  0x55   : > { %7437 = dma.hbm_to_vmem [thread:$0]  (!%p8414_p7), %s656_s18, 4096, %s658_s0, %s645_s16, %s11677_s26, %s11677_s26, %s11676_s13  }
  0x56   : > { %s7149_s2 = sshll.u32 %s8162_s24, 7  ;;  %s11678_s29 = sld [smem:[#allocation79_spill]] }
  0x57   : > { %s671_s1 = scalar_lea.vmem [#allocation5], %s6263_s14  ;;  %s668_s23 = scalar_lea.sflag [#allocation6], %s667_s8 }
  0x58   : > { %s679_s20 = sshll.u32 %s671_s1, 4  ;;  %s680_s20 = int_to_ptr.vmem [resolvable:$true] %s679_s20 }
  0x5c   : > { %s676_s3 = scalar_lea.hbm %s11678_s29, %s7149_s2  ;;  %s7993_s0 = scalar_lea.hbm %s11678_s29, 256 }
  0x5d   : > { %s677_s17 = sshll.u32 %s676_s3, 4  ;;  %s678_s17 = int_to_ptr.hbm [resolvable:$true] %s677_s17 }
  0x5e   : > { %s7986_s25 = sshra.s32 %s678_s17, 4  ;;  %s7987_s25 = int_to_ptr.hbm [resolvable:$true] %s7986_s25 }
  0x5f   : > { %s7988_s4 = scalar_lea.hbm %s7987_s25, 128  ;;  %p7994_p13 = scmp.lt.s32.totalorder %s7987_s25, %s11678_s29 }
  0x60   : > { %p7989_p5 = scmp.ne.s32.totalorder %s7987_s25, %s7988_s4  ;;  %p7995_p11 = scmp.lt.s32.totalorder %s7993_s0, %s7988_s4 }
  0x62   : > { %p7991_p8 = pnand %p7989_p5, %p7960_p9  ;;  %p7996_p0 = por %p7995_p11, %p7994_p13 }
  0x64   : > { %p7992_p10 = pneg %p7991_p8 }
  0x66   : > { %p7997_p2 = pnand %p7996_p0, %p7992_p10 }
  0x68   : > { %8000 = shalt.err (!%p7997_p2)
}
  0x69   : > { %s11679_s8 = smov 8   ;;  %s11680_s14 = smov 128  }
  0x6a   : > { %7440 = dma.hbm_to_vmem [thread:$0]  (!%p8414_p7), %s678_s17, 2048, %s680_s20, %s668_s23, %s11680_s14, %s11680_s14, %s11679_s8  }
  0x6b   : > { %691 = sbr.rel (%p8315_p3) target bundleno = 1969 (0x7b1), region = 92 }
  0x70   : > { %s8458_s1 = sand.u32 1, %s8154_s22  }
  0x71   : > { %s8461_s3 = sshll.u32 %s8458_s1, 8  ;;  %s694_s26 = scalar_lea.sflag [#allocation3], %s8458_s1 }
  0x72   : > { %s8465_s2 = scalar_lea.vmem [#allocation2], %s8461_s3 }
  0x73   : > { %8117 = dma.done.wait (%p8388_p12), %s694_s26, 4096  }
  0x74   : > { %8119 = vsyncadd (%p8388_p12), %s694_s26, 4294963200  ;;  %s703_s6 = sand.u32 1, %s8310_s27   ;;  %s6268_s28 = sshll.u32 %s8458_s1, 7 }
  0x75   : > { %s704_s30 = scalar_lea.sflag [#allocation6], %s703_s6  ;;  %s8477_s20 = scalar_lea.vmem [#allocation5], %s6268_s28 }
  0x76   : > { %8121 = dma.done.wait (%p8388_p12), %s704_s30, 2048  }
  0x77   : > { %8123 = vsyncadd (%p8388_p12), %s704_s30, 4294965248 }
  0x78   : > { %8125 = dma.done.wait (%p67_p1), [#allocation6], 8192  }
  0x79   : > { %8127 = vsyncadd (%p67_p1), [#allocation6], 4294959104 }
  0x7a   : > { %8129 = dma.done.wait (%p67_p1), [#allocation9], 6144  }
  0x7b   : > { %8131 = vsyncadd (%p67_p1), [#allocation9], 4294961152 }
  0x7c   : > { %8133 = dma.done.wait (%p67_p1), [#allocation12], 6144  }
  0x7d   : > { %8135 = vsyncadd (%p67_p1), [#allocation12], 4294961152 }
  0x7e   : > { %8137 = dma.done.wait (%p67_p1), [#allocation15], 4096  }
  0x7f   : > { %8139 = vsyncadd (%p67_p1), [#allocation15], 4294963200  ;;  %v6392_v0 = vld [vmem:[#allocation7 + $0xe0] sm:$0xf]  ;;  %v7180_v1 = vld [vmem:[#allocation7 + $0xec] sm:$0xf0] }
  0x80   : > { %v7178_v2 = vld [vmem:[#allocation7 + $0xe4] sm:$0xf]  ;;  %v6393_v3 = vor.u32 %v7180_v1, %v6392_v0  ;;  %v6394_v4 = vld [vmem:[#allocation7 + $0xf0] sm:$0xf0]  ;;  %v6376_v5 = vld [vmem:[#allocation7 + $0xc0] sm:$0xf] }
  0x81   : > { %v7176_v6 = vld [vmem:[#allocation7 + $0xcc] sm:$0xf0]  ;;  %v8499_v7 = vor.u32 %v7178_v2, %v6394_v4  ;;  %v7174_v8 = vld [vmem:[#allocation7 + $0xc4] sm:$0xf]  ;;  %v6378_v9 = vld [vmem:[#allocation7 + $0xd0] sm:$0xf0] }
  0x82   : > { %1258 = vmatpush.bf16.msra.mxu0 %v6393_v3  ;;  %7357 = vmatpush.bf16.msra.mxu3 %v6393_v3  ;;  %v6377_v10 = vor.u32 %v7176_v6, %v6376_v5  ;;  %v6520_v11 = vld [vmem:[#allocation7 + $0x1e0] sm:$0xf]  ;;  %v7212_v12 = vld [vmem:[#allocation7 + $0x1ec] sm:$0xf0]  ;;  %v8502_v13 = vor.u32 %v7174_v8, %v6378_v9  ;;  %v7170_v17 = vld [vmem:[#allocation7 + $0xa4] sm:$0xf] }
  0x83   : > { %7373 = vmatpush.bf16.msra.mxu2 %v8499_v7  ;;  %v6360_v14 = vld [vmem:[#allocation7 + $0xa0] sm:$0xf]  ;;  %v7172_v15 = vld [vmem:[#allocation7 + $0xac] sm:$0xf0]  ;;  %v8504_v16 = vor.u32 %v7212_v12, %v6520_v11  ;;  %v6362_v18 = vld [vmem:[#allocation7 + $0xb0] sm:$0xf0] }
  0x84   : > { %v6504_v19 = vld [vmem:[#allocation7 + $0x1c0] sm:$0xf]  ;;  %v7208_v20 = vld [vmem:[#allocation7 + $0x1cc] sm:$0xf0]  ;;  %v6361_v22 = vor.u32 %v7172_v15, %v6360_v14  ;;  %v8510_v25 = vor.u32 %v7170_v17, %v6362_v18  ;;  %v7166_v28 = vld [vmem:[#allocation7 + $0x84] sm:$0xf] }
  0x85   : > { %7365 = vmatpush.bf16.msra.mxu1 %v8504_v16  ;;  %v8507_v21 = vor.u32 %v7208_v20, %v6504_v19  ;;  %v6488_v23 = vld [vmem:[#allocation7 + $0x1a0] sm:$0xf]  ;;  %v7204_v24 = vld [vmem:[#allocation7 + $0x1ac] sm:$0xf0]  ;;  %v6346_v29 = vld [vmem:[#allocation7 + $0x90] sm:$0xf0] }
  0x86   : > { %1259 = vmatpush.bf16.msra.mxu0 %v6377_v10  ;;  %7358 = vmatpush.bf16.msra.mxu3 %v6377_v10  ;;  %v6344_v26 = vld [vmem:[#allocation7 + $0x80] sm:$0xf]  ;;  %v7168_v27 = vld [vmem:[#allocation7 + $0x8c] sm:$0xf0]  ;;  %v8513_v30 = vor.u32 %v7204_v24, %v6488_v23  ;;  %v8516_v34 = vor.u32 %v7166_v28, %v6346_v29  ;;  %v7162_v37 = vld [vmem:[#allocation7 + $0x64] sm:$0xf] }
  0x87   : > { %7374 = vmatpush.bf16.msra.mxu2 %v8502_v13  ;;  %v6345_v31 = vor.u32 %v7168_v27, %v6344_v26  ;;  %v6472_v32 = vld [vmem:[#allocation7 + $0x180] sm:$0xf]  ;;  %v7200_v33 = vld [vmem:[#allocation7 + $0x18c] sm:$0xf0]  ;;  %v6330_v38 = vld [vmem:[#allocation7 + $0x70] sm:$0xf0] }
  0x88   : > { %v6328_v35 = vld [vmem:[#allocation7 + $0x60] sm:$0xf]  ;;  %v7164_v36 = vld [vmem:[#allocation7 + $0x6c] sm:$0xf0]  ;;  %v8519_v39 = vor.u32 %v7200_v33, %v6472_v32  ;;  %v8522_v43 = vor.u32 %v7162_v37, %v6330_v38  ;;  %v7158_v46 = vld [vmem:[#allocation7 + $0x44] sm:$0xf] }
  0x89   : > { %7366 = vmatpush.bf16.msra.mxu1 %v8507_v21  ;;  %v6329_v40 = vor.u32 %v7164_v36, %v6328_v35  ;;  %v6456_v41 = vld [vmem:[#allocation7 + $0x160] sm:$0xf]  ;;  %v7196_v42 = vld [vmem:[#allocation7 + $0x16c] sm:$0xf0]  ;;  %v6314_v47 = vld [vmem:[#allocation7 + $0x50] sm:$0xf0] }
  0x8a   : > { %1260 = vmatpush.bf16.msra.mxu0 %v6361_v22  ;;  %7359 = vmatpush.bf16.msra.mxu3 %v6361_v22  ;;  %v6312_v44 = vld [vmem:[#allocation7 + $0x40] sm:$0xf]  ;;  %v7160_v45 = vld [vmem:[#allocation7 + $0x4c] sm:$0xf0]  ;;  %v8525_v48 = vor.u32 %v7196_v42, %v6456_v41  ;;  %v8528_v52 = vor.u32 %v7158_v46, %v6314_v47  ;;  %v7154_v55 = vld [vmem:[#allocation7 + $0x24] sm:$0xf] }
  0x8b   : > { %7375 = vmatpush.bf16.msra.mxu2 %v8510_v25  ;;  %v6313_v49 = vor.u32 %v7160_v45, %v6312_v44  ;;  %v6440_v50 = vld [vmem:[#allocation7 + $0x140] sm:$0xf]  ;;  %v7192_v51 = vld [vmem:[#allocation7 + $0x14c] sm:$0xf0]  ;;  %v6298_v56 = vld [vmem:[#allocation7 + $0x30] sm:$0xf0] }
  0x8c   : > { %v6296_v53 = vld [vmem:[#allocation7 + $0x20] sm:$0xf]  ;;  %v7156_v54 = vld [vmem:[#allocation7 + $0x2c] sm:$0xf0]  ;;  %v8531_v57 = vor.u32 %v7192_v51, %v6440_v50  ;;  %v8534_v61 = vor.u32 %v7154_v55, %v6298_v56  ;;  %v7150_v0 = vld [vmem:[#allocation7 + $0x4] sm:$0xf] }
  0x8d   : > { %7367 = vmatpush.bf16.msra.mxu1 %v8513_v30  ;;  %v6297_v58 = vor.u32 %v7156_v54, %v6296_v53  ;;  %v6424_v59 = vld [vmem:[#allocation7 + $0x120] sm:$0xf]  ;;  %v7188_v60 = vld [vmem:[#allocation7 + $0x12c] sm:$0xf0]  ;;  %v6282_v1 = vld [vmem:[#allocation7 + $0x10] sm:$0xf0] }
  0x8e   : > { %1261 = vmatpush.bf16.msra.mxu0 %v6345_v31  ;;  %7360 = vmatpush.bf16.msra.mxu3 %v6345_v31  ;;  %v6280_v62 = vld [vmem:[#allocation7] sm:$0xf]  ;;  %v7152_v63 = vld [vmem:[#allocation7 + $0xc] sm:$0xf0]  ;;  %v7210_v2 = vld [vmem:[#allocation7 + $0x1e4] sm:$0xf]  ;;  %v8538_v5 = vor.u32 %v7188_v60, %v6424_v59  ;;  %v8544_v11 = vor.u32 %v7150_v0, %v6282_v1 }
  0x8f   : > { %7376 = vmatpush.bf16.msra.mxu2 %v8516_v34  ;;  %v6522_v3 = vld [vmem:[#allocation7 + $0x1f0] sm:$0xf0]  ;;  %v816_v4 = vld [vmem:[%s8465_s2] sm:$0xff]  ;;  %v6281_v6 = vor.u32 %v7152_v63, %v6280_v62  ;;  %v7184_v15 = vld [vmem:[#allocation7 + $0x10c] sm:$0xf0]  ;;  %s11681_s23 = sld [smem:[#allocation81_spill]] }
  0x90   : > { %v818_v8 = vld [vmem:[%s8465_s2 + $0x10] sm:$0xff]  ;;  %v824_v9 = vld [vmem:[%s8465_s2 + $0x40] sm:$0xff]  ;;  %v6525_v12 = vor.u32 %v7210_v2, %v6522_v3  ;;  %v825_v23 = vld [vmem:[%s8465_s2 + $0x48] sm:$0xff]  ;;  %s9011_s19 = scalar_lea.vmem [#allocation16], %s8461_s3  ;;  %s8176_s13 = smov 16  }
  0x91   : > { %7368 = vmatpush.bf16.msra.mxu1 %v8519_v39  ;;  %v826_v10 = vld [vmem:[%s8465_s2 + $0x50] sm:$0xff]  ;;  %v6408_v14 = vld [vmem:[#allocation7 + $0x100] sm:$0xf]  ;;  %v7206_v17 = vld [vmem:[#allocation7 + $0x1c4] sm:$0xf]  ;;  %v8546_v19 = vpack.c.bf16 %v818_v8, %v816_v4  ;;  %s8177_s11 = smov 112  }
  0x92   : > { %1262 = vmatpush.bf16.msra.mxu0 %v6329_v40  ;;  %7361 = vmatpush.bf16.msra.mxu3 %v6329_v40  ;;  %v6506_v18 = vld [vmem:[#allocation7 + $0x1d0] sm:$0xf0]  ;;  %v8548_v20 = vpack.c.bf16 %v826_v10, %v824_v9  ;;  %v6409_v22 = vor.u32 %v7184_v15, %v6408_v14  ;;  %v827_v24 = vld [vmem:[%s8465_s2 + $0x58] sm:$0xff]  ;;  %v7202_v27 = vld [vmem:[#allocation7 + $0x1a4] sm:$0xf]  ;;  %s11697_s18 = sld [smem:[#allocation86_spill]] }
  0x93   : > { %7377 = vmatpush.bf16.msra.mxu2 %v8522_v43  ;;  %v6509_v26 = vor.u32 %v7206_v17, %v6506_v18  ;;  %v6490_v28 = vld [vmem:[#allocation7 + $0x1b0] sm:$0xf0]  ;;  %v8557_v29 = vpack.c.bf16 %v827_v24, %v825_v23  ;;  %v820_v35 = vld [vmem:[%s8465_s2 + $0x20] sm:$0xff]  ;;  %v831_v42 = vld [vmem:[%s8465_s2 + $0x78] sm:$0xff]  ;;  %s11737_s30 = sld [smem:[#allocation85_spill]] }
  0x94   : > { %v6493_v31 = vor.u32 %v7202_v27, %v6490_v28  ;;  %v6474_v32 = vld [vmem:[#allocation7 + $0x190] sm:$0xf0]  ;;  %v828_v37 = vld [vmem:[%s8465_s2 + $0x60] sm:$0xff]  ;;  %v817_v51 = vld [vmem:[%s8465_s2 + $0x8] sm:$0xff]  ;;  %s11758_s4 = sld [smem:[#allocation88_spill]] }
  0x95   : > { %7369 = vmatpush.bf16.msra.mxu1 %v8525_v48  ;;  %v822_v36 = vld [vmem:[%s8465_s2 + $0x30] sm:$0xff]  ;;  %v7190_v46 = vld [vmem:[#allocation7 + $0x144] sm:$0xf]  ;;  %v819_v53 = vld [vmem:[%s8465_s2 + $0x18] sm:$0xff]  ;;  %s11682_s25 = smov %s11681_s23  ;;  %s11774_s8 = sld [smem:[#allocation90_spill]] }
  0x96   : > { %1263 = vmatpush.bf16.msra.mxu0 %v6313_v49  ;;  %7362 = vmatpush.bf16.msra.mxu3 %v6313_v49  ;;  %v830_v38 = vld [vmem:[%s8465_s2 + $0x70] sm:$0xff]  ;;  %v8568_v40 = vpack.c.bf16 %v822_v36, %v820_v35  ;;  %v832_v49 = vld [vmem:[%s8465_s2 + $0x80] sm:$0xff]  ;;  %v8589_v55 = vpack.c.bf16 %v819_v53, %v817_v51  ;;  %v833_v56 = vld [vmem:[%s8465_s2 + $0x88] sm:$0xff] }
  0x97   : > { %7378 = vmatpush.bf16.msra.mxu2 %v8528_v52  ;;  %v8570_v41 = vpack.c.bf16 %v830_v38, %v828_v37  ;;  %v6458_v44 = vld [vmem:[#allocation7 + $0x170] sm:$0xf0]  ;;  %v6402_v60 = vld [vmem:[#allocation7 + $0xf8] sm:$0xf0]  ;;  %v7175_v63 = vld [vmem:[#allocation7 + $0xcc] sm:$0xf] }
  0x98   : > { %v6442_v47 = vld [vmem:[#allocation7 + $0x150] sm:$0xf0]  ;;  %v6386_v0 = vld [vmem:[#allocation7 + $0xd8] sm:$0xf0]  ;;  %v7186_v1 = vld [vmem:[#allocation7 + $0x124] sm:$0xf] }
  0x99   : > { %7370 = vmatpush.bf16.msra.mxu1 %v8531_v57  ;;  %v834_v50 = vld [vmem:[%s8465_s2 + $0x90] sm:$0xff]  ;;  %v7171_v4 = vld [vmem:[#allocation7 + $0xac] sm:$0xf]  ;;  %v6354_v9 = vld [vmem:[#allocation7 + $0x98] sm:$0xf0] }
  0x9a   : > { %1264 = vmatpush.bf16.msra.mxu0 %v6297_v58  ;;  %7363 = vmatpush.bf16.msra.mxu3 %v6297_v58  ;;  %v8587_v54 = vpack.c.bf16 %v834_v50, %v832_v49  ;;  %v7179_v58 = vld [vmem:[#allocation7 + $0xec] sm:$0xf]  ;;  %v6426_v2 = vld [vmem:[#allocation7 + $0x130] sm:$0xf0]  ;;  %v823_v14 = vld [vmem:[%s8465_s2 + $0x38] sm:$0xff] }
  0x9b   : > { %7379 = vmatpush.bf16.msra.mxu2 %v8534_v61  ;;  %v6405_v62 = vor.u32 %v7179_v58, %v6402_v60  ;;  %v6429_v3 = vor.u32 %v7186_v1, %v6426_v2  ;;  %v7167_v8 = vld [vmem:[#allocation7 + $0x8c] sm:$0xf]  ;;  %v838_v10 = vld [vmem:[%s8465_s2 + $0xb0] sm:$0xff]  ;;  %v6338_v24 = vld [vmem:[#allocation7 + $0x78] sm:$0xf0] }
  0x9c   : > { %v6357_v15 = vor.u32 %v7167_v8, %v6354_v9  ;;  %v837_v18 = vld [vmem:[%s8465_s2 + $0xa8] sm:$0xff]  ;;  %v7182_v27 = vld [vmem:[#allocation7 + $0x104] sm:$0xf]  ;;  %v6410_v28 = vld [vmem:[#allocation7 + $0x110] sm:$0xf0] }
  0x9d   : > { %7371 = vmatpush.bf16.msra.mxu1 %v8538_v5  ;;  %v7163_v23 = vld [vmem:[#allocation7 + $0x6c] sm:$0xf]  ;;  %v6322_v37 = vld [vmem:[#allocation7 + $0x58] sm:$0xf0]  ;;  %v7177_v49 = vld [vmem:[#allocation7 + $0xd4] sm:$0xf0] }
  0x9e   : > { %1265 = vmatpush.bf16.msra.mxu0 %v6281_v6  ;;  %7364 = vmatpush.bf16.msra.mxu3 %v6281_v6  ;;  %v836_v6 = vld [vmem:[%s8465_s2 + $0xa0] sm:$0xff]  ;;  %v7159_v36 = vld [vmem:[#allocation7 + $0x4c] sm:$0xf]  ;;  %v6290_v53 = vld [vmem:[#allocation7 + $0x18] sm:$0xf0] }
  0x9f   : > { %7380 = vmatpush.bf16.msra.mxu2 %v8544_v11  ;;  %v8607_v17 = vpack.c.bf16 %v838_v10, %v836_v6  ;;  %v6325_v38 = vor.u32 %v7159_v36, %v6322_v37  ;;  %v7151_v51 = vld [vmem:[#allocation7 + $0xc] sm:$0xf]  ;;  %v6368_v60 = vld [vmem:[#allocation7 + $0xa8] sm:$0xf]  ;;  %v843_v1 = vld [vmem:[%s8465_s2 + $0xd8] sm:$0xff] }
  0xa0   : > { %v7211_v8 = vld [vmem:[#allocation7 + $0x1ec] sm:$0xf]  ;;  %v6530_v9 = vld [vmem:[#allocation7 + $0x1f8] sm:$0xf0]  ;;  %v6464_v10 = vld [vmem:[#allocation7 + $0x168] sm:$0xf] }
  0xa1   : > { %1266 = vmatmul.bf16.vlgmr.msra.gmra.mxu0 %v8546_v19  ;;  %1276 = vmatmul.bf16.vlgmr.msra.gmra.mxu3 %v8548_v20 }
  0xa2   : > { %1405 = vmatpush.bf16.msrb.mxu3 %v6525_v12  ;;  %1307 = vmatpush.bf16.msrb.mxu0 %v8504_v16  ;;  %v7198_v16 = vld [vmem:[#allocation7 + $0x184] sm:$0xf]  ;;  %v821_v12 = vld [vmem:[%s8465_s2 + $0x28] sm:$0xff] }
  0xa3   : > { %1374 = vmatmul.bf16.vlgmr.msra.gmra.mxu2 %v8548_v20  ;;  %7372 = vmatpush.bf16.msra.mxu1 %v6409_v22  ;;  %v6477_v33 = vor.u32 %v7198_v16, %v6474_v32  ;;  %v6413_v16 = vor.u32 %v7182_v27, %v6410_v28  ;;  %v7213_v32 = vld [vmem:[#allocation7 + $0x1f4] sm:$0xf0] }
  0xa4   : > { %1552 = vmatpush.bf16.msrb.mxu2 %v6405_v62  ;;  %v7173_v62 = vld [vmem:[#allocation7 + $0xb4] sm:$0xf0] }
  0xa5   : > { %v6369_v2 = vor.u32 %v7173_v62, %v6368_v60  ;;  %v7199_v62 = vld [vmem:[#allocation7 + $0x18c] sm:$0xf] }
  0xa6   : > { %1406 = vmatpush.bf16.msrb.mxu3 %v6509_v26  ;;  %1308 = vmatpush.bf16.msrb.mxu0 %v8507_v21  ;;  %v829_v21 = vld [vmem:[%s8465_s2 + $0x68] sm:$0xff]  ;;  %v6341_v26 = vor.u32 %v7163_v23, %v6338_v24  ;;  %v7165_v24 = vld [vmem:[#allocation7 + $0x74] sm:$0xf0] }
  0xa7   : > { %1325 = vmatmul.bf16.vlgmr.msra.gmra.mxu1 %v8557_v29  ;;  %v6336_v23 = vld [vmem:[#allocation7 + $0x68] sm:$0xf] }
  0xa8   : > { %v6337_v28 = vor.u32 %v7165_v24, %v6336_v23 }
  0xaa   : > { %1407 = vmatpush.bf16.msrb.mxu3 %v6493_v31  ;;  %1309 = vmatpush.bf16.msrb.mxu0 %v8513_v30  ;;  %v8577_v30 = vpack.c.bf16 %v831_v42, %v829_v21  ;;  %v6528_v31 = vld [vmem:[#allocation7 + $0x1e8] sm:$0xf]  ;;  %v7209_v42 = vld [vmem:[#allocation7 + $0x1d4] sm:$0xf0] }
  0xab   : > { %v6529_v35 = vor.u32 %v7213_v32, %v6528_v31  ;;  %v6512_v21 = vld [vmem:[#allocation7 + $0x1c8] sm:$0xf]  ;;  %v7161_v32 = vld [vmem:[#allocation7 + $0x54] sm:$0xf0] }
  0xac   : > { %v6432_v31 = vld [vmem:[#allocation7 + $0x128] sm:$0xf] }
  0xad   : > { %1503 = vmatpush.bf16.msrb.mxu1 %v6529_v35  ;;  %v846_v35 = vld [vmem:[%s8465_s2 + $0xf0] sm:$0xff] }
  0xae   : > { %1408 = vmatpush.bf16.msrb.mxu3 %v6477_v33  ;;  %1310 = vmatpush.bf16.msrb.mxu0 %v8519_v39  ;;  %v7194_v39 = vld [vmem:[#allocation7 + $0x164] sm:$0xf]  ;;  %v7181_v33 = vld [vmem:[#allocation7 + $0xf4] sm:$0xf0] }
  0xaf   : > { %v6461_v45 = vor.u32 %v7194_v39, %v6458_v44  ;;  %v7155_v39 = vld [vmem:[#allocation7 + $0x2c] sm:$0xf] }
  0xb1   : > { %1271 = vmatmul.bf16.gmra.mxu0 %v8568_v40  ;;  %1281 = vmatmul.bf16.gmra.mxu3 %v8570_v41 }
  0xb2   : > { %1311 = vmatpush.bf16.msrb.mxu0 %v8525_v48  ;;  %1409 = vmatpush.bf16.msrb.mxu3 %v6461_v45  ;;  %v6445_v48 = vor.u32 %v7190_v46, %v6442_v47  ;;  %v6306_v45 = vld [vmem:[#allocation7 + $0x38] sm:$0xf0]  ;;  %v6496_v46 = vld [vmem:[#allocation7 + $0x1a8] sm:$0xf]  ;;  %v7205_v47 = vld [vmem:[#allocation7 + $0x1b4] sm:$0xf0] }
  0xb3   : > { %1379 = vmatmul.bf16.gmra.mxu2 %v8570_v41  ;;  %v6309_v50 = vor.u32 %v7155_v39, %v6306_v45  ;;  %v847_v39 = vld [vmem:[%s8465_s2 + $0xf8] sm:$0xff]  ;;  %v6416_v45 = vld [vmem:[#allocation7 + $0x108] sm:$0xf] }
  0xb6   : > { %1312 = vmatpush.bf16.msrb.mxu0 %v8531_v57  ;;  %1410 = vmatpush.bf16.msrb.mxu3 %v6445_v48  ;;  %v835_v57 = vld [vmem:[%s8465_s2 + $0x98] sm:$0xff]  ;;  %v6384_v48 = vld [vmem:[#allocation7 + $0xc8] sm:$0xf] }
  0xb7   : > { %1330 = vmatmul.bf16.gmra.mxu1 %v8577_v30  ;;  %v8596_v59 = vpack.c.bf16 %v835_v57, %v833_v56  ;;  %v840_v56 = vld [vmem:[%s8465_s2 + $0xc0] sm:$0xff]  ;;  %v6497_v57 = vor.u32 %v7205_v47, %v6496_v46  ;;  %v6385_v58 = vor.u32 %v7177_v49, %v6384_v48  ;;  %v7185_v46 = vld [vmem:[#allocation7 + $0x114] sm:$0xf0]  ;;  %v6288_v47 = vld [vmem:[#allocation7 + $0x8] sm:$0xf] }
  0xb8   : > { %v7153_v48 = vld [vmem:[#allocation7 + $0x14] sm:$0xf0]  ;;  %v6417_v49 = vor.u32 %v7185_v46, %v6416_v45 }
  0xba   : > { %1313 = vmatpush.bf16.msrb.mxu0 %v8538_v5  ;;  %v6370_v5 = vld [vmem:[#allocation7 + $0xb8] sm:$0xf0]  ;;  %1411 = vmatpush.bf16.msrb.mxu3 %v6429_v3  ;;  %v6480_v3 = vld [vmem:[#allocation7 + $0x188] sm:$0xf] }
  0xbe   : > { %1314 = vmatpush.bf16.msrb.mxu0 %v6409_v22  ;;  %v839_v22 = vld [vmem:[%s8465_s2 + $0xb8] sm:$0xff]  ;;  %1412 = vmatpush.bf16.msrb.mxu3 %v6413_v16  ;;  %v6320_v16 = vld [vmem:[#allocation7 + $0x48] sm:$0xf] }
  0xbf   : > { %v6321_v37 = vor.u32 %v7161_v32, %v6320_v16 }
  0xc1   : > { %1286 = vmatmul.bf16.gmra.mxu3 %v8587_v54  ;;  %1315 = vmatmul.bf16.vlgmr.msrb.gmra.mxu0 %v8589_v55 }
  0xc2   : > { %1356 = vmatpush.bf16.msra.mxu0 %v8499_v7  ;;  %v6389_v7 = vor.u32 %v7175_v63, %v6386_v0  ;;  %v6293_v63 = vor.u32 %v7151_v51, %v6290_v53  ;;  %v7207_v51 = vld [vmem:[#allocation7 + $0x1cc] sm:$0xf]  ;;  %v6514_v53 = vld [vmem:[#allocation7 + $0x1d8] sm:$0xf0] }
  0xc3   : > { %1384 = vmatmul.bf16.gmra.mxu2 %v8587_v54 }
  0xc4   : > { %1553 = vmatpush.bf16.msrb.mxu2 %v6389_v7  ;;  %v841_v7 = vld [vmem:[%s8465_s2 + $0xc8] sm:$0xff] }
  0xc5   : > { %v8631_v6 = vpack.c.bf16 %v843_v1, %v841_v7 }
  0xc6   : > { %1357 = vmatpush.bf16.msra.mxu0 %v8502_v13  ;;  %v6373_v13 = vor.u32 %v7171_v4, %v6370_v5  ;;  %v7201_v4 = vld [vmem:[#allocation7 + $0x194] sm:$0xf0] }
  0xc7   : > { %1335 = vmatmul.bf16.gmra.mxu1 %v8596_v59  ;;  %v7169_v5 = vld [vmem:[#allocation7 + $0x94] sm:$0xf0] }
  0xc8   : > { %1554 = vmatpush.bf16.msrb.mxu2 %v6373_v13  ;;  %v6481_v13 = vor.u32 %v7201_v4, %v6480_v3  ;;  %v7195_v3 = vld [vmem:[#allocation7 + $0x16c] sm:$0xf]  ;;  %v6466_v4 = vld [vmem:[#allocation7 + $0x178] sm:$0xf0] }
  0xca   : > { %1358 = vmatpush.bf16.msra.mxu0 %v8510_v25  ;;  %v8609_v25 = vpack.c.bf16 %v823_v14, %v821_v12  ;;  %v6533_v14 = vor.u32 %v7211_v8, %v6530_v9 }
  0xcc   : > { %1555 = vmatpush.bf16.msrb.mxu2 %v6357_v15  ;;  %v7197_v15 = vld [vmem:[#allocation7 + $0x174] sm:$0xf0]  ;;  %1601 = vmatpush.bf16.msra.mxu3 %v6533_v14 }
  0xce   : > { %1359 = vmatpush.bf16.msra.mxu0 %v8516_v34  ;;  %v8616_v34 = vpack.c.bf16 %v839_v22, %v837_v18  ;;  %v6448_v18 = vld [vmem:[#allocation7 + $0x148] sm:$0xf]  ;;  %v7193_v22 = vld [vmem:[#allocation7 + $0x154] sm:$0xf0] }
  0xcf   : > { %v6449_v27 = vor.u32 %v7193_v22, %v6448_v18 }
  0xd0   : > { %1556 = vmatpush.bf16.msrb.mxu2 %v6341_v26  ;;  %v6465_v26 = vor.u32 %v7197_v15, %v6464_v10 }
  0xd1   : > { %1291 = vmatmul.bf16.gmra.mxu3 %v8607_v17  ;;  %1320 = vmatmul.bf16.gmra.mxu0 %v8609_v25 }
  0xd2   : > { %1360 = vmatpush.bf16.msra.mxu0 %v8522_v43  ;;  %v6400_v43 = vld [vmem:[#allocation7 + $0xe8] sm:$0xf] }
  0xd3   : > { %1389 = vmatmul.bf16.gmra.mxu2 %v8607_v17  ;;  %v6401_v44 = vor.u32 %v7181_v33, %v6400_v43  ;;  %v7189_v43 = vld [vmem:[#allocation7 + $0x134] sm:$0xf0]  ;;  %v844_v33 = vld [vmem:[%s8465_s2 + $0xe0] sm:$0xff] }
  0xd4   : > { %1557 = vmatpush.bf16.msrb.mxu2 %v6325_v38  ;;  %v6433_v36 = vor.u32 %v7189_v43, %v6432_v31  ;;  %v6304_v38 = vld [vmem:[#allocation7 + $0x28] sm:$0xf] }
  0xd6   : > { %1361 = vmatpush.bf16.msra.mxu0 %v8528_v52  ;;  %v6513_v52 = vor.u32 %v7209_v42, %v6512_v21  ;;  %v7157_v21 = vld [vmem:[#allocation7 + $0x34] sm:$0xf0]  ;;  %v8637_v42 = vpack.c.bf16 %v846_v35, %v844_v33 }
  0xd7   : > { %1340 = vmatmul.bf16.gmra.mxu1 %v8616_v34 }
  0xd8   : > { %1504 = vmatpush.bf16.msrb.mxu1 %v6513_v52  ;;  %1558 = vmatpush.bf16.msrb.mxu2 %v6309_v50  ;;  %v845_v52 = vld [vmem:[%s8465_s2 + $0xe8] sm:$0xff] }
  0xd9   : > { %v8643_v50 = vpack.c.bf16 %v847_v39, %v845_v52 }
  0xda   : > { %1362 = vmatpush.bf16.msra.mxu0 %v8534_v61  ;;  %v842_v61 = vld [vmem:[%s8465_s2 + $0xd0] sm:$0xff] }
  0xdb   : > { %v8625_v0 = vpack.c.bf16 %v842_v61, %v840_v56  ;;  %v6289_v56 = vor.u32 %v7153_v48, %v6288_v47  ;;  %v6517_v61 = vor.u32 %v7207_v51, %v6514_v53  ;;  %v6592_v48 = vld [vmem:[#allocation8 + $0x70] sm:$0xf]  ;;  %v7228_v51 = vld [vmem:[#allocation8 + $0x74] sm:$0xf] }
  0xdc   : > { %1505 = vmatpush.bf16.msrb.mxu1 %v6497_v57  ;;  %1559 = vmatpush.bf16.msrb.mxu2 %v6293_v63  ;;  %v7203_v57 = vld [vmem:[#allocation7 + $0x1ac] sm:$0xf]  ;;  %v6482_v63 = vld [vmem:[#allocation7 + $0x198] sm:$0xf0] }
  0xdd   : > { %1602 = vmatpush.bf16.msra.mxu3 %v6517_v61  ;;  %v6485_v7 = vor.u32 %v7199_v62, %v6482_v63  ;;  %v6594_v63 = vld [vmem:[#allocation8 + $0x78] sm:$0xf0] }
  0xde   : > { %1363 = vmatpush.bf16.msra.mxu0 %v8544_v11  ;;  %v6352_v11 = vld [vmem:[#allocation7 + $0x88] sm:$0xf] }
  0xdf   : > { %v6353_v12 = vor.u32 %v7169_v5, %v6352_v11  ;;  %v6469_v5 = vor.u32 %v7195_v3, %v6466_v4 }
  0xe0   : > { %1506 = vmatpush.bf16.msrb.mxu1 %v6481_v13 }
  0xe1   : > { %1296 = vmatmul.bf16.gmra.mxu3 %v8625_v0  ;;  %1364 = vmatmul.bf16.vlgmr.msra.gmra.mxu0 %v8546_v19 }
  0xe2   : > { %1454 = vmatpush.bf16.msrb.mxu0 %v6401_v44  ;;  %v6305_v44 = vor.u32 %v7157_v21, %v6304_v38 }
  0xe3   : > { %1394 = vmatmul.bf16.gmra.mxu2 %v8625_v0 }
  0xe4   : > { %1507 = vmatpush.bf16.msrb.mxu1 %v6465_v26 }
  0xe6   : > { %1455 = vmatpush.bf16.msrb.mxu0 %v6385_v58  ;;  %v6498_v58 = vld [vmem:[#allocation7 + $0x1b8] sm:$0xf0] }
  0xe7   : > { %1345 = vmatmul.bf16.gmra.mxu1 %v8631_v6  ;;  %v6501_v60 = vor.u32 %v7203_v57, %v6498_v58  ;;  %v7187_v58 = vld [vmem:[#allocation7 + $0x12c] sm:$0xf] }
  0xe8   : > { %1508 = vmatpush.bf16.msrb.mxu1 %v6449_v27  ;;  %v7191_v27 = vld [vmem:[#allocation7 + $0x14c] sm:$0xf] }
  0xe9   : > { %1603 = vmatpush.bf16.msra.mxu3 %v6501_v60  ;;  %v6434_v60 = vld [vmem:[#allocation7 + $0x138] sm:$0xf0] }
  0xea   : > { %1456 = vmatpush.bf16.msrb.mxu0 %v6369_v2 }
  0xec   : > { %1509 = vmatpush.bf16.msrb.mxu1 %v6433_v36 }
  0xed   : > { %1604 = vmatpush.bf16.msra.mxu3 %v6485_v7  ;;  %v6437_v7 = vor.u32 %v7187_v58, %v6434_v60  ;;  %v6560_v60 = vld [vmem:[#allocation8 + $0x30] sm:$0xf] }
  0xee   : > { %1457 = vmatpush.bf16.msrb.mxu0 %v6353_v12 }
  0xf0   : > { %1510 = vmatpush.bf16.msrb.mxu1 %v6417_v49  ;;  %v7229_v49 = vld [vmem:[#allocation8 + $0x74] sm:$0xf0] }
  0xf1   : > { %1301 = vmatmul.bf16.gmra.mxu3 %v8637_v42  ;;  %1369 = vmatmul.bf16.gmra.mxu0 %v8568_v40  ;;  %v6593_v62 = vor.u32 %v7229_v49, %v6592_v48 }
  0xf2   : > { %1458 = vmatpush.bf16.msrb.mxu0 %v6337_v28  ;;  %1605 = vmatpush.bf16.msra.mxu3 %v6469_v5  ;;  %v6450_v28 = vld [vmem:[#allocation7 + $0x158] sm:$0xf0]  ;;  %v7227_v5 = vld [vmem:[#allocation8 + $0x64] sm:$0xf0] }
  0xf3   : > { %1399 = vmatmul.bf16.gmra.mxu2 %v8637_v42  ;;  %v6453_v31 = vor.u32 %v7191_v27, %v6450_v28  ;;  %v6576_v27 = vld [vmem:[#allocation8 + $0x50] sm:$0xf]  ;;  %v7225_v28 = vld [vmem:[#allocation8 + $0x54] sm:$0xf0] }
  0xf6   : > { %1459 = vmatpush.bf16.msrb.mxu0 %v6321_v37  ;;  %1606 = vmatpush.bf16.msra.mxu3 %v6453_v31  ;;  %v7224_v31 = vld [vmem:[#allocation8 + $0x54] sm:$0xf] }
  0xf7   : > { %1350 = vmatmul.bf16.gmra.mxu1 %v8643_v50 }
  0xfa   : > { %1460 = vmatpush.bf16.msrb.mxu0 %v6305_v44  ;;  %1607 = vmatpush.bf16.msra.mxu3 %v6437_v7 }
  0xfe   : > { %1461 = vmatpush.bf16.msrb.mxu0 %v6289_v56 }
 0x101   : > { %1413 = vmatmul.bf16.vlgmr.msrb.gmra.mxu3 %v8589_v55  ;;  %1462 = vmatmul.bf16.vlgmr.msrb.gmra.mxu0 %v8546_v19 }
 0x102   : > { %2056 = vmatpush.bf16.msra.mxu0 %v6593_v62  ;;  %v7221_v62 = vld [vmem:[#allocation8 + $0x34] sm:$0xf0] }
 0x103   : > { %1560 = vmatmul.bf16.vlgmr.msrb.gmra.mxu2 %v8546_v19  ;;  %v8658_v19 = vld [vmem:[%s11681_s23] sm:$0xf]  ;;  %s11331_s23 = scalar_lea.sflag [#allocation18], %s703_s6 }
 0x104   : > { %v8661_v2 = vperm.slane %v8658_v19, 0 }
 0x107   : > { %1511 = vmatmul.bf16.vlgmr.msrb.gmra.mxu1 %v8589_v55 }
 0x111   : > { %1418 = vmatmul.bf16.gmra.mxu3 %v8609_v25  ;;  %1467 = vmatmul.bf16.gmra.mxu0 %v8568_v40 }
 0x113   : > { %1565 = vmatmul.bf16.gmra.mxu2 %v8568_v40 }
 0x117   : > { %1516 = vmatmul.bf16.gmra.mxu1 %v8609_v25 }
 0x11e   : > { %v1267_v1 = vpop.f32.mrf.mxu0 }
 0x11f   : > { %v1268_v52 = vadd.f32 %v1267_v1, %v8661_v2  ;;  %v6597_v1 = vor.u32 %v7228_v51, %v6594_v63  ;;  %v7220_v63 = vld [vmem:[#allocation8 + $0x34] sm:$0xf] }
 0x121   : > { %1423 = vmatmul.bf16.gmra.mxu3 %v8557_v29  ;;  %1472 = vmatmul.bf16.gmra.mxu0 %v8548_v20 }
 0x122   : > { %2154 = vmatpush.bf16.msra.mxu2 %v6597_v1 }
 0x123   : > { %1570 = vmatmul.bf16.gmra.mxu2 %v8548_v20 }
 0x124   : > { %v1326_v40 = vpop.f32.mrf.mxu1  ;;  %v1277_v11 = vpop.f32.mrf.mxu3 }
 0x125   : > { %v1278_v13 = vadd.f32 %v1277_v11, %v8661_v2  ;;  %v6584_v11 = vld [vmem:[#allocation8 + $0x60] sm:$0xf] }
 0x126   : > { %v8667_v8 = vpop.f32.mrf.mxu2  ;;  %v1269_v9 = vpop.f32.mrf.mxu0 }
 0x127   : > { %1521 = vmatmul.bf16.gmra.mxu1 %v8557_v29  ;;  %v1327_v10 = vadd.f32 %v1326_v40, %v1278_v13  ;;  %v1270_v61 = vadd.f32 %v1269_v9, %v8661_v2  ;;  %v7226_v13 = vld [vmem:[#allocation8 + $0x64] sm:$0xf] }
 0x129   : > { %v1730_v22 = vmul.f32 0.01, %v1327_v10  ;;  %vm1666_vm0 = vcmp.ge.f32.partialorder %v1327_v10, 0.0 }
 0x12b   : > { %v1794_v43 = vsel %vm1666_vm0, %v1327_v10, %v1730_v22 }
 0x12c   : > { %v1328_v12 = vpop.f32.mrf.mxu1  ;;  %v1279_v14 = vpop.f32.mrf.mxu3 }
 0x12d   : > { %v1280_v15 = vadd.f32 %v1279_v14, %v8661_v2  ;;  %v6585_v14 = vor.u32 %v7227_v5, %v6584_v11  ;;  %v6562_v11 = vld [vmem:[#allocation8 + $0x38] sm:$0xf0] }
 0x12e   : > { %v8671_v18 = vpop.f32.mrf.mxu2  ;;  %v8673_v20 = vpop.f32.mrf.mxu0 }
 0x12f   : > { %v1329_v23 = vadd.f32 %v1328_v12, %v1280_v15  ;;  %v6586_v15 = vld [vmem:[#allocation8 + $0x68] sm:$0xf0]  ;;  %2057 = vmatpush.bf16.msra.mxu0 %v6585_v14 }
 0x131   : > { %vm1670_vm1 = vcmp.ge.f32.partialorder %v1329_v23, 0.0  ;;  %v1734_v24 = vmul.f32 0.01, %v1329_v23  ;;  %1428 = vmatmul.bf16.gmra.mxu3 %v8577_v30  ;;  %1477 = vmatmul.bf16.gmra.mxu0 %v8570_v41 }
 0x133   : > { %1575 = vmatmul.bf16.gmra.mxu2 %v8570_v41  ;;  %v1798_v16 = vsel %vm1670_vm1, %v1329_v23, %v1734_v24  ;;  %v6589_v23 = vor.u32 %v7226_v13, %v6586_v15  ;;  %v6565_v13 = vor.u32 %v7220_v63, %v6562_v11  ;;  %v6536_v63 = vld [vmem:[#allocation8] sm:$0xf]  ;;  %v6538_v11 = vld [vmem:[#allocation8 + $0x8] sm:$0xf0] }
 0x134   : > { %v1331_v26 = vpop.f32.mrf.mxu1  ;;  %v1282_v32 = vpop.f32.mrf.mxu3  ;;  %v8678_v33 = vpack.c.bf16 %v1798_v16, %v1794_v43 }
 0x135   : > { %v1283_v35 = vadd.f32 %v1282_v32, %v8661_v2  ;;  %2155 = vmatpush.bf16.msra.mxu2 %v6589_v23 }
 0x136   : > { %v8681_v36 = vpop.f32.mrf.mxu2  ;;  %v8684_v37 = vpop.f32.mrf.mxu0 }
 0x137   : > { %1526 = vmatmul.bf16.gmra.mxu1 %v8577_v30  ;;  %v1332_v38 = vadd.f32 %v1331_v26, %v1283_v35  ;;  %v6577_v35 = vor.u32 %v7225_v28, %v6576_v27  ;;  %v7219_v27 = vld [vmem:[#allocation8 + $0x24] sm:$0xf0] }
 0x139   : > { %vm1674_vm2 = vcmp.ge.f32.partialorder %v1332_v38, 0.0  ;;  %v1738_v46 = vmul.f32 0.01, %v1332_v38  ;;  %2058 = vmatpush.bf16.msra.mxu0 %v6577_v35 }
 0x13b   : > { %v1802_v40 = vsel %vm1674_vm2, %v1332_v38, %v1738_v46  ;;  %v6578_v38 = vld [vmem:[#allocation8 + $0x58] sm:$0xf0]  ;;  %v7223_v46 = vld [vmem:[#allocation8 + $0x44] sm:$0xf0] }
 0x13c   : > { %v1333_v41 = vpop.f32.mrf.mxu1  ;;  %v1284_v21 = vpop.f32.mrf.mxu3 }
 0x13d   : > { %v1285_v39 = vadd.f32 %v1284_v21, %v8661_v2  ;;  %v6581_v21 = vor.u32 %v7224_v31, %v6578_v38 }
 0x13e   : > { %v8688_v44 = vpop.f32.mrf.mxu2  ;;  %v1316_v45 = vpop.f32.mrf.mxu0 }
 0x13f   : > { %v1334_v47 = vadd.f32 %v1333_v41, %v1285_v39  ;;  %v1317_v53 = vadd.f32 %v1316_v45, %v1268_v52  ;;  %v6568_v45 = vld [vmem:[#allocation8 + $0x40] sm:$0xf]  ;;  %2156 = vmatpush.bf16.msra.mxu2 %v6581_v21  ;;  %v7243_v21 = vld [vmem:[#allocation8 + $0xe4] sm:$0xf0] }
 0x140   : > { %v6569_v51 = vor.u32 %v7223_v46, %v6568_v45  ;;  %v6544_v45 = vld [vmem:[#allocation8 + $0x10] sm:$0xf]  ;;  %v7217_v46 = vld [vmem:[#allocation8 + $0x14] sm:$0xf0] }
 0x141   : > { %vm1678_vm3 = vcmp.ge.f32.partialorder %v1334_v47, 0.0  ;;  %v1742_v56 = vmul.f32 0.01, %v1334_v47  ;;  %1433 = vmatmul.bf16.gmra.mxu3 %v8596_v59  ;;  %1482 = vmatmul.bf16.gmra.mxu0 %v8587_v54  ;;  %v1714_v9 = vmul.f32 0.01, %v1317_v53  ;;  %vm1650_vm4 = vcmp.ge.f32.partialorder %v1317_v53, 0.0 }
 0x142   : > { %2059 = vmatpush.bf16.msra.mxu0 %v6569_v51  ;;  %v6545_v51 = vor.u32 %v7217_v46, %v6544_v45 }
 0x143   : > { %1580 = vmatmul.bf16.gmra.mxu2 %v8587_v54  ;;  %v1806_v3 = vsel %vm1678_vm3, %v1334_v47, %v1742_v56  ;;  %v1778_v43 = vsel %vm1650_vm4, %v1317_v53, %v1714_v9  ;;  %v7222_v47 = vld [vmem:[#allocation8 + $0x44] sm:$0xf]  ;;  %v6570_v53 = vld [vmem:[#allocation8 + $0x48] sm:$0xf0]  ;;  %v6656_v9 = vld [vmem:[#allocation8 + $0xf0] sm:$0xf] }
 0x144   : > { %v1336_v57 = vpop.f32.mrf.mxu1  ;;  %v1287_v4 = vpop.f32.mrf.mxu3  ;;  %v8695_v10 = vpack.c.bf16 %v1806_v3, %v1802_v40  ;;  %v6573_v58 = vor.u32 %v7222_v47, %v6570_v53  ;;  %v7183_v40 = vld [vmem:[#allocation7 + $0x10c] sm:$0xf]  ;;  %v6418_v3 = vld [vmem:[#allocation7 + $0x118] sm:$0xf0]  ;;  %v7216_v47 = vld [vmem:[#allocation8 + $0x14] sm:$0xf] }
 0x145   : > { %v1288_v54 = vadd.f32 %v1287_v4, %v8661_v2  ;;  %v6561_v4 = vor.u32 %v7221_v62, %v6560_v60  ;;  %v6421_v5 = vor.u32 %v7183_v40, %v6418_v3  ;;  %v6546_v53 = vld [vmem:[#allocation8 + $0x18] sm:$0xf0] }
 0x146   : > { %v8698_v12 = vpop.f32.mrf.mxu2  ;;  %v1318_v22 = vpop.f32.mrf.mxu0  ;;  %2157 = vmatpush.bf16.msra.mxu2 %v6573_v58  ;;  %v7241_v58 = vld [vmem:[#allocation8 + $0xd4] sm:$0xf0] }
 0x147   : > { %1531 = vmatmul.bf16.gmra.mxu1 %v8596_v59  ;;  %v1319_v24 = vadd.f32 %v1318_v22, %v1270_v61  ;;  %v1337_v26 = vadd.f32 %v1336_v57, %v1288_v54  ;;  %v7245_v54 = vld [vmem:[#allocation8 + $0xf4] sm:$0xf0]  ;;  %2060 = vmatpush.bf16.msra.mxu0 %v6561_v4 }
 0x148   : > { %v6657_v23 = vor.u32 %v7245_v54, %v6656_v9  ;;  %1608 = vmatpush.bf16.msra.mxu3 %v6421_v5 }
 0x149   : > { %vm1654_vm5 = vcmp.ge.f32.partialorder %v1319_v24, 0.0  ;;  %v1718_v16 = vmul.f32 0.01, %v1319_v24  ;;  %vm1682_vm6 = vcmp.ge.f32.partialorder %v1337_v26, 0.0  ;;  %v1746_v61 = vmul.f32 0.01, %v1337_v26 }
 0x14a   : > { %2105 = vmatpush.bf16.msra.mxu1 %v6657_v23  ;;  %2158 = vmatpush.bf16.msra.mxu2 %v6565_v13 }
 0x14b   : > { %v1782_v41 = vsel %vm1654_vm5, %v1319_v24, %v1718_v16  ;;  %v1810_v14 = vsel %vm1682_vm6, %v1337_v26, %v1746_v61  ;;  %v6552_v24 = vld [vmem:[#allocation8 + $0x20] sm:$0xf]  ;;  %v6549_v61 = vor.u32 %v7216_v47, %v6546_v53 }
 0x14c   : > { %v1338_v32 = vpop.f32.mrf.mxu1  ;;  %v8701_v52 = vpack.c.bf16 %v1782_v41, %v1778_v43  ;;  %v1289_v39 = vpop.f32.mrf.mxu3  ;;  %v6553_v16 = vor.u32 %v7219_v27, %v6552_v24  ;;  %v6648_v41 = vld [vmem:[#allocation8 + $0xe0] sm:$0xf]  ;;  %v1273_v24 = vadd.f32 %v8673_v20, %v8661_v2 }
 0x14d   : > { %v1290_v48 = vadd.f32 %v1289_v39, %v8661_v2  ;;  %v6649_v39 = vor.u32 %v7243_v21, %v6648_v41  ;;  %v7237_v41 = vld [vmem:[#allocation8 + $0xb4] sm:$0xf0]  ;;  %v6616_v53 = vld [vmem:[#allocation8 + $0xa0] sm:$0xf] }
 0x14e   : > { %v8704_v49 = vpop.f32.mrf.mxu2  ;;  %v8706_v56 = vpop.f32.mrf.mxu0  ;;  %2061 = vmatpush.bf16.msra.mxu0 %v6553_v16  ;;  %v1275_v16 = vadd.f32 %v8684_v37, %v8661_v2 }
 0x14f   : > { %v1339_v57 = vadd.f32 %v1338_v32, %v1290_v48  ;;  %v6554_v32 = vld [vmem:[#allocation8 + $0x28] sm:$0xf0]  ;;  %2106 = vmatpush.bf16.msra.mxu1 %v6649_v39  ;;  %v1322_v37 = vadd.f32 %v8706_v56, %v1273_v24 }
 0x151   : > { %vm1686_vm7 = vcmp.ge.f32.partialorder %v1339_v57, 0.0  ;;  %v1750_v7 = vmul.f32 0.01, %v1339_v57  ;;  %1438 = vmatmul.bf16.gmra.mxu3 %v8616_v34  ;;  %1487 = vmatmul.bf16.gmra.mxu0 %v8607_v17  ;;  %vm1658_vm10 = vcmp.ge.f32.partialorder %v1322_v37, 0.0 }
 0x152   : > { %2062 = vmatpush.bf16.msra.mxu0 %v6545_v51 }
 0x153   : > { %1585 = vmatmul.bf16.gmra.mxu2 %v8607_v17  ;;  %v1814_v15 = vsel %vm1686_vm7, %v1339_v57, %v1750_v7  ;;  %v7218_v17 = vld [vmem:[#allocation8 + $0x24] sm:$0xf]  ;;  %v6640_v57 = vld [vmem:[#allocation8 + $0xd0] sm:$0xf]  ;;  %v7215_v7 = vld [vmem:[#allocation8 + $0x4] sm:$0xf0] }
 0x154   : > { %v1341_v1 = vpop.f32.mrf.mxu1  ;;  %v1292_v22 = vpop.f32.mrf.mxu3  ;;  %v8713_v28 = vpack.c.bf16 %v1814_v15, %v1810_v14  ;;  %v6557_v38 = vor.u32 %v7218_v17, %v6554_v32  ;;  %v6641_v62 = vor.u32 %v7241_v58, %v6640_v57  ;;  %v6537_v4 = vor.u32 %v7215_v7, %v6536_v63  ;;  %v6632_v14 = vld [vmem:[#allocation8 + $0xc0] sm:$0xf]  ;;  %v7239_v15 = vld [vmem:[#allocation8 + $0xc4] sm:$0xf0]  ;;  %v7244_v17 = vld [vmem:[#allocation8 + $0xf4] sm:$0xf] }
 0x155   : > { %v1293_v31 = vadd.f32 %v1292_v22, %v8661_v2  ;;  %v6633_v22 = vor.u32 %v7239_v15, %v6632_v14  ;;  %v1722_v58 = vmul.f32 0.01, %v1322_v37  ;;  %v6608_v63 = vld [vmem:[#allocation8 + $0x90] sm:$0xf]  ;;  %v7233_v7 = vld [vmem:[#allocation8 + $0x94] sm:$0xf0] }
 0x156   : > { %v8716_v43 = vpop.f32.mrf.mxu2  ;;  %v8719_v26 = vpop.f32.mrf.mxu0  ;;  %2159 = vmatpush.bf16.msra.mxu2 %v6557_v38  ;;  %2107 = vmatpush.bf16.msra.mxu1 %v6641_v62  ;;  %v6624_v38 = vld [vmem:[#allocation8 + $0xb0] sm:$0xf]  ;;  %v6600_v14 = vld [vmem:[#allocation8 + $0x80] sm:$0xf]  ;;  %v7231_v15 = vld [vmem:[#allocation8 + $0x84] sm:$0xf0] }
 0x157   : > { %1536 = vmatmul.bf16.gmra.mxu1 %v8616_v34  ;;  %v1342_v35 = vadd.f32 %v1341_v1, %v1293_v31  ;;  %v7214_v1 = vld [vmem:[#allocation8 + $0x4] sm:$0xf]  ;;  %2063 = vmatpush.bf16.msra.mxu0 %v6537_v4  ;;  %v6658_v31 = vld [vmem:[#allocation8 + $0xf8] sm:$0xf0]  ;;  %v6625_v46 = vor.u32 %v7237_v41, %v6624_v38 }
 0x158   : > { %v6541_v54 = vor.u32 %v7214_v1, %v6538_v11  ;;  %v6661_v32 = vor.u32 %v7244_v17, %v6658_v31  ;;  %v7242_v17 = vld [vmem:[#allocation8 + $0xe4] sm:$0xf]  ;;  %v6650_v31 = vld [vmem:[#allocation8 + $0xe8] sm:$0xf0] }
 0x159   : > { %v1754_v13 = vmul.f32 0.01, %v1342_v35  ;;  %vm1690_vm8 = vcmp.ge.f32.partialorder %v1342_v35, 0.0 }
 0x15a   : > { %2160 = vmatpush.bf16.msra.mxu2 %v6549_v61  ;;  %2108 = vmatpush.bf16.msra.mxu1 %v6633_v22  ;;  %v7235_v61 = vld [vmem:[#allocation8 + $0xa4] sm:$0xf0] }
 0x15b   : > { %v1818_v21 = vsel %vm1690_vm8, %v1342_v35, %v1754_v13  ;;  %2203 = vmatpush.bf16.msrb.mxu3 %v6661_v32  ;;  %v1324_v35 = vadd.f32 %v8719_v26, %v1275_v16  ;;  %v6617_v57 = vor.u32 %v7235_v61, %v6616_v53  ;;  %v6653_v16 = vor.u32 %v7242_v17, %v6650_v31 }
 0x15c   : > { %v1343_v48 = vpop.f32.mrf.mxu1  ;;  %v1294_v60 = vpop.f32.mrf.mxu3 }
 0x15d   : > { %v1295_v40 = vadd.f32 %v1294_v60, %v8661_v2  ;;  %v1726_v62 = vmul.f32 0.01, %v1324_v35  ;;  %vm1662_vm11 = vcmp.ge.f32.partialorder %v1324_v35, 0.0 }
 0x15e   : > { %v8722_v3 = vpop.f32.mrf.mxu2  ;;  %v8724_v5 = vpop.f32.mrf.mxu0  ;;  %2161 = vmatpush.bf16.msra.mxu2 %v6541_v54  ;;  %2109 = vmatpush.bf16.msra.mxu1 %v6625_v46 }
 0x15f   : > { %v1344_v9 = vadd.f32 %v1343_v48, %v1295_v40  ;;  %v6609_v40 = vor.u32 %v7233_v7, %v6608_v63  ;;  %v1790_v54 = vsel %vm1662_vm11, %v1324_v35, %v1726_v62  ;;  %2204 = vmatpush.bf16.msrb.mxu3 %v6653_v16  ;;  %v7240_v7 = vld [vmem:[#allocation8 + $0xd4] sm:$0xf] }
 0x161   : > { %vm1694_vm9 = vcmp.ge.f32.partialorder %v1344_v9, 0.0  ;;  %v1758_v23 = vmul.f32 0.01, %v1344_v9  ;;  %1443 = vmatmul.bf16.gmra.mxu3 %v8631_v6  ;;  %1492 = vmatmul.bf16.gmra.mxu0 %v8625_v0 }
 0x162   : > { %2110 = vmatpush.bf16.msra.mxu1 %v6617_v57 }
 0x163   : > { %1590 = vmatmul.bf16.gmra.mxu2 %v8625_v0  ;;  %v1822_v39 = vsel %vm1694_vm9, %v1344_v9, %v1758_v23  ;;  %v1786_v9 = vsel %vm1658_vm10, %v1322_v37, %v1722_v58  ;;  %v6601_v23 = vor.u32 %v7231_v15, %v6600_v14  ;;  %v8764_v37 = vperm.slane %v8658_v19, 2 }
 0x164   : > { %v1346_v27 = vpop.f32.mrf.mxu1  ;;  %v1297_v45 = vpop.f32.mrf.mxu3  ;;  %v8735_v20 = vpack.c.bf16 %v1822_v39, %v1818_v21  ;;  %v8750_v22 = vpack.c.bf16 %v1790_v54, %v1786_v9 }
 0x165   : > { %v1298_v0 = vadd.f32 %v1297_v45, %v8661_v2 }
 0x166   : > { %v8738_v47 = vpop.f32.mrf.mxu2  ;;  %v8742_v48 = vpop.f32.mrf.mxu0  ;;  %2111 = vmatpush.bf16.msra.mxu1 %v6609_v40 }
 0x167   : > { %1541 = vmatmul.bf16.gmra.mxu1 %v8631_v6  ;;  %v1347_v51 = vadd.f32 %v1346_v27, %v1298_v0 }
 0x169   : > { %v1762_v26 = vmul.f32 0.01, %v1347_v51  ;;  %vm1698_vm12 = vcmp.ge.f32.partialorder %v1347_v51, 0.0 }
 0x16a   : > { %2112 = vmatpush.bf16.msra.mxu1 %v6601_v23 }
 0x16b   : > { %v1826_v32 = vsel %vm1698_vm12, %v1347_v51, %v1762_v26 }
 0x16c   : > { %v1348_v60 = vpop.f32.mrf.mxu1  ;;  %v1299_v1 = vpop.f32.mrf.mxu3 }
 0x16d   : > { %v1300_v56 = vadd.f32 %v1299_v1, %v8661_v2  ;;  %v6642_v1 = vld [vmem:[#allocation8 + $0xd8] sm:$0xf0] }
 0x16e   : > { %v8746_v4 = vpop.f32.mrf.mxu2  ;;  %v8748_v11 = vpop.f32.mrf.mxu0 }
 0x16f   : > { %v1349_v13 = vadd.f32 %v1348_v60, %v1300_v56  ;;  %v8769_v60 = vperm.slane %v8658_v19, 1  ;;  %v6645_v56 = vor.u32 %v7240_v7, %v6642_v1 }
 0x171   : > { %vm1702_vm13 = vcmp.ge.f32.partialorder %v1349_v13, 0.0  ;;  %v1766_v24 = vmul.f32 0.01, %v1349_v13  ;;  %1448 = vmatmul.bf16.gmra.mxu3 %v8643_v50  ;;  %1497 = vmatmul.bf16.gmra.mxu0 %v8637_v42  ;;  %v1366_v19 = vadd.f32 %v8724_v5, %v8769_v60  ;;  %v1371_v1 = vadd.f32 %v8748_v11, %v8769_v60 }
 0x172   : > { %2205 = vmatpush.bf16.msrb.mxu3 %v6645_v56 }
 0x173   : > { %1595 = vmatmul.bf16.gmra.mxu2 %v8637_v42  ;;  %v1830_v38 = vsel %vm1702_vm13, %v1349_v13, %v1766_v24 }
 0x174   : > { %v1351_v27 = vpop.f32.mrf.mxu1  ;;  %v1302_v41 = vpop.f32.mrf.mxu3  ;;  %v8755_v21 = vpack.c.bf16 %v1830_v38, %v1826_v32 }
 0x175   : > { %v1303_v39 = vadd.f32 %v1302_v41, %v8661_v2 }
 0x176   : > { %v8759_v45 = vpop.f32.mrf.mxu0  ;;  %v8761_v0 = vpop.f32.mrf.mxu2 }
 0x177   : > { %1546 = vmatmul.bf16.gmra.mxu1 %v8643_v50  ;;  %v1352_v46 = vadd.f32 %v1351_v27, %v1303_v39 }
 0x179   : > { %v1770_v61 = vmul.f32 0.01, %v1352_v46  ;;  %vm1706_vm14 = vcmp.ge.f32.partialorder %v1352_v46, 0.0 }
 0x17b   : > { %v1834_v26 = vsel %vm1706_vm14, %v1352_v46, %v1770_v61 }
 0x17c   : > { %v1353_v42 = vpop.f32.mrf.mxu1  ;;  %v1304_v35 = vpop.f32.mrf.mxu3 }
 0x17d   : > { %v1305_v51 = vadd.f32 %v1304_v35, %v8661_v2 }
 0x17e   : > { %v1463_v53 = vpop.f32.mrf.mxu0  ;;  %v8773_v63 = vpop.f32.mrf.mxu2 }
 0x17f   : > { %v1354_v57 = vadd.f32 %v1353_v42, %v1305_v51  ;;  %v1464_v58 = vadd.f32 %v1463_v53, %v8764_v37 }
 0x181   : > { %vm1710_vm15 = vcmp.ge.f32.partialorder %v1354_v57, 0.0  ;;  %v1774_v62 = vmul.f32 0.01, %v1354_v57  ;;  %1609 = vmatmul.bf16.vlgmr.msra.gmra.mxu3 %v8589_v55  ;;  %2064 = vmatmul.bf16.vlgmr.msra.gmra.mxu0 %v8701_v52 }
 0x183   : > { %2162 = vmatmul.bf16.vlgmr.msra.gmra.mxu2 %v8701_v52  ;;  %v1838_v13 = vsel %vm1710_vm15, %v1354_v57, %v1774_v62  ;;  %v1368_v52 = vadd.f32 %v8742_v48, %v8769_v60  ;;  %v7238_v57 = vld [vmem:[#allocation8 + $0xc4] sm:$0xf] }
 0x184   : > { %v1512_v2 = vpop.f32.mrf.mxu1  ;;  %v1414_v9 = vpop.f32.mrf.mxu3  ;;  %v8778_v54 = vpack.c.bf16 %v1838_v13, %v1834_v26 }
 0x185   : > { %v1513_v40 = vadd.f32 %v1512_v2, %v1464_v58  ;;  %v1415_v15 = vadd.f32 %v1414_v9, %v1366_v19  ;;  %v6634_v58 = vld [vmem:[#allocation8 + $0xc8] sm:$0xf0] }
 0x186   : > { %v1465_v55 = vpop.f32.mrf.mxu0  ;;  %v8783_v31 = vpop.f32.mrf.mxu2  ;;  %v6637_v2 = vor.u32 %v7238_v57, %v6634_v58 }
 0x187   : > { %v1466_v14 = vadd.f32 %v1465_v55, %v8764_v37  ;;  %v1716_v23 = vmul.f32 0.01, %v1513_v40  ;;  %vm1652_vm0 = vcmp.ge.f32.partialorder %v1513_v40, 0.0  ;;  %v1715_v17 = vmul.f32 0.01, %v1415_v15 }
 0x188   : > { %vm1651_vm2 = vcmp.ge.f32.partialorder %v1415_v15, 0.0  ;;  %2206 = vmatpush.bf16.msrb.mxu3 %v6637_v2 }
 0x189   : > { %v8785_v32 = vsel %vm1652_vm0, %v1513_v40, %v1716_v23  ;;  %v1779_v35 = vsel %vm1651_vm2, %v1415_v15, %v1715_v17  ;;  %v6626_v17 = vld [vmem:[#allocation8 + $0xb8] sm:$0xf0] }
 0x18c   : > { %v1514_v24 = vpop.f32.mrf.mxu1  ;;  %v1416_v16 = vpop.f32.mrf.mxu3 }
 0x18d   : > { %v1515_v27 = vadd.f32 %v1514_v24, %v1466_v14  ;;  %v1417_v5 = vadd.f32 %v1416_v16, %v1368_v52 }
 0x18e   : > { %v1468_v41 = vpop.f32.mrf.mxu0 }
 0x18f   : > { %vm1656_vm1 = vcmp.ge.f32.partialorder %v1515_v27, 0.0  ;;  %v1720_v38 = vmul.f32 0.01, %v1515_v27  ;;  %vm1655_vm3 = vcmp.ge.f32.partialorder %v1417_v5, 0.0  ;;  %v1719_v39 = vmul.f32 0.01, %v1417_v5 }
 0x190   : > { %v1469_v46 = vadd.f32 %v1468_v41, %v8764_v37 }
 0x191   : > { %v8788_v48 = vsel %vm1656_vm1, %v1515_v27, %v1720_v38  ;;  %v1783_v51 = vsel %vm1655_vm3, %v1417_v5, %v1719_v39  ;;  %1614 = vmatmul.bf16.gmra.mxu3 %v8609_v25  ;;  %2069 = vmatmul.bf16.gmra.mxu0 %v8750_v22  ;;  %v8802_v25 = vpop.f32.mrf.mxu2  ;;  %v7236_v27 = vld [vmem:[#allocation8 + $0xb4] sm:$0xf] }
 0x192   : > { %v2626_v42 = vpack.c.bf16 %v8788_v48, %v8785_v32  ;;  %v8794_v53 = vpack.c.bf16 %v1783_v51, %v1779_v35  ;;  %v6629_v5 = vor.u32 %v7236_v27, %v6626_v17  ;;  %v1378_v35 = vadd.f32 %v8671_v18, %v8769_v60  ;;  %v7260_v48 = vld [vmem:[#allocation10 + $0x70] sm:$0xff] }
 0x193   : > { %2167 = vmatmul.bf16.gmra.mxu2 %v8750_v22  ;;  %v1373_v22 = vadd.f32 %v8759_v45, %v8769_v60 }
 0x194   : > { %v1517_v61 = vpop.f32.mrf.mxu1  ;;  %v1419_v7 = vpop.f32.mrf.mxu3  ;;  %2113 = vmatmul.bf16.vlgmr.msra.gmra.mxu1 %v8794_v53  ;;  %2207 = vmatpush.bf16.msrb.mxu3 %v6629_v5 }
 0x195   : > { %v8797_v62 = vadd.f32 %v1517_v61, %v1469_v46  ;;  %v1420_v56 = vadd.f32 %v1419_v7, %v1371_v1 }
 0x196   : > { %v8804_v40 = vpop.f32.mrf.mxu0 }
 0x197   : > { %v1723_v19 = vmul.f32 0.01, %v1420_v56  ;;  %vm1659_vm4 = vcmp.ge.f32.partialorder %v1420_v56, 0.0  ;;  %vm1660_vm14 = vcmp.ge.f32.partialorder %v8797_v62, 0.0 }
 0x199   : > { %v8811_v15 = vpop.f32.mrf.mxu2  ;;  %v1787_v52 = vsel %vm1659_vm4, %v1420_v56, %v1723_v19  ;;  %v7234_v56 = vld [vmem:[#allocation8 + $0xa4] sm:$0xf] }
 0x19c   : > { %v8808_v26 = vpop.f32.mrf.mxu1  ;;  %v1421_v13 = vpop.f32.mrf.mxu3 }
 0x19d   : > { %v1422_v9 = vadd.f32 %v1421_v13, %v1373_v22  ;;  %v6618_v13 = vld [vmem:[#allocation8 + $0xa8] sm:$0xf0] }
 0x19e   : > { %v1473_v55 = vpop.f32.mrf.mxu0 }
 0x19f   : > { %vm1663_vm5 = vcmp.ge.f32.partialorder %v1422_v9, 0.0  ;;  %v1727_v14 = vmul.f32 0.01, %v1422_v9  ;;  %v1474_v11 = vadd.f32 %v1473_v55, %v8764_v37 }
 0x1a1   : > { %1619 = vmatmul.bf16.gmra.mxu3 %v8557_v29  ;;  %2074 = vmatmul.bf16.gmra.mxu0 %v8678_v33  ;;  %v1791_v45 = vsel %vm1663_vm5, %v1422_v9, %v1727_v14  ;;  %v1376_v29 = vadd.f32 %v8667_v8, %v8769_v60  ;;  %v8825_v46 = vpop.f32.mrf.mxu2  ;;  %v6621_v9 = vor.u32 %v7234_v56, %v6618_v13  ;;  %v7267_v56 = vld [vmem:[#allocation11 + $0x28] sm:$0xff] }
 0x1a2   : > { %v8816_v23 = vpack.c.bf16 %v1791_v45, %v1787_v52  ;;  %v1383_v45 = vadd.f32 %v8688_v44, %v8769_v60 }
 0x1a3   : > { %2172 = vmatmul.bf16.gmra.mxu2 %v8678_v33  ;;  %2208 = vmatpush.bf16.msrb.mxu3 %v6621_v9 }
 0x1a4   : > { %v1522_v24 = vpop.f32.mrf.mxu1  ;;  %v1424_v38 = vpop.f32.mrf.mxu3  ;;  %2118 = vmatmul.bf16.gmra.mxu1 %v8816_v23 }
 0x1a5   : > { %v8818_v16 = vadd.f32 %v1522_v24, %v1474_v11  ;;  %v1425_v39 = vadd.f32 %v1424_v38, %v1376_v29 }
 0x1a6   : > { %v8823_v41 = vpop.f32.mrf.mxu0 }
 0x1a7   : > { %v1731_v61 = vmul.f32 0.01, %v1425_v39  ;;  %vm1667_vm6 = vcmp.ge.f32.partialorder %v1425_v39, 0.0  ;;  %vm1668_vm2 = vcmp.ge.f32.partialorder %v8818_v16, 0.0 }
 0x1a9   : > { %v1795_v7 = vsel %vm1667_vm6, %v1425_v39, %v1731_v61  ;;  %v8839_v55 = vpop.f32.mrf.mxu2  ;;  %v7232_v61 = vld [vmem:[#allocation8 + $0x94] sm:$0xf] }
 0x1ac   : > { %v8827_v33 = vpop.f32.mrf.mxu1  ;;  %v1426_v51 = vpop.f32.mrf.mxu3 }
 0x1ad   : > { %v1427_v57 = vadd.f32 %v1426_v51, %v1378_v35 }
 0x1ae   : > { %v1478_v58 = vpop.f32.mrf.mxu0 }
 0x1af   : > { %vm1671_vm7 = vcmp.ge.f32.partialorder %v1427_v57, 0.0  ;;  %v1735_v2 = vmul.f32 0.01, %v1427_v57  ;;  %v1479_v8 = vadd.f32 %v1478_v58, %v8764_v37  ;;  %v7269_v58 = vld [vmem:[#allocation11 + $0x38] sm:$0xff] }
 0x1b0   : > { %2774 = vmatpush.bf16.msrb.mxu2 %v7269_v58 }
 0x1b1   : > { %1624 = vmatmul.bf16.gmra.mxu3 %v8577_v30  ;;  %2079 = vmatmul.bf16.gmra.mxu0 %v8695_v10  ;;  %v1799_v1 = vsel %vm1671_vm7, %v1427_v57, %v1735_v2  ;;  %v1381_v30 = vadd.f32 %v8681_v36, %v8769_v60  ;;  %v8850_v5 = vpop.f32.mrf.mxu2  ;;  %v6610_v57 = vld [vmem:[#allocation8 + $0x98] sm:$0xf0] }
 0x1b2   : > { %v8835_v22 = vpack.c.bf16 %v1799_v1, %v1795_v7 }
 0x1b3   : > { %2177 = vmatmul.bf16.gmra.mxu2 %v8695_v10 }
 0x1b4   : > { %v1527_v18 = vpop.f32.mrf.mxu1  ;;  %v1429_v14 = vpop.f32.mrf.mxu3  ;;  %2123 = vmatmul.bf16.gmra.mxu1 %v8835_v22 }
 0x1b5   : > { %v8837_v19 = vadd.f32 %v1527_v18, %v1479_v8  ;;  %v1430_v10 = vadd.f32 %v1429_v14, %v1381_v30  ;;  %v6613_v8 = vor.u32 %v7232_v61, %v6610_v57  ;;  %v1388_v14 = vadd.f32 %v8704_v49, %v8769_v60  ;;  %v7265_v61 = vld [vmem:[#allocation11 + $0x18] sm:$0xff] }
 0x1b6   : > { %v8844_v11 = vpop.f32.mrf.mxu0 }
 0x1b7   : > { %v1739_v27 = vmul.f32 0.01, %v1430_v10  ;;  %vm1675_vm8 = vcmp.ge.f32.partialorder %v1430_v10, 0.0  ;;  %2209 = vmatpush.bf16.msrb.mxu3 %v6613_v8  ;;  %vm1676_vm6 = vcmp.ge.f32.partialorder %v8837_v19, 0.0 }
 0x1b9   : > { %v1803_v39 = vsel %vm1675_vm8, %v1430_v10, %v1739_v27  ;;  %v8865_v18 = vpop.f32.mrf.mxu2 }
 0x1bc   : > { %v8846_v52 = vpop.f32.mrf.mxu1  ;;  %v1431_v24 = vpop.f32.mrf.mxu3 }
 0x1bd   : > { %v1432_v17 = vadd.f32 %v1431_v24, %v1383_v45  ;;  %v7266_v24 = vld [vmem:[#allocation11 + $0x20] sm:$0xff] }
 0x1be   : > { %v1483_v38 = vpop.f32.mrf.mxu0 }
 0x1bf   : > { %vm1679_vm9 = vcmp.ge.f32.partialorder %v1432_v17, 0.0  ;;  %v1743_v29 = vmul.f32 0.01, %v1432_v17  ;;  %v1484_v36 = vadd.f32 %v1483_v38, %v8764_v37 }
 0x1c1   : > { %1629 = vmatmul.bf16.gmra.mxu3 %v8596_v59  ;;  %2084 = vmatmul.bf16.gmra.mxu0 %v8713_v28  ;;  %v1807_v35 = vsel %vm1679_vm9, %v1432_v17, %v1743_v29  ;;  %v1386_v59 = vadd.f32 %v8698_v12, %v8769_v60 }
 0x1c2   : > { %v8856_v44 = vpack.c.bf16 %v1807_v35, %v1803_v39  ;;  %v7230_v35 = vld [vmem:[#allocation8 + $0x84] sm:$0xf] }
 0x1c3   : > { %2182 = vmatmul.bf16.gmra.mxu2 %v8713_v28  ;;  %v7268_v28 = vld [vmem:[#allocation11 + $0x30] sm:$0xff] }
 0x1c4   : > { %v1532_v51 = vpop.f32.mrf.mxu1  ;;  %v1434_v7 = vpop.f32.mrf.mxu3  ;;  %2128 = vmatmul.bf16.gmra.mxu1 %v8856_v44  ;;  %2775 = vmatpush.bf16.msrb.mxu2 %v7268_v28 }
 0x1c5   : > { %v8858_v2 = vadd.f32 %v1532_v51, %v1484_v36  ;;  %v1435_v13 = vadd.f32 %v1434_v7, %v1386_v59  ;;  %v8874_v36 = vpop.f32.mrf.mxu2  ;;  %v6602_v51 = vld [vmem:[#allocation8 + $0x88] sm:$0xf0] }
 0x1c6   : > { %v8863_v1 = vpop.f32.mrf.mxu0  ;;  %v6605_v58 = vor.u32 %v7230_v35, %v6602_v51  ;;  %v7263_v59 = vld [vmem:[#allocation11 + $0x8] sm:$0xff] }
 0x1c7   : > { %v1747_v10 = vmul.f32 0.01, %v1435_v13  ;;  %vm1683_vm10 = vcmp.ge.f32.partialorder %v1435_v13, 0.0 }
 0x1c8   : > { %2776 = vmatpush.bf16.msrb.mxu2 %v7267_v56  ;;  %2210 = vmatpush.bf16.msrb.mxu3 %v6605_v58 }
 0x1c9   : > { %v1811_v38 = vsel %vm1683_vm10, %v1435_v13, %v1747_v10  ;;  %v1393_v13 = vadd.f32 %v8722_v3, %v8769_v60 }
 0x1cc   : > { %v8867_v9 = vpop.f32.mrf.mxu1  ;;  %v1436_v30 = vpop.f32.mrf.mxu3  ;;  %2777 = vmatpush.bf16.msrb.mxu2 %v7266_v24 }
 0x1cd   : > { %v1437_v45 = vadd.f32 %v1436_v30, %v1388_v14  ;;  %v8890_v14 = vpop.f32.mrf.mxu2 }
 0x1ce   : > { %v1488_v12 = vpop.f32.mrf.mxu0 }
 0x1cf   : > { %vm1687_vm11 = vcmp.ge.f32.partialorder %v1437_v45, 0.0  ;;  %v1751_v27 = vmul.f32 0.01, %v1437_v45  ;;  %v1489_v17 = vadd.f32 %v1488_v12, %v8764_v37  ;;  %v7262_v12 = vld [vmem:[#allocation11] sm:$0xff] }
 0x1d0   : > { %2778 = vmatpush.bf16.msrb.mxu2 %v7265_v61  ;;  %v1471_v61 = vadd.f32 %v8804_v40, %v8764_v37  ;;  %v1398_v40 = vadd.f32 %v8746_v4, %v8769_v60 }
 0x1d1   : > { %1634 = vmatmul.bf16.gmra.mxu3 %v8616_v34  ;;  %2089 = vmatmul.bf16.gmra.mxu0 %v8735_v20  ;;  %v1815_v29 = vsel %vm1687_vm11, %v1437_v45, %v1751_v27  ;;  %v1391_v34 = vadd.f32 %v8716_v43, %v8769_v60 }
 0x1d2   : > { %v8877_v49 = vpack.c.bf16 %v1815_v29, %v1811_v38  ;;  %v7277_v38 = vld [vmem:[#allocation11 + $0x78] sm:$0xff] }
 0x1d3   : > { %2187 = vmatmul.bf16.gmra.mxu2 %v8735_v20  ;;  %v7264_v20 = vld [vmem:[#allocation11 + $0x10] sm:$0xff]  ;;  %v7253_v29 = vld [vmem:[#allocation10 + $0x38] sm:$0xff]  ;;  %2823 = vmatpush.bf16.msra.mxu3 %v7277_v38 }
 0x1d4   : > { %v1537_v39 = vpop.f32.mrf.mxu1  ;;  %v1439_v8 = vpop.f32.mrf.mxu3  ;;  %2133 = vmatmul.bf16.gmra.mxu1 %v8877_v49  ;;  %2779 = vmatpush.bf16.msrb.mxu2 %v7264_v20  ;;  %v1520_v20 = vadd.f32 %v8808_v26, %v1471_v61 }
 0x1d5   : > { %v8879_v57 = vadd.f32 %v1537_v39, %v1489_v17  ;;  %v1440_v28 = vadd.f32 %v1439_v8, %v1391_v34  ;;  %2528 = vmatpush.bf16.msrb.mxu0 %v7253_v29  ;;  %v7252_v8 = vld [vmem:[#allocation10 + $0x30] sm:$0xff]  ;;  %v8905_v34 = vpop.f32.mrf.mxu2 }
 0x1d6   : > { %v8884_v7 = vpop.f32.mrf.mxu0  ;;  %vm1664_vm15 = vcmp.ge.f32.partialorder %v1520_v20, 0.0 }
 0x1d7   : > { %v1755_v10 = vmul.f32 0.01, %v1440_v28  ;;  %vm1691_vm12 = vcmp.ge.f32.partialorder %v1440_v28, 0.0 }
 0x1d8   : > { %2780 = vmatpush.bf16.msrb.mxu2 %v7263_v59 }
 0x1d9   : > { %v1819_v17 = vsel %vm1691_vm12, %v1440_v28, %v1755_v10  ;;  %2529 = vmatpush.bf16.msrb.mxu0 %v7252_v8  ;;  %v7251_v28 = vld [vmem:[#allocation10 + $0x28] sm:$0xff]  ;;  %v1728_v10 = vmul.f32 0.01, %v1520_v20 }
 0x1dc   : > { %v8886_v56 = vpop.f32.mrf.mxu1  ;;  %v1441_v30 = vpop.f32.mrf.mxu3  ;;  %2781 = vmatpush.bf16.msrb.mxu2 %v7262_v12  ;;  %v7250_v12 = vld [vmem:[#allocation10 + $0x20] sm:$0xff] }
 0x1dd   : > { %v1442_v45 = vadd.f32 %v1441_v30, %v1393_v13  ;;  %2530 = vmatpush.bf16.msrb.mxu0 %v7251_v28  ;;  %v1724_v30 = vmul.f32 0.01, %v8797_v62 }
 0x1de   : > { %v1493_v43 = vpop.f32.mrf.mxu0 }
 0x1df   : > { %vm1695_vm13 = vcmp.ge.f32.partialorder %v1442_v45, 0.0  ;;  %v1759_v24 = vmul.f32 0.01, %v1442_v45  ;;  %v1494_v27 = vadd.f32 %v1493_v43, %v8764_v37  ;;  %v8920_v4 = vsel %vm1660_vm14, %v8797_v62, %v1724_v30 }
 0x1e0   : > { %v1476_v62 = vadd.f32 %v8823_v41, %v8764_v37  ;;  %v1403_v41 = vadd.f32 %v8773_v63, %v8769_v60 }
 0x1e1   : > { %1639 = vmatmul.bf16.gmra.mxu3 %v8631_v6  ;;  %2094 = vmatmul.bf16.gmra.mxu0 %v8755_v21  ;;  %v1823_v3 = vsel %vm1695_vm13, %v1442_v45, %v1759_v24  ;;  %v1396_v6 = vadd.f32 %v8738_v47, %v8769_v60 }
 0x1e2   : > { %v8896_v39 = vpack.c.bf16 %v1823_v3, %v1819_v17  ;;  %2531 = vmatpush.bf16.msrb.mxu0 %v7250_v12  ;;  %v8917_v17 = vpop.f32.mrf.mxu2  ;;  %v8922_v3 = vsel %vm1664_vm15, %v1520_v20, %v1728_v10  ;;  %v1401_v20 = vadd.f32 %v8761_v0, %v8769_v60  ;;  %v1525_v30 = vadd.f32 %v8827_v33, %v1476_v62  ;;  %v7773_v0 = vld [vmem:[%s11682_s25] sm:$0xf] }
 0x1e3   : > { %2192 = vmatmul.bf16.gmra.mxu2 %v8755_v21  ;;  %v2628_v61 = vpack.c.bf16 %v8922_v3, %v8920_v4  ;;  %v1732_v12 = vmul.f32 0.01, %v8818_v16 }
 0x1e4   : > { %v1542_v35 = vpop.f32.mrf.mxu1  ;;  %v1444_v58 = vpop.f32.mrf.mxu3  ;;  %2138 = vmatmul.bf16.gmra.mxu1 %v8896_v39  ;;  %vm1672_vm3 = vcmp.ge.f32.partialorder %v1525_v30, 0.0 }
 0x1e5   : > { %v8898_v51 = vadd.f32 %v1542_v35, %v1494_v27  ;;  %v1445_v59 = vadd.f32 %v1444_v58, %v1396_v6  ;;  %v7249_v35 = vld [vmem:[#allocation10 + $0x18] sm:$0xff]  ;;  %v8953_v63 = vsel %vm1668_vm2, %v8818_v16, %v1732_v12  ;;  %v1481_v16 = vadd.f32 %v8844_v11, %v8764_v37 }
 0x1e6   : > { %v8907_v21 = vpop.f32.mrf.mxu0  ;;  %2532 = vmatpush.bf16.msrb.mxu0 %v7249_v35 }
 0x1e7   : > { %v1763_v45 = vmul.f32 0.01, %v1445_v59  ;;  %vm1699_vm0 = vcmp.ge.f32.partialorder %v1445_v59, 0.0 }
 0x1e9   : > { %v1827_v38 = vsel %vm1699_vm0, %v1445_v59, %v1763_v45  ;;  %v7248_v59 = vld [vmem:[#allocation10 + $0x10] sm:$0xff] }
 0x1ea   : > { %2533 = vmatpush.bf16.msrb.mxu0 %v7248_v59  ;;  %v8941_v45 = vpop.f32.mrf.mxu2 }
 0x1ec   : > { %v8910_v13 = vpop.f32.mrf.mxu1  ;;  %v1446_v47 = vpop.f32.mrf.mxu3 }
 0x1ed   : > { %v1447_v43 = vadd.f32 %v1446_v47, %v1398_v40  ;;  %v7276_v40 = vld [vmem:[#allocation11 + $0x70] sm:$0xff]  ;;  %v7247_v47 = vld [vmem:[#allocation10 + $0x8] sm:$0xff] }
 0x1ee   : > { %v1498_v26 = vpop.f32.mrf.mxu0  ;;  %2824 = vmatpush.bf16.msra.mxu3 %v7276_v40  ;;  %2534 = vmatpush.bf16.msrb.mxu0 %v7247_v47 }
 0x1ef   : > { %vm1703_vm1 = vcmp.ge.f32.partialorder %v1447_v43, 0.0  ;;  %v1767_v24 = vmul.f32 0.01, %v1447_v43  ;;  %v1499_v27 = vadd.f32 %v1498_v26, %v8764_v37  ;;  %v1736_v26 = vmul.f32 0.01, %v1525_v30 }
 0x1f1   : > { %1644 = vmatmul.bf16.gmra.mxu3 %v8643_v50  ;;  %2099 = vmatmul.bf16.gmra.mxu0 %v8778_v54  ;;  %v1831_v29 = vsel %vm1703_vm1, %v1447_v43, %v1767_v24  ;;  %v8948_v43 = vperm.slane %v7773_v0, 3  ;;  %v8955_v35 = vsel %vm1672_vm3, %v1525_v30, %v1736_v26  ;;  %vm1684_vm3 = vcmp.ge.f32.partialorder %v8858_v2, 0.0 }
 0x1f2   : > { %v8929_v58 = vpack.c.bf16 %v1831_v29, %v1827_v38  ;;  %v7246_v38 = vld [vmem:[#allocation10] sm:$0xff]  ;;  %v8969_v40 = vpop.f32.mrf.mxu2 }
 0x1f3   : > { %2197 = vmatmul.bf16.gmra.mxu2 %v8778_v54  ;;  %v7261_v54 = vld [vmem:[#allocation10 + $0x78] sm:$0xff]  ;;  %2535 = vmatpush.bf16.msrb.mxu0 %v7246_v38  ;;  %v1564_v47 = vadd.f32 %v8802_v25, %v8948_v43 }
 0x1f4   : > { %v1547_v6 = vpop.f32.mrf.mxu1  ;;  %v1449_v50 = vpop.f32.mrf.mxu3  ;;  %2143 = vmatmul.bf16.gmra.mxu1 %v8929_v58 }
 0x1f5   : > { %v8931_v8 = vadd.f32 %v1547_v6, %v1499_v27  ;;  %v1450_v10 = vadd.f32 %v1449_v50, %v1401_v20  ;;  %2577 = vmatpush.bf16.msrb.mxu1 %v7261_v54  ;;  %v1562_v6 = vadd.f32 %v8783_v31, %v8948_v43  ;;  %v2630_v20 = vpack.c.bf16 %v8955_v35, %v8953_v63  ;;  %v7275_v31 = vld [vmem:[#allocation11 + $0x68] sm:$0xff] }
 0x1f6   : > { %v8938_v28 = vpop.f32.mrf.mxu0  ;;  %2825 = vmatpush.bf16.msra.mxu3 %v7275_v31  ;;  %v1574_v35 = vadd.f32 %v8850_v5, %v8948_v43  ;;  %v1577_v5 = vadd.f32 %v8865_v18, %v8948_v43 }
 0x1f7   : > { %v1771_v24 = vmul.f32 0.01, %v1450_v10  ;;  %vm1707_vm4 = vcmp.ge.f32.partialorder %v1450_v10, 0.0 }
 0x1f9   : > { %v1835_v62 = vsel %vm1707_vm4, %v1450_v10, %v1771_v24  ;;  %v8975_v10 = vld [vmem:[%s11563_s5] sm:$0x3]  ;;  %2578 = vmatpush.bf16.msrb.mxu1 %v7260_v48 }
 0x1fa   : > { %v8981_v11 = vperm.slane %v8975_v10, 0  ;;  %v8987_v24 = vpop.f32.mrf.mxu2 }
 0x1fc   : > { %v1451_v33 = vpop.f32.mrf.mxu3  ;;  %v8977_v32 = vpop.f32.mrf.mxu1 }
 0x1fd   : > { %v1452_v27 = vadd.f32 %v1451_v33, %v1403_v41  ;;  %v1740_v41 = vmul.f32 0.01, %v8837_v19 }
 0x1fe   : > { %v2065_v29 = vpop.f32.mrf.mxu0 }
 0x1ff   : > { %vm1711_vm5 = vcmp.ge.f32.partialorder %v1452_v27, 0.0  ;;  %v1775_v60 = vmul.f32 0.01, %v1452_v27 }
 0x201   : > { %2211 = vmatmul.bf16.vlgmr.msrb.gmra.mxu3 %v8794_v53  ;;  %v1839_v50 = vsel %vm1711_vm5, %v1452_v27, %v1775_v60  ;;  %v8991_v60 = vsel %vm1676_vm6, %v8837_v19, %v1740_v41  ;;  %v7259_v41 = vld [vmem:[#allocation10 + $0x68] sm:$0xff] }
 0x202   : > { %v8965_v59 = vpack.c.bf16 %v1839_v50, %v1835_v62  ;;  %2579 = vmatpush.bf16.msrb.mxu1 %v7259_v41 }
 0x203   : > { %2782 = vmatmul.bf16.vlgmr.msrb.gmra.mxu2 %v2626_v42  ;;  %v1530_v42 = vadd.f32 %v8846_v52, %v1481_v16  ;;  %v2066_v52 = vadd.f32 %v2065_v29, %v8981_v11 }
 0x204   : > { %v1610_v54 = vpop.f32.mrf.mxu3  ;;  %2148 = vmatmul.bf16.gmra.mxu1 %v8965_v59 }
 0x205   : > { %v1611_v53 = vadd.f32 %v1610_v54, %v1562_v6  ;;  %v1744_v0 = vmul.f32 0.01, %v1530_v42  ;;  %vm1680_vm7 = vcmp.ge.f32.partialorder %v1530_v42, 0.0  ;;  %v1567_v6 = vadd.f32 %v8811_v15, %v8948_v43 }
 0x206   : > { %v2067_v30 = vpop.f32.mrf.mxu0 }
 0x207   : > { %v1717_v26 = vmul.f32 0.01, %v1611_v53  ;;  %vm1653_vm8 = vcmp.ge.f32.partialorder %v1611_v53, 0.0  ;;  %v8993_v25 = vsel %vm1680_vm7, %v1530_v42, %v1744_v0  ;;  %v2068_v42 = vadd.f32 %v2067_v30, %v8981_v11  ;;  %v9014_v0 = vpop.f32.mrf.mxu2 }
 0x208   : > { %v2632_v29 = vpack.c.bf16 %v8993_v25, %v8991_v60  ;;  %v7257_v60 = vld [vmem:[#allocation10 + $0x58] sm:$0xff] }
 0x209   : > { %v8997_v62 = vsel %vm1653_vm8, %v1611_v53, %v1717_v26  ;;  %v7274_v53 = vld [vmem:[#allocation11 + $0x60] sm:$0xff] }
 0x20a   : > { %2826 = vmatpush.bf16.msra.mxu3 %v7274_v53 }
 0x20c   : > { %v1612_v12 = vpop.f32.mrf.mxu3 }
 0x20d   : > { %v1613_v33 = vadd.f32 %v1612_v12, %v1564_v47 }
 0x20e   : > { %v2070_v27 = vpop.f32.mrf.mxu0 }
 0x20f   : > { %vm1657_vm9 = vcmp.ge.f32.partialorder %v1613_v33, 0.0  ;;  %v1721_v38 = vmul.f32 0.01, %v1613_v33 }
 0x211   : > { %v8999_v50 = vsel %vm1657_vm9, %v1613_v33, %v1721_v38  ;;  %v2114_v16 = vpop.f32.mrf.mxu1  ;;  %2216 = vmatmul.bf16.gmra.mxu3 %v8816_v23  ;;  %vm1692_vm9 = vcmp.ge.f32.partialorder %v8879_v57, 0.0 }
 0x212   : > { %v2627_v19 = vpack.c.bf16 %v8999_v50, %v8997_v62  ;;  %v2115_v54 = vadd.f32 %v2114_v16, %v2066_v52  ;;  %v2071_v52 = vadd.f32 %v2070_v27, %v8981_v11  ;;  %v9027_v27 = vpop.f32.mrf.mxu2 }
 0x213   : > { %2787 = vmatmul.bf16.gmra.mxu2 %v2628_v61  ;;  %v1569_v61 = vadd.f32 %v8825_v46, %v8948_v43 }
 0x214   : > { %vm2252_vm10 = vcmp.ge.f32.partialorder %v2115_v54, 0.0  ;;  %v2284_v15 = vmul.f32 0.01, %v2115_v54  ;;  %v1615_v31 = vpop.f32.mrf.mxu3 }
 0x215   : > { %v1616_v48 = vadd.f32 %v1615_v31, %v1567_v6 }
 0x216   : > { %v2316_v47 = vsel %vm2252_vm10, %v2115_v54, %v2284_v15  ;;  %v2072_v23 = vpop.f32.mrf.mxu0  ;;  %v1572_v15 = vadd.f32 %v8839_v55, %v8948_v43 }
 0x217   : > { %2348 = vst [vmem:[%s9011_s19] sm:$0xff] %v2316_v47  ;;  %v1725_v26 = vmul.f32 0.01, %v1616_v48  ;;  %vm1661_vm12 = vcmp.ge.f32.partialorder %v1616_v48, 0.0 }
 0x219   : > { %v2116_v4 = vpop.f32.mrf.mxu1  ;;  %v9023_v46 = vsel %vm1661_vm12, %v1616_v48, %v1725_v26  ;;  %v2073_v48 = vadd.f32 %v2072_v23, %v8981_v11 }
 0x21a   : > { %v2117_v3 = vadd.f32 %v2116_v4, %v2068_v42 }
 0x21c   : > { %vm2254_vm11 = vcmp.ge.f32.partialorder %v2117_v3, 0.0  ;;  %v2286_v12 = vmul.f32 0.01, %v2117_v3  ;;  %v1617_v30 = vpop.f32.mrf.mxu3 }
 0x21d   : > { %v1618_v33 = vadd.f32 %v1617_v30, %v1569_v61 }
 0x21e   : > { %v2318_v38 = vsel %vm2254_vm11, %v2117_v3, %v2286_v12  ;;  %v2075_v6 = vpop.f32.mrf.mxu0  ;;  %v7258_v12 = vld [vmem:[#allocation10 + $0x60] sm:$0xff] }
 0x21f   : > { %2350 = vst [vmem:[%s9011_s19 + $0x10] sm:$0xff] %v2318_v38  ;;  %v2380_v16 = vpack.c.bf16 %v2318_v38, %v2316_v47  ;;  %vm1665_vm13 = vcmp.ge.f32.partialorder %v1618_v33, 0.0  ;;  %v1729_v54 = vmul.f32 0.01, %v1618_v33  ;;  %2580 = vmatpush.bf16.msrb.mxu1 %v7258_v12 }
 0x221   : > { %v2119_v31 = vpop.f32.mrf.mxu1  ;;  %2221 = vmatmul.bf16.gmra.mxu3 %v8835_v22  ;;  %2536 = vmatmul.bf16.vlgmr.msrb.gmra.mxu0 %v2380_v16  ;;  %v9025_v53 = vsel %vm1665_vm13, %v1618_v33, %v1729_v54  ;;  %v7273_v22 = vld [vmem:[#allocation11 + $0x58] sm:$0xff]  ;;  %v1486_v54 = vadd.f32 %v8863_v1, %v8764_v37 }
 0x222   : > { %v2120_v42 = vadd.f32 %v2119_v31, %v2071_v52  ;;  %v2629_v47 = vpack.c.bf16 %v9025_v53, %v9023_v46  ;;  %2827 = vmatpush.bf16.msra.mxu3 %v7273_v22 }
 0x223   : > { %2792 = vmatmul.bf16.gmra.mxu2 %v2630_v20  ;;  %v9038_v20 = vpop.f32.mrf.mxu2  ;;  %2581 = vmatpush.bf16.msrb.mxu1 %v7257_v60 }
 0x224   : > { %vm2256_vm14 = vcmp.ge.f32.partialorder %v2120_v42, 0.0  ;;  %v2288_v55 = vmul.f32 0.01, %v2120_v42  ;;  %v1620_v41 = vpop.f32.mrf.mxu3 }
 0x225   : > { %v1621_v4 = vadd.f32 %v1620_v41, %v1572_v15 }
 0x226   : > { %v2077_v3 = vpop.f32.mrf.mxu0  ;;  %v2320_v61 = vsel %vm2256_vm14, %v2120_v42, %v2288_v55  ;;  %v2076_v42 = vadd.f32 %v2075_v6, %v8981_v11  ;;  %v1535_v6 = vadd.f32 %v8867_v9, %v1486_v54 }
 0x227   : > { %2352 = vst [vmem:[%s9011_s19 + $0x20] sm:$0xff] %v2320_v61  ;;  %v1733_v52 = vmul.f32 0.01, %v1621_v4  ;;  %vm1669_vm0 = vcmp.ge.f32.partialorder %v1621_v4, 0.0  ;;  %v2078_v9 = vadd.f32 %v2077_v3, %v8981_v11  ;;  %v1491_v3 = vadd.f32 %v8884_v7, %v8764_v37 }
 0x228   : > { %vm1688_vm4 = vcmp.ge.f32.partialorder %v1535_v6, 0.0 }
 0x229   : > { %v2121_v30 = vpop.f32.mrf.mxu1  ;;  %v9047_v41 = vsel %vm1669_vm0, %v1621_v4, %v1733_v52 }
 0x22a   : > { %v2122_v63 = vadd.f32 %v2121_v30, %v2073_v48 }
 0x22b   : > { %v9057_v4 = vpop.f32.mrf.mxu2 }
 0x22c   : > { %vm2258_vm15 = vcmp.ge.f32.partialorder %v2122_v63, 0.0  ;;  %v2290_v26 = vmul.f32 0.01, %v2122_v63  ;;  %v1622_v33 = vpop.f32.mrf.mxu3 }
 0x22d   : > { %v1623_v38 = vadd.f32 %v1622_v33, %v1574_v35  ;;  %v1748_v35 = vmul.f32 0.01, %v8858_v2  ;;  %v1579_v33 = vadd.f32 %v8874_v36, %v8948_v43 }
 0x22e   : > { %v2080_v23 = vpop.f32.mrf.mxu0  ;;  %v2322_v16 = vsel %vm2258_vm15, %v2122_v63, %v2290_v26  ;;  %v1752_v26 = vmul.f32 0.01, %v1535_v6  ;;  %vm1700_vm15 = vcmp.ge.f32.partialorder %v8898_v51, 0.0 }
 0x22f   : > { %vm1673_vm1 = vcmp.ge.f32.partialorder %v1623_v38, 0.0  ;;  %v1737_v15 = vmul.f32 0.01, %v1623_v38  ;;  %2354 = vst [vmem:[%s9011_s19 + $0x30] sm:$0xff] %v2322_v16  ;;  %v2382_v31 = vpack.c.bf16 %v2322_v16, %v2320_v61  ;;  %v1812_v52 = vsel %vm1684_vm3, %v8858_v2, %v1748_v35 }
 0x230   : > { %v2081_v2 = vadd.f32 %v2080_v23, %v8981_v11 }
 0x231   : > { %v2124_v55 = vpop.f32.mrf.mxu1  ;;  %2226 = vmatmul.bf16.gmra.mxu3 %v8856_v44  ;;  %2541 = vmatmul.bf16.gmra.mxu0 %v2382_v31  ;;  %v9049_v22 = vsel %vm1673_vm1, %v1623_v38, %v1737_v15  ;;  %v7272_v44 = vld [vmem:[#allocation11 + $0x50] sm:$0xff]  ;;  %v1816_v38 = vsel %vm1688_vm4, %v1535_v6, %v1752_v26  ;;  %v1582_v6 = vadd.f32 %v8890_v14, %v8948_v43  ;;  %v7271_v14 = vld [vmem:[#allocation11 + $0x48] sm:$0xff] }
 0x232   : > { %v2125_v48 = vadd.f32 %v2124_v55, %v2076_v42  ;;  %v2631_v1 = vpack.c.bf16 %v9049_v22, %v9047_v41  ;;  %2828 = vmatpush.bf16.msra.mxu3 %v7272_v44  ;;  %v1540_v26 = vadd.f32 %v8886_v56, %v1491_v3 }
 0x233   : > { %2797 = vmatmul.bf16.gmra.mxu2 %v2632_v29  ;;  %v9069_v36 = vpop.f32.mrf.mxu2 }
 0x234   : > { %vm2260_vm2 = vcmp.ge.f32.partialorder %v2125_v48, 0.0  ;;  %v2292_v18 = vmul.f32 0.01, %v2125_v48  ;;  %v1625_v61 = vpop.f32.mrf.mxu3  ;;  %vm1696_vm10 = vcmp.ge.f32.partialorder %v1540_v26, 0.0 }
 0x235   : > { %v1626_v12 = vadd.f32 %v1625_v61, %v1577_v5  ;;  %v2634_v5 = vpack.c.bf16 %v1816_v38, %v1812_v52 }
 0x236   : > { %v2082_v30 = vpop.f32.mrf.mxu0  ;;  %v2324_v63 = vsel %vm2260_vm2, %v2125_v48, %v2292_v18  ;;  %2829 = vmatpush.bf16.msra.mxu3 %v7271_v14 }
 0x237   : > { %2356 = vst [vmem:[%s9011_s19 + $0x40] sm:$0xff] %v2324_v63  ;;  %v1741_v15 = vmul.f32 0.01, %v1626_v12  ;;  %vm1677_vm6 = vcmp.ge.f32.partialorder %v1626_v12, 0.0 }
 0x239   : > { %v2126_v25 = vpop.f32.mrf.mxu1  ;;  %v9075_v44 = vsel %vm1677_vm6, %v1626_v12, %v1741_v15  ;;  %v1760_v12 = vmul.f32 0.01, %v1540_v26 }
 0x23a   : > { %v2127_v29 = vadd.f32 %v2126_v25, %v2078_v9 }
 0x23b   : > { %v9086_v56 = vpop.f32.mrf.mxu2 }
 0x23c   : > { %vm2262_vm5 = vcmp.ge.f32.partialorder %v2127_v29, 0.0  ;;  %v2294_v16 = vmul.f32 0.01, %v2127_v29  ;;  %v1627_v54 = vpop.f32.mrf.mxu3 }
 0x23d   : > { %v1628_v31 = vadd.f32 %v1627_v54, %v1579_v33  ;;  %v2083_v33 = vadd.f32 %v2082_v30, %v8981_v11  ;;  %v1584_v54 = vadd.f32 %v8905_v34, %v8948_v43 }
 0x23e   : > { %v2326_v42 = vsel %vm2262_vm5, %v2127_v29, %v2294_v16  ;;  %v2085_v48 = vpop.f32.mrf.mxu0  ;;  %v7256_v29 = vld [vmem:[#allocation10 + $0x50] sm:$0xff]  ;;  %vm1708_vm5 = vcmp.ge.f32.partialorder %v8931_v8, 0.0 }
 0x23f   : > { %vm1681_vm7 = vcmp.ge.f32.partialorder %v1628_v31, 0.0  ;;  %v1745_v55 = vmul.f32 0.01, %v1628_v31  ;;  %2358 = vst [vmem:[%s9011_s19 + $0x50] sm:$0xff] %v2326_v42  ;;  %v2384_v18 = vpack.c.bf16 %v2326_v42, %v2324_v63  ;;  %2582 = vmatpush.bf16.msrb.mxu1 %v7256_v29  ;;  %v2086_v34 = vadd.f32 %v2085_v48, %v8981_v11 }
 0x240   : > { %v1764_v29 = vmul.f32 0.01, %v8898_v51 }
 0x241   : > { %v2129_v61 = vpop.f32.mrf.mxu1  ;;  %2231 = vmatmul.bf16.gmra.mxu3 %v8877_v49  ;;  %2546 = vmatmul.bf16.gmra.mxu0 %v2384_v18  ;;  %v9077_v7 = vsel %vm1681_vm7, %v1628_v31, %v1745_v55  ;;  %v1756_v49 = vmul.f32 0.01, %v8879_v57  ;;  %v1824_v31 = vsel %vm1696_vm10, %v1540_v26, %v1760_v12 }
 0x242   : > { %v2130_v35 = vadd.f32 %v2129_v61, %v2081_v2  ;;  %v2633_v63 = vpack.c.bf16 %v9077_v7, %v9075_v44  ;;  %v1496_v2 = vadd.f32 %v8907_v21, %v8764_v37  ;;  %v3355_v44 = vld [vmem:[%s8477_s20 + $0x30] sm:$0xff] }
 0x243   : > { %2802 = vmatmul.bf16.gmra.mxu2 %v2634_v5  ;;  %v1820_v15 = vsel %vm1692_vm9, %v8879_v57, %v1756_v49  ;;  %v1587_v57 = vadd.f32 %v8917_v17, %v8948_v43 }
 0x244   : > { %vm2264_vm8 = vcmp.ge.f32.partialorder %v2130_v35, 0.0  ;;  %v2296_v23 = vmul.f32 0.01, %v2130_v35  ;;  %v1630_v60 = vpop.f32.mrf.mxu3  ;;  %v2636_v18 = vpack.c.bf16 %v1824_v31, %v1820_v15  ;;  %v1545_v14 = vadd.f32 %v8910_v13, %v1496_v2 }
 0x245   : > { %v1631_v9 = vadd.f32 %v1630_v60, %v1582_v6  ;;  %v1589_v15 = vadd.f32 %v8941_v45, %v8948_v43  ;;  %v1828_v31 = vsel %vm1700_vm15, %v8898_v51, %v1764_v29 }
 0x246   : > { %v2328_v25 = vsel %vm2264_vm8, %v2130_v35, %v2296_v23  ;;  %v2087_v52 = vpop.f32.mrf.mxu0  ;;  %vm1704_vm0 = vcmp.ge.f32.partialorder %v1545_v14, 0.0 }
 0x247   : > { %2360 = vst [vmem:[%s9011_s19 + $0x60] sm:$0xff] %v2328_v25  ;;  %v1749_v3 = vmul.f32 0.01, %v1631_v9  ;;  %vm1685_vm12 = vcmp.ge.f32.partialorder %v1631_v9, 0.0  ;;  %v2088_v13 = vadd.f32 %v2087_v52, %v8981_v11 }
 0x249   : > { %v2131_v38 = vpop.f32.mrf.mxu1  ;;  %v9098_v26 = vsel %vm1685_vm12, %v1631_v9, %v1749_v3 }
 0x24a   : > { %v2132_v16 = vadd.f32 %v2131_v38, %v2083_v33  ;;  %v1768_v33 = vmul.f32 0.01, %v1545_v14  ;;  %v7255_v38 = vld [vmem:[#allocation10 + $0x48] sm:$0xff] }
 0x24b   : > { %2583 = vmatpush.bf16.msrb.mxu1 %v7255_v38 }
 0x24c   : > { %vm2266_vm11 = vcmp.ge.f32.partialorder %v2132_v16, 0.0  ;;  %v2298_v42 = vmul.f32 0.01, %v2132_v16  ;;  %v1632_v5 = vpop.f32.mrf.mxu3 }
 0x24d   : > { %v1633_v55 = vadd.f32 %v1632_v5, %v1584_v54 }
 0x24e   : > { %v2330_v30 = vsel %vm2266_vm11, %v2132_v16, %v2298_v42  ;;  %v2090_v48 = vpop.f32.mrf.mxu0  ;;  %v1832_v42 = vsel %vm1704_vm0, %v1545_v14, %v1768_v33 }
 0x24f   : > { %vm1689_vm13 = vcmp.ge.f32.partialorder %v1633_v55, 0.0  ;;  %v1753_v6 = vmul.f32 0.01, %v1633_v55  ;;  %2362 = vst [vmem:[%s9011_s19 + $0x70] sm:$0xff] %v2330_v30  ;;  %v2386_v61 = vpack.c.bf16 %v2330_v30, %v2328_v25  ;;  %v9105_v25 = vpop.f32.mrf.mxu2  ;;  %v2091_v51 = vadd.f32 %v2090_v48, %v8981_v11 }
 0x251   : > { %v2134_v35 = vpop.f32.mrf.mxu1  ;;  %2236 = vmatmul.bf16.gmra.mxu3 %v8896_v39  ;;  %2551 = vmatmul.bf16.gmra.mxu0 %v2386_v61  ;;  %v9100_v23 = vsel %vm1689_vm13, %v1633_v55, %v1753_v6  ;;  %v7270_v39 = vld [vmem:[#allocation11 + $0x40] sm:$0xff]  ;;  %v2638_v6 = vpack.c.bf16 %v1832_v42, %v1828_v31  ;;  %v1501_v61 = vadd.f32 %v8938_v28, %v8764_v37 }
 0x252   : > { %v2135_v60 = vadd.f32 %v2134_v35, %v2086_v34  ;;  %v2635_v21 = vpack.c.bf16 %v9100_v23, %v9098_v26  ;;  %2830 = vmatpush.bf16.msra.mxu3 %v7270_v39 }
 0x253   : > { %2807 = vmatmul.bf16.gmra.mxu2 %v2636_v18  ;;  %v1550_v28 = vadd.f32 %v8977_v32, %v1501_v61  ;;  %v7254_v32 = vld [vmem:[#allocation10 + $0x40] sm:$0xff] }
 0x254   : > { %vm2268_vm14 = vcmp.ge.f32.partialorder %v2135_v60, 0.0  ;;  %v2300_v17 = vmul.f32 0.01, %v2135_v60  ;;  %v1635_v49 = vpop.f32.mrf.mxu3  ;;  %2584 = vmatpush.bf16.msrb.mxu1 %v7254_v32 }
 0x255   : > { %v1636_v12 = vadd.f32 %v1635_v49, %v1587_v57  ;;  %v1592_v57 = vadd.f32 %v8969_v40, %v8948_v43  ;;  %vm1712_vm6 = vcmp.ge.f32.partialorder %v1550_v28, 0.0 }
 0x256   : > { %v2332_v9 = vsel %vm2268_vm14, %v2135_v60, %v2300_v17  ;;  %v2092_v30 = vpop.f32.mrf.mxu0 }
 0x257   : > { %2364 = vst [vmem:[%s9011_s19 + $0x80] sm:$0xff] %v2332_v9  ;;  %v1757_v55 = vmul.f32 0.01, %v1636_v12  ;;  %v9114_v2 = vpop.f32.mrf.mxu2  ;;  %vm1693_vm2 = vcmp.ge.f32.partialorder %v1636_v12, 0.0  ;;  %v2093_v33 = vadd.f32 %v2092_v30, %v8981_v11 }
 0x259   : > { %v2136_v16 = vpop.f32.mrf.mxu1  ;;  %v9123_v60 = vsel %vm1693_vm2, %v1636_v12, %v1757_v55 }
 0x25a   : > { %v2137_v54 = vadd.f32 %v2136_v16, %v2088_v13  ;;  %v1594_v16 = vadd.f32 %v8987_v24, %v8948_v43  ;;  %v1597_v24 = vadd.f32 %v9014_v0, %v8948_v43 }
 0x25c   : > { %vm2270_vm1 = vcmp.ge.f32.partialorder %v2137_v54, 0.0  ;;  %v2302_v5 = vmul.f32 0.01, %v2137_v54  ;;  %v1637_v3 = vpop.f32.mrf.mxu3 }
 0x25d   : > { %v1638_v18 = vadd.f32 %v1637_v3, %v1589_v15 }
 0x25e   : > { %v2334_v52 = vsel %vm2270_vm1, %v2137_v54, %v2302_v5  ;;  %v2095_v29 = vpop.f32.mrf.mxu0 }
 0x25f   : > { %vm1697_vm3 = vcmp.ge.f32.partialorder %v1638_v18, 0.0  ;;  %v1761_v45 = vmul.f32 0.01, %v1638_v18  ;;  %2366 = vst [vmem:[%s9011_s19 + $0x90] sm:$0xff] %v2334_v52  ;;  %v2388_v34 = vpack.c.bf16 %v2334_v52, %v2332_v9  ;;  %v1776_v9 = vmul.f32 0.01, %v1550_v28  ;;  %v9133_v12 = vpop.f32.mrf.mxu2 }
 0x261   : > { %v2139_v35 = vpop.f32.mrf.mxu1  ;;  %2241 = vmatmul.bf16.gmra.mxu3 %v8929_v58  ;;  %2556 = vmatmul.bf16.gmra.mxu0 %v2388_v34  ;;  %v9125_v14 = vsel %vm1697_vm3, %v1638_v18, %v1761_v45  ;;  %v1772_v58 = vmul.f32 0.01, %v8931_v8  ;;  %v1840_v15 = vsel %vm1712_vm6, %v1550_v28, %v1776_v9 }
 0x262   : > { %v2140_v17 = vadd.f32 %v2139_v35, %v2091_v51  ;;  %v2637_v37 = vpack.c.bf16 %v9125_v14, %v9123_v60 }
 0x263   : > { %2812 = vmatmul.bf16.gmra.mxu2 %v2638_v6  ;;  %v1836_v54 = vsel %vm1708_vm5, %v8931_v8, %v1772_v58  ;;  %v2096_v6 = vadd.f32 %v2095_v29, %v8981_v11 }
 0x264   : > { %vm2272_vm4 = vcmp.ge.f32.partialorder %v2140_v17, 0.0  ;;  %v2304_v48 = vmul.f32 0.01, %v2140_v17  ;;  %v1640_v49 = vpop.f32.mrf.mxu3  ;;  %v2640_v18 = vpack.c.bf16 %v1840_v15, %v1836_v54  ;;  %v9159_v15 = vperm.slane %v8975_v10, 1 }
 0x265   : > { %v1641_v40 = vadd.f32 %v1640_v49, %v1592_v57 }
 0x266   : > { %v2336_v39 = vsel %vm2272_vm4, %v2140_v17, %v2304_v48  ;;  %v2097_v8 = vpop.f32.mrf.mxu0  ;;  %v2164_v10 = vadd.f32 %v9038_v20, %v9159_v15  ;;  %v2176_v41 = vadd.f32 %v9114_v2, %v9159_v15  ;;  %v2179_v2 = vadd.f32 %v9133_v12, %v9159_v15 }
 0x267   : > { %2368 = vst [vmem:[%s9011_s19 + $0xa0] sm:$0xff] %v2336_v39  ;;  %v1765_v5 = vmul.f32 0.01, %v1641_v40  ;;  %vm1701_vm8 = vcmp.ge.f32.partialorder %v1641_v40, 0.0  ;;  %v9148_v51 = vpop.f32.mrf.mxu2 }
 0x268   : > { %v2181_v12 = vadd.f32 %v9148_v51, %v9159_v15 }
 0x269   : > { %v2141_v38 = vpop.f32.mrf.mxu1  ;;  %v9144_v45 = vsel %vm1701_vm8, %v1641_v40, %v1765_v5 }
 0x26a   : > { %v2142_v13 = vadd.f32 %v2141_v38, %v2093_v33 }
 0x26c   : > { %vm2274_vm7 = vcmp.ge.f32.partialorder %v2142_v13, 0.0  ;;  %v2306_v31 = vmul.f32 0.01, %v2142_v13  ;;  %v1642_v42 = vpop.f32.mrf.mxu3 }
 0x26d   : > { %v1643_v3 = vadd.f32 %v1642_v42, %v1594_v16 }
 0x26e   : > { %v2338_v55 = vsel %vm2274_vm7, %v2142_v13, %v2306_v31  ;;  %v2100_v58 = vpop.f32.mrf.mxu0 }
 0x26f   : > { %vm1705_vm9 = vcmp.ge.f32.partialorder %v1643_v3, 0.0  ;;  %v1769_v30 = vmul.f32 0.01, %v1643_v3  ;;  %2370 = vst [vmem:[%s9011_s19 + $0xb0] sm:$0xff] %v2338_v55  ;;  %v2390_v52 = vpack.c.bf16 %v2338_v55, %v2336_v39  ;;  %v1599_v39 = vadd.f32 %v9027_v27, %v8948_v43  ;;  %v2183_v53 = vpop.f32.mrf.mxu2 }
 0x270   : > { %v2101_v54 = vadd.f32 %v2100_v58, %v8981_v11 }
 0x271   : > { %v2144_v61 = vpop.f32.mrf.mxu1  ;;  %2246 = vmatmul.bf16.gmra.mxu3 %v8965_v59  ;;  %2561 = vmatmul.bf16.gmra.mxu0 %v2390_v52  ;;  %v9146_v34 = vsel %vm1705_vm9, %v1643_v3, %v1769_v30  ;;  %v2098_v59 = vadd.f32 %v2097_v8, %v8981_v11  ;;  %v2166_v8 = vadd.f32 %v9057_v4, %v9159_v15 }
 0x272   : > { %v2145_v57 = vadd.f32 %v2144_v61, %v2096_v6  ;;  %v2639_v35 = vpack.c.bf16 %v9146_v34, %v9144_v45 }
 0x273   : > { %2817 = vmatmul.bf16.gmra.mxu2 %v2640_v18 }
 0x274   : > { %vm2276_vm10 = vcmp.ge.f32.partialorder %v2145_v57, 0.0  ;;  %v2308_v17 = vmul.f32 0.01, %v2145_v57  ;;  %v1645_v0 = vpop.f32.mrf.mxu3 }
 0x275   : > { %v1646_v28 = vadd.f32 %v1645_v0, %v1597_v24 }
 0x276   : > { %v2340_v48 = vsel %vm2276_vm10, %v2145_v57, %v2308_v17  ;;  %v2102_v18 = vpop.f32.mrf.mxu0 }
 0x277   : > { %2372 = vst [vmem:[%s9011_s19 + $0xc0] sm:$0xff] %v2340_v48  ;;  %v1773_v33 = vmul.f32 0.01, %v1646_v28  ;;  %vm1709_vm12 = vcmp.ge.f32.partialorder %v1646_v28, 0.0  ;;  %v2103_v52 = vadd.f32 %v2102_v18, %v8981_v11  ;;  %v3354_v18 = vld [vmem:[%s8477_s20 + $0x28] sm:$0xff] }
 0x279   : > { %v2146_v49 = vpop.f32.mrf.mxu1  ;;  %v9164_v43 = vsel %vm1709_vm12, %v1646_v28, %v1773_v33 }
 0x27a   : > { %v2147_v40 = vadd.f32 %v2146_v49, %v2098_v59  ;;  %v3350_v59 = vld [vmem:[%s8477_s20 + $0x8] sm:$0xff]  ;;  %v2169_v49 = vadd.f32 %v9069_v36, %v9159_v15 }
 0x27c   : > { %vm2278_vm11 = vcmp.ge.f32.partialorder %v2147_v40, 0.0  ;;  %v2310_v9 = vmul.f32 0.01, %v2147_v40  ;;  %v1647_v29 = vpop.f32.mrf.mxu3 }
 0x27d   : > { %v1648_v38 = vadd.f32 %v1647_v29, %v1599_v39 }
 0x27e   : > { %v2342_v13 = vsel %vm2278_vm11, %v2147_v40, %v2310_v9  ;;  %v3351_v9 = vld [vmem:[%s8477_s20 + $0x10] sm:$0xff] }
 0x27f   : > { %vm1713_vm13 = vcmp.ge.f32.partialorder %v1648_v38, 0.0  ;;  %v1777_v32 = vmul.f32 0.01, %v1648_v38  ;;  %2374 = vst [vmem:[%s9011_s19 + $0xd0] sm:$0xff] %v2342_v13  ;;  %v2392_v16 = vpack.c.bf16 %v2342_v13, %v2340_v48  ;;  %3433 = vrot.lane.b32.xlu0 %v3351_v9, %s8176_s13  ;;  %v3352_v13 = vld [vmem:[%s8477_s20 + $0x18] sm:$0xff] }
 0x281   : > { %v2149_v31 = vpop.f32.mrf.mxu1  ;;  %2566 = vmatmul.bf16.gmra.mxu0 %v2392_v16  ;;  %2831 = vmatmul.bf16.vlgmr.msra.gmra.mxu3 %v2627_v19  ;;  %v9166_v27 = vsel %vm1713_vm13, %v1648_v38, %v1777_v32  ;;  %v3349_v19 = vld [vmem:[%s8477_s20] sm:$0xff]  ;;  %v2174_v16 = vadd.f32 %v9105_v25, %v9159_v15 }
 0x282   : > { %v2150_v42 = vadd.f32 %v2149_v31, %v2101_v54  ;;  %v2641_v5 = vpack.c.bf16 %v9166_v27, %v9164_v43  ;;  %3429 = vrot.lane.b32.xlu1 %v3349_v19, %s8176_s13  ;;  %v2185_v54 = vpop.f32.mrf.mxu2  ;;  %v3353_v19 = vld [vmem:[%s8477_s20 + $0x20] sm:$0xff] }
 0x283   : > { %3437 = vrot.lane.b32.xlu2 %v3353_v19, %s8176_s13  ;;  %v2186_v23 = vadd.f32 %v2185_v54, %v9159_v15 }
 0x284   : > { %vm2280_vm14 = vcmp.ge.f32.partialorder %v2150_v42, 0.0  ;;  %v2312_v3 = vmul.f32 0.01, %v2150_v42  ;;  %v2212_v55 = vpop.f32.mrf.mxu3 }
 0x285   : > { %v2213_v30 = vadd.f32 %v2212_v55, %v2164_v10 }
 0x286   : > { %v2344_v62 = vsel %vm2280_vm14, %v2150_v42, %v2312_v3 }
 0x287   : > { %vm2253_vm15 = vcmp.ge.f32.partialorder %v2213_v30, 0.0  ;;  %v2285_v50 = vmul.f32 0.01, %v2213_v30  ;;  %2376 = vst [vmem:[%s9011_s19 + $0xe0] sm:$0xff] %v2344_v62  ;;  %3439 = vrot.lane.b32.xlu0 %v3354_v18, %s8176_s13 }
 0x289   : > { %v2317_v6 = vsel %vm2253_vm15, %v2213_v30, %v2285_v50  ;;  %v2151_v24 = vpop.f32.mrf.mxu1 }
 0x28a   : > { %2349 = vst [vmem:[%s9011_s19 + $0x8] sm:$0xff] %v2317_v6  ;;  %v2152_v20 = vadd.f32 %v2151_v24, %v2103_v52  ;;  %3431 = vrot.lane.b32.xlu1 %v3350_v59, %s8176_s13  ;;  %v2188_v3 = vpop.f32.mrf.mxu2 }
 0x28c   : > { %vm2282_vm0 = vcmp.ge.f32.partialorder %v2152_v20, 0.0  ;;  %v2314_v61 = vmul.f32 0.01, %v2152_v20  ;;  %v2214_v57 = vpop.f32.mrf.mxu3 }
 0x28d   : > { %v2215_v17 = vadd.f32 %v2214_v57, %v2166_v8  ;;  %v3358_v8 = vld [vmem:[%s8477_s20 + $0x48] sm:$0xff] }
 0x28e   : > { %v2346_v0 = vsel %vm2282_vm0, %v2152_v20, %v2314_v61  ;;  %v3356_v20 = vld [vmem:[%s8477_s20 + $0x38] sm:$0xff]  ;;  %3447 = vrot.lane.b32.xlu2 %v3358_v8, %s8176_s13  ;;  %vm3599_vm0 = vcmask 130048  }
 0x28f   : > { %vm2255_vm1 = vcmp.ge.f32.partialorder %v2215_v17, 0.0  ;;  %v2287_v28 = vmul.f32 0.01, %v2215_v17  ;;  %2378 = vst [vmem:[%s9011_s19 + $0xf0] sm:$0xff] %v2346_v0  ;;  %v2394_v11 = vpack.c.bf16 %v2346_v0, %v2344_v62  ;;  %3443 = vrot.lane.b32.xlu0 %v3356_v20, %s8176_s13  ;;  %v2184_v0 = vadd.f32 %v2183_v53, %v9159_v15 }
 0x290   : > { %v2189_v53 = vadd.f32 %v2188_v3, %v9159_v15 }
 0x291   : > { %v2319_v48 = vsel %vm2255_vm1, %v2215_v17, %v2287_v28  ;;  %2571 = vmatmul.bf16.gmra.mxu0 %v2394_v11  ;;  %2836 = vmatmul.bf16.gmra.mxu3 %v2629_v47  ;;  %v2171_v47 = vadd.f32 %v9086_v56, %v9159_v15 }
 0x292   : > { %2351 = vst [vmem:[%s9011_s19 + $0x18] sm:$0xff] %v2319_v48  ;;  %v2381_v4 = vpack.c.bf16 %v2319_v48, %v2317_v6  ;;  %3435 = vrot.lane.b32.xlu1 %v3352_v13, %s8176_s13  ;;  %v2190_v7 = vpop.f32.mrf.mxu2  ;;  %v3359_v48 = vld [vmem:[%s8477_s20 + $0x50] sm:$0xff] }
 0x293   : > { %v2191_v13 = vadd.f32 %v2190_v7, %v9159_v15 }
 0x294   : > { %v2217_v40 = vpop.f32.mrf.mxu3  ;;  %2585 = vmatmul.bf16.vlgmr.msrb.gmra.mxu1 %v2381_v4  ;;  %v3357_v4 = vld [vmem:[%s8477_s20 + $0x40] sm:$0xff] }
 0x295   : > { %v2218_v39 = vadd.f32 %v2217_v40, %v2169_v49 }
 0x296   : > { %3449 = vrot.lane.b32.xlu2 %v3359_v48, %s8176_s13 }
 0x297   : > { %vm2257_vm2 = vcmp.ge.f32.partialorder %v2218_v39, 0.0  ;;  %v2289_v58 = vmul.f32 0.01, %v2218_v39 }
 0x299   : > { %v2321_v46 = vsel %vm2257_vm2, %v2218_v39, %v2289_v58  ;;  %v3362_v39 = vld [vmem:[%s8477_s20 + $0x68] sm:$0xff] }
 0x29a   : > { %2353 = vst [vmem:[%s9011_s19 + $0x28] sm:$0xff] %v2321_v46  ;;  %3441 = vrot.lane.b32.xlu1 %v3355_v44, %s8176_s13  ;;  %v2193_v17 = vpop.f32.mrf.mxu2 }
 0x29c   : > { %v2219_v29 = vpop.f32.mrf.mxu3 }
 0x29d   : > { %v2220_v33 = vadd.f32 %v2219_v29, %v2171_v47 }
 0x29e   : > { %3455 = vrot.lane.b32.xlu2 %v3362_v39, %s8176_s13 }
 0x29f   : > { %vm2259_vm3 = vcmp.ge.f32.partialorder %v2220_v33, 0.0  ;;  %v2291_v36 = vmul.f32 0.01, %v2220_v33 }
 0x2a1   : > { %2841 = vmatmul.bf16.gmra.mxu3 %v2631_v1  ;;  %v2323_v38 = vsel %vm2259_vm3, %v2220_v33, %v2291_v36 }
 0x2a2   : > { %2355 = vst [vmem:[%s9011_s19 + $0x38] sm:$0xff] %v2323_v38  ;;  %v2383_v32 = vpack.c.bf16 %v2323_v38, %v2321_v46  ;;  %3445 = vrot.lane.b32.xlu1 %v3357_v4, %s8176_s13 }
 0x2a4   : > { %v2222_v56 = vpop.f32.mrf.mxu3  ;;  %2590 = vmatmul.bf16.gmra.mxu1 %v2383_v32 }
 0x2a5   : > { %v2223_v31 = vadd.f32 %v2222_v56, %v2174_v16 }
 0x2a7   : > { %vm2261_vm4 = vcmp.ge.f32.partialorder %v2223_v31, 0.0  ;;  %v2293_v42 = vmul.f32 0.01, %v2223_v31 }
 0x2a9   : > { %v2325_v10 = vsel %vm2261_vm4, %v2223_v31, %v2293_v42  ;;  %v2194_v31 = vadd.f32 %v2193_v17, %v9159_v15 }
 0x2aa   : > { %2357 = vst [vmem:[%s9011_s19 + $0x48] sm:$0xff] %v2325_v10 }
 0x2ac   : > { %v2224_v22 = vpop.f32.mrf.mxu3 }
 0x2ad   : > { %v2225_v1 = vadd.f32 %v2224_v22, %v2176_v41  ;;  %v3361_v41 = vld [vmem:[%s8477_s20 + $0x60] sm:$0xff] }
 0x2af   : > { %vm2263_vm5 = vcmp.ge.f32.partialorder %v2225_v1, 0.0  ;;  %v2295_v25 = vmul.f32 0.01, %v2225_v1 }
 0x2b1   : > { %2846 = vmatmul.bf16.gmra.mxu3 %v2633_v63  ;;  %v2327_v55 = vsel %vm2263_vm5, %v2225_v1, %v2295_v25 }
 0x2b2   : > { %2359 = vst [vmem:[%s9011_s19 + $0x58] sm:$0xff] %v2327_v55  ;;  %v2385_v30 = vpack.c.bf16 %v2327_v55, %v2325_v10 }
 0x2b4   : > { %v2227_v62 = vpop.f32.mrf.mxu3  ;;  %2595 = vmatmul.bf16.gmra.mxu1 %v2385_v30 }
 0x2b5   : > { %v2228_v50 = vadd.f32 %v2227_v62, %v2179_v2 }
 0x2b7   : > { %vm2265_vm6 = vcmp.ge.f32.partialorder %v2228_v50, 0.0  ;;  %v2297_v52 = vmul.f32 0.01, %v2228_v50 }
 0x2b9   : > { %v2329_v63 = vsel %vm2265_vm6, %v2228_v50, %v2297_v52  ;;  %v2537_v52 = vpop.f32.mrf.mxu0 }
 0x2ba   : > { %2361 = vst [vmem:[%s9011_s19 + $0x68] sm:$0xff] %v2329_v63 }
 0x2bc   : > { %v2229_v6 = vpop.f32.mrf.mxu3 }
 0x2bd   : > { %v2230_v24 = vadd.f32 %v2229_v6, %v2181_v12 }
 0x2bf   : > { %vm2267_vm7 = vcmp.ge.f32.partialorder %v2230_v24, 0.0  ;;  %v2299_v61 = vmul.f32 0.01, %v2230_v24 }
 0x2c1   : > { %2851 = vmatmul.bf16.gmra.mxu3 %v2635_v21  ;;  %v2331_v57 = vsel %vm2267_vm7, %v2230_v24, %v2299_v61  ;;  %v2195_v21 = vpop.f32.mrf.mxu2  ;;  %v2539_v8 = vpop.f32.mrf.mxu0 }
 0x2c2   : > { %2363 = vst [vmem:[%s9011_s19 + $0x78] sm:$0xff] %v2331_v57  ;;  %v2387_v51 = vpack.c.bf16 %v2331_v57, %v2329_v63  ;;  %v2196_v45 = vadd.f32 %v2195_v21, %v9159_v15 }
 0x2c4   : > { %v2232_v28 = vpop.f32.mrf.mxu3  ;;  %2600 = vmatmul.bf16.gmra.mxu1 %v2387_v51  ;;  %v9275_v51 = vld [vmem:[%s11565_s7] ss:$0 sm:$0xff] }
 0x2c5   : > { %v2233_v11 = vadd.f32 %v2232_v28, %v2184_v0  ;;  %v2538_v48 = vadd.f32 %v9275_v51, %v2537_v52 }
 0x2c7   : > { %vm2269_vm8 = vcmp.ge.f32.partialorder %v2233_v11, 0.0  ;;  %v2301_v59 = vmul.f32 0.01, %v2233_v11 }
 0x2c9   : > { %v2333_v26 = vsel %vm2269_vm8, %v2233_v11, %v2301_v59  ;;  %v2198_v33 = vpop.f32.mrf.mxu2  ;;  %v2542_v28 = vpop.f32.mrf.mxu0 }
 0x2ca   : > { %2365 = vst [vmem:[%s9011_s19 + $0x88] sm:$0xff] %v2333_v26  ;;  %v2199_v30 = vadd.f32 %v2198_v33, %v9159_v15 }
 0x2cc   : > { %v2234_v49 = vpop.f32.mrf.mxu3 }
 0x2cd   : > { %v2235_v40 = vadd.f32 %v2234_v49, %v2186_v23 }
 0x2cf   : > { %vm2271_vm9 = vcmp.ge.f32.partialorder %v2235_v40, 0.0  ;;  %v2303_v58 = vmul.f32 0.01, %v2235_v40 }
 0x2d1   : > { %2856 = vmatmul.bf16.gmra.mxu3 %v2637_v37  ;;  %v2335_v9 = vsel %vm2271_vm9, %v2235_v40, %v2303_v58  ;;  %v3360_v37 = vld [vmem:[%s8477_s20 + $0x58] sm:$0xff]  ;;  %v2200_v16 = vpop.f32.mrf.mxu2  ;;  %v2544_v58 = vpop.f32.mrf.mxu0 }
 0x2d2   : > { %2367 = vst [vmem:[%s9011_s19 + $0x98] sm:$0xff] %v2335_v9  ;;  %v2389_v46 = vpack.c.bf16 %v2335_v9, %v2333_v26  ;;  %3451 = vrot.lane.b32.xlu1 %v3360_v37, %s8176_s13  ;;  %v2201_v7 = vadd.f32 %v2200_v16, %v9159_v15  ;;  %v2540_v16 = vadd.f32 %v9275_v51, %v2539_v8 }
 0x2d4   : > { %v2237_v47 = vpop.f32.mrf.mxu3  ;;  %2605 = vmatmul.bf16.gmra.mxu1 %v2389_v46 }
 0x2d5   : > { %v2238_v29 = vadd.f32 %v2237_v47, %v2189_v53 }
 0x2d7   : > { %vm2273_vm10 = vcmp.ge.f32.partialorder %v2238_v29, 0.0  ;;  %v2305_v36 = vmul.f32 0.01, %v2238_v29 }
 0x2d9   : > { %v2337_v38 = vsel %vm2273_vm10, %v2238_v29, %v2305_v36  ;;  %v2783_v3 = vpop.f32.mrf.mxu2 }
 0x2da   : > { %2369 = vst [vmem:[%s9011_s19 + $0xa8] sm:$0xff] %v2337_v38  ;;  %3453 = vrot.lane.b32.xlu1 %v3361_v41, %s8176_s13 }
 0x2dc   : > { %v2239_v60 = vpop.f32.mrf.mxu3 }
 0x2dd   : > { %v2240_v14 = vadd.f32 %v2239_v60, %v2191_v13 }
 0x2df   : > { %vm2275_vm11 = vcmp.ge.f32.partialorder %v2240_v14, 0.0  ;;  %v2307_v32 = vmul.f32 0.01, %v2240_v14 }
 0x2e1   : > { %2861 = vmatmul.bf16.gmra.mxu3 %v2639_v35  ;;  %v2339_v54 = vsel %vm2275_vm11, %v2240_v14, %v2307_v32  ;;  %v2785_v2 = vpop.f32.mrf.mxu2 }
 0x2e2   : > { %2371 = vst [vmem:[%s9011_s19 + $0xb8] sm:$0xff] %v2339_v54  ;;  %v2391_v56 = vpack.c.bf16 %v2339_v54, %v2337_v38  ;;  %v2547_v38 = vpop.f32.mrf.mxu0 }
 0x2e4   : > { %v2242_v42 = vpop.f32.mrf.mxu3  ;;  %2610 = vmatmul.bf16.gmra.mxu1 %v2391_v56 }
 0x2e5   : > { %v2243_v10 = vadd.f32 %v2242_v42, %v2194_v31 }
 0x2e7   : > { %vm2277_vm12 = vcmp.ge.f32.partialorder %v2243_v10, 0.0  ;;  %v2309_v22 = vmul.f32 0.01, %v2243_v10 }
 0x2e9   : > { %v2341_v1 = vsel %vm2277_vm12, %v2243_v10, %v2309_v22  ;;  %v2788_v27 = vpop.f32.mrf.mxu2 }
 0x2ea   : > { %2373 = vst [vmem:[%s9011_s19 + $0xc8] sm:$0xff] %v2341_v1  ;;  %v2549_v10 = vpop.f32.mrf.mxu0 }
 0x2ec   : > { %v2244_v34 = vpop.f32.mrf.mxu3 }
 0x2ed   : > { %v2245_v35 = vadd.f32 %v2244_v34, %v2196_v45  ;;  %v2545_v45 = vadd.f32 %v9275_v51, %v2544_v58 }
 0x2ef   : > { %vm2279_vm13 = vcmp.ge.f32.partialorder %v2245_v35, 0.0  ;;  %v2311_v25 = vmul.f32 0.01, %v2245_v35 }
 0x2f1   : > { %2866 = vmatmul.bf16.gmra.mxu3 %v2641_v5  ;;  %v2343_v55 = vsel %vm2279_vm13, %v2245_v35, %v2311_v25  ;;  %v9264_v5 = vld [vmem:[%s11567_s9] ss:$0 sm:$0xff]  ;;  %v2790_v15 = vpop.f32.mrf.mxu2 }
 0x2f2   : > { %2375 = vst [vmem:[%s9011_s19 + $0xd8] sm:$0xff] %v2343_v55  ;;  %v2393_v18 = vpack.c.bf16 %v2343_v55, %v2341_v1  ;;  %v2784_v20 = vadd.f32 %v9264_v5, %v2783_v3  ;;  %v2786_v17 = vadd.f32 %v9264_v5, %v2785_v2  ;;  %v2789_v23 = vadd.f32 %v9264_v5, %v2788_v27 }
 0x2f3   : > { %v2791_v46 = vadd.f32 %v9264_v5, %v2790_v15  ;;  %v2543_v3 = vadd.f32 %v9275_v51, %v2542_v28 }
 0x2f4   : > { %v2247_v62 = vpop.f32.mrf.mxu3  ;;  %2615 = vmatmul.bf16.gmra.mxu1 %v2393_v18  ;;  %v3430_v36 = vpop.permute.xlu1 %3429 }
 0x2f5   : > { %v2248_v50 = vadd.f32 %v2247_v62, %v2199_v30  ;;  %v9314_v62 = vpop.f32.mrf.mxu0 }
 0x2f7   : > { %vm2281_vm14 = vcmp.ge.f32.partialorder %v2248_v50, 0.0  ;;  %v2313_v19 = vmul.f32 0.01, %v2248_v50 }
 0x2f9   : > { %v2345_v44 = vsel %vm2281_vm14, %v2248_v50, %v2313_v19  ;;  %v2793_v4 = vpop.f32.mrf.mxu2  ;;  %v2550_v19 = vadd.f32 %v9275_v51, %v2549_v10 }
 0x2fa   : > { %2377 = vst [vmem:[%s9011_s19 + $0xe8] sm:$0xff] %v2345_v44  ;;  %v2794_v14 = vadd.f32 %v9264_v5, %v2793_v4 }
 0x2fc   : > { %v2249_v63 = vpop.f32.mrf.mxu3  ;;  %v3432_v27 = vpop.permute.xlu1 %3431 }
 0x2fd   : > { %v2250_v43 = vadd.f32 %v2249_v63, %v2201_v7  ;;  %v2554_v8 = vpop.f32.mrf.mxu0 }
 0x2ff   : > { %vm2283_vm15 = vcmp.ge.f32.partialorder %v2250_v43, 0.0  ;;  %v2315_v12 = vmul.f32 0.01, %v2250_v43 }
 0x301   : > { %v2347_v6 = vsel %vm2283_vm15, %v2250_v43, %v2315_v12  ;;  %v2795_v53 = vpop.f32.mrf.mxu2 }
 0x302   : > { %2379 = vst [vmem:[%s9011_s19 + $0xf8] sm:$0xff] %v2347_v6  ;;  %v2395_v24 = vpack.c.bf16 %v2347_v6, %v2345_v44  ;;  %v2796_v42 = vadd.f32 %v9264_v5, %v2795_v53 }
 0x304   : > { %2620 = vmatmul.bf16.gmra.mxu1 %v2395_v24  ;;  %v2832_v61 = vpop.f32.mrf.mxu3 }
 0x305   : > { %v9268_v57 = vadd.f32 %v2832_v61, %v2784_v20  ;;  %v9332_v58 = vpop.f32.mrf.mxu0 }
 0x307   : > { %2872 = vmax.xlane.f32.xlu0 %v9268_v57 }
 0x309   : > { %v2798_v54 = vpop.f32.mrf.mxu2 }
 0x30c   : > { %v2834_v0 = vpop.f32.mrf.mxu3 }
 0x30d   : > { %v9277_v11 = vadd.f32 %v2834_v0, %v2786_v17  ;;  %v3434_v0 = vpop.permute.xlu0 %3433 }
 0x30f   : > { %2874 = vmax.xlane.f32.xlu0 %v9277_v11 }
 0x311   : > { %v2586_v59 = vpop.f32.mrf.mxu1  ;;  %v9307_v34 = vpop.f32.mrf.mxu2 }
 0x312   : > { %v9281_v26 = vadd.f32 %v2586_v59, %v2538_v48  ;;  %v3436_v48 = vpop.permute.xlu1 %3435 }
 0x314   : > { %11683 = vst [vmem:[#allocation33_spill] sm:$0xff] %v9281_v26  ;;  %v2837_v21 = vpop.f32.mrf.mxu3  ;;  %v3365_v49 = vmul.f32 0.5, %v9281_v26 }
 0x315   : > { %v9285_v40 = vadd.f32 %v2837_v21, %v2789_v23 }
 0x316   : > { %v3381_v39 = vmul.f32 1.442695, %v3365_v49  ;;  %v2548_v49 = vadd.f32 %v9275_v51, %v2547_v38 }
 0x317   : > { %2876 = vmax.xlane.f32.xlu2 %v9285_v40 }
 0x318   : > { %7517 = vpow2.f32 %v3381_v39  ;;  %v2799_v39 = vadd.f32 %v9264_v5, %v2798_v54  ;;  %v9344_v54 = vpop.f32.mrf.mxu0 }
 0x319   : > { %v2588_v9 = vpop.f32.mrf.mxu1  ;;  %v9318_v43 = vpop.f32.mrf.mxu2 }
 0x31a   : > { %v9298_v56 = vadd.f32 %v2588_v9, %v2540_v16 }
 0x31c   : > { %v2839_v47 = vpop.f32.mrf.mxu3  ;;  %11684 = vst [vmem:[#allocation34_spill] sm:$0xff] %v9298_v56  ;;  %v3366_v41 = vmul.f32 0.5, %v9298_v56 }
 0x31d   : > { %v9289_v29 = vadd.f32 %v2839_v47, %v2791_v46 }
 0x31e   : > { %v7518_v33 = vpop.eup %7517  ;;  %v3383_v25 = vmul.f32 1.442695, %v3366_v41 }
 0x31f   : > { %2878 = vmax.xlane.f32.xlu2 %v9289_v29  ;;  %v3477_v13 = vmul.f32 %v7518_v33, %v3430_v36  ;;  %v3440_v33 = vpop.permute.xlu0 %3439 }
 0x320   : > { %7519 = vpow2.f32 %v3383_v25  ;;  %v2562_v25 = vpop.f32.mrf.mxu0 }
 0x321   : > { %v2591_v60 = vpop.f32.mrf.mxu1  ;;  %v2805_v59 = vpop.f32.mrf.mxu2 }
 0x322   : > { %v9309_v35 = vadd.f32 %v2591_v60, %v2543_v3  ;;  %v3438_v3 = vpop.permute.xlu2 %3437 }
 0x323   : > { %3509 = vrot.lane.b32.xlu0 %v3477_v13, %s8177_s11 }
 0x324   : > { %v2842_v37 = vpop.f32.mrf.mxu3  ;;  %11685 = vst [vmem:[#allocation35_spill] sm:$0xff] %v9309_v35  ;;  %v3367_v30 = vmul.f32 0.5, %v9309_v35 }
 0x325   : > { %v9294_v32 = vadd.f32 %v2842_v37, %v2794_v14 }
 0x326   : > { %v3385_v52 = vmul.f32 1.442695, %v3367_v30  ;;  %v7520_v63 = vpop.eup %7519  ;;  %v2563_v30 = vadd.f32 %v9275_v51, %v2562_v25 }
 0x327   : > { %2880 = vmax.xlane.f32.xlu2 %v9294_v32  ;;  %v3478_v24 = vmul.f32 %v7520_v63, %v3432_v27  ;;  %v2801_v63 = vadd.f32 %v9264_v5, %v9307_v34 }
 0x328   : > { %7521 = vpow2.f32 %v3385_v52 }
 0x329   : > { %v2593_v31 = vpop.f32.mrf.mxu1  ;;  %v2808_v13 = vpop.f32.mrf.mxu2 }
 0x32a   : > { %v9311_v55 = vadd.f32 %v2593_v31, %v2545_v45  ;;  %v2809_v16 = vadd.f32 %v9264_v5, %v2808_v13  ;;  %v9363_v27 = vpop.permute.xlu2 %3447 }
 0x32c   : > { %v2844_v22 = vpop.f32.mrf.mxu3  ;;  %11686 = vst [vmem:[#allocation36_spill] sm:$0xff] %v9311_v55  ;;  %v3368_v50 = vmul.f32 0.5, %v9311_v55 }
 0x32d   : > { %v9302_v1 = vadd.f32 %v2844_v22, %v2796_v42 }
 0x32e   : > { %v3387_v44 = vmul.f32 1.442695, %v3368_v50  ;;  %v7522_v17 = vpop.eup %7521 }
 0x32f   : > { %2882 = vmax.xlane.f32.xlu1 %v9302_v1  ;;  %v3479_v23 = vmul.f32 %v7522_v17, %v3434_v0  ;;  %v2806_v0 = vadd.f32 %v9264_v5, %v2805_v59  ;;  %v6824_v59 = vld [vmem:[%s11570_s12] sm:$0xf] }
 0x330   : > { %7523 = vpow2.f32 %v3387_v44 }
 0x331   : > { %v2596_v18 = vpop.f32.mrf.mxu1  ;;  %v9348_v10 = vpop.f32.mrf.mxu2 }
 0x332   : > { %v9334_v46 = vadd.f32 %v2596_v18, %v2548_v49 }
 0x334   : > { %v2847_v2 = vpop.f32.mrf.mxu3  ;;  %11688 = vst [vmem:[#allocation38_spill] sm:$0xff] %v9334_v46  ;;  %v3369_v60 = vmul.f32 0.5, %v9334_v46 }
 0x335   : > { %v9336_v47 = vadd.f32 %v2847_v2, %v2799_v39 }
 0x336   : > { %v7524_v28 = vpop.eup %7523  ;;  %v3389_v37 = vmul.f32 1.442695, %v3369_v60 }
 0x337   : > { %v3480_v21 = vmul.f32 %v7524_v28, %v3436_v48  ;;  %v3444_v28 = vpop.permute.xlu0 %3443  ;;  %v9373_v48 = vpop.permute.xlu2 %3449 }
 0x339   : > { %v2598_v7 = vpop.f32.mrf.mxu1  ;;  %v2813_v50 = vpop.f32.mrf.mxu2 }
 0x33a   : > { %v9320_v12 = vadd.f32 %v2598_v7, %v2550_v19  ;;  %v2814_v52 = vadd.f32 %v9264_v5, %v2813_v50 }
 0x33c   : > { %11687 = vst [vmem:[#allocation37_spill] sm:$0xff] %v9320_v12  ;;  %v2849_v6 = vpop.f32.mrf.mxu3  ;;  %v3370_v20 = vmul.f32 0.5, %v9320_v12 }
 0x33e   : > { %v3391_v15 = vmul.f32 1.442695, %v3370_v20  ;;  %v2555_v20 = vadd.f32 %v9275_v51, %v2554_v8 }
 0x33f   : > { %3511 = vrot.lane.b32.xlu2 %v3478_v24, %s8177_s11  ;;  %v9365_v24 = vadd.f32 %v2849_v6, %v2801_v63  ;;  %v9379_v39 = vpop.permute.xlu2 %3455  ;;  %v3442_v63 = vpop.permute.xlu1 %3441 }
 0x340   : > { %7525 = vpow2.f32 %v3391_v15 }
 0x341   : > { %v9324_v61 = vpop.f32.mrf.mxu1  ;;  %7527 = vpow2.f32 %v3389_v37  ;;  %v2815_v6 = vpop.f32.mrf.mxu2 }
 0x342   : > { %v2816_v8 = vadd.f32 %v9264_v5, %v2815_v6 }
 0x344   : > { %v9326_v4 = vpop.f32.mrf.mxu3 }
 0x346   : > { %v7526_v53 = vpop.eup %7525 }
 0x347   : > { %3513 = vrot.lane.b32.xlu2 %v3479_v23, %s8177_s11  ;;  %v3482_v38 = vmul.f32 %v7526_v53, %v3440_v33  ;;  %v7528_v22 = vpop.eup %7527  ;;  %v7287_v53 = vld [vmem:[%s11570_s12 + $0x4] sm:$0xf0]  ;;  %v7286_v33 = vld [vmem:[%s11570_s12 + $0x4] sm:$0xf] }
 0x348   : > { %3515 = vrot.lane.b32.xlu1 %v3480_v21, %s8177_s11  ;;  %v3481_v18 = vmul.f32 %v7528_v22, %v3438_v3  ;;  %v6825_v60 = vor.u32 %v7287_v53, %v6824_v59  ;;  %v2553_v22 = vadd.f32 %v9275_v51, %v9314_v62 }
 0x349   : > { %v2603_v9 = vpop.f32.mrf.mxu1 }
 0x34a   : > { %v9369_v15 = vadd.f32 %v2603_v9, %v2555_v20  ;;  %3631 = vmatpush.bf16.msra.mxu1 %v6825_v60 }
 0x34c   : > { %v2854_v36 = vpop.f32.mrf.mxu3  ;;  %11690 = vst [vmem:[#allocation40_spill] sm:$0xff] %v9369_v15  ;;  %v3372_v17 = vmul.f32 0.5, %v9369_v15 }
 0x34d   : > { %2884 = vmax.xlane.f32.xlu0 %v9336_v47  ;;  %v9375_v23 = vadd.f32 %v2854_v36, %v2806_v0 }
 0x34e   : > { %v3395_v34 = vmul.f32 1.442695, %v3372_v17 }
 0x350   : > { %3519 = vrot.lane.b32.xlu1 %v3482_v38, %s8177_s11  ;;  %7529 = vpow2.f32 %v3395_v34  ;;  %v6826_v38 = vld [vmem:[%s11570_s12 + $0x8] sm:$0xf0] }
 0x351   : > { %v9341_v14 = vpop.f32.mrf.mxu1  ;;  %v6829_v37 = vor.u32 %v7286_v33, %v6826_v38  ;;  %v3363_v38 = vld [vmem:[%s8477_s20 + $0x70] sm:$0xff] }
 0x353   : > { %3680 = vmatpush.bf16.msra.mxu2 %v6829_v37 }
 0x354   : > { %v2857_v31 = vpop.f32.mrf.mxu3 }
 0x355   : > { %v9346_v42 = vadd.f32 %v2857_v31, %v2809_v16  ;;  %v2818_v16 = vpop.f32.mrf.mxu2 }
 0x356   : > { %v7530_v36 = vpop.eup %7529  ;;  %v2819_v3 = vadd.f32 %v9264_v5, %v2818_v16 }
 0x357   : > { %v3484_v25 = vmul.f32 %v7530_v36, %v3444_v28 }
 0x359   : > { %v9350_v41 = vpop.f32.mrf.mxu1 }
 0x35c   : > { %v9352_v45 = vpop.f32.mrf.mxu3 }
 0x35d   : > { %v2820_v37 = vpop.f32.mrf.mxu2 }
 0x361   : > { %v2611_v2 = vpop.f32.mrf.mxu1  ;;  %3517 = vrot.lane.b32.xlu0 %v3481_v18, %s8177_s11  ;;  %v2804_v18 = vadd.f32 %v9264_v5, %v9318_v43 }
 0x362   : > { %v9356_v19 = vadd.f32 %v2611_v2, %v2563_v30  ;;  %v9403_v30 = vadd.f32 %v9324_v61, %v2553_v22 }
 0x364   : > { %11689 = vst [vmem:[#allocation39_spill] sm:$0xff] %v9356_v19  ;;  %v2862_v44 = vpop.f32.mrf.mxu3  ;;  %v3371_v43 = vmul.f32 0.5, %v9403_v30 }
 0x365   : > { %v9359_v7 = vadd.f32 %v2862_v44, %v2814_v52  ;;  %11691 = vst [vmem:[#allocation41_spill] sm:$0xff] %v9403_v30  ;;  %v9409_v52 = vadd.f32 %v9326_v4, %v2804_v18  ;;  %v3446_v4 = vpop.permute.xlu1 %3445 }
 0x366   : > { %v3393_v20 = vmul.f32 1.442695, %v3371_v43 }
 0x36c   : > { %v2864_v21 = vpop.f32.mrf.mxu3 }
 0x36d   : > { %v9381_v9 = vadd.f32 %v2864_v21, %v2816_v8  ;;  %v9424_v21 = vpop.permute.xlu1 %3451 }
 0x370   : > { %2886 = vmax.xlane.f32.xlu2 %v9365_v24 }
 0x374   : > { %v2867_v31 = vpop.f32.mrf.mxu3 }
 0x375   : > { %v9405_v2 = vadd.f32 %v2867_v31, %v2819_v3  ;;  %v9430_v36 = vpop.permute.xlu1 %3453  ;;  %v2821_v3 = vadd.f32 %v9264_v5, %v2820_v37 }
 0x37a   : > { %2890 = vmax.xlane.f32.xlu1 %v9375_v23  ;;  %v2873_v49 = vpop.xlane.xlu0 %2872 }
 0x37b   : > { %v2904_v13 = vsub.f32 %v9268_v57, %v2873_v49 }
 0x37c   : > { %v2869_v22 = vpop.f32.mrf.mxu3 }
 0x37d   : > { %v2920_v57 = vmul.f32 1.442695, %v2904_v13  ;;  %v2811_v13 = vadd.f32 %v9264_v5, %v9348_v10  ;;  %v9444_v18 = vadd.f32 %v2869_v22, %v2821_v3  ;;  %v2558_v5 = vadd.f32 %v9275_v51, %v9332_v58 }
 0x37f   : > { %7531 = vpow2.f32 %v2920_v57  ;;  %v9435_v60 = vadd.f32 %v9352_v45, %v2811_v13 }
 0x382   : > { %2898 = vmax.xlane.f32.xlu1 %v9381_v9  ;;  %v2875_v50 = vpop.xlane.xlu0 %2874 }
 0x383   : > { %v2905_v44 = vsub.f32 %v9277_v11, %v2875_v50 }
 0x385   : > { %v2922_v61 = vmul.f32 1.442695, %v2905_v44  ;;  %v9415_v17 = vpop.eup %7531  ;;  %v9457_v44 = vadd.f32 %v9341_v14, %v2558_v5 }
 0x387   : > { %7533 = vpow2.f32 %v2922_v61  ;;  %11692 = vst [vmem:[#allocation42_spill] sm:$0xff] %v9457_v44  ;;  %v3373_v43 = vmul.f32 0.5, %v9457_v44 }
 0x388   : > { %3523 = vrot.lane.b32.xlu2 %v3484_v25, %s8177_s11  ;;  %7535 = vpow2.f32 %v3393_v20 }
 0x38a   : > { %v2877_v62 = vpop.xlane.xlu2 %2876  ;;  %2900 = vmax.xlane.f32.xlu1 %v9405_v2 }
 0x38b   : > { %2888 = vmax.xlane.f32.xlu0 %v9409_v52  ;;  %v2906_v16 = vsub.f32 %v9285_v40, %v2877_v62 }
 0x38d   : > { %v9420_v28 = vpop.eup %7533  ;;  %v2924_v25 = vmul.f32 1.442695, %v2906_v16 }
 0x38e   : > { %v7536_v34 = vpop.eup %7535 }
 0x38f   : > { %v3483_v6 = vmul.f32 %v7536_v34, %v3442_v63  ;;  %7537 = vpow2.f32 %v2924_v25  ;;  %v3397_v63 = vmul.f32 1.442695, %v3373_v43  ;;  %v7285_v25 = vld [vmem:[%s11568_s10 + $0x38] sm:$0xff]  ;;  %v7283_v43 = vld [vmem:[%s11568_s10 + $0x28] sm:$0xff] }
 0x390   : > { %3300 = vmatpush.bf16.msra.mxu0 %v7285_v25 }
 0x391   : > { %7539 = vpow2.f32 %v3397_v63 }
 0x392   : > { %v9417_v0 = vpop.xlane.xlu2 %2878  ;;  %2952 = vadd.xlane.f32.xlu1 %v9415_v17 }
 0x395   : > { %v3510_v8 = vpop.permute.xlu0 %3509  ;;  %v9451_v62 = vpop.eup %7537 }
 0x396   : > { %v3557_v59 = vadd.f32 %v3510_v8, %v9281_v26 }
 0x397   : > { %v7540_v13 = vpop.eup %7539 }
 0x39a   : > { %v2881_v11 = vpop.xlane.xlu2 %2880  ;;  %2954 = vadd.xlane.f32.xlu1 %v9420_v28 }
 0x39b   : > { %v2908_v20 = vsub.f32 %v9294_v32, %v2881_v11  ;;  %v3485_v32 = vmul.f32 %v7540_v13, %v3446_v4 }
 0x39f   : > { %3521 = vrot.lane.b32.xlu0 %v3483_v6, %s8177_s11  ;;  %v2928_v6 = vmul.f32 1.442695, %v2908_v20 }
 0x3a1   : > { %7541 = vpow2.f32 %v2928_v6 }
 0x3a2   : > { %v3512_v49 = vpop.permute.xlu2 %3511  ;;  %v9440_v31 = vpop.xlane.xlu1 %2882 }
 0x3a3   : > { %v3558_v53 = vadd.f32 %v3512_v49, %v9298_v56 }
 0x3a5   : > { %v3573_v33 = vpack.c.bf16 %v3558_v53, %v3557_v59  ;;  %v2564_v59 = vpop.f32.mrf.mxu0  ;;  %v3364_v53 = vld [vmem:[%s8477_s20 + $0x78] sm:$0xff]  ;;  %s11841_s20 = sld [smem:[#allocation92_spill]] }
 0x3a7   : > { %6830 = vmatmul.msk.bf16.vlgmr.msra.gmra.mxu1 %vm3599_vm0, %v3573_v33  ;;  %6838 = vmatmul.msk.bf16.vlgmr.msra.gmra.mxu2 %vm3599_vm0, %v3573_v33  ;;  %v2613_v33 = vpop.f32.mrf.mxu1  ;;  %v9468_v11 = vpop.eup %7541 }
 0x3aa   : > { %v3514_v10 = vpop.permute.xlu2 %3513 }
 0x3ab   : > { %v3559_v57 = vadd.f32 %v3514_v10, %v9309_v35 }
 0x3ad   : > { %v2567_v37 = vpop.f32.mrf.mxu0 }
 0x3ae   : > { %v2568_v4 = vadd.f32 %v9275_v51, %v2567_v37 }
 0x3af   : > { %v2616_v22 = vpop.f32.mrf.mxu1 }
 0x3b0   : > { %v9480_v10 = vadd.f32 %v2616_v22, %v2568_v4 }
 0x3b1   : > { %2894 = vmax.xlane.f32.xlu2 %v9435_v60 }
 0x3b2   : > { %11694 = vst [vmem:[#allocation44_spill] sm:$0xff] %v9480_v10  ;;  %v3377_v5 = vmul.f32 0.5, %v9480_v10 }
 0x3b3   : > { %3457 = vrot.lane.b32.xlu1 %v3363_v38, %s8176_s13  ;;  %v2565_v38 = vadd.f32 %v9275_v51, %v2564_v59 }
 0x3b4   : > { %v3405_v6 = vmul.f32 1.442695, %v3377_v5 }
 0x3b5   : > { %v9473_v16 = vadd.f32 %v2613_v33, %v2565_v38  ;;  %v7303_v33 = vld [vmem:[#allocation13 + $0x74] sm:$0xf0] }
 0x3b7   : > { %11693 = vst [vmem:[#allocation43_spill] sm:$0xff] %v9473_v16  ;;  %v3376_v3 = vmul.f32 0.5, %v9473_v16 }
 0x3b9   : > { %2902 = vmax.xlane.f32.xlu2 %v9444_v18 }
 0x3ba   : > { %v3516_v45 = vpop.permute.xlu1 %3515 }
 0x3bb   : > { %v3560_v50 = vadd.f32 %v3516_v45, %v9311_v55  ;;  %v3403_v45 = vmul.f32 1.442695, %v3376_v3  ;;  %v7301_v3 = vld [vmem:[#allocation13 + $0x64] sm:$0xf0] }
 0x3bd   : > { %v3574_v40 = vpack.c.bf16 %v3560_v50, %v3559_v57  ;;  %v7284_v57 = vld [vmem:[%s11568_s10 + $0x30] sm:$0xff]  ;;  %v2569_v50 = vpop.f32.mrf.mxu0  ;;  %7543 = vpow2.f32 %v3403_v45  ;;  %v7279_v45 = vld [vmem:[%s11568_s10 + $0x8] sm:$0xff] }
 0x3be   : > { %3301 = vmatpush.bf16.msra.mxu0 %v7284_v57  ;;  %v2570_v63 = vadd.f32 %v9275_v51, %v2569_v50  ;;  %7545 = vpow2.f32 %v3405_v6  ;;  %v6888_v57 = vld [vmem:[#allocation13 + $0x50] sm:$0xf]  ;;  %v7299_v50 = vld [vmem:[#allocation13 + $0x54] sm:$0xf0]  ;;  %v7297_v6 = vld [vmem:[#allocation13 + $0x44] sm:$0xf0] }
 0x3bf   : > { %6831 = vmatmul.msk.bf16.gmra.mxu1 %vm3599_vm0, %v3574_v40  ;;  %6839 = vmatmul.msk.bf16.gmra.mxu2 %vm3599_vm0, %v3574_v40  ;;  %v2618_v40 = vpop.f32.mrf.mxu1  ;;  %v6889_v5 = vor.u32 %v7299_v50, %v6888_v57 }
 0x3c0   : > { %v2885_v61 = vpop.xlane.xlu0 %2884 }
 0x3c1   : > { %2956 = vadd.xlane.f32.xlu2 %v9451_v62  ;;  %v2910_v59 = vsub.f32 %v9336_v47, %v2885_v61  ;;  %v7280_v47 = vld [vmem:[%s11568_s10 + $0x10] sm:$0xff]  ;;  %v6896_v61 = vld [vmem:[#allocation13 + $0x60] sm:$0xf] }
 0x3c2   : > { %v3520_v34 = vpop.permute.xlu1 %3519  ;;  %3302 = vmatpush.bf16.msra.mxu0 %v7283_v43  ;;  %v6897_v25 = vor.u32 %v7301_v3, %v6896_v61 }
 0x3c3   : > { %v3562_v49 = vadd.f32 %v3520_v34, %v9320_v12  ;;  %v9490_v34 = vadd.f32 %v2618_v40, %v2570_v63  ;;  %v2932_v22 = vmul.f32 1.442695, %v2910_v59 }
 0x3c5   : > { %11695 = vst [vmem:[#allocation45_spill] sm:$0xff] %v9490_v34 }
 0x3c9   : > { %2892 = vmax.xlane.f32.xlu0 %v9346_v42 }
 0x3d3   : > { %v3518_v8 = vpop.permute.xlu0 %3517 }
 0x3d4   : > { %v3561_v58 = vadd.f32 %v3518_v8, %v9334_v46  ;;  %v7282_v8 = vld [vmem:[%s11568_s10 + $0x20] sm:$0xff] }
 0x3d5   : > { %3303 = vmatpush.bf16.msra.mxu0 %v7282_v8 }
 0x3d6   : > { %v3575_v14 = vpack.c.bf16 %v3562_v49, %v3561_v58  ;;  %v7544_v49 = vpop.eup %7543  ;;  %v3378_v58 = vmul.f32 0.5, %v9490_v34 }
 0x3d7   : > { %v3488_v13 = vmul.f32 %v7544_v49, %v9424_v21  ;;  %v7546_v4 = vpop.eup %7545 }
 0x3d8   : > { %6832 = vmatmul.msk.bf16.gmra.mxu1 %vm3599_vm0, %v3575_v14  ;;  %6840 = vmatmul.msk.bf16.gmra.mxu2 %vm3599_vm0, %v3575_v14  ;;  %v7281_v14 = vld [vmem:[%s11568_s10 + $0x18] sm:$0xff]  ;;  %v3407_v37 = vmul.f32 1.442695, %v3378_v58  ;;  %v3489_v40 = vmul.f32 %v7546_v4, %v9430_v36  ;;  %v2560_v36 = vadd.f32 %v9275_v51, %v9344_v54 }
 0x3d9   : > { %3459 = vrot.lane.b32.xlu2 %v3364_v53, %s8176_s13  ;;  %v6904_v53 = vld [vmem:[#allocation13 + $0x70] sm:$0xf]  ;;  %3304 = vmatpush.bf16.msra.mxu0 %v7281_v14  ;;  %v7291_v4 = vld [vmem:[#allocation13 + $0x14] sm:$0xf0] }
 0x3da   : > { %7547 = vpow2.f32 %v3407_v37  ;;  %v9524_v59 = vadd.f32 %v9350_v41, %v2560_v36  ;;  %v6872_v14 = vld [vmem:[#allocation13 + $0x30] sm:$0xf]  ;;  %v7293_v41 = vld [vmem:[#allocation13 + $0x24] sm:$0xf0] }
 0x3db   : > { %7549 = vpow2.f32 %v2932_v22  ;;  %v6864_v22 = vld [vmem:[#allocation13 + $0x20] sm:$0xf] }
 0x3dc   : > { %11696 = vst [vmem:[#allocation46_spill] sm:$0xff] %v9524_v59  ;;  %v3374_v54 = vmul.f32 0.5, %v9524_v59 }
 0x3dd   : > { %2960 = vadd.xlane.f32.xlu1 %v9468_v11  ;;  %3525 = vrot.lane.b32.xlu0 %v3485_v32, %s8177_s11  ;;  %v6905_v32 = vor.u32 %v7303_v33, %v6904_v53  ;;  %v7295_v53 = vld [vmem:[#allocation13 + $0x34] sm:$0xf0] }
 0x3de   : > { %3305 = vmatpush.bf16.msra.mxu0 %v7280_v47  ;;  %v6865_v47 = vor.u32 %v7293_v41, %v6864_v22 }
 0x3df   : > { %4032 = vmatpush.bf16.msrb.mxu3 %v6905_v32 }
 0x3e0   : > { %v7548_v8 = vpop.eup %7547 }
 0x3e1   : > { %v9518_v58 = vpop.eup %7549  ;;  %v3490_v33 = vmul.f32 %v7548_v8, %v9379_v39  ;;  %v3399_v39 = vmul.f32 1.442695, %v3374_v54 }
 0x3e2   : > { %3306 = vmatpush.bf16.msra.mxu0 %v7279_v45 }
 0x3e3   : > { %4033 = vmatpush.bf16.msrb.mxu3 %v6897_v25  ;;  %v9527_v32 = vpop.xlane.xlu2 %2886  ;;  %v6856_v25 = vld [vmem:[#allocation13 + $0x10] sm:$0xf] }
 0x3e4   : > { %v6857_v45 = vor.u32 %v7291_v4, %v6856_v25 }
 0x3e7   : > { %4034 = vmatpush.bf16.msrb.mxu3 %v6889_v5 }
 0x3ed   : > { %v2891_v20 = vpop.xlane.xlu1 %2890 }
 0x3ee   : > { %v2913_v21 = vsub.f32 %v9375_v23, %v2891_v20  ;;  %v7278_v23 = vld [vmem:[%s11568_s10] sm:$0xff] }
 0x3ef   : > { %v6880_v20 = vld [vmem:[#allocation13 + $0x40] sm:$0xf]  ;;  %3307 = vmatpush.bf16.msra.mxu0 %v7278_v23  ;;  %v7289_v23 = vld [vmem:[#allocation13 + $0x4] sm:$0xf0] }
 0x3f0   : > { %v2938_v63 = vmul.f32 1.442695, %v2913_v21  ;;  %v6881_v49 = vor.u32 %v7297_v6, %v6880_v20 }
 0x3f2   : > { %4035 = vmatpush.bf16.msrb.mxu3 %v6881_v49  ;;  %7551 = vpow2.f32 %v2938_v63  ;;  %v6848_v63 = vld [vmem:[#allocation13] sm:$0xf]  ;;  %v2621_v49 = vpop.f32.mrf.mxu1 }
 0x3f3   : > { %v6849_v20 = vor.u32 %v7289_v23, %v6848_v63 }
 0x3f5   : > { %v9501_v38 = vpop.xlane.xlu1 %2898 }
 0x3f6   : > { %3531 = vrot.lane.b32.xlu1 %v3488_v13, %s8177_s11  ;;  %v6873_v13 = vor.u32 %v7295_v53, %v6872_v14 }
 0x3f8   : > { %4036 = vmatpush.bf16.msrb.mxu3 %v6873_v13  ;;  %v9532_v61 = vpop.eup %7551 }
 0x3fa   : > { %v9543_v23 = vpop.f32.mrf.mxu1 }
 0x3fc   : > { %4037 = vmatpush.bf16.msrb.mxu3 %v6865_v47 }
 0x3fd   : > { %v9512_v43 = vpop.xlane.xlu1 %2900 }
 0x3fe   : > { %3533 = vrot.lane.b32.xlu1 %v3489_v40, %s8177_s11  ;;  %v9534_v3 = vpop.xlane.xlu0 %2888  ;;  %v3524_v40 = vpop.permute.xlu2 %3523 }
 0x3ff   : > { %v3564_v36 = vadd.f32 %v3524_v40, %v9369_v15 }
 0x400   : > { %4038 = vmatpush.bf16.msrb.mxu3 %v6857_v45 }
 0x402   : > { %2964 = vadd.xlane.f32.xlu2 %v9518_v58 }
 0x404   : > { %4039 = vmatpush.bf16.msrb.mxu3 %v6849_v20 }
 0x405   : > { %v2953_v37 = vpop.xlane.xlu1 %2952 }
 0x406   : > { %7553 = vrcp.f32 %v2953_v37  ;;  %3535 = vrot.lane.b32.xlu1 %v3490_v33, %s8177_s11  ;;  %v2995_v41 = vand.u32 2147483648, %v2953_v37  ;;  %vm2989_vm2 = vweird.f32 %v2953_v37  ;;  %v2993_v47 = vand.u32 2147483647, %v2953_v37 }
 0x407   : > { %2896 = vmax.xlane.f32.xlu0 %v9359_v7 }
 0x408   : > { %vm2994_vm5 = vcmp.eq.f32.partialorder %v2993_v47, 8.507059e+37  ;;  %v2572_v47 = vpop.f32.mrf.mxu0 }
 0x40a   : > { %2970 = vadd.xlane.f32.xlu2 %v9532_v61 }
 0x40c   : > { %v7554_v21 = vpop.eup %7553 }
 0x40d   : > { %v2985_v57 = vmul.f32 %v7554_v21, %v2953_v37  ;;  %v2955_v50 = vpop.xlane.xlu1 %2954  ;;  %vm2990_vm1 = vweird.f32 %v7554_v21 }
 0x40e   : > { %7555 = vrcp.f32 %v2955_v50  ;;  %vm2991_vm3 = vmor %vm2989_vm2, %vm2990_vm1  ;;  %v3010_v4 = vand.u32 2147483648, %v2955_v50  ;;  %v3008_v40 = vand.u32 2147483647, %v2955_v50  ;;  %vm3004_vm6 = vweird.f32 %v2955_v50 }
 0x40f   : > { %7557 = vpow2.f32 %v3399_v39  ;;  %v2986_v5 = vsub.f32 1.0, %v2985_v57 }
 0x410   : > { %v3011_v37 = vor.u32 1.1754944e-38, %v3010_v4  ;;  %vm3009_vm8 = vcmp.eq.f32.partialorder %v3008_v40, 8.507059e+37 }
 0x411   : > { %v2987_v6 = vmul.f32 %v7554_v21, %v2986_v5  ;;  %v3522_v8 = vpop.permute.xlu0 %3521  ;;  %v2996_v5 = vor.u32 1.1754944e-38, %v2995_v41 }
 0x412   : > { %v3563_v14 = vadd.f32 %v3522_v8, %v9403_v30 }
 0x413   : > { %v2988_v54 = vadd.f32 %v7554_v21, %v2987_v6 }
 0x414   : > { %v7556_v53 = vpop.eup %7555  ;;  %v3576_v33 = vpack.c.bf16 %v3564_v36, %v3563_v14 }
 0x415   : > { %v7558_v13 = vpop.eup %7557  ;;  %v3000_v22 = vmul.f32 %v7556_v53, %v2955_v50  ;;  %v2992_v45 = vsel %vm2991_vm3, %v7554_v21, %v2988_v54  ;;  %vm3005_vm4 = vweird.f32 %v7556_v53  ;;  %v3583_v50 = vld [vmem:[%s11697_s18] sm:$0x3] }
 0x416   : > { %6833 = vmatmul.msk.bf16.gmra.mxu1 %vm3599_vm0, %v3576_v33  ;;  %6841 = vmatmul.msk.bf16.gmra.mxu2 %vm3599_vm0, %v3576_v33  ;;  %v3486_v25 = vmul.f32 %v7558_v13, %v9363_v27  ;;  %v2997_v20 = vsel %vm2994_vm5, %v2996_v5, %v2992_v45  ;;  %vm3006_vm7 = vmor %vm3004_vm6, %vm3005_vm4  ;;  %v9557_v13 = vperm.slane %v3583_v50, 0  ;;  %v2907_v5 = vsub.f32 %v9289_v29, %v9417_v0 }
 0x417   : > { %v3001_v39 = vsub.f32 1.0, %v3000_v22  ;;  %v9546_v8 = vmul.f32 %v9415_v17, %v2997_v20 }
 0x418   : > { %v2926_v20 = vmul.f32 1.442695, %v2907_v5 }
 0x419   : > { %v3002_v57 = vmul.f32 %v7556_v53, %v3001_v39 }
 0x41b   : > { %v3003_v63 = vadd.f32 %v7556_v53, %v3002_v57  ;;  %3527 = vrot.lane.b32.xlu0 %v3486_v25, %s8177_s11 }
 0x41d   : > { %v3007_v6 = vsel %vm3006_vm7, %v7556_v53, %v3003_v63 }
 0x41e   : > { %v3012_v27 = vsel %vm3009_vm8, %v3011_v37, %v3007_v6 }
 0x41f   : > { %v9549_v21 = vmul.f32 %v9420_v28, %v3012_v27 }
 0x421   : > { %v3224_v36 = vpack.c.bf16 %v9549_v21, %v9546_v8 }
 0x423   : > { %3308 = vmatmul.bf16.vlgmr.msra.gmra.mxu0 %v3224_v36 }
 0x424   : > { %v2895_v14 = vpop.xlane.xlu2 %2894  ;;  %v3633_v33 = vpop.f32.mrf.mxu1 }
 0x425   : > { %v2915_v53 = vsub.f32 %v9435_v60, %v2895_v14  ;;  %v3634_v17 = vadd.f32 %v3633_v33, %v9557_v13  ;;  %v2573_v60 = vadd.f32 %v9275_v51, %v2572_v47  ;;  %v2909_v51 = vsub.f32 %v9302_v1, %v9440_v31 }
 0x427   : > { %v2942_v54 = vmul.f32 1.442695, %v2915_v53  ;;  %v3754_v22 = vmul.f32 0.01, %v3634_v17  ;;  %vm3722_vm9 = vcmp.ge.f32.partialorder %v3634_v17, 0.0  ;;  %v9567_v40 = vadd.f32 %v2621_v49, %v2573_v60  ;;  %v3458_v49 = vpop.permute.xlu1 %3457 }
 0x428   : > { %v2930_v36 = vmul.f32 1.442695, %v2909_v51 }
 0x429   : > { %7559 = vpow2.f32 %v2942_v54  ;;  %v3786_v4 = vsel %vm3722_vm9, %v3634_v17, %v3754_v22  ;;  %11698 = vst [vmem:[#allocation47_spill] sm:$0xff] %v9567_v40  ;;  %v3379_v63 = vmul.f32 0.5, %v9567_v40  ;;  %v3375_v22 = vmul.f32 0.5, %v9356_v19 }
 0x42a   : > { %7561 = vpow2.f32 %v2926_v20 }
 0x42b   : > { %v3409_v37 = vmul.f32 1.442695, %v3379_v63 }
 0x42c   : > { %v3635_v28 = vpop.f32.mrf.mxu1  ;;  %v2903_v20 = vpop.xlane.xlu2 %2902 }
 0x42d   : > { %v3636_v41 = vadd.f32 %v3635_v28, %v9557_v13  ;;  %7563 = vpow2.f32 %v3409_v37 }
 0x42e   : > { %7565 = vpow2.f32 %v2930_v36 }
 0x42f   : > { %v9561_v39 = vpop.eup %7559  ;;  %vm3724_vm10 = vcmp.ge.f32.partialorder %v3636_v41, 0.0  ;;  %v3756_v25 = vmul.f32 0.01, %v3636_v41 }
 0x430   : > { %2974 = vadd.xlane.f32.xlu2 %v9561_v39  ;;  %v9576_v50 = vpop.eup %7561 }
 0x431   : > { %v3788_v45 = vsel %vm3724_vm10, %v3636_v41, %v3756_v25  ;;  %v3401_v41 = vmul.f32 1.442695, %v3375_v22  ;;  %v5654_v22 = vmul.f32 1.442695, %v9334_v46 }
 0x432   : > { %v9565_v57 = vpack.c.bf16 %v3788_v45, %v3786_v4 }
 0x433   : > { %v7564_v33 = vpop.eup %7563  ;;  %7567 = vpow2.f32 %v3401_v41 }
 0x434   : > { %4040 = vmatmul.bf16.vlgmr.msrb.gmra.mxu3 %v9565_v57  ;;  %v3491_v0 = vmul.f32 %v7564_v33, %v3458_v49  ;;  %v9583_v28 = vpop.eup %7565 }
 0x439   : > { %v7568_v60 = vpop.eup %7567 }
 0x43a   : > { %v3487_v63 = vmul.f32 %v7568_v60, %v9373_v48 }
 0x43c   : > { %v3638_v6 = vpop.f32.mrf.mxu1 }
 0x43d   : > { %v3639_v27 = vadd.f32 %v3638_v6, %v9557_v13  ;;  %v2919_v6 = vsub.f32 %v9444_v18, %v2903_v20  ;;  %v2911_v18 = vsub.f32 %v9365_v24, %v9527_v32  ;;  %v5660_v32 = vmul.f32 1.442695, %v9369_v15 }
 0x43f   : > { %v3758_v53 = vmul.f32 0.01, %v3639_v27  ;;  %vm3726_vm11 = vcmp.ge.f32.partialorder %v3639_v27, 0.0  ;;  %v2950_v49 = vmul.f32 1.442695, %v2919_v6 }
 0x441   : > { %v3790_v1 = vsel %vm3726_vm11, %v3639_v27, %v3758_v53  ;;  %7569 = vpow2.f32 %v2950_v49 }
 0x444   : > { %v3640_v14 = vpop.f32.mrf.mxu1 }
 0x445   : > { %v3641_v29 = vadd.f32 %v3640_v14, %v9557_v13  ;;  %2958 = vadd.xlane.f32.xlu0 %v9576_v50  ;;  %v2893_v14 = vpop.xlane.xlu0 %2892 }
 0x447   : > { %vm3728_vm12 = vcmp.ge.f32.partialorder %v3641_v29, 0.0  ;;  %v3760_v54 = vmul.f32 0.01, %v3641_v29  ;;  %v9596_v33 = vpop.eup %7569 }
 0x448   : > { %3537 = vrot.lane.b32.xlu2 %v3491_v0, %s8177_s11 }
 0x449   : > { %v3792_v31 = vsel %vm3728_vm12, %v3641_v29, %v3760_v54  ;;  %v5646_v29 = vmul.f32 1.442695, %v9281_v26 }
 0x44a   : > { %v9581_v17 = vpack.c.bf16 %v3792_v31, %v3790_v1  ;;  %v2918_v1 = vsub.f32 %v9405_v2, %v9512_v43  ;;  %v2934_v31 = vmul.f32 1.442695, %v2911_v18 }
 0x44b   : > { %7571 = vpow2.f32 %v5646_v29 }
 0x44c   : > { %4045 = vmatmul.bf16.gmra.mxu3 %v9581_v17  ;;  %v2948_v41 = vmul.f32 1.442695, %v2918_v1 }
 0x44d   : > { %2962 = vadd.xlane.f32.xlu0 %v9583_v28 }
 0x44f   : > { %v3526_v48 = vpop.permute.xlu0 %3525 }
 0x455   : > { %v3643_v47 = vpop.f32.mrf.mxu1 }
 0x456   : > { %v3644_v25 = vadd.f32 %v3643_v47, %v9557_v13  ;;  %v7572_v47 = vpop.eup %7571 }
 0x458   : > { %v3762_v45 = vmul.f32 0.01, %v3644_v25  ;;  %vm3730_vm13 = vcmp.ge.f32.partialorder %v3644_v25, 0.0 }
 0x45a   : > { %v3794_v51 = vsel %vm3730_vm13, %v3644_v25, %v3762_v45  ;;  %v2912_v25 = vsub.f32 %v9409_v52, %v9534_v3  ;;  %v2914_v52 = vsub.f32 %v9346_v42, %v2893_v14  ;;  %v5666_v42 = vmul.f32 1.442695, %v9356_v19 }
 0x45c   : > { %v2936_v2 = vmul.f32 1.442695, %v2912_v25  ;;  %v2940_v6 = vmul.f32 1.442695, %v2914_v52  ;;  %v5640_v25 = vadd.f32 1.0, %v9356_v19 }
 0x45d   : > { %v3645_v4 = vpop.f32.mrf.mxu1 }
 0x45e   : > { %v3646_v5 = vadd.f32 %v3645_v4, %v9557_v13 }
 0x460   : > { %vm3732_vm14 = vcmp.ge.f32.partialorder %v3646_v5, 0.0  ;;  %v3764_v37 = vmul.f32 0.01, %v3646_v5 }
 0x461   : > { %3529 = vrot.lane.b32.xlu0 %v3487_v63, %s8177_s11  ;;  %v3565_v63 = vadd.f32 %v3526_v48, %v9457_v44  ;;  %v2917_v48 = vsub.f32 %v9381_v9, %v9501_v38 }
 0x462   : > { %v3796_v27 = vsel %vm3732_vm14, %v3646_v5, %v3764_v37  ;;  %v5634_v5 = vadd.f32 1.0, %v9334_v46 }
 0x463   : > { %v9593_v36 = vpack.c.bf16 %v3796_v27, %v3794_v51  ;;  %v2946_v18 = vmul.f32 1.442695, %v2917_v48 }
 0x465   : > { %4050 = vmatmul.bf16.gmra.mxu3 %v9593_v36 }
 0x471   : > { %2982 = vadd.xlane.f32.xlu2 %v9596_v33 }
 0x47a   : > { %v2897_v53 = vpop.xlane.xlu0 %2896 }
 0x47b   : > { %v2916_v0 = vsub.f32 %v9359_v7, %v2897_v53  ;;  %v5630_v7 = vadd.f32 1.0, %v9281_v26  ;;  %v5637_v53 = vadd.f32 1.0, %v9369_v15 }
 0x47d   : > { %v2944_v54 = vmul.f32 1.442695, %v2916_v0  ;;  %v5678_v24 = vsub.f32 %v5630_v7, %v7572_v47  ;;  %v5648_v0 = vmul.f32 1.442695, %v9298_v56  ;;  %v2574_v47 = vpop.f32.mrf.mxu0 }
 0x47f   : > { %7573 = vpow2.f32 %v2944_v54 }
 0x480   : > { %7575 = vpow2.f32 %v2934_v31  ;;  %v5672_v31 = vmul.f32 1.442695, %v9490_v34 }
 0x481   : > { %7577 = vpow2.f32 %v5654_v22 }
 0x482   : > { %7579 = vpow2.f32 %v2948_v41 }
 0x483   : > { %7581 = vpow2.f32 %v2936_v2  ;;  %v7774_v2 = vld [vmem:[%s11565_s7] ss:$0 sm:$0xff] }
 0x484   : > { %7583 = vpow2.f32 %v5660_v32  ;;  %v2575_v32 = vadd.f32 %v7774_v2, %v2574_v47  ;;  %v5638_v47 = vadd.f32 1.0, %v9457_v44 }
 0x485   : > { %v9608_v60 = vpop.eup %7573  ;;  %7585 = vpow2.f32 %v2940_v6  ;;  %v5631_v6 = vadd.f32 1.0, %v9298_v56  ;;  %v7304_v56 = vld [vmem:[#allocation13 + $0x84] sm:$0xf] }
 0x486   : > { %2976 = vadd.xlane.f32.xlu1 %v9608_v60  ;;  %v9613_v43 = vpop.eup %7575  ;;  %7587 = vpow2.f32 %v5666_v42 }
 0x487   : > { %v7578_v4 = vpop.eup %7577  ;;  %7589 = vpow2.f32 %v5648_v0 }
 0x488   : > { %v9618_v3 = vpop.eup %7579  ;;  %v5682_v37 = vsub.f32 %v5634_v5, %v7578_v4  ;;  %7591 = vpow2.f32 %v2946_v18  ;;  %v5635_v18 = vadd.f32 1.0, %v9320_v12 }
 0x489   : > { %5710 = vrot.lane.b32.xlu2 %v5678_v24, %s8177_s11  ;;  %v9625_v27 = vpop.eup %7581  ;;  %7593 = vpow2.f32 %v5672_v31  ;;  %v5650_v31 = vmul.f32 1.442695, %v9309_v35 }
 0x48a   : > { %v7584_v14 = vpop.eup %7583 }
 0x48b   : > { %2966 = vadd.xlane.f32.xlu0 %v9613_v43  ;;  %v5685_v29 = vsub.f32 %v5637_v53, %v7584_v14  ;;  %v9637_v1 = vpop.eup %7585  ;;  %v9661_v53 = vpop.xlane.xlu2 %2956 }
 0x48c   : > { %v7588_v9 = vpop.eup %7587  ;;  %vm3019_vm3 = vweird.f32 %v9661_v53 }
 0x48d   : > { %v3528_v45 = vpop.permute.xlu0 %3527  ;;  %v5688_v24 = vsub.f32 %v5640_v25, %v7588_v9  ;;  %v7590_v5 = vpop.eup %7589 }
 0x48e   : > { %v3566_v20 = vadd.f32 %v3528_v45, %v9524_v59  ;;  %2980 = vadd.xlane.f32.xlu1 %v9618_v3  ;;  %v5656_v45 = vmul.f32 1.442695, %v9320_v12  ;;  %v5679_v42 = vsub.f32 %v5631_v6, %v7590_v5  ;;  %v5674_v5 = vmul.f32 1.442695, %v9567_v40 }
 0x490   : > { %v3577_v51 = vpack.c.bf16 %v3566_v20, %v3565_v63  ;;  %v9650_v20 = vpop.eup %7591  ;;  %7595 = vpow2.f32 %v5656_v45 }
 0x491   : > { %5718 = vrot.lane.b32.xlu2 %v5682_v37, %s8177_s11  ;;  %v9653_v37 = vadd.f32 %v9543_v23, %v2575_v32  ;;  %v5662_v23 = vmul.f32 1.442695, %v9457_v44  ;;  %7597 = vrcp.f32 %v9661_v53  ;;  %v9675_v32 = vpop.xlane.xlu1 %2960  ;;  %v5644_v44 = vadd.f32 1.0, %v9567_v40 }
 0x492   : > { %6834 = vmatmul.msk.bf16.gmra.mxu1 %vm3599_vm0, %v3577_v51  ;;  %6842 = vmatmul.msk.bf16.gmra.mxu2 %vm3599_vm0, %v3577_v51  ;;  %v7594_v51 = vpop.eup %7593  ;;  %vm3049_vm12 = vweird.f32 %v9675_v32 }
 0x493   : > { %2968 = vadd.xlane.f32.xlu0 %v9625_v27  ;;  %v3648_v49 = vpop.f32.mrf.mxu1  ;;  %11700 = vst [vmem:[#allocation49_spill] sm:$0xff] %v9653_v37  ;;  %v3380_v14 = vmul.f32 0.5, %v9653_v37  ;;  %7599 = vpow2.f32 %v5662_v23 }
 0x494   : > { %v3649_v54 = vadd.f32 %v3648_v49, %v9557_v13  ;;  %v5643_v49 = vadd.f32 1.0, %v9490_v34 }
 0x495   : > { %v3411_v0 = vmul.f32 1.442695, %v3380_v14 }
 0x496   : > { %v3766_v38 = vmul.f32 0.01, %v3649_v54  ;;  %vm3734_vm15 = vcmp.ge.f32.partialorder %v3649_v54, 0.0  ;;  %v5691_v48 = vsub.f32 %v5643_v49, %v7594_v51  ;;  %v5641_v49 = vadd.f32 1.0, %v9473_v16 }
 0x497   : > { %7601 = vpow2.f32 %v3411_v0 }
 0x498   : > { %v3798_v4 = vsel %vm3734_vm15, %v3649_v54, %v3766_v38  ;;  %7603 = vpow2.f32 %v5650_v31  ;;  %v6968_v31 = vld [vmem:[#allocation13 + $0xf0] sm:$0xf] }
 0x499   : > { %5724 = vrot.lane.b32.xlu2 %v5685_v29, %s8177_s11  ;;  %v7596_v29 = vpop.eup %7595 }
 0x49a   : > { %v5683_v54 = vsub.f32 %v5635_v18, %v7596_v29  ;;  %v9670_v9 = vpop.eup %7597  ;;  %v5658_v29 = vmul.f32 1.442695, %v9403_v30  ;;  %v7318_v18 = vld [vmem:[#allocation13 + $0xf4] sm:$0xf] }
 0x49b   : > { %v3650_v22 = vpop.f32.mrf.mxu1  ;;  %2972 = vadd.xlane.f32.xlu0 %v9637_v1  ;;  %v7600_v38 = vpop.eup %7599  ;;  %vm3020_vm2 = vweird.f32 %v9670_v9 }
 0x49c   : > { %v3651_v41 = vadd.f32 %v3650_v22, %v9557_v13  ;;  %v5668_v22 = vmul.f32 1.442695, %v9473_v16  ;;  %v5686_v2 = vsub.f32 %v5638_v47, %v7600_v38  ;;  %vm9707_vm4 = vmor %vm3019_vm3, %vm3020_vm2 }
 0x49d   : > { %v7602_v25 = vpop.eup %7601 }
 0x49e   : > { %vm3736_vm1 = vcmp.ge.f32.partialorder %v3651_v41, 0.0  ;;  %v3768_v7 = vmul.f32 0.01, %v3651_v41  ;;  %7605 = vpow2.f32 %v5668_v22  ;;  %v7604_v6 = vpop.eup %7603 }
 0x4a0   : > { %v3800_v52 = vsel %vm3736_vm1, %v3651_v41, %v3768_v7  ;;  %v3460_v41 = vpop.permute.xlu2 %3459  ;;  %v3015_v7 = vmul.f32 %v9670_v9, %v9661_v53 }
 0x4a1   : > { %5730 = vrot.lane.b32.xlu2 %v5688_v24, %s8177_s11  ;;  %v9648_v63 = vpack.c.bf16 %v3800_v52, %v3798_v4  ;;  %v3492_v24 = vmul.f32 %v7602_v25, %v3460_v41  ;;  %v5652_v4 = vmul.f32 1.442695, %v9311_v55 }
 0x4a2   : > { %v3016_v52 = vsub.f32 1.0, %v3015_v7 }
 0x4a3   : > { %11699 = vst [vmem:[#allocation48_spill] sm:$0xff] %v9648_v63  ;;  %4055 = vmatmul.bf16.gmra.mxu3 %v9648_v63  ;;  %2978 = vadd.xlane.f32.xlu0 %v9650_v20 }
 0x4a4   : > { %v7606_v51 = vpop.eup %7605  ;;  %v3017_v14 = vmul.f32 %v9670_v9, %v3016_v52 }
 0x4a5   : > { %v5689_v23 = vsub.f32 %v5641_v49, %v7606_v51 }
 0x4a6   : > { %v3018_v38 = vadd.f32 %v9670_v9, %v3017_v14 }
 0x4a7   : > { %5712 = vrot.lane.b32.xlu1 %v5679_v42, %s8177_s11  ;;  %v5632_v42 = vadd.f32 1.0, %v9309_v35 }
 0x4a8   : > { %v9695_v41 = vpop.xlane.xlu2 %2964 }
 0x4a9   : > { %5736 = vrot.lane.b32.xlu2 %v5691_v48, %s8177_s11  ;;  %v5680_v48 = vsub.f32 %v5632_v42, %v7604_v6  ;;  %v5633_v6 = vadd.f32 1.0, %v9311_v55  ;;  %v3023_v42 = vand.u32 2147483647, %v9661_v53 }
 0x4ab   : > { %vm3024_vm6 = vcmp.eq.f32.partialorder %v3023_v42, 8.507059e+37 }
 0x4af   : > { %5720 = vrot.lane.b32.xlu1 %v5683_v54, %s8177_s11  ;;  %v6970_v54 = vld [vmem:[#allocation13 + $0xf8] sm:$0xf0] }
 0x4b0   : > { %v6973_v7 = vor.u32 %v7318_v18, %v6970_v54 }
 0x4b2   : > { %4179 = vmatpush.bf16.msrb.mxu2 %v6973_v7 }
 0x4b7   : > { %3539 = vrot.lane.b32.xlu0 %v3492_v24, %s8177_s11  ;;  %5726 = vrot.lane.b32.xlu1 %v5686_v2, %s8177_s11  ;;  %v7319_v24 = vld [vmem:[#allocation13 + $0xf4] sm:$0xf0]  ;;  %v7302_v2 = vld [vmem:[#allocation13 + $0x74] sm:$0xf] }
 0x4b8   : > { %v9680_v45 = vpop.xlane.xlu0 %2958  ;;  %v6969_v14 = vor.u32 %v7319_v24, %v6968_v31  ;;  %v3022_v31 = vsel %vm9707_vm4, %v9670_v9, %v3018_v38  ;;  %vm3079_vm4 = vweird.f32 %v9695_v41 }
 0x4b9   : > { %7607 = vrcp.f32 %v9680_v45  ;;  %v3040_v54 = vand.u32 2147483648, %v9680_v45  ;;  %vm3034_vm7 = vweird.f32 %v9680_v45 }
 0x4ba   : > { %7609 = vrcp.f32 %v9675_v32  ;;  %4081 = vmatpush.bf16.msrb.mxu0 %v6969_v14  ;;  %v3532_v14 = vpop.permute.xlu1 %3531 }
 0x4bb   : > { %7611 = vpow2.f32 %v5652_v4  ;;  %v6906_v4 = vld [vmem:[#allocation13 + $0x78] sm:$0xf0] }
 0x4bc   : > { %7613 = vpow2.f32 %v5674_v5  ;;  %v3025_v5 = vand.u32 2147483648, %v9661_v53  ;;  %v3038_v53 = vand.u32 2147483647, %v9680_v45 }
 0x4be   : > { %vm3039_vm9 = vcmp.eq.f32.partialorder %v3038_v53, 8.507059e+37 }
 0x4bf   : > { %v7608_v0 = vpop.eup %7607  ;;  %5714 = vrot.lane.b32.xlu0 %v5680_v48, %s8177_s11  ;;  %5732 = vrot.lane.b32.xlu1 %v5689_v23, %s8177_s11  ;;  %v6909_v48 = vor.u32 %v7302_v2, %v6906_v4 }
 0x4c0   : > { %v9691_v22 = vpop.eup %7609  ;;  %v3030_v47 = vmul.f32 %v7608_v0, %v9680_v45  ;;  %v9698_v25 = vpop.xlane.xlu0 %2962  ;;  %vm3035_vm5 = vweird.f32 %v7608_v0 }
 0x4c1   : > { %v7612_v52 = vpop.eup %7611  ;;  %7615 = vrcp.f32 %v9698_v25  ;;  %v3045_v18 = vmul.f32 %v9691_v22, %v9675_v32  ;;  %4130 = vmatpush.bf16.msrb.mxu1 %v6909_v48  ;;  %vm3036_vm8 = vmor %vm3034_vm7, %vm3035_vm5  ;;  %v9727_v45 = vpop.xlane.xlu2 %2970  ;;  %v5636_v48 = vadd.f32 1.0, %v9403_v30  ;;  %vm3050_vm10 = vweird.f32 %v9691_v22 }
 0x4c2   : > { %v7614_v51 = vpop.eup %7613  ;;  %v3031_v49 = vsub.f32 1.0, %v3030_v47  ;;  %7617 = vpow2.f32 %v5658_v29  ;;  %v3026_v47 = vor.u32 1.1754944e-38, %v3025_v5  ;;  %v5681_v7 = vsub.f32 %v5633_v6, %v7612_v52  ;;  %vm9748_vm13 = vmor %vm3049_vm12, %vm3050_vm10 }
 0x4c3   : > { %v5692_v24 = vsub.f32 %v5644_v44, %v7614_v51  ;;  %v3046_v29 = vsub.f32 1.0, %v3045_v18  ;;  %v5664_v44 = vmul.f32 1.442695, %v9524_v59  ;;  %vm3064_vm14 = vweird.f32 %v9698_v25 }
 0x4c4   : > { %v3032_v15 = vmul.f32 %v7608_v0, %v3031_v49  ;;  %v3041_v49 = vor.u32 1.1754944e-38, %v3040_v54  ;;  %v3027_v23 = vsel %vm3024_vm6, %v3026_v47, %v3022_v31  ;;  %v3070_v54 = vand.u32 2147483648, %v9698_v25 }
 0x4c5   : > { %v9730_v6 = vmul.f32 %v9451_v62, %v3027_v23  ;;  %v3047_v42 = vmul.f32 %v9691_v22, %v3046_v29  ;;  %7619 = vpow2.f32 %v5664_v44  ;;  %v5670_v31 = vmul.f32 1.442695, %v9480_v10 }
 0x4c6   : > { %v3033_v2 = vadd.f32 %v7608_v0, %v3032_v15  ;;  %v5639_v23 = vadd.f32 1.0, %v9524_v59  ;;  %v3534_v59 = vpop.permute.xlu1 %3533 }
 0x4c7   : > { %v9720_v4 = vpop.eup %7615  ;;  %5716 = vrot.lane.b32.xlu0 %v5681_v7, %s8177_s11  ;;  %5738 = vrot.lane.b32.xlu1 %v5692_v24, %s8177_s11  ;;  %v3068_v7 = vand.u32 2147483647, %v9698_v25  ;;  %v3053_v24 = vand.u32 2147483647, %v9675_v32  ;;  %7621 = vpow2.f32 %v5670_v31  ;;  %v5676_v31 = vmul.f32 1.442695, %v9653_v37 }
 0x4c8   : > { %v3060_v9 = vmul.f32 %v9720_v4, %v9698_v25  ;;  %v3037_v38 = vsel %vm3036_vm8, %v7608_v0, %v3033_v2  ;;  %v7618_v15 = vpop.eup %7617  ;;  %vm3065_vm11 = vweird.f32 %v9720_v4  ;;  %v3055_v2 = vand.u32 2147483648, %v9675_v32  ;;  %v6962_v25 = vld [vmem:[#allocation13 + $0xe8] sm:$0xf0] }
 0x4c9   : > { %v3042_v52 = vsel %vm3039_vm9, %v3041_v49, %v3037_v38  ;;  %v5684_v62 = vsub.f32 %v5636_v48, %v7618_v15  ;;  %vm9756_vm15 = vmor %vm3064_vm14, %vm3065_vm11  ;;  %v3071_v49 = vor.u32 1.1754944e-38, %v3070_v54  ;;  %v9761_v38 = vpop.xlane.xlu2 %2974  ;;  %v7316_v15 = vld [vmem:[#allocation13 + $0xe4] sm:$0xf]  ;;  %v6898_v54 = vld [vmem:[#allocation13 + $0x68] sm:$0xf0]  ;;  %vm3069_vm1 = vcmp.eq.f32.partialorder %v3068_v7, 8.507059e+37 }
 0x4ca   : > { %v3061_v5 = vsub.f32 1.0, %v3060_v9  ;;  %v9733_v51 = vmul.f32 %v9576_v50, %v3042_v52  ;;  %v3048_v50 = vadd.f32 %v9691_v22, %v3047_v42  ;;  %v6960_v52 = vld [vmem:[#allocation13 + $0xe0] sm:$0xf]  ;;  %v6965_v48 = vor.u32 %v7316_v15, %v6962_v25 }
 0x4cb   : > { %v7620_v9 = vpop.eup %7619  ;;  %vm3054_vm2 = vcmp.eq.f32.partialorder %v3053_v24, 8.507059e+37  ;;  %v5642_v24 = vadd.f32 1.0, %v9480_v10  ;;  %7623 = vpow2.f32 %v5676_v31 }
 0x4cc   : > { %v3062_v0 = vmul.f32 %v9720_v4, %v3061_v5  ;;  %v3225_v18 = vpack.c.bf16 %v9733_v51, %v9730_v6  ;;  %v3568_v5 = vadd.f32 %v3532_v14, %v9473_v16  ;;  %v3052_v42 = vsel %vm9748_vm13, %v9691_v22, %v3048_v50  ;;  %4180 = vmatpush.bf16.msrb.mxu2 %v6965_v48 }
 0x4cd   : > { %v5687_v30 = vsub.f32 %v5639_v23, %v7620_v9  ;;  %v7622_v47 = vpop.eup %7621  ;;  %v5645_v9 = vadd.f32 1.0, %v9653_v37  ;;  %7625 = vrcp.f32 %v9695_v41 }
 0x4ce   : > { %v3063_v53 = vadd.f32 %v9720_v4, %v3062_v0  ;;  %3313 = vmatmul.bf16.gmra.mxu0 %v3225_v18  ;;  %v7317_v0 = vld [vmem:[#allocation13 + $0xe4] sm:$0xf0]  ;;  %v7300_v18 = vld [vmem:[#allocation13 + $0x64] sm:$0xf]  ;;  %v3536_v23 = vpop.permute.xlu1 %3535 }
 0x4cf   : > { %5722 = vrot.lane.b32.xlu0 %v5684_v62, %s8177_s11  ;;  %v6961_v29 = vor.u32 %v7317_v0, %v6960_v52  ;;  %v6952_v0 = vld [vmem:[#allocation13 + $0xd0] sm:$0xf] }
 0x4d0   : > { %v3067_v44 = vsel %vm9756_vm15, %v9720_v4, %v3063_v53  ;;  %v6901_v4 = vor.u32 %v7300_v18, %v6898_v54  ;;  %v3056_v53 = vor.u32 1.1754944e-38, %v3055_v2  ;;  %v7298_v18 = vld [vmem:[#allocation13 + $0x54] sm:$0xf] }
 0x4d1   : > { %v3072_v46 = vsel %vm3069_vm1, %v3071_v49, %v3067_v44  ;;  %4082 = vmatpush.bf16.msrb.mxu0 %v6961_v29  ;;  %v9782_v2 = vpop.permute.xlu2 %3537  ;;  %v5690_v49 = vsub.f32 %v5642_v24, %v7622_v47  ;;  %v6944_v47 = vld [vmem:[#allocation13 + $0xc0] sm:$0xf]  ;;  %v7313_v24 = vld [vmem:[#allocation13 + $0xc4] sm:$0xf0]  ;;  %vm3124_vm1 = vweird.f32 %v9727_v45 }
 0x4d2   : > { %4131 = vmatpush.bf16.msrb.mxu1 %v6901_v4  ;;  %v3057_v22 = vsel %vm3054_vm2, %v3056_v53, %v3052_v42  ;;  %v9775_v50 = vmul.f32 %v9583_v28, %v3072_v46  ;;  %v7624_v46 = vpop.eup %7623  ;;  %v3570_v28 = vadd.f32 %v3536_v23, %v9490_v34 }
 0x4d3   : > { %v3530_v32 = vpop.permute.xlu0 %3529  ;;  %v9779_v7 = vmul.f32 %v9468_v11, %v3057_v22  ;;  %v3569_v11 = vadd.f32 %v3534_v59, %v9480_v10  ;;  %v5693_v15 = vsub.f32 %v5645_v9, %v7624_v46  ;;  %v7315_v59 = vld [vmem:[#allocation13 + $0xd4] sm:$0xf0]  ;;  %v7626_v4 = vpop.eup %7625  ;;  %v6946_v22 = vld [vmem:[#allocation13 + $0xc8] sm:$0xf0]  ;;  %v6945_v46 = vor.u32 %v7313_v24, %v6944_v47 }
 0x4d4   : > { %v3567_v62 = vadd.f32 %v3530_v32, %v9356_v19  ;;  %11707 = vst [vmem:[#allocation50_spill] sm:$0xff] %v9775_v50  ;;  %v6954_v32 = vld [vmem:[#allocation13 + $0xd8] sm:$0xf0]  ;;  %v6953_v54 = vor.u32 %v7315_v59, %v6952_v0  ;;  %v3075_v53 = vmul.f32 %v7626_v4, %v9695_v41  ;;  %vm3080_vm3 = vweird.f32 %v7626_v4  ;;  %v6850_v10 = vld [vmem:[#allocation13 + $0x8] sm:$0xf0] }
 0x4d5   : > { %11708 = vst [vmem:[#allocation51_spill] sm:$0xff] %v9779_v7  ;;  %v3579_v25 = vpack.c.bf16 %v3570_v28, %v3569_v11  ;;  %v6882_v28 = vld [vmem:[#allocation13 + $0x48] sm:$0xf0]  ;;  %vm3081_vm5 = vmor %vm3079_vm4, %vm3080_vm3 }
 0x4d6   : > { %v3578_v14 = vpack.c.bf16 %v3568_v5, %v3567_v62  ;;  %v7314_v5 = vld [vmem:[#allocation13 + $0xd4] sm:$0xf]  ;;  %v6890_v62 = vld [vmem:[#allocation13 + $0x58] sm:$0xf0]  ;;  %4083 = vmatpush.bf16.msrb.mxu0 %v6953_v54 }
 0x4d7   : > { %5728 = vrot.lane.b32.xlu0 %v5687_v30, %s8177_s11  ;;  %v3226_v30 = vpack.c.bf16 %v9775_v50, %v9779_v7  ;;  %v6957_v48 = vor.u32 %v7314_v5, %v6954_v32  ;;  %v6893_v29 = vor.u32 %v7298_v18, %v6890_v62  ;;  %v6936_v32 = vld [vmem:[#allocation13 + $0xb0] sm:$0xf] }
 0x4d8   : > { %6835 = vmatmul.msk.bf16.gmra.mxu1 %vm3599_vm0, %v3578_v14  ;;  %6843 = vmatmul.msk.bf16.gmra.mxu2 %vm3599_vm0, %v3578_v14  ;;  %v7312_v14 = vld [vmem:[#allocation13 + $0xc4] sm:$0xf] }
 0x4d9   : > { %4181 = vmatpush.bf16.msrb.mxu2 %v6957_v48  ;;  %4132 = vmatpush.bf16.msrb.mxu1 %v6893_v29  ;;  %v6949_v31 = vor.u32 %v7312_v14, %v6946_v22  ;;  %v7294_v48 = vld [vmem:[#allocation13 + $0x34] sm:$0xf]  ;;  %v6874_v29 = vld [vmem:[#allocation13 + $0x38] sm:$0xf0]  ;;  %v3083_v22 = vand.u32 2147483647, %v9695_v41 }
 0x4da   : > { %4084 = vmatpush.bf16.msrb.mxu0 %v6945_v46  ;;  %v6877_v47 = vor.u32 %v7294_v48, %v6874_v29 }
 0x4db   : > { %vm3084_vm7 = vcmp.eq.f32.partialorder %v3083_v22, 8.507059e+37 }
 0x4dd   : > { %4182 = vmatpush.bf16.msrb.mxu2 %v6949_v31 }
 0x4de   : > { %3318 = vmatmul.bf16.gmra.mxu0 %v3226_v30  ;;  %v7296_v30 = vld [vmem:[#allocation13 + $0x44] sm:$0xf] }
 0x4df   : > { %5734 = vrot.lane.b32.xlu0 %v5690_v49, %s8177_s11  ;;  %v3076_v49 = vsub.f32 1.0, %v3075_v53  ;;  %v6885_v9 = vor.u32 %v7296_v30, %v6882_v28  ;;  %v3085_v53 = vand.u32 2147483648, %v9695_v41 }
 0x4e1   : > { %v3077_v11 = vmul.f32 %v7626_v4, %v3076_v49  ;;  %4133 = vmatpush.bf16.msrb.mxu1 %v6885_v9  ;;  %v3086_v28 = vor.u32 1.1754944e-38, %v3085_v53 }
 0x4e3   : > { %v3078_v59 = vadd.f32 %v7626_v4, %v3077_v11 }
 0x4e4   : > { %v9790_v44 = vpop.xlane.xlu2 %2982 }
 0x4e5   : > { %v3082_v46 = vsel %vm3081_vm5, %v7626_v4, %v3078_v59  ;;  %4134 = vmatpush.bf16.msrb.mxu1 %v6877_v47  ;;  %v7308_v59 = vld [vmem:[#allocation13 + $0xa4] sm:$0xf] }
 0x4e6   : > { %v3087_v41 = vsel %vm3084_vm7, %v3086_v28, %v3082_v46  ;;  %v7292_v47 = vld [vmem:[#allocation13 + $0x24] sm:$0xf] }
 0x4e7   : > { %5740 = vrot.lane.b32.xlu0 %v5693_v15, %s8177_s11  ;;  %v7310_v15 = vld [vmem:[#allocation13 + $0xb4] sm:$0xf]  ;;  %v9821_v53 = vmul.f32 %v9518_v58, %v3087_v41  ;;  %s10439_s11 = scalar_lea.vmem [#allocation17], %s8461_s3  ;;  %s11274_s3 = scalar_lea.vmem [#allocation19], %s6268_s28 }
 0x4e8   : > { %6836 = vmatmul.msk.bf16.gmra.mxu1 %vm3599_vm0, %v3579_v25  ;;  %6844 = vmatmul.msk.bf16.gmra.mxu2 %vm3599_vm0, %v3579_v25  ;;  %v6938_v25 = vld [vmem:[#allocation13 + $0xb8] sm:$0xf0] }
 0x4e9   : > { %v6941_v5 = vor.u32 %v7310_v15, %v6938_v25  ;;  %11709 = vst [vmem:[#allocation52_spill] sm:$0xff] %v9821_v53 }
 0x4eb   : > { %4183 = vmatpush.bf16.msrb.mxu2 %v6941_v5 }
 0x4ec   : > { %v5711_v52 = vpop.permute.xlu2 %5710 }
 0x4ed   : > { %v5758_v42 = vsel %vm3599_vm0, %v5711_v52, 0.0 }
 0x4ee   : > { %5759 = vadd.xlane.f32.xlu2 %v5758_v42  ;;  %v7311_v42 = vld [vmem:[#allocation13 + $0xb4] sm:$0xf0] }
 0x4ef   : > { %v6937_v62 = vor.u32 %v7311_v42, %v6936_v32 }
 0x4f1   : > { %4085 = vmatpush.bf16.msrb.mxu0 %v6937_v62 }
 0x4f4   : > { %v5719_v35 = vpop.permute.xlu2 %5718 }
 0x4f9   : > { %v9804_v14 = vpop.xlane.xlu1 %2976 }
 0x4fe   : > { %v2967_v23 = vpop.xlane.xlu0 %2966 }
 0x4ff   : > { %7627 = vrcp.f32 %v2967_v23  ;;  %v3100_v49 = vand.u32 2147483648, %v2967_v23  ;;  %v3098_v9 = vand.u32 2147483647, %v2967_v23  ;;  %vm3094_vm8 = vweird.f32 %v2967_v23 }
 0x500   : > { %7629 = vrcp.f32 %v9727_v45 }
 0x501   : > { %v3101_v5 = vor.u32 1.1754944e-38, %v3100_v49  ;;  %vm3099_vm10 = vcmp.eq.f32.partialorder %v3098_v9, 8.507059e+37  ;;  %v9818_v29 = vpop.xlane.xlu1 %2980  ;;  %v3130_v9 = vand.u32 2147483648, %v9727_v45 }
 0x505   : > { %v7628_v52 = vpop.eup %7627 }
 0x506   : > { %v9799_v0 = vpop.eup %7629  ;;  %v3090_v18 = vmul.f32 %v7628_v52, %v2967_v23  ;;  %v9801_v54 = vpop.xlane.xlu0 %2968  ;;  %vm3095_vm6 = vweird.f32 %v7628_v52 }
 0x507   : > { %7631 = vrcp.f32 %v9801_v54  ;;  %v3120_v24 = vmul.f32 %v9799_v0, %v9727_v45  ;;  %vm3096_vm9 = vmor %vm3094_vm8, %vm3095_vm6  ;;  %v3115_v46 = vand.u32 2147483648, %v9801_v54  ;;  %vm3125_vm12 = vweird.f32 %v9799_v0 }
 0x508   : > { %v3091_v31 = vsub.f32 1.0, %v3090_v18  ;;  %v6930_v18 = vld [vmem:[#allocation13 + $0xa8] sm:$0xf0]  ;;  %vm3109_vm13 = vweird.f32 %v9801_v54  ;;  %vm9859_vm2 = vmor %vm3124_vm1, %vm3125_vm12 }
 0x509   : > { %v3121_v25 = vsub.f32 1.0, %v3120_v24  ;;  %v6866_v24 = vld [vmem:[#allocation13 + $0x28] sm:$0xf0] }
 0x50a   : > { %v3092_v30 = vmul.f32 %v7628_v52, %v3091_v31  ;;  %v6933_v31 = vor.u32 %v7308_v59, %v6930_v18 }
 0x50c   : > { %v3093_v11 = vadd.f32 %v7628_v52, %v3092_v30  ;;  %v3128_v30 = vand.u32 2147483647, %v9727_v45  ;;  %4184 = vmatpush.bf16.msrb.mxu2 %v6933_v31 }
 0x50d   : > { %v9811_v15 = vpop.eup %7631 }
 0x50e   : > { %v3105_v32 = vmul.f32 %v9811_v15, %v9801_v54  ;;  %v9815_v42 = vpop.xlane.xlu0 %2972  ;;  %v3097_v48 = vsel %vm3096_vm9, %v7628_v52, %v3093_v11  ;;  %v3122_v52 = vmul.f32 %v9799_v0, %v3121_v25  ;;  %vm3110_vm11 = vweird.f32 %v9811_v15  ;;  %v9839_v25 = vpop.f32.mrf.mxu2 }
 0x50f   : > { %v3653_v4 = vpop.f32.mrf.mxu1  ;;  %7633 = vrcp.f32 %v9815_v42  ;;  %v3102_v23 = vsel %vm3099_vm10, %v3101_v5, %v3097_v48  ;;  %v6928_v48 = vld [vmem:[#allocation13 + $0xa0] sm:$0xf]  ;;  %vm9845_vm14 = vcmp.eq.f32.partialorder %v3128_v30, 8.507059e+37  ;;  %vm9849_vm15 = vmor %vm3109_vm13, %vm3110_vm11  ;;  %v6922_v30 = vld [vmem:[#allocation13 + $0x98] sm:$0xf0]  ;;  %v3145_v59 = vand.u32 2147483648, %v9815_v42 }
 0x510   : > { %v3106_v62 = vsub.f32 1.0, %v3105_v32  ;;  %v9824_v22 = vmul.f32 %v9613_v43, %v3102_v23  ;;  %7635 = vrcp.f32 %v9761_v38  ;;  %v3654_v28 = vadd.f32 %v3653_v4, %v9557_v13  ;;  %v7309_v4 = vld [vmem:[#allocation13 + $0xa4] sm:$0xf0] }
 0x511   : > { %v6869_v43 = vor.u32 %v7292_v47, %v6866_v24  ;;  %v3123_v5 = vadd.f32 %v9799_v0, %v3122_v52  ;;  %v3113_v32 = vand.u32 2147483647, %v9801_v54  ;;  %v7290_v47 = vld [vmem:[#allocation13 + $0x14] sm:$0xf]  ;;  %v6858_v52 = vld [vmem:[#allocation13 + $0x18] sm:$0xf0]  ;;  %v6929_v34 = vor.u32 %v7309_v4, %v6928_v48 }
 0x512   : > { %11710 = vst [vmem:[#allocation53_spill] sm:$0xff] %v9824_v22  ;;  %v3107_v49 = vmul.f32 %v9811_v15, %v3106_v62  ;;  %v3227_v58 = vpack.c.bf16 %v9824_v22, %v9821_v53  ;;  %v3116_v62 = vor.u32 1.1754944e-38, %v3115_v46  ;;  %v3770_v23 = vmul.f32 0.01, %v3654_v28  ;;  %v6914_v48 = vld [vmem:[#allocation13 + $0x88] sm:$0xf0] }
 0x513   : > { %4135 = vmatpush.bf16.msrb.mxu1 %v6869_v43  ;;  %vm3738_vm3 = vcmp.ge.f32.partialorder %v3654_v28, 0.0  ;;  %v3127_v12 = vsel %vm9859_vm2, %v9799_v0, %v3123_v5  ;;  %vm3114_vm5 = vcmp.eq.f32.partialorder %v3113_v32, 8.507059e+37  ;;  %4086 = vmatpush.bf16.msrb.mxu0 %v6929_v34  ;;  %v3131_v4 = vor.u32 1.1754944e-38, %v3130_v9 }
 0x514   : > { %v3108_v11 = vadd.f32 %v9811_v15, %v3107_v49  ;;  %3323 = vmatmul.bf16.gmra.mxu0 %v3227_v58  ;;  %v7306_v49 = vld [vmem:[#allocation13 + $0x94] sm:$0xf]  ;;  %v3802_v18 = vsel %vm3738_vm3, %v3654_v28, %v3770_v23  ;;  %v6917_v58 = vor.u32 %v7304_v56, %v6914_v48  ;;  %v5770_v56 = vsel %vm3599_vm0, %v5719_v35, 0.0 }
 0x515   : > { %v9837_v41 = vpop.eup %7633  ;;  %vm3139_vm8 = vweird.f32 %v9815_v42  ;;  %v3143_v23 = vand.u32 2147483647, %v9815_v42  ;;  %vm3154_vm10 = vweird.f32 %v9761_v38 }
 0x516   : > { %v9853_v24 = vpop.eup %7635  ;;  %v3135_v46 = vmul.f32 %v9837_v41, %v9815_v42  ;;  %v3112_v45 = vsel %vm9849_vm15, %v9811_v15, %v3108_v11  ;;  %v6861_v15 = vor.u32 %v7290_v47, %v6858_v52  ;;  %v6925_v11 = vor.u32 %v7306_v49, %v6922_v30  ;;  %v9875_v22 = vpop.xlane.xlu0 %2978 }
 0x517   : > { %v3655_v31 = vpop.f32.mrf.mxu1  ;;  %v3150_v55 = vmul.f32 %v9853_v24, %v9761_v38  ;;  %7637 = vrcp.f32 %v9875_v22  ;;  %vm3140_vm6 = vweird.f32 %v9837_v41  ;;  %vm3155_vm7 = vweird.f32 %v9853_v24 }
 0x518   : > { %v3656_v54 = vadd.f32 %v3655_v31, %v9557_v13  ;;  %v7288_v31 = vld [vmem:[#allocation13 + $0x4] sm:$0xf]  ;;  %v3136_v26 = vsub.f32 1.0, %v3135_v46  ;;  %4136 = vmatpush.bf16.msrb.mxu1 %v6861_v15  ;;  %4185 = vmatpush.bf16.msrb.mxu2 %v6925_v11  ;;  %7639 = vrcp.f32 %v9804_v14  ;;  %v3160_v52 = vand.u32 2147483648, %v9761_v38  ;;  %vm9909_vm9 = vmor %vm3139_vm8, %vm3140_vm6 }
 0x519   : > { %v5713_v43 = vpop.permute.xlu1 %5712  ;;  %v6853_v5 = vor.u32 %v7288_v31, %v6850_v10  ;;  %v3151_v34 = vsub.f32 1.0, %v3150_v55  ;;  %v5725_v10 = vpop.permute.xlu2 %5724  ;;  %v3158_v30 = vand.u32 2147483647, %v9761_v38  ;;  %vm9920_vm11 = vmor %vm3154_vm10, %vm3155_vm7  ;;  %v3571_v15 = vadd.f32 %v9782_v2, %v9567_v40  ;;  %v7775_v2 = vld [vmem:[%s11697_s18] sm:$0x3] }
 0x51a   : > { %vm3740_vm4 = vcmp.ge.f32.partialorder %v3656_v54, 0.0  ;;  %v3772_v16 = vmul.f32 0.01, %v3656_v54  ;;  %v5761_v19 = vsel %vm3599_vm0, %v5713_v43, 0.0  ;;  %v3117_v43 = vsel %vm3114_vm5, %v3116_v62, %v3112_v45 }
 0x51b   : > { %5762 = vadd.xlane.f32.xlu1 %v5761_v19  ;;  %v3132_v19 = vsel %vm9845_vm14, %v3131_v4, %v3127_v12  ;;  %v9883_v9 = vmul.f32 %v9625_v27, %v3117_v43  ;;  %v3137_v28 = vmul.f32 %v9837_v41, %v3136_v26  ;;  %v3152_v55 = vmul.f32 %v9853_v24, %v3151_v34  ;;  %v6920_v26 = vld [vmem:[#allocation13 + $0x90] sm:$0xf] }
 0x51c   : > { %v3804_v63 = vsel %vm3740_vm4, %v3656_v54, %v3772_v16  ;;  %v3684_v16 = vpop.f32.mrf.mxu2  ;;  %4137 = vmatpush.bf16.msrb.mxu1 %v6853_v5  ;;  %4186 = vmatpush.bf16.msrb.mxu2 %v6917_v58  ;;  %v3146_v11 = vor.u32 1.1754944e-38, %v3145_v59  ;;  %v5779_v38 = vsel %vm3599_vm0, %v5725_v10, 0.0  ;;  %vm3144_vm12 = vcmp.eq.f32.partialorder %v3143_v23, 8.507059e+37 }
 0x51d   : > { %v9877_v0 = vpack.c.bf16 %v3804_v63, %v3802_v18  ;;  %11717 = vst [vmem:[#allocation54_spill] sm:$0xff] %v9883_v9  ;;  %v9888_v63 = vmul.f32 %v9532_v61, %v3132_v19  ;;  %v3138_v27 = vadd.f32 %v9837_v41, %v3137_v28  ;;  %v7307_v61 = vld [vmem:[#allocation13 + $0x94] sm:$0xf0]  ;;  %v9897_v32 = vpop.eup %7637  ;;  %v3153_v35 = vadd.f32 %v9853_v24, %v3152_v55 }
 0x51e   : > { %v6921_v62 = vor.u32 %v7307_v61, %v6920_v26  ;;  %v9904_v47 = vpop.eup %7639  ;;  %v3180_v46 = vmul.f32 %v9897_v32, %v9875_v22  ;;  %v3161_v18 = vor.u32 1.1754944e-38, %v3160_v52  ;;  %vm3159_vm13 = vcmp.eq.f32.partialorder %v3158_v30, 8.507059e+37  ;;  %v7305_v52 = vld [vmem:[#allocation13 + $0x84] sm:$0xf0] }
 0x51f   : > { %4060 = vmatmul.bf16.gmra.mxu3 %v9877_v0  ;;  %11718 = vst [vmem:[#allocation55_spill] sm:$0xff] %v9888_v63  ;;  %v3228_v12 = vpack.c.bf16 %v9888_v63, %v9883_v9  ;;  %v3142_v42 = vsel %vm9909_vm9, %v9837_v41, %v3138_v27  ;;  %v3165_v4 = vmul.f32 %v9904_v47, %v9804_v14  ;;  %v9936_v19 = vperm.slane %v7775_v2, 1 }
 0x520   : > { %4087 = vmatpush.bf16.msrb.mxu0 %v6921_v62  ;;  %v3157_v41 = vsel %vm9920_vm11, %v9853_v24, %v3153_v35  ;;  %v3147_v5 = vsel %vm3144_vm12, %v3146_v11, %v3142_v42  ;;  %v3181_v58 = vsub.f32 1.0, %v3180_v46  ;;  %7641 = vrcp.f32 %v9818_v29 }
 0x521   : > { %v3162_v34 = vsel %vm3159_vm13, %v3161_v18, %v3157_v41  ;;  %v3166_v28 = vsub.f32 1.0, %v3165_v4  ;;  %v9941_v24 = vmul.f32 %v9637_v1, %v3147_v5  ;;  %v3685_v55 = vadd.f32 %v3684_v16, %v9936_v19  ;;  %v5721_v62 = vpop.permute.xlu1 %5720 }
 0x522   : > { %v9947_v27 = vmul.f32 %v9561_v39, %v3162_v34  ;;  %v3683_v26 = vadd.f32 %v9839_v25, %v9936_v19  ;;  %7643 = vrcp.f32 %v9790_v44  ;;  %vm3185_vm15 = vweird.f32 %v9897_v32  ;;  %v6912_v25 = vld [vmem:[#allocation13 + $0x80] sm:$0xf] }
 0x523   : > { %5771 = vadd.xlane.f32.xlu1 %v5770_v56  ;;  %v5731_v56 = vpop.permute.xlu2 %5730  ;;  %11723 = vst [vmem:[#allocation56_spill] sm:$0xff] %v9941_v24  ;;  %v3167_v16 = vmul.f32 %v9904_v47, %v3166_v28  ;;  %v3757_v39 = vmul.f32 0.01, %v3685_v55  ;;  %vm3725_vm14 = vcmp.ge.f32.partialorder %v3685_v55, 0.0  ;;  %v3190_v46 = vand.u32 2147483648, %v9875_v22 }
 0x524   : > { %3328 = vmatmul.bf16.gmra.mxu0 %v3228_v12  ;;  %v9906_v54 = vpop.f32.mrf.mxu2  ;;  %v3182_v12 = vmul.f32 %v9897_v32, %v3181_v58  ;;  %11724 = vst [vmem:[#allocation57_spill] sm:$0xff] %v9947_v27  ;;  %v5788_v59 = vsel %vm3599_vm0, %v5731_v56, 0.0  ;;  %v3229_v35 = vpack.c.bf16 %v9947_v27, %v9941_v24  ;;  %v3755_v30 = vmul.f32 0.01, %v3683_v26 }
 0x525   : > { %v3168_v42 = vadd.f32 %v9904_v47, %v3167_v16  ;;  %vm3170_vm1 = vweird.f32 %v9904_v47  ;;  %vm3184_vm2 = vweird.f32 %v9875_v22  ;;  %v3188_v31 = vand.u32 2147483647, %v9875_v22 }
 0x526   : > { %v3183_v23 = vadd.f32 %v9897_v32, %v3182_v12  ;;  %v9959_v49 = vpop.eup %7641  ;;  %vm3723_vm3 = vcmp.ge.f32.partialorder %v3683_v26, 0.0  ;;  %v3789_v11 = vsel %vm3725_vm14, %v3685_v55, %v3757_v39  ;;  %vm9972_vm4 = vmor %vm3184_vm2, %vm3185_vm15  ;;  %vm3169_vm5 = vweird.f32 %v9804_v14 }
 0x527   : > { %v3173_v4 = vand.u32 2147483647, %v9804_v14  ;;  %v3195_v22 = vmul.f32 %v9959_v49, %v9818_v29  ;;  %vm9987_vm6 = vmor %vm3169_vm5, %vm3170_vm1  ;;  %v3191_v58 = vor.u32 1.1754944e-38, %v3190_v46  ;;  %v5773_v2 = vsel %vm3599_vm0, %v5721_v62, 0.0 }
 0x528   : > { %v3187_v18 = vsel %vm9972_vm4, %v9897_v32, %v3183_v23  ;;  %v3787_v34 = vsel %vm3723_vm3, %v3683_v26, %v3755_v30  ;;  %vm3189_vm7 = vcmp.eq.f32.partialorder %v3188_v31, 8.507059e+37  ;;  %v3172_v32 = vsel %vm9987_vm6, %v9904_v47, %v3168_v42 }
 0x529   : > { %v3540_v45 = vpop.permute.xlu0 %3539  ;;  %v9999_v56 = vpack.c.bf16 %v3789_v11, %v3787_v34  ;;  %v3192_v12 = vsel %vm3189_vm7, %v3191_v58, %v3187_v18  ;;  %vm3174_vm8 = vcmp.eq.f32.partialorder %v3173_v4, 8.507059e+37  ;;  %v3688_v23 = vadd.f32 %v9906_v54, %v9936_v19 }
 0x52a   : > { %v3572_v48 = vadd.f32 %v3540_v45, %v9653_v37  ;;  %v6913_v45 = vor.u32 %v7305_v52, %v6912_v25  ;;  %v10004_v16 = vmul.f32 %v9650_v20, %v3192_v12  ;;  %v10015_v52 = vpop.f32.mrf.mxu0  ;;  %vm3200_vm9 = vweird.f32 %v9959_v49 }
 0x52b   : > { %5780 = vadd.xlane.f32.xlu1 %v5779_v38  ;;  %v3759_v54 = vmul.f32 0.01, %v3688_v23  ;;  %vm3199_vm12 = vweird.f32 %v9818_v29  ;;  %v3203_v31 = vand.u32 2147483647, %v9818_v29  ;;  %vm3727_vm13 = vcmp.ge.f32.partialorder %v3688_v23, 0.0 }
 0x52c   : > { %v3580_v43 = vpack.c.bf16 %v3572_v48, %v3571_v15  ;;  %v3689_v61 = vpop.f32.mrf.mxu2  ;;  %v9966_v15 = vpop.eup %7643  ;;  %v3175_v48 = vand.u32 2147483648, %v9804_v14  ;;  %4088 = vmatpush.bf16.msrb.mxu0 %v6913_v45  ;;  %11729 = vst [vmem:[#allocation58_spill] sm:$0xff] %v10004_v16  ;;  %v3205_v45 = vand.u32 2147483648, %v9818_v29  ;;  %vm10029_vm14 = vmor %vm3199_vm12, %vm3200_vm9  ;;  %vm3214_vm15 = vweird.f32 %v9790_v44 }
 0x52d   : > { %v3210_v28 = vmul.f32 %v9966_v15, %v9790_v44  ;;  %v3690_v62 = vadd.f32 %v3689_v61, %v9936_v19  ;;  %vm3215_vm11 = vweird.f32 %v9966_v15  ;;  %v3218_v4 = vand.u32 2147483647, %v9790_v44 }
 0x52e   : > { %6837 = vmatmul.msk.bf16.gmra.mxu1 %vm3599_vm0, %v3580_v43  ;;  %6845 = vmatmul.msk.bf16.gmra.mxu2 %vm3599_vm0, %v3580_v43  ;;  %v3176_v55 = vor.u32 1.1754944e-38, %v3175_v48  ;;  %v3220_v48 = vand.u32 2147483648, %v9790_v44  ;;  %vm10038_vm1 = vmor %vm3214_vm15, %vm3215_vm11  ;;  %v3206_v5 = vor.u32 1.1754944e-38, %v3205_v45  ;;  %vm3204_vm2 = vcmp.eq.f32.partialorder %v3203_v31, 8.507059e+37  ;;  %v7351_v45 = vld [vmem:[#allocation14 + $0xf4] sm:$0xf0] }
 0x52f   : > { %vm3729_vm10 = vcmp.ge.f32.partialorder %v3690_v62, 0.0  ;;  %v3791_v44 = vsel %vm3727_vm13, %v3688_v23, %v3759_v54  ;;  %vm3219_vm3 = vcmp.eq.f32.partialorder %v3218_v4, 8.507059e+37  ;;  %v7096_v54 = vld [vmem:[#allocation14 + $0xf0] sm:$0xf] }
 0x530   : > { %v3177_v26 = vsel %vm3174_vm8, %v3176_v55, %v3172_v32  ;;  %v7097_v31 = vor.u32 %v7351_v45, %v7096_v54 }
 0x531   : > { %v5715_v10 = vpop.permute.xlu0 %5714  ;;  %v10009_v39 = vmul.f32 %v9608_v60, %v3177_v26  ;;  %v3761_v60 = vmul.f32 0.01, %v3690_v62 }
 0x532   : > { %v5764_v1 = vsel %vm3599_vm0, %v5715_v10, 0.0  ;;  %v3196_v10 = vsub.f32 1.0, %v3195_v22  ;;  %v10052_v55 = vpop.f32.mrf.mxu0  ;;  %4587 = vmatpush.bf16.msra.mxu0 %v7097_v31 }
 0x533   : > { %5789 = vadd.xlane.f32.xlu1 %v5788_v59  ;;  %5765 = vadd.xlane.f32.xlu0 %v5764_v1  ;;  %v5727_v59 = vpop.permute.xlu1 %5726  ;;  %v3211_v1 = vsub.f32 1.0, %v3210_v28  ;;  %11730 = vst [vmem:[#allocation59_spill] sm:$0xff] %v10009_v39  ;;  %v3230_v61 = vpack.c.bf16 %v10004_v16, %v10009_v39 }
 0x534   : > { %3333 = vmatmul.bf16.gmra.mxu0 %v3229_v35  ;;  %v9983_v43 = vpop.f32.mrf.mxu2  ;;  %v3197_v47 = vmul.f32 %v9959_v49, %v3196_v10 }
 0x535   : > { %v3212_v20 = vmul.f32 %v9966_v15, %v3211_v1  ;;  %v3693_v26 = vadd.f32 %v9983_v43, %v9936_v19 }
 0x536   : > { %v3198_v46 = vadd.f32 %v9959_v49, %v3197_v47 }
 0x537   : > { %v3213_v42 = vadd.f32 %v9966_v15, %v3212_v20  ;;  %v3763_v23 = vmul.f32 0.01, %v3693_v26  ;;  %v7350_v20 = vld [vmem:[#allocation14 + $0xf4] sm:$0xf]  ;;  %vm3731_vm5 = vcmp.ge.f32.partialorder %v3693_v26, 0.0 }
 0x538   : > { %v3202_v18 = vsel %vm10029_vm14, %v9959_v49, %v3198_v46  ;;  %v3221_v49 = vor.u32 1.1754944e-38, %v3220_v48  ;;  %v7034_v46 = vld [vmem:[#allocation14 + $0x78] sm:$0xf0] }
 0x539   : > { %v5717_v41 = vpop.permute.xlu0 %5716  ;;  %v3207_v32 = vsel %vm3204_vm2, %v3206_v5, %v3202_v18  ;;  %v3795_v38 = vsel %vm3731_vm5, %v3693_v26, %v3763_v23  ;;  %v7024_v5 = vld [vmem:[#allocation14 + $0x60] sm:$0xf] }
 0x53a   : > { %v5767_v14 = vsel %vm3599_vm0, %v5717_v41, 0.0  ;;  %v3793_v41 = vsel %vm3729_vm10, %v3690_v62, %v3761_v60  ;;  %v10057_v10 = vmul.f32 %v9618_v3, %v3207_v32 }
 0x53b   : > { %5376 = vmax.xlane.f32.xlu1 %v9549_v21  ;;  %5774 = vadd.xlane.f32.xlu0 %v5773_v2  ;;  %v5733_v11 = vpop.permute.xlu1 %5732  ;;  %v10050_v28 = vpack.c.bf16 %v3793_v41, %v3791_v44  ;;  %v7333_v44 = vld [vmem:[#allocation14 + $0x64] sm:$0xf0] }
 0x53c   : > { %5768 = vadd.xlane.f32.xlu2 %v5767_v14  ;;  %v3694_v30 = vpop.f32.mrf.mxu2  ;;  %v5791_v58 = vsel %vm3599_vm0, %v5733_v11, 0.0  ;;  %v3217_v14 = vsel %vm10038_vm1, %v9966_v15, %v3213_v42  ;;  %11735 = vst [vmem:[#allocation60_spill] sm:$0xff] %v10057_v10  ;;  %v7335_v15 = vld [vmem:[#allocation14 + $0x74] sm:$0xf0] }
 0x53d   : > { %v3222_v12 = vsel %vm3219_vm3, %v3221_v49, %v3217_v14  ;;  %v3695_v1 = vadd.f32 %v3694_v30, %v9936_v19  ;;  %v7334_v30 = vld [vmem:[#allocation14 + $0x74] sm:$0xf]  ;;  %v7348_v14 = vld [vmem:[#allocation14 + $0xe4] sm:$0xf]  ;;  %v7090_v49 = vld [vmem:[#allocation14 + $0xe8] sm:$0xf0] }
 0x53e   : > { %4138 = vmatmul.bf16.vlgmr.msrb.gmra.mxu1 %v9565_v57  ;;  %4187 = vmatmul.bf16.vlgmr.msrb.gmra.mxu2 %v9999_v56  ;;  %v5782_v57 = vsel %vm3599_vm0, %v5727_v59, 0.0  ;;  %v7032_v59 = vld [vmem:[#allocation14 + $0x70] sm:$0xf]  ;;  %v10063_v47 = vmul.f32 %v9596_v33, %v3222_v12  ;;  %v7037_v42 = vor.u32 %v7334_v30, %v7034_v46  ;;  %v7025_v12 = vor.u32 %v7333_v44, %v7024_v5  ;;  %v11739_v46 = vld [vmem:[#allocation33_spill] sm:$0xff]  ;;  %v11740_v5 = vld [vmem:[#allocation48_spill] sm:$0xff] }
 0x53f   : > { %vm3733_vm4 = vcmp.ge.f32.partialorder %v3695_v1, 0.0  ;;  %v3765_v43 = vmul.f32 0.01, %v3695_v1 }
 0x540   : > { %11736 = vst [vmem:[#allocation61_spill] sm:$0xff] %v10063_v47  ;;  %v3231_v3 = vpack.c.bf16 %v10063_v47, %v10057_v10  ;;  %4636 = vmatpush.bf16.msra.mxu1 %v7037_v42 }
 0x541   : > { %v5723_v35 = vpop.permute.xlu0 %5722  ;;  %v3797_v11 = vsel %vm3733_vm4, %v3695_v1, %v3765_v43  ;;  %v7332_v43 = vld [vmem:[#allocation14 + $0x64] sm:$0xf] }
 0x542   : > { %v5776_v25 = vsel %vm3599_vm0, %v5723_v35, 0.0  ;;  %v7033_v35 = vor.u32 %v7335_v15, %v7032_v59  ;;  %v10077_v4 = vpack.c.bf16 %v3797_v11, %v3795_v38  ;;  %v7093_v59 = vor.u32 %v7348_v14, %v7090_v49  ;;  %v10088_v15 = vld [vmem:[%s11737_s30] ss:$0 sm:$0xff]  ;;  %s6014_s30 = sshll.u32 %s10439_s11, 4  ;;  %s6015_s30 = int_to_ptr.vmem [resolvable:$true] %s6014_s30 }
 0x543   : > { %5378 = vmax.xlane.f32.xlu1 %v9730_v6  ;;  %5783 = vadd.xlane.f32.xlu0 %v5782_v57 }
 0x544   : > { %5777 = vadd.xlane.f32.xlu2 %v5776_v25  ;;  %3338 = vmatmul.bf16.gmra.mxu0 %v3230_v61  ;;  %v10048_v34 = vpop.f32.mrf.mxu2  ;;  %v7098_v61 = vld [vmem:[#allocation14 + $0xf8] sm:$0xf0] }
 0x545   : > { %4538 = vmatpush.bf16.msra.mxu3 %v7033_v35  ;;  %v7101_v60 = vor.u32 %v7350_v20, %v7098_v61  ;;  %v3698_v1 = vadd.f32 %v10048_v34, %v9936_v19  ;;  %v7088_v34 = vld [vmem:[#allocation14 + $0xe0] sm:$0xf] }
 0x547   : > { %4685 = vmatpush.bf16.msra.mxu2 %v7101_v60  ;;  %v3767_v20 = vmul.f32 0.01, %v3698_v1  ;;  %vm3735_vm9 = vcmp.ge.f32.partialorder %v3698_v1, 0.0 }
 0x549   : > { %v5729_v22 = vpop.permute.xlu0 %5728  ;;  %4539 = vmatpush.bf16.msra.mxu3 %v7025_v12 }
 0x54a   : > { %v5785_v2 = vsel %vm3599_vm0, %v5729_v22, 0.0 }
 0x54b   : > { %5380 = vmax.xlane.f32.xlu1 %v9733_v51  ;;  %5792 = vadd.xlane.f32.xlu0 %v5791_v58  ;;  %v10070_v57 = vpop.f32.mrf.mxu0 }
 0x54c   : > { %5786 = vadd.xlane.f32.xlu2 %v5785_v2  ;;  %v3699_v25 = vpop.f32.mrf.mxu2  ;;  %4686 = vmatpush.bf16.msra.mxu2 %v7093_v59  ;;  %v3315_v38 = vadd.f32 %v10088_v15, %v10070_v57 }
 0x54d   : > { %v3700_v58 = vadd.f32 %v3699_v25, %v9936_v19  ;;  %v7349_v25 = vld [vmem:[#allocation14 + $0xe4] sm:$0xf0] }
 0x54e   : > { %4143 = vmatmul.bf16.gmra.mxu1 %v9581_v17  ;;  %4192 = vmatmul.bf16.gmra.mxu2 %v10050_v28  ;;  %v7089_v30 = vor.u32 %v7349_v25, %v7088_v34  ;;  %v7331_v34 = vld [vmem:[#allocation14 + $0x54] sm:$0xf0]  ;;  %v7346_v25 = vld [vmem:[#allocation14 + $0xd4] sm:$0xf] }
 0x54f   : > { %vm3737_vm8 = vcmp.ge.f32.partialorder %v3700_v58, 0.0 }
 0x550   : > { %4588 = vmatpush.bf16.msra.mxu0 %v7089_v30 }
 0x551   : > { %v5735_v62 = vpop.permute.xlu0 %5734 }
 0x552   : > { %v5794_v17 = vsel %vm3599_vm0, %v5735_v62, 0.0  ;;  %v11738_v62 = vld [vmem:[#allocation53_spill] sm:$0xff] }
 0x553   : > { %5382 = vmax.xlane.f32.xlu1 %v9779_v7  ;;  %5374 = vmax.xlane.f32.xlu0 %v9546_v8  ;;  %v3316_v2 = vpop.f32.mrf.mxu0 }
 0x554   : > { %5795 = vadd.xlane.f32.xlu2 %v5794_v17  ;;  %3343 = vmatmul.bf16.gmra.mxu0 %v3231_v3  ;;  %v10079_v41 = vpop.f32.mrf.mxu2  ;;  %v3769_v17 = vmul.f32 0.01, %v3700_v58  ;;  %v3310_v3 = vadd.f32 %v10088_v15, %v10015_v52  ;;  %v3799_v52 = vsel %vm3735_vm9, %v3698_v1, %v3767_v20 }
 0x555   : > { %v3658_v33 = vpop.f32.mrf.mxu1  ;;  %v3703_v1 = vadd.f32 %v10079_v41, %v9936_v19 }
 0x556   : > { %v3659_v48 = vadd.f32 %v3658_v33, %v9557_v13  ;;  %v7026_v33 = vld [vmem:[#allocation14 + $0x68] sm:$0xf0]  ;;  %v5550_v54 = vsub.f32 %v3310_v3, %v11739_v46  ;;  %v3801_v42 = vsel %vm3737_vm8, %v3700_v58, %v3769_v17  ;;  %v3312_v58 = vadd.f32 %v10088_v15, %v10052_v55 }
 0x557   : > { %v7029_v61 = vor.u32 %v7332_v43, %v7026_v33  ;;  %v10107_v31 = vpack.c.bf16 %v3801_v42, %v3799_v52  ;;  %v11743_v3 = vld [vmem:[#allocation34_spill] sm:$0xff]  ;;  %v7016_v33 = vld [vmem:[#allocation14 + $0x50] sm:$0xf]  ;;  %vm3739_vm13 = vcmp.ge.f32.partialorder %v3703_v1, 0.0 }
 0x558   : > { %vm3742_vm6 = vcmp.ge.f32.partialorder %v3659_v48, 0.0  ;;  %v3774_v18 = vmul.f32 0.01, %v3659_v48  ;;  %v7017_v30 = vor.u32 %v7331_v34, %v7016_v33 }
 0x559   : > { %4637 = vmatpush.bf16.msra.mxu1 %v7029_v61 }
 0x55a   : > { %4540 = vmatpush.bf16.msra.mxu3 %v7017_v30  ;;  %v10147_v30 = vpop.permute.xlu1 %5738 }
 0x55b   : > { %5384 = vmax.xlane.f32.xlu1 %v9775_v50  ;;  %5390 = vmax.xlane.f32.xlu0 %v9883_v9  ;;  %v3319_v45 = vpop.f32.mrf.mxu0 }
 0x55c   : > { %5386 = vmax.xlane.f32.xlu2 %v9821_v53  ;;  %v3704_v60 = vpop.f32.mrf.mxu2  ;;  %v3320_v42 = vadd.f32 %v10088_v15, %v3319_v45 }
 0x55d   : > { %v3660_v22 = vpop.f32.mrf.mxu1  ;;  %v3705_v44 = vadd.f32 %v3704_v60, %v9936_v19  ;;  %v7082_v60 = vld [vmem:[#allocation14 + $0xd8] sm:$0xf0] }
 0x55e   : > { %v3661_v29 = vadd.f32 %v3660_v22, %v9557_v13  ;;  %4148 = vmatmul.bf16.gmra.mxu1 %v9593_v36  ;;  %4197 = vmatmul.bf16.gmra.mxu2 %v10077_v4  ;;  %v3806_v36 = vsel %vm3742_vm6, %v3659_v48, %v3774_v18  ;;  %v5566_v48 = vmul.f32 %v5550_v54, %v5550_v54  ;;  %v3771_v54 = vmul.f32 0.01, %v3703_v1 }
 0x55f   : > { %v3317_v22 = vadd.f32 %v10088_v15, %v3316_v2  ;;  %vm3741_vm12 = vcmp.ge.f32.partialorder %v3705_v44, 0.0  ;;  %v3773_v43 = vmul.f32 0.01, %v3705_v44  ;;  %v7085_v52 = vor.u32 %v7346_v25, %v7082_v60 }
 0x560   : > { %vm3744_vm7 = vcmp.ge.f32.partialorder %v3661_v29, 0.0  ;;  %v3776_v32 = vmul.f32 0.01, %v3661_v29  ;;  %v5582_v57 = vsel %vm3599_vm0, %v5566_v48, 0.0  ;;  %v7018_v48 = vld [vmem:[#allocation14 + $0x58] sm:$0xf0] }
 0x561   : > { %4687 = vmatpush.bf16.msra.mxu2 %v7085_v52  ;;  %v7328_v52 = vld [vmem:[#allocation14 + $0x44] sm:$0xf] }
 0x562   : > { %v3808_v26 = vsel %vm3744_vm7, %v3661_v29, %v3776_v32  ;;  %v11741_v32 = vld [vmem:[#allocation35_spill] sm:$0xff] }
 0x563   : > { %5388 = vmax.xlane.f32.xlu1 %v11738_v62  ;;  %5396 = vmax.xlane.f32.xlu0 %v9947_v27  ;;  %v10095_v35 = vpack.c.bf16 %v3808_v26, %v3806_v36  ;;  %v5552_v2 = vsub.f32 %v3315_v38, %v11741_v32  ;;  %v11742_v36 = vld [vmem:[#allocation36_spill] sm:$0xff]  ;;  %v3321_v17 = vpop.f32.mrf.mxu0  ;;  %v3805_v38 = vsel %vm3741_vm12, %v3705_v44, %v3773_v43 }
 0x564   : > { %5392 = vmax.xlane.f32.xlu2 %v9888_v63  ;;  %4089 = vmatmul.bf16.vlgmr.msrb.gmra.mxu0 %v9999_v56  ;;  %v3707_v14 = vpop.f32.mrf.mxu2  ;;  %v5553_v26 = vsub.f32 %v3317_v22, %v11742_v36  ;;  %v3322_v41 = vadd.f32 %v10088_v15, %v3321_v17 }
 0x565   : > { %v3663_v23 = vpop.f32.mrf.mxu1  ;;  %4065 = vmatmul.bf16.gmra.mxu3 %v10095_v35  ;;  %v5568_v20 = vmul.f32 %v5552_v2, %v5552_v2  ;;  %v3803_v2 = vsel %vm3739_vm13, %v3703_v1, %v3771_v54  ;;  %v3708_v34 = vadd.f32 %v3707_v14, %v9936_v19  ;;  %v7074_v54 = vld [vmem:[#allocation14 + $0xc8] sm:$0xf0] }
 0x566   : > { %v3664_v56 = vadd.f32 %v3663_v23, %v9557_v13  ;;  %v5551_v23 = vsub.f32 %v3312_v58, %v11743_v3  ;;  %v5569_v61 = vmul.f32 %v5553_v26, %v5553_v26  ;;  %v10138_v44 = vpack.c.bf16 %v3805_v38, %v3803_v2  ;;  %v7010_v14 = vld [vmem:[#allocation14 + $0x48] sm:$0xf0]  ;;  %v7345_v38 = vld [vmem:[#allocation14 + $0xc4] sm:$0xf0] }
 0x567   : > { %vm3743_vm15 = vcmp.ge.f32.partialorder %v3708_v34, 0.0 }
 0x568   : > { %v3778_v18 = vmul.f32 0.01, %v3664_v56  ;;  %vm3746_vm10 = vcmp.ge.f32.partialorder %v3664_v56, 0.0 }
 0x56a   : > { %v3810_v12 = vsel %vm3746_vm10, %v3664_v56, %v3778_v18  ;;  %v5567_v56 = vmul.f32 %v5551_v23, %v5551_v23  ;;  %v5588_v18 = vsel %vm3599_vm0, %v5568_v20, 0.0  ;;  %v7329_v20 = vld [vmem:[#allocation14 + $0x44] sm:$0xf0] }
 0x56b   : > { %5394 = vmax.xlane.f32.xlu1 %v9941_v24  ;;  %5402 = vmax.xlane.f32.xlu0 %v10057_v10 }
 0x56c   : > { %5398 = vmax.xlane.f32.xlu2 %v10009_v39  ;;  %v3709_v22 = vpop.f32.mrf.mxu2 }
 0x56d   : > { %v3665_v11 = vpop.f32.mrf.mxu1  ;;  %v3710_v43 = vadd.f32 %v3709_v22, %v9936_v19 }
 0x56e   : > { %v3666_v29 = vadd.f32 %v3665_v11, %v9557_v13  ;;  %4153 = vmatmul.bf16.gmra.mxu1 %v11740_v5  ;;  %4202 = vmatmul.bf16.gmra.mxu2 %v10107_v31  ;;  %v7330_v11 = vld [vmem:[#allocation14 + $0x54] sm:$0xf]  ;;  %v11744_v5 = vld [vmem:[#allocation37_spill] sm:$0xff] }
 0x56f   : > { %v5555_v58 = vsub.f32 %v3322_v41, %v11744_v5  ;;  %v3777_v25 = vmul.f32 0.01, %v3710_v43  ;;  %vm3745_vm14 = vcmp.ge.f32.partialorder %v3710_v43, 0.0 }
 0x570   : > { %vm3748_vm11 = vcmp.ge.f32.partialorder %v3666_v29, 0.0  ;;  %v3780_v49 = vmul.f32 0.01, %v3666_v29 }
 0x571   : > { %v5571_v17 = vmul.f32 %v5555_v58, %v5555_v58 }
 0x572   : > { %v3812_v59 = vsel %vm3748_vm11, %v3666_v29, %v3780_v49  ;;  %v5591_v29 = vsel %vm3599_vm0, %v5569_v61, 0.0  ;;  %v11745_v49 = vld [vmem:[#allocation38_spill] sm:$0xff]  ;;  %v7344_v61 = vld [vmem:[#allocation14 + $0xc4] sm:$0xf] }
 0x573   : > { %5400 = vmax.xlane.f32.xlu1 %v10004_v16  ;;  %5583 = vadd.xlane.f32.xlu0 %v5582_v57  ;;  %v10124_v55 = vpack.c.bf16 %v3812_v59, %v3810_v12  ;;  %v5554_v45 = vsub.f32 %v3320_v42, %v11745_v49  ;;  %v5585_v57 = vsel %vm3599_vm0, %v5567_v56, 0.0  ;;  %v7080_v12 = vld [vmem:[#allocation14 + $0xd0] sm:$0xf]  ;;  %v7347_v59 = vld [vmem:[#allocation14 + $0xd4] sm:$0xf0]  ;;  %v5597_v33 = vsel %vm3599_vm0, %v5571_v17, 0.0 }
 0x574   : > { %5404 = vmax.xlane.f32.xlu2 %v10063_v47  ;;  %4094 = vmatmul.bf16.gmra.mxu0 %v10050_v28  ;;  %v7021_v28 = vor.u32 %v7330_v11, %v7018_v48  ;;  %v7081_v26 = vor.u32 %v7347_v59, %v7080_v12  ;;  %v3712_v41 = vpop.f32.mrf.mxu2  ;;  %v3775_v42 = vmul.f32 0.01, %v3708_v34  ;;  %v7077_v56 = vor.u32 %v7344_v61, %v7074_v54  ;;  %v7002_v61 = vld [vmem:[#allocation14 + $0x38] sm:$0xf0] }
 0x575   : > { %4070 = vmatmul.bf16.gmra.mxu3 %v10124_v55  ;;  %v5570_v23 = vmul.f32 %v5554_v45, %v5554_v45  ;;  %v7013_v11 = vor.u32 %v7328_v52, %v7010_v14  ;;  %v3809_v48 = vsel %vm3745_vm14, %v3710_v43, %v3777_v25  ;;  %v3713_v2 = vadd.f32 %v3712_v41, %v9936_v19  ;;  %v7327_v43 = vld [vmem:[#allocation14 + $0x34] sm:$0xf0]  ;;  %v7326_v41 = vld [vmem:[#allocation14 + $0x34] sm:$0xf] }
 0x576   : > { %4638 = vmatpush.bf16.msra.mxu1 %v7021_v28  ;;  %4589 = vmatpush.bf16.msra.mxu0 %v7081_v26  ;;  %v3807_v28 = vsel %vm3743_vm15, %v3708_v34, %v3775_v42  ;;  %v11746_v26 = vld [vmem:[#allocation41_spill] sm:$0xff]  ;;  %v7342_v34 = vld [vmem:[#allocation14 + $0xb4] sm:$0xf] }
 0x577   : > { %v5594_v1 = vsel %vm3599_vm0, %v5570_v23, 0.0  ;;  %4688 = vmatpush.bf16.msra.mxu2 %v7077_v56  ;;  %v10149_v22 = vpack.c.bf16 %v3809_v48, %v3807_v28  ;;  %v7000_v23 = vld [vmem:[#allocation14 + $0x30] sm:$0xf]  ;;  %v3779_v25 = vmul.f32 0.01, %v3713_v2  ;;  %vm3747_vm2 = vcmp.ge.f32.partialorder %v3713_v2, 0.0 }
 0x578   : > { %v7343_v48 = vld [vmem:[#allocation14 + $0xb4] sm:$0xf0] }
 0x579   : > { %v3811_v52 = vsel %vm3747_vm2, %v3713_v2, %v3779_v25  ;;  %v11747_v28 = vld [vmem:[#allocation40_spill] sm:$0xff]  ;;  %v6992_v2 = vld [vmem:[#allocation14 + $0x20] sm:$0xf]  ;;  %v7340_v25 = vld [vmem:[#allocation14 + $0xa4] sm:$0xf] }
 0x57a   : > { %4639 = vmatpush.bf16.msra.mxu1 %v7013_v11  ;;  %v7064_v11 = vld [vmem:[#allocation14 + $0xb0] sm:$0xf] }
 0x57b   : > { %5589 = vadd.xlane.f32.xlu1 %v5588_v18  ;;  %5592 = vadd.xlane.f32.xlu0 %v5591_v29 }
 0x57c   : > { %5586 = vadd.xlane.f32.xlu2 %v5585_v57  ;;  %v3714_v29 = vpop.f32.mrf.mxu2 }
 0x57d   : > { %v3715_v45 = vadd.f32 %v3714_v29, %v9936_v19 }
 0x57e   : > { %4158 = vmatmul.bf16.gmra.mxu1 %v9877_v0  ;;  %4207 = vmatmul.bf16.gmra.mxu2 %v10138_v44  ;;  %v7008_v0 = vld [vmem:[#allocation14 + $0x40] sm:$0xf] }
 0x57f   : > { %v7009_v60 = vor.u32 %v7329_v20, %v7008_v0  ;;  %v3781_v59 = vmul.f32 0.01, %v3715_v45  ;;  %vm3749_vm1 = vcmp.ge.f32.partialorder %v3715_v45, 0.0 }
 0x581   : > { %4541 = vmatpush.bf16.msra.mxu3 %v7009_v60  ;;  %v3813_v54 = vsel %vm3749_vm1, %v3715_v45, %v3781_v59  ;;  %v10173_v45 = vpop.permute.xlu2 %5736 }
 0x582   : > { %v10164_v14 = vpack.c.bf16 %v3813_v54, %v3811_v52  ;;  %v6994_v54 = vld [vmem:[#allocation14 + $0x28] sm:$0xf0] }
 0x583   : > { %5598 = vadd.xlane.f32.xlu1 %v5597_v33 }
 0x584   : > { %5595 = vadd.xlane.f32.xlu2 %v5594_v1  ;;  %4099 = vmatmul.bf16.gmra.mxu0 %v10077_v4  ;;  %v7072_v4 = vld [vmem:[#allocation14 + $0xc0] sm:$0xf]  ;;  %v7066_v1 = vld [vmem:[#allocation14 + $0xb8] sm:$0xf0] }
 0x585   : > { %v7073_v18 = vor.u32 %v7345_v38, %v7072_v4  ;;  %v7069_v20 = vor.u32 %v7342_v34, %v7066_v1  ;;  %v7065_v38 = vor.u32 %v7343_v48, %v7064_v11  ;;  %v11751_v11 = vld [vmem:[#allocation46_spill] sm:$0xff] }
 0x587   : > { %4590 = vmatpush.bf16.msra.mxu0 %v7073_v18  ;;  %4689 = vmatpush.bf16.msra.mxu2 %v7069_v20  ;;  %v10167_v18 = vpop.permute.xlu0 %5740 }
 0x589   : > { %v10183_v20 = vpop.xlane.xlu2 %5759 }
 0x58b   : > { %4591 = vmatpush.bf16.msra.mxu0 %v7065_v38 }
 0x58e   : > { %v10151_v58 = vpop.xlane.xlu1 %5762  ;;  %4163 = vmatmul.bf16.gmra.mxu1 %v10095_v35  ;;  %4212 = vmatmul.bf16.gmra.mxu2 %v10149_v22  ;;  %v7001_v35 = vor.u32 %v7327_v43, %v7000_v23 }
 0x590   : > { %4542 = vmatpush.bf16.msra.mxu3 %v7001_v35  ;;  %v11749_v35 = vld [vmem:[#allocation42_spill] sm:$0xff] }
 0x591   : > { %v3324_v57 = vpop.f32.mrf.mxu0 }
 0x592   : > { %v3325_v12 = vadd.f32 %v10088_v15, %v3324_v57 }
 0x594   : > { %v5556_v17 = vsub.f32 %v3325_v12, %v11746_v26  ;;  %4104 = vmatmul.bf16.gmra.mxu0 %v10107_v31  ;;  %v7005_v31 = vor.u32 %v7326_v41, %v7002_v61  ;;  %v7325_v12 = vld [vmem:[#allocation14 + $0x24] sm:$0xf0] }
 0x596   : > { %v10160_v33 = vpop.xlane.xlu1 %5771  ;;  %v5572_v0 = vmul.f32 %v5556_v17, %v5556_v17  ;;  %4640 = vmatpush.bf16.msra.mxu1 %v7005_v31  ;;  %v6993_v17 = vor.u32 %v7325_v12, %v6992_v2  ;;  %v7056_v12 = vld [vmem:[#allocation14 + $0xa0] sm:$0xf] }
 0x598   : > { %v5600_v60 = vsel %vm3599_vm0, %v5572_v0, 0.0  ;;  %4543 = vmatpush.bf16.msra.mxu3 %v6993_v17  ;;  %v7058_v0 = vld [vmem:[#allocation14 + $0xa8] sm:$0xf0] }
 0x599   : > { %v3326_v42 = vpop.f32.mrf.mxu0  ;;  %5601 = vadd.xlane.f32.xlu0 %v5600_v60  ;;  %v7061_v61 = vor.u32 %v7340_v25, %v7058_v0  ;;  %v7324_v60 = vld [vmem:[#allocation14 + $0x24] sm:$0xf] }
 0x59a   : > { %v3327_v56 = vadd.f32 %v10088_v15, %v3326_v42  ;;  %v6997_v42 = vor.u32 %v7324_v60, %v6994_v54  ;;  %v7042_v60 = vld [vmem:[#allocation14 + $0x88] sm:$0xf0] }
 0x59b   : > { %4690 = vmatpush.bf16.msra.mxu2 %v7061_v61  ;;  %v7336_v61 = vld [vmem:[#allocation14 + $0x84] sm:$0xf] }
 0x59c   : > { %v5557_v4 = vsub.f32 %v3327_v56, %v11747_v28  ;;  %4641 = vmatpush.bf16.msra.mxu1 %v6997_v42 }
 0x59e   : > { %v10169_v29 = vpop.xlane.xlu1 %5780  ;;  %4168 = vmatmul.bf16.gmra.mxu1 %v10124_v55  ;;  %4217 = vmatmul.bf16.gmra.mxu2 %v10164_v14  ;;  %v5573_v57 = vmul.f32 %v5557_v4, %v5557_v4 }
 0x59f   : > { %11748 = vst [vmem:[#allocation33_spill] sm:$0xff] %v10169_v29 }
 0x5a0   : > { %v5603_v59 = vsel %vm3599_vm0, %v5573_v57, 0.0 }
 0x5a1   : > { %v3329_v23 = vpop.f32.mrf.mxu0  ;;  %5604 = vadd.xlane.f32.xlu2 %v5603_v59  ;;  %v7341_v59 = vld [vmem:[#allocation14 + $0xa4] sm:$0xf0] }
 0x5a2   : > { %v3330_v43 = vadd.f32 %v10088_v15, %v3329_v23  ;;  %v7057_v23 = vor.u32 %v7341_v59, %v7056_v12  ;;  %v7323_v59 = vld [vmem:[#allocation14 + $0x14] sm:$0xf0] }
 0x5a4   : > { %v5558_v34 = vsub.f32 %v3330_v43, %v11749_v35  ;;  %4109 = vmatmul.bf16.gmra.mxu0 %v10138_v44  ;;  %v7338_v43 = vld [vmem:[#allocation14 + $0x94] sm:$0xf] }
 0x5a5   : > { %4592 = vmatpush.bf16.msra.mxu0 %v7057_v23 }
 0x5a6   : > { %v10179_v55 = vpop.xlane.xlu1 %5789  ;;  %v10181_v1 = vpop.xlane.xlu0 %5765  ;;  %v5574_v41 = vmul.f32 %v5558_v34, %v5558_v34  ;;  %v7050_v34 = vld [vmem:[#allocation14 + $0x98] sm:$0xf0] }
 0x5a7   : > { %11750 = vst [vmem:[#allocation48_spill] sm:$0xff] %v10179_v55 }
 0x5a8   : > { %v5606_v31 = vsel %vm3599_vm0, %v5574_v41, 0.0  ;;  %v7053_v41 = vor.u32 %v7338_v43, %v7050_v34 }
 0x5a9   : > { %v3331_v56 = vpop.f32.mrf.mxu0  ;;  %5607 = vadd.xlane.f32.xlu1 %v5606_v31 }
 0x5aa   : > { %v3332_v44 = vadd.f32 %v10088_v15, %v3331_v56  ;;  %4691 = vmatpush.bf16.msra.mxu2 %v7053_v41  ;;  %v7045_v56 = vor.u32 %v7336_v61, %v7042_v60 }
 0x5ab   : > { %v3668_v52 = vpop.f32.mrf.mxu1 }
 0x5ac   : > { %v5559_v48 = vsub.f32 %v3332_v44, %v11751_v11  ;;  %v3669_v17 = vadd.f32 %v3668_v52, %v9557_v13 }
 0x5ae   : > { %v10188_v4 = vpop.xlane.xlu1 %5376  ;;  %v10190_v38 = vpop.xlane.xlu0 %5774  ;;  %v5575_v2 = vmul.f32 %v5559_v48, %v5559_v48  ;;  %v3782_v44 = vmul.f32 0.01, %v3669_v17  ;;  %vm3750_vm3 = vcmp.ge.f32.partialorder %v3669_v17, 0.0  ;;  %v11753_v48 = vld [vmem:[#allocation39_spill] sm:$0xff]  ;;  %4692 = vmatpush.bf16.msra.mxu2 %v7045_v56 }
 0x5af   : > { %11752 = vst [vmem:[#allocation35_spill] sm:$0xff] %v10190_v38  ;;  %v10192_v57 = vpop.xlane.xlu2 %5768 }
 0x5b0   : > { %v5609_v0 = vsel %vm3599_vm0, %v5575_v2, 0.0  ;;  %v6984_v2 = vld [vmem:[#allocation14 + $0x10] sm:$0xf] }
 0x5b1   : > { %v3717_v25 = vpop.f32.mrf.mxu2  ;;  %v3334_v54 = vpop.f32.mrf.mxu0  ;;  %5610 = vadd.xlane.f32.xlu0 %v5609_v0  ;;  %v6985_v41 = vor.u32 %v7323_v59, %v6984_v2  ;;  %v11756_v59 = vld [vmem:[#allocation43_spill] sm:$0xff] }
 0x5b2   : > { %v3335_v31 = vadd.f32 %v10088_v15, %v3334_v54  ;;  %v3718_v43 = vadd.f32 %v3717_v25, %v9936_v19 }
 0x5b3   : > { %v3670_v42 = vpop.f32.mrf.mxu1  ;;  %4544 = vmatpush.bf16.msra.mxu3 %v6985_v41 }
 0x5b4   : > { %v3671_v52 = vadd.f32 %v3670_v42, %v9557_v13  ;;  %v5560_v12 = vsub.f32 %v3335_v31, %v11753_v48  ;;  %4114 = vmatmul.bf16.gmra.mxu0 %v10149_v22  ;;  %v3814_v13 = vsel %vm3750_vm3, %v3669_v17, %v3782_v44  ;;  %v7322_v31 = vld [vmem:[#allocation14 + $0x14] sm:$0xf]  ;;  %v6986_v22 = vld [vmem:[#allocation14 + $0x18] sm:$0xf0]  ;;  %v3783_v10 = vmul.f32 0.01, %v3718_v43 }
 0x5b5   : > { %v6989_v47 = vor.u32 %v7322_v31, %v6986_v22  ;;  %vm3751_vm5 = vcmp.ge.f32.partialorder %v3718_v43, 0.0  ;;  %v7048_v17 = vld [vmem:[#allocation14 + $0x90] sm:$0xf]  ;;  %v7339_v44 = vld [vmem:[#allocation14 + $0x94] sm:$0xf0] }
 0x5b6   : > { %vm3752_vm4 = vcmp.ge.f32.partialorder %v3671_v52, 0.0  ;;  %v3784_v34 = vmul.f32 0.01, %v3671_v52  ;;  %v10201_v23 = vpop.xlane.xlu1 %5378  ;;  %v10203_v0 = vpop.xlane.xlu0 %5783  ;;  %v5576_v60 = vmul.f32 %v5560_v12, %v5560_v12  ;;  %v7049_v12 = vor.u32 %v7339_v44, %v7048_v17 }
 0x5b7   : > { %11754 = vst [vmem:[#allocation36_spill] sm:$0xff] %v10203_v0  ;;  %v10205_v61 = vpop.xlane.xlu2 %5777  ;;  %4642 = vmatpush.bf16.msra.mxu1 %v6989_v47 }
 0x5b8   : > { %11755 = vst [vmem:[#allocation34_spill] sm:$0xff] %v10205_v61  ;;  %v3816_v54 = vsel %vm3752_vm4, %v3671_v52, %v3784_v34  ;;  %v5612_v16 = vsel %vm3599_vm0, %v5576_v60, 0.0  ;;  %4593 = vmatpush.bf16.msra.mxu0 %v7049_v12 }
 0x5b9   : > { %v3719_v42 = vpop.f32.mrf.mxu2  ;;  %v3832_v25 = vpack.c.bf16 %v3816_v54, %v3814_v13  ;;  %v3336_v39 = vpop.f32.mrf.mxu0  ;;  %5613 = vadd.xlane.f32.xlu2 %v5612_v16 }
 0x5ba   : > { %v3720_v27 = vadd.f32 %v3719_v42, %v9936_v19  ;;  %v3337_v2 = vadd.f32 %v10088_v15, %v3336_v39  ;;  %v3815_v19 = vsel %vm3751_vm5, %v3718_v43, %v3783_v10  ;;  %v10218_v39 = vld [vmem:[%s11758_s4] sm:$0x3] }
 0x5bb   : > { %4075 = vmatmul.bf16.gmra.mxu3 %v3832_v25  ;;  %v4139_v56 = vpop.f32.mrf.mxu1  ;;  %4173 = vmatmul.bf16.gmra.mxu1 %v3832_v25  ;;  %v10225_v47 = vperm.slane %v10218_v39, 1 }
 0x5bc   : > { %vm3753_vm6 = vcmp.ge.f32.partialorder %v3720_v27, 0.0  ;;  %v3785_v52 = vmul.f32 0.01, %v3720_v27  ;;  %v5561_v34 = vsub.f32 %v3337_v2, %v11756_v59  ;;  %v11760_v2 = vld [vmem:[#allocation44_spill] sm:$0xff]  ;;  %v7321_v59 = vld [vmem:[#allocation14 + $0x4] sm:$0xf0] }
 0x5bd   : > { %v4140_v25 = vadd.f32 %v4139_v56, %v10225_v47 }
 0x5be   : > { %v10211_v41 = vpop.xlane.xlu1 %5380  ;;  %v10213_v60 = vpop.xlane.xlu0 %5792  ;;  %v3817_v16 = vsel %vm3753_vm6, %v3720_v27, %v3785_v52  ;;  %v5577_v54 = vmul.f32 %v5561_v34, %v5561_v34  ;;  %v7040_v34 = vld [vmem:[#allocation14 + $0x80] sm:$0xf] }
 0x5bf   : > { %11757 = vst [vmem:[#allocation62_spill] sm:$0xff] %v10213_v60  ;;  %v10220_v13 = vpop.xlane.xlu2 %5786  ;;  %v10222_v31 = vpack.c.bf16 %v3817_v16, %v3815_v19  ;;  %v7337_v19 = vld [vmem:[#allocation14 + $0x84] sm:$0xf0]  ;;  %v5806_v60 = vlaneseq }
 0x5c0   : > { %11759 = vst [vmem:[#allocation63_spill] sm:$0xff] %v10220_v13  ;;  %v5615_v22 = vsel %vm3599_vm0, %v5577_v54, 0.0 }
 0x5c1   : > { %v4188_v42 = vpop.f32.mrf.mxu2  ;;  %4222 = vmatmul.bf16.gmra.mxu2 %v10222_v31  ;;  %5616 = vadd.xlane.f32.xlu1 %v5615_v22  ;;  %v3339_v27 = vpop.f32.mrf.mxu0  ;;  %v6976_v22 = vld [vmem:[#allocation14] sm:$0xf] }
 0x5c2   : > { %v3340_v10 = vadd.f32 %v10088_v15, %v3339_v27  ;;  %v4189_v44 = vadd.f32 %v4188_v42, %v4140_v25  ;;  %v7041_v27 = vor.u32 %v7337_v19, %v7040_v34  ;;  %v6977_v24 = vor.u32 %v7321_v59, %v6976_v22  ;;  %v11762_v22 = vld [vmem:[#allocation45_spill] sm:$0xff] }
 0x5c3   : > { %v4141_v43 = vpop.f32.mrf.mxu1  ;;  %v10244_v59 = vand.u32 127, %v5806_v60 }
 0x5c4   : > { %v5562_v17 = vsub.f32 %v3340_v10, %v11760_v2  ;;  %4119 = vmatmul.bf16.gmra.mxu0 %v10164_v14  ;;  %v4142_v56 = vadd.f32 %v4141_v43, %v10225_v47  ;;  %v7320_v10 = vld [vmem:[#allocation14 + $0x4] sm:$0xf]  ;;  %v6978_v2 = vld [vmem:[#allocation14 + $0x8] sm:$0xf0]  ;;  %v4261_v48 = vmul.f32 0.01, %v4189_v44  ;;  %4545 = vmatpush.bf16.msra.mxu3 %v6977_v24 }
 0x5c5   : > { %4594 = vmatpush.bf16.msra.mxu0 %v7041_v27  ;;  %v6981_v25 = vor.u32 %v7320_v10, %v6978_v2  ;;  %vm4229_vm7 = vcmp.ge.f32.partialorder %v4189_v44, 0.0  ;;  %vm5808_vm9 = vcmp.eq.s32.totalorder %v10244_v59, 48 }
 0x5c6   : > { %v10233_v52 = vpop.xlane.xlu1 %5382  ;;  %v10235_v12 = vpop.xlane.xlu0 %5374  ;;  %v5578_v54 = vmul.f32 %v5562_v17, %v5562_v17  ;;  %v4293_v2 = vsel %vm4229_vm7, %v4189_v44, %v4261_v48 }
 0x5c7   : > { %v10237_v16 = vpop.xlane.xlu2 %5795  ;;  %v10241_v17 = vpop.f32.mrf.mxu3  ;;  %4643 = vmatpush.bf16.msra.mxu1 %v6981_v25 }
 0x5c8   : > { %11761 = vst [vmem:[#allocation64_spill] sm:$0xff] %v10237_v16  ;;  %v5618_v42 = vsel %vm3599_vm0, %v5578_v54, 0.0 }
 0x5c9   : > { %v4190_v14 = vpop.f32.mrf.mxu2  ;;  %v3341_v55 = vpop.f32.mrf.mxu0  ;;  %5619 = vadd.xlane.f32.xlu0 %v5618_v42 }
 0x5ca   : > { %v4191_v63 = vadd.f32 %v4190_v14, %v4142_v56  ;;  %v3342_v34 = vadd.f32 %v10088_v15, %v3341_v55 }
 0x5cb   : > { %v4144_v19 = vpop.f32.mrf.mxu1 }
 0x5cc   : > { %vm4231_vm8 = vcmp.ge.f32.partialorder %v4191_v63, 0.0  ;;  %v4263_v43 = vmul.f32 0.01, %v4191_v63  ;;  %v5563_v54 = vsub.f32 %v3342_v34, %v11762_v22  ;;  %v4145_v44 = vadd.f32 %v4144_v19, %v10225_v47 }
 0x5ce   : > { %v4295_v27 = vsel %vm4231_vm8, %v4191_v63, %v4263_v43  ;;  %v10248_v56 = vpop.xlane.xlu1 %5384  ;;  %v5391_v24 = vpop.xlane.xlu0 %5390  ;;  %v5579_v60 = vmul.f32 %v5563_v54, %v5563_v54 }
 0x5cf   : > { %11763 = vst [vmem:[#allocation65_spill] sm:$0xff] %v10248_v56  ;;  %v4325_v10 = vpack.c.bf16 %v4295_v27, %v4293_v2  ;;  %v10250_v14 = vpop.xlane.xlu2 %5386  ;;  %v10254_v55 = vsel %vm5808_vm9, %v5391_v24, 0.0  ;;  %v4043_v43 = vpop.f32.mrf.mxu3 }
 0x5d0   : > { %11764 = vst [vmem:[#allocation66_spill] sm:$0xff] %v10250_v14  ;;  %v5621_v25 = vsel %vm3599_vm0, %v5579_v60, 0.0 }
 0x5d1   : > { %11765 = vst [vmem:[#allocation67_spill] sm:$0xff] %v10254_v55  ;;  %v4193_v42 = vpop.f32.mrf.mxu2  ;;  %4693 = vmatmul.bf16.vlgmr.msra.gmra.mxu2 %v4325_v10  ;;  %v3344_v34 = vpop.f32.mrf.mxu0  ;;  %5622 = vadd.xlane.f32.xlu2 %v5621_v25 }
 0x5d2   : > { %v3345_v48 = vadd.f32 %v10088_v15, %v3344_v34  ;;  %v4194_v27 = vadd.f32 %v4193_v42, %v4145_v44 }
 0x5d3   : > { %v4146_v63 = vpop.f32.mrf.mxu1 }
 0x5d4   : > { %v5564_v2 = vsub.f32 %v3345_v48, %v9567_v40  ;;  %4124 = vmatmul.bf16.gmra.mxu0 %v10222_v31  ;;  %v4147_v19 = vadd.f32 %v4146_v63, %v10225_v47  ;;  %v4265_v44 = vmul.f32 0.01, %v4194_v27  ;;  %vm4233_vm10 = vcmp.ge.f32.partialorder %v4194_v27, 0.0 }
 0x5d6   : > { %v5389_v24 = vpop.xlane.xlu1 %5388  ;;  %v5397_v22 = vpop.xlane.xlu0 %5396  ;;  %v5580_v34 = vmul.f32 %v5564_v2, %v5564_v2 }
 0x5d7   : > { %v10263_v54 = vsel %vm5808_vm9, %v5389_v24, 0.0  ;;  %v5393_v60 = vpop.xlane.xlu2 %5392  ;;  %v10267_v25 = vsel %vm5808_vm9, %v5397_v22, 0.0  ;;  %v4046_v2 = vpop.f32.mrf.mxu3 }
 0x5d8   : > { %11766 = vst [vmem:[#allocation68_spill] sm:$0xff] %v10263_v54  ;;  %v10272_v48 = vsel %vm5808_vm9, %v5393_v60, 0.0  ;;  %v5624_v31 = vsel %vm3599_vm0, %v5580_v34, 0.0  ;;  %v4297_v60 = vsel %vm4233_vm10, %v4194_v27, %v4265_v44  ;;  %v5407_v54 = vld [vmem:[%s8465_s2 + $0x8] sm:$0xff] }
 0x5d9   : > { %11767 = vst [vmem:[#allocation69_spill] sm:$0xff] %v10267_v25  ;;  %v4195_v42 = vpop.f32.mrf.mxu2  ;;  %v3346_v40 = vpop.f32.mrf.mxu0  ;;  %5625 = vadd.xlane.f32.xlu1 %v5624_v31 }
 0x5da   : > { %11768 = vst [vmem:[#allocation70_spill] sm:$0xff] %v10272_v48  ;;  %v4196_v24 = vadd.f32 %v4195_v42, %v4147_v19  ;;  %v3347_v16 = vadd.f32 %v10088_v15, %v3346_v40 }
 0x5db   : > { %v4149_v11 = vpop.f32.mrf.mxu1 }
 0x5dc   : > { %vm4235_vm11 = vcmp.ge.f32.partialorder %v4196_v24, 0.0  ;;  %v4267_v22 = vmul.f32 0.01, %v4196_v24  ;;  %v5565_v63 = vsub.f32 %v3347_v16, %v9653_v37  ;;  %v10290_v16 = vperm.slane %v10218_v39, 0 }
 0x5de   : > { %v5395_v25 = vpop.xlane.xlu1 %5394  ;;  %v5403_v13 = vpop.xlane.xlu0 %5402  ;;  %v4299_v48 = vsel %vm4235_vm11, %v4196_v24, %v4267_v22  ;;  %v5581_v15 = vmul.f32 %v5565_v63, %v5565_v63  ;;  %v4150_v24 = vadd.f32 %v4149_v11, %v10225_v47  ;;  %v4044_v11 = vadd.f32 %v4043_v43, %v10290_v16 }
 0x5df   : > { %v10279_v34 = vsel %vm5808_vm9, %v5395_v25, 0.0  ;;  %v5399_v9 = vpop.xlane.xlu2 %5398  ;;  %v10283_v19 = vsel %vm5808_vm9, %v5403_v13, 0.0  ;;  %v4327_v40 = vpack.c.bf16 %v4299_v48, %v4297_v60  ;;  %v4042_v13 = vadd.f32 %v10241_v17, %v10290_v16  ;;  %v4048_v60 = vpop.f32.mrf.mxu3 }
 0x5e0   : > { %11769 = vst [vmem:[#allocation71_spill] sm:$0xff] %v10279_v34  ;;  %v10287_v31 = vsel %vm5808_vm9, %v5399_v9, 0.0  ;;  %v5627_v42 = vsel %vm3599_vm0, %v5581_v15, 0.0 }
 0x5e1   : > { %11770 = vst [vmem:[#allocation72_spill] sm:$0xff] %v10283_v19  ;;  %v4198_v27 = vpop.f32.mrf.mxu2  ;;  %4698 = vmatmul.bf16.gmra.mxu2 %v4327_v40  ;;  %v4090_v25 = vpop.f32.mrf.mxu0  ;;  %5628 = vadd.xlane.f32.xlu0 %v5627_v42 }
 0x5e2   : > { %11771 = vst [vmem:[#allocation73_spill] sm:$0xff] %v10287_v31  ;;  %v4199_v48 = vadd.f32 %v4198_v27, %v4150_v24  ;;  %v4091_v9 = vadd.f32 %v4090_v25, %v4042_v13 }
 0x5e3   : > { %v4151_v44 = vpop.f32.mrf.mxu1 }
 0x5e4   : > { %4595 = vmatmul.bf16.vlgmr.msra.gmra.mxu0 %v4325_v10  ;;  %v4152_v15 = vadd.f32 %v4151_v44, %v10225_v47  ;;  %v4269_v17 = vmul.f32 0.01, %v4199_v48  ;;  %v4260_v24 = vmul.f32 0.01, %v4091_v9  ;;  %vm4237_vm12 = vcmp.ge.f32.partialorder %v4199_v48, 0.0 }
 0x5e5   : > { %vm4228_vm13 = vcmp.ge.f32.partialorder %v4091_v9, 0.0 }
 0x5e6   : > { %v5401_v22 = vpop.xlane.xlu1 %5400  ;;  %v4301_v44 = vsel %vm4237_vm12, %v4199_v48, %v4269_v17  ;;  %v4292_v31 = vsel %vm4228_vm13, %v4091_v9, %v4260_v24  ;;  %v4049_v9 = vadd.f32 %v4048_v60, %v10290_v16 }
 0x5e7   : > { %v10298_v39 = vsel %vm5808_vm9, %v5401_v22, 0.0  ;;  %v5405_v63 = vpop.xlane.xlu2 %5404  ;;  %v4051_v34 = vpop.f32.mrf.mxu3 }
 0x5e8   : > { %11772 = vst [vmem:[#allocation74_spill] sm:$0xff] %v10298_v39  ;;  %v10303_v42 = vsel %vm5808_vm9, %v5405_v63, 0.0 }
 0x5e9   : > { %11773 = vst [vmem:[#allocation75_spill] sm:$0xff] %v10303_v42  ;;  %v4200_v37 = vpop.f32.mrf.mxu2  ;;  %v4092_v10 = vpop.f32.mrf.mxu0 }
 0x5ea   : > { %v4201_v27 = vadd.f32 %v4200_v37, %v4152_v15  ;;  %v4093_v25 = vadd.f32 %v4092_v10, %v4044_v11  ;;  %v4047_v11 = vadd.f32 %v4046_v2, %v10290_v16 }
 0x5eb   : > { %v4154_v13 = vpop.f32.mrf.mxu1 }
 0x5ec   : > { %vm4239_vm14 = vcmp.ge.f32.partialorder %v4201_v27, 0.0  ;;  %v4271_v22 = vmul.f32 0.01, %v4201_v27  ;;  %vm4230_vm15 = vcmp.ge.f32.partialorder %v4093_v25, 0.0  ;;  %v4262_v39 = vmul.f32 0.01, %v4093_v25 }
 0x5ed   : > { %v4155_v15 = vadd.f32 %v4154_v13, %v10225_v47 }
 0x5ee   : > { %v4303_v19 = vsel %vm4239_vm14, %v4201_v27, %v4271_v22  ;;  %v4294_v63 = vsel %vm4230_vm15, %v4093_v25, %v4262_v39 }
 0x5ef   : > { %v4329_v42 = vpack.c.bf16 %v4303_v19, %v4301_v44  ;;  %v4324_v43 = vpack.c.bf16 %v4294_v63, %v4292_v31  ;;  %v4053_v39 = vpop.f32.mrf.mxu3 }
 0x5f1   : > { %v4203_v35 = vpop.f32.mrf.mxu2  ;;  %4703 = vmatmul.bf16.gmra.mxu2 %v4329_v42  ;;  %v4095_v0 = vpop.f32.mrf.mxu0  ;;  %4546 = vmatmul.bf16.vlgmr.msra.gmra.mxu3 %v4324_v43 }
 0x5f2   : > { %4644 = vmatmul.bf16.vlgmr.msra.gmra.mxu1 %v4324_v43  ;;  %v4204_v10 = vadd.f32 %v4203_v35, %v4155_v15  ;;  %v4096_v55 = vadd.f32 %v4095_v0, %v4047_v11 }
 0x5f3   : > { %v4156_v37 = vpop.f32.mrf.mxu1 }
 0x5f4   : > { %4600 = vmatmul.bf16.gmra.mxu0 %v4327_v40  ;;  %v4157_v48 = vadd.f32 %v4156_v37, %v10225_v47  ;;  %v4273_v31 = vmul.f32 0.01, %v4204_v10  ;;  %v4264_v24 = vmul.f32 0.01, %v4096_v55  ;;  %vm4241_vm1 = vcmp.ge.f32.partialorder %v4204_v10, 0.0 }
 0x5f5   : > { %vm4232_vm2 = vcmp.ge.f32.partialorder %v4096_v55, 0.0 }
 0x5f6   : > { %v4305_v35 = vsel %vm4241_vm1, %v4204_v10, %v4273_v31  ;;  %v4296_v40 = vsel %vm4232_vm2, %v4096_v55, %v4264_v24  ;;  %v4054_v55 = vadd.f32 %v4053_v39, %v10290_v16 }
 0x5f7   : > { %v4056_v37 = vpop.f32.mrf.mxu3 }
 0x5f9   : > { %v4205_v19 = vpop.f32.mrf.mxu2  ;;  %v4097_v17 = vpop.f32.mrf.mxu0 }
 0x5fa   : > { %v4206_v27 = vadd.f32 %v4205_v19, %v4157_v48  ;;  %v4098_v25 = vadd.f32 %v4097_v17, %v4049_v9  ;;  %v4052_v9 = vadd.f32 %v4051_v34, %v10290_v16 }
 0x5fb   : > { %v4159_v22 = vpop.f32.mrf.mxu1 }
 0x5fc   : > { %vm4243_vm3 = vcmp.ge.f32.partialorder %v4206_v27, 0.0  ;;  %v4275_v13 = vmul.f32 0.01, %v4206_v27  ;;  %vm4234_vm4 = vcmp.ge.f32.partialorder %v4098_v25, 0.0  ;;  %v4266_v2 = vmul.f32 0.01, %v4098_v25 }
 0x5fd   : > { %v4160_v48 = vadd.f32 %v4159_v22, %v10225_v47 }
 0x5fe   : > { %v4307_v0 = vsel %vm4243_vm3, %v4206_v27, %v4275_v13  ;;  %v4298_v44 = vsel %vm4234_vm4, %v4098_v25, %v4266_v2 }
 0x5ff   : > { %v4331_v63 = vpack.c.bf16 %v4307_v0, %v4305_v35  ;;  %v4326_v60 = vpack.c.bf16 %v4298_v44, %v4296_v40  ;;  %v4058_v0 = vpop.f32.mrf.mxu3 }
 0x601   : > { %v4208_v43 = vpop.f32.mrf.mxu2  ;;  %4708 = vmatmul.bf16.gmra.mxu2 %v4331_v63  ;;  %v4100_v15 = vpop.f32.mrf.mxu0  ;;  %4551 = vmatmul.bf16.gmra.mxu3 %v4326_v60 }
 0x602   : > { %4649 = vmatmul.bf16.gmra.mxu1 %v4326_v60  ;;  %v4209_v19 = vadd.f32 %v4208_v43, %v4160_v48  ;;  %v4101_v17 = vadd.f32 %v4100_v15, %v4052_v9 }
 0x603   : > { %v4161_v11 = vpop.f32.mrf.mxu1 }
 0x604   : > { %4605 = vmatmul.bf16.gmra.mxu0 %v4329_v42  ;;  %v4162_v10 = vadd.f32 %v4161_v11, %v10225_v47  ;;  %v4277_v27 = vmul.f32 0.01, %v4209_v19  ;;  %v4268_v13 = vmul.f32 0.01, %v4101_v17  ;;  %vm4245_vm5 = vcmp.ge.f32.partialorder %v4209_v19, 0.0 }
 0x605   : > { %vm4236_vm6 = vcmp.ge.f32.partialorder %v4101_v17, 0.0 }
 0x606   : > { %v4309_v42 = vsel %vm4245_vm5, %v4209_v19, %v4277_v27  ;;  %v4300_v44 = vsel %vm4236_vm6, %v4101_v17, %v4268_v13  ;;  %v4059_v17 = vadd.f32 %v4058_v0, %v10290_v16 }
 0x607   : > { %v4061_v9 = vpop.f32.mrf.mxu3 }
 0x609   : > { %v4210_v31 = vpop.f32.mrf.mxu2  ;;  %v4102_v24 = vpop.f32.mrf.mxu0 }
 0x60a   : > { %v4211_v25 = vadd.f32 %v4210_v31, %v4162_v10  ;;  %v4103_v2 = vadd.f32 %v4102_v24, %v4054_v55  ;;  %v4057_v55 = vadd.f32 %v4056_v37, %v10290_v16 }
 0x60b   : > { %v4164_v35 = vpop.f32.mrf.mxu1 }
 0x60c   : > { %vm4247_vm7 = vcmp.ge.f32.partialorder %v4211_v25, 0.0  ;;  %v4279_v22 = vmul.f32 0.01, %v4211_v25  ;;  %vm4238_vm8 = vcmp.ge.f32.partialorder %v4103_v2, 0.0  ;;  %v4270_v34 = vmul.f32 0.01, %v4103_v2 }
 0x60d   : > { %v4165_v10 = vadd.f32 %v4164_v35, %v10225_v47 }
 0x60e   : > { %v4311_v40 = vsel %vm4247_vm7, %v4211_v25, %v4279_v22  ;;  %v4302_v60 = vsel %vm4238_vm8, %v4103_v2, %v4270_v34 }
 0x60f   : > { %v4333_v43 = vpack.c.bf16 %v4311_v40, %v4309_v42  ;;  %v4328_v39 = vpack.c.bf16 %v4302_v60, %v4300_v44 }
 0x611   : > { %v4213_v15 = vpop.f32.mrf.mxu2  ;;  %4713 = vmatmul.bf16.gmra.mxu2 %v4333_v43  ;;  %v4105_v11 = vpop.f32.mrf.mxu0  ;;  %4556 = vmatmul.bf16.gmra.mxu3 %v4328_v39 }
 0x612   : > { %4654 = vmatmul.bf16.gmra.mxu1 %v4328_v39  ;;  %v4214_v31 = vadd.f32 %v4213_v15, %v4165_v10  ;;  %v4106_v24 = vadd.f32 %v4105_v11, %v4057_v55  ;;  %v4062_v55 = vadd.f32 %v4061_v9, %v10290_v16 }
 0x613   : > { %v4166_v48 = vpop.f32.mrf.mxu1 }
 0x614   : > { %4610 = vmatmul.bf16.gmra.mxu0 %v4331_v63  ;;  %v4167_v19 = vadd.f32 %v4166_v48, %v10225_v47  ;;  %v4281_v25 = vmul.f32 0.01, %v4214_v31  ;;  %v4272_v22 = vmul.f32 0.01, %v4106_v24  ;;  %vm4249_vm10 = vcmp.ge.f32.partialorder %v4214_v31, 0.0  ;;  %v4063_v63 = vpop.f32.mrf.mxu3 }
 0x615   : > { %vm4240_vm11 = vcmp.ge.f32.partialorder %v4106_v24, 0.0 }
 0x616   : > { %v4313_v40 = vsel %vm4249_vm10, %v4214_v31, %v4281_v25  ;;  %v4304_v60 = vsel %vm4240_vm11, %v4106_v24, %v4272_v22  ;;  %v4064_v24 = vadd.f32 %v4063_v63, %v10290_v16 }
 0x619   : > { %v4215_v27 = vpop.f32.mrf.mxu2  ;;  %v4107_v13 = vpop.f32.mrf.mxu0 }
 0x61a   : > { %v4216_v2 = vadd.f32 %v4215_v27, %v4167_v19  ;;  %v4108_v34 = vadd.f32 %v4107_v13, %v4059_v17 }
 0x61b   : > { %v4169_v42 = vpop.f32.mrf.mxu1 }
 0x61c   : > { %vm4251_vm12 = vcmp.ge.f32.partialorder %v4216_v2, 0.0  ;;  %v4283_v35 = vmul.f32 0.01, %v4216_v2  ;;  %vm4242_vm13 = vcmp.ge.f32.partialorder %v4108_v34, 0.0  ;;  %v4274_v37 = vmul.f32 0.01, %v4108_v34  ;;  %v4066_v17 = vpop.f32.mrf.mxu3 }
 0x61d   : > { %v4170_v10 = vadd.f32 %v4169_v42, %v10225_v47 }
 0x61e   : > { %v4315_v44 = vsel %vm4251_vm12, %v4216_v2, %v4283_v35  ;;  %v4306_v39 = vsel %vm4242_vm13, %v4108_v34, %v4274_v37  ;;  %vm5891_vm12 = vcmp.eq.s32.totalorder %v10244_v59, 51  ;;  %vm5858_vm13 = vcmp.eq.s32.totalorder %v10244_v59, 50 }
 0x61f   : > { %v4335_v15 = vpack.c.bf16 %v4315_v44, %v4313_v40  ;;  %v4330_v0 = vpack.c.bf16 %v4306_v39, %v4304_v60 }
 0x621   : > { %v4218_v11 = vpop.f32.mrf.mxu2  ;;  %4718 = vmatmul.bf16.gmra.mxu2 %v4335_v15  ;;  %v4110_v48 = vpop.f32.mrf.mxu0  ;;  %4561 = vmatmul.bf16.gmra.mxu3 %v4330_v0 }
 0x622   : > { %4659 = vmatmul.bf16.gmra.mxu1 %v4330_v0  ;;  %v4219_v27 = vadd.f32 %v4218_v11, %v4170_v10  ;;  %v4111_v13 = vadd.f32 %v4110_v48, %v4062_v55  ;;  %v4067_v48 = vadd.f32 %v4066_v17, %v10290_v16 }
 0x623   : > { %v4171_v19 = vpop.f32.mrf.mxu1 }
 0x624   : > { %4615 = vmatmul.bf16.gmra.mxu0 %v4333_v43  ;;  %v4172_v31 = vadd.f32 %v4171_v19, %v10225_v47  ;;  %v4285_v2 = vmul.f32 0.01, %v4219_v27  ;;  %v4276_v35 = vmul.f32 0.01, %v4111_v13  ;;  %vm4253_vm14 = vcmp.ge.f32.partialorder %v4219_v27, 0.0  ;;  %v4068_v0 = vpop.f32.mrf.mxu3 }
 0x625   : > { %vm4244_vm15 = vcmp.ge.f32.partialorder %v4111_v13, 0.0  ;;  %v4069_v55 = vadd.f32 %v4068_v0, %v10290_v16 }
 0x626   : > { %v4317_v43 = vsel %vm4253_vm14, %v4219_v27, %v4285_v2  ;;  %v4308_v44 = vsel %vm4244_vm15, %v4111_v13, %v4276_v35 }
 0x629   : > { %v4220_v25 = vpop.f32.mrf.mxu2  ;;  %v4112_v22 = vpop.f32.mrf.mxu0 }
 0x62a   : > { %v4221_v34 = vadd.f32 %v4220_v25, %v4172_v31  ;;  %v4113_v37 = vadd.f32 %v4112_v22, %v4064_v24 }
 0x62c   : > { %vm4255_vm1 = vcmp.ge.f32.partialorder %v4221_v34, 0.0  ;;  %v4287_v42 = vmul.f32 0.01, %v4221_v34  ;;  %vm4246_vm2 = vcmp.ge.f32.partialorder %v4113_v37, 0.0  ;;  %v4278_v9 = vmul.f32 0.01, %v4113_v37  ;;  %v4071_v19 = vpop.f32.mrf.mxu3 }
 0x62e   : > { %v4319_v40 = vsel %vm4255_vm1, %v4221_v34, %v4287_v42  ;;  %v4310_v60 = vsel %vm4246_vm2, %v4113_v37, %v4278_v9 }
 0x62f   : > { %v4337_v39 = vpack.c.bf16 %v4319_v40, %v4317_v43  ;;  %v4332_v11 = vpack.c.bf16 %v4310_v60, %v4308_v44 }
 0x631   : > { %4723 = vmatmul.bf16.gmra.mxu2 %v4337_v39  ;;  %v4115_v63 = vpop.f32.mrf.mxu0  ;;  %4566 = vmatmul.bf16.gmra.mxu3 %v4332_v11 }
 0x632   : > { %4664 = vmatmul.bf16.gmra.mxu1 %v4332_v11  ;;  %v4116_v10 = vadd.f32 %v4115_v63, %v4067_v48 }
 0x634   : > { %4620 = vmatmul.bf16.gmra.mxu0 %v4335_v15  ;;  %v4280_v24 = vmul.f32 0.01, %v4116_v10  ;;  %vm4248_vm3 = vcmp.ge.f32.partialorder %v4116_v10, 0.0  ;;  %v4073_v37 = vpop.f32.mrf.mxu3  ;;  %v4072_v15 = vadd.f32 %v4071_v19, %v10290_v16 }
 0x635   : > { %v4074_v40 = vadd.f32 %v4073_v37, %v10290_v16 }
 0x636   : > { %v4312_v2 = vsel %vm4248_vm3, %v4116_v10, %v4280_v24 }
 0x638   : > { %v4174_v25 = vpop.f32.mrf.mxu1 }
 0x639   : > { %v4117_v31 = vpop.f32.mrf.mxu0  ;;  %v4175_v42 = vadd.f32 %v4174_v25, %v10225_v47 }
 0x63a   : > { %v4118_v27 = vadd.f32 %v4117_v31, %v4069_v55 }
 0x63c   : > { %vm4250_vm4 = vcmp.ge.f32.partialorder %v4118_v27, 0.0  ;;  %v4282_v13 = vmul.f32 0.01, %v4118_v27 }
 0x63e   : > { %v4314_v22 = vsel %vm4250_vm4, %v4118_v27, %v4282_v13  ;;  %v4076_v48 = vpop.f32.mrf.mxu3 }
 0x63f   : > { %v4334_v34 = vpack.c.bf16 %v4314_v22, %v4312_v2 }
 0x640   : > { %v4176_v43 = vpop.f32.mrf.mxu1 }
 0x641   : > { %v4120_v35 = vpop.f32.mrf.mxu0  ;;  %4571 = vmatmul.bf16.gmra.mxu3 %v4334_v34  ;;  %v4177_v0 = vadd.f32 %v4176_v43, %v10225_v47 }
 0x642   : > { %4669 = vmatmul.bf16.gmra.mxu1 %v4334_v34  ;;  %v4121_v9 = vadd.f32 %v4120_v35, %v4072_v15  ;;  %v4077_v34 = vadd.f32 %v4076_v48, %v10290_v16  ;;  %v4372_v48 = vld [vmem:[%s11774_s8] sm:$0x3] }
 0x644   : > { %v4223_v17 = vpop.f32.mrf.mxu2  ;;  %4625 = vmatmul.bf16.gmra.mxu0 %v4337_v39  ;;  %v4284_v11 = vmul.f32 0.01, %v4121_v9  ;;  %vm4252_vm5 = vcmp.ge.f32.partialorder %v4121_v9, 0.0 }
 0x645   : > { %v4224_v44 = vadd.f32 %v4223_v17, %v4175_v42 }
 0x646   : > { %v4316_v24 = vsel %vm4252_vm5, %v4121_v9, %v4284_v11  ;;  %v4078_v35 = vpop.f32.mrf.mxu3 }
 0x647   : > { %v4289_v55 = vmul.f32 0.01, %v4224_v44  ;;  %vm4257_vm7 = vcmp.ge.f32.partialorder %v4224_v44, 0.0  ;;  %v4079_v17 = vadd.f32 %v4078_v35, %v10290_v16 }
 0x649   : > { %v4122_v60 = vpop.f32.mrf.mxu0  ;;  %v4321_v25 = vsel %vm4257_vm7, %v4224_v44, %v4289_v55 }
 0x64a   : > { %v4123_v63 = vadd.f32 %v4122_v60, %v4074_v40 }
 0x64c   : > { %v4225_v10 = vpop.f32.mrf.mxu2  ;;  %vm4254_vm6 = vcmp.ge.f32.partialorder %v4123_v63, 0.0  ;;  %v4286_v31 = vmul.f32 0.01, %v4123_v63 }
 0x64d   : > { %v4226_v19 = vadd.f32 %v4225_v10, %v4177_v0  ;;  %v10333_v10 = vperm.slane %v4372_v48, 1 }
 0x64e   : > { %v4318_v27 = vsel %vm4254_vm6, %v4123_v63, %v4286_v31 }
 0x64f   : > { %vm4259_vm8 = vcmp.ge.f32.partialorder %v4226_v19, 0.0  ;;  %v4291_v39 = vmul.f32 0.01, %v4226_v19  ;;  %v4336_v13 = vpack.c.bf16 %v4318_v27, %v4316_v24  ;;  %v10336_v24 = vperm.slane %v4372_v48, 0 }
 0x651   : > { %v4323_v2 = vsel %vm4259_vm8, %v4226_v19, %v4291_v39  ;;  %v4125_v22 = vpop.f32.mrf.mxu0  ;;  %4576 = vmatmul.bf16.gmra.mxu3 %v4336_v13 }
 0x652   : > { %4674 = vmatmul.bf16.gmra.mxu1 %v4336_v13  ;;  %v4339_v47 = vpack.c.bf16 %v4323_v2, %v4321_v25  ;;  %v4126_v37 = vadd.f32 %v4125_v22, %v4077_v34 }
 0x654   : > { %4728 = vmatmul.bf16.gmra.mxu2 %v4339_v47  ;;  %4630 = vmatmul.bf16.gmra.mxu0 %v4339_v47  ;;  %v4694_v15 = vpop.f32.mrf.mxu2  ;;  %v4288_v43 = vmul.f32 0.01, %v4126_v37  ;;  %vm4256_vm10 = vcmp.ge.f32.partialorder %v4126_v37, 0.0 }
 0x656   : > { %v4320_v44 = vsel %vm4256_vm10, %v4126_v37, %v4288_v43 }
 0x659   : > { %v4127_v42 = vpop.f32.mrf.mxu0 }
 0x65a   : > { %v4128_v9 = vadd.f32 %v4127_v42, %v4079_v17 }
 0x65c   : > { %vm4258_vm11 = vcmp.ge.f32.partialorder %v4128_v9, 0.0  ;;  %v4290_v40 = vmul.f32 0.01, %v4128_v9  ;;  %v4696_v63 = vpop.f32.mrf.mxu2 }
 0x65e   : > { %v4322_v60 = vsel %vm4258_vm11, %v4128_v9, %v4290_v40 }
 0x65f   : > { %v4338_v0 = vpack.c.bf16 %v4322_v60, %v4320_v44 }
 0x661   : > { %4581 = vmatmul.bf16.gmra.mxu3 %v4338_v0  ;;  %v4596_v11 = vpop.f32.mrf.mxu0 }
 0x662   : > { %4679 = vmatmul.bf16.gmra.mxu1 %v4338_v0 }
 0x664   : > { %v4699_v55 = vpop.f32.mrf.mxu2 }
 0x669   : > { %v4598_v16 = vpop.f32.mrf.mxu0 }
 0x66c   : > { %v4701_v47 = vpop.f32.mrf.mxu2 }
 0x66f   : > { %v4645_v31 = vpop.f32.mrf.mxu1 }
 0x670   : > { %v4646_v19 = vadd.f32 %v4645_v31, %v10333_v10 }
 0x671   : > { %v4601_v2 = vpop.f32.mrf.mxu0 }
 0x672   : > { %v4695_v39 = vadd.f32 %v4694_v15, %v4646_v19 }
 0x674   : > { %v7103_v27 = vmul.f32 -1.442695, %v4695_v39  ;;  %v4547_v13 = vpop.f32.mrf.mxu3  ;;  %v10347_v31 = vpop.f32.mrf.mxu2 }
 0x675   : > { %v4548_v25 = vadd.f32 %v4547_v13, %v10336_v24 }
 0x676   : > { %7645 = vpow2.f32 %v7103_v27 }
 0x677   : > { %v4647_v22 = vpop.f32.mrf.mxu1  ;;  %v4597_v34 = vadd.f32 %v4596_v11, %v4548_v25  ;;  %v10354_v25 = vadd.f32 %v9546_v8, %v11739_v46  ;;  %v10370_v46 = vsel %vm5891_vm12, %v10183_v20, 0.0 }
 0x678   : > { %v4648_v35 = vadd.f32 %v4647_v22, %v10333_v10 }
 0x679   : > { %v7102_v37 = vmul.f32 -1.442695, %v4597_v34  ;;  %v10345_v11 = vpop.f32.mrf.mxu0 }
 0x67a   : > { %v4697_v17 = vadd.f32 %v4696_v63, %v4648_v35 }
 0x67b   : > { %7647 = vpow2.f32 %v7102_v37  ;;  %v5584_v37 = vpop.xlane.xlu0 %5583 }
 0x67c   : > { %v7646_v42 = vpop.eup %7645  ;;  %v7105_v43 = vmul.f32 -1.442695, %v4697_v17  ;;  %v4549_v15 = vpop.f32.mrf.mxu3 }
 0x67d   : > { %v10340_v9 = vadd.f32 1.0, %v7646_v42  ;;  %v4550_v40 = vadd.f32 %v4549_v15, %v10336_v24  ;;  %v10375_v42 = vsel %vm5808_vm9, %v10188_v4, 0.0 }
 0x67e   : > { %7649 = vpow2.f32 %v7105_v43  ;;  %v10380_v43 = vsel %vm5808_vm9, %v10235_v12, 0.0 }
 0x67f   : > { %7651 = vrcp.f32 %v10340_v9  ;;  %v4650_v44 = vpop.f32.mrf.mxu1  ;;  %v4599_v60 = vadd.f32 %v4598_v16, %v4550_v40  ;;  %v4888_v35 = vand.u32 2147483648, %v10340_v9  ;;  %vm4882_vm14 = vweird.f32 %v10340_v9 }
 0x680   : > { %v4651_v0 = vadd.f32 %v4650_v44, %v10333_v10 }
 0x681   : > { %v7648_v48 = vpop.eup %7647  ;;  %v7104_v63 = vmul.f32 -1.442695, %v4599_v60  ;;  %v4889_v12 = vor.u32 1.1754944e-38, %v4888_v35 }
 0x682   : > { %v4700_v19 = vadd.f32 %v4699_v55, %v4651_v0  ;;  %v10349_v39 = vadd.f32 1.0, %v7648_v48  ;;  %v4886_v55 = vand.u32 2147483647, %v10340_v9  ;;  %v10387_v0 = vsel %vm5858_vm13, %v5584_v37, 0.0 }
 0x683   : > { %7653 = vpow2.f32 %v7104_v63 }
 0x684   : > { %v7650_v27 = vpop.eup %7649  ;;  %v7107_v13 = vmul.f32 -1.442695, %v4700_v19  ;;  %7655 = vrcp.f32 %v10349_v39  ;;  %v4552_v34 = vpop.f32.mrf.mxu3  ;;  %v4871_v60 = vand.u32 2147483647, %v10349_v39  ;;  %vm10390_vm15 = vcmp.eq.f32.partialorder %v4886_v55, 8.507059e+37 }
 0x685   : > { %v10356_v16 = vpop.eup %7651  ;;  %v10359_v22 = vadd.f32 1.0, %v7650_v27  ;;  %v4553_v17 = vadd.f32 %v4552_v34, %v10336_v24  ;;  %vm4867_vm1 = vweird.f32 %v10349_v39  ;;  %v10400_v34 = vpop.f32.mrf.mxu0  ;;  %v4873_v37 = vand.u32 2147483648, %v10349_v39 }
 0x686   : > { %7657 = vpow2.f32 %v7107_v13  ;;  %v4878_v8 = vmul.f32 %v10356_v16, %v10340_v9  ;;  %vm4883_vm2 = vweird.f32 %v10356_v16  ;;  %vm10409_vm3 = vcmp.eq.f32.partialorder %v4871_v60, 8.507059e+37 }
 0x687   : > { %7659 = vrcp.f32 %v10359_v22  ;;  %v4652_v15 = vpop.f32.mrf.mxu1  ;;  %v4602_v40 = vadd.f32 %v4601_v2, %v4553_v17  ;;  %v4916_v55 = vand.u32 2147483647, %v10359_v22  ;;  %v10405_v17 = vpop.f32.mrf.mxu2  ;;  %vm4884_vm5 = vmor %vm4882_vm14, %vm4883_vm2  ;;  %v4874_v53 = vor.u32 1.1754944e-38, %v4873_v37 }
 0x688   : > { %v4653_v44 = vadd.f32 %v4652_v15, %v10333_v10  ;;  %v4879_v20 = vsub.f32 1.0, %v4878_v8  ;;  %vm4912_vm6 = vweird.f32 %v10359_v22 }
 0x689   : > { %v7654_v48 = vpop.eup %7653  ;;  %v7106_v63 = vmul.f32 -1.442695, %v4602_v40  ;;  %v4918_v40 = vand.u32 2147483648, %v10359_v22  ;;  %vm10446_vm8 = vcmp.eq.f32.partialorder %v4916_v55, 8.507059e+37 }
 0x68a   : > { %v4702_v19 = vadd.f32 %v4701_v47, %v4653_v44  ;;  %v4880_v2 = vmul.f32 %v10356_v16, %v4879_v20  ;;  %v10396_v27 = vpop.eup %7655  ;;  %v10398_v13 = vadd.f32 1.0, %v7654_v48 }
 0x68b   : > { %7661 = vpow2.f32 %v7106_v63  ;;  %v4863_v8 = vmul.f32 %v10396_v27, %v10349_v39  ;;  %vm4868_vm4 = vweird.f32 %v10396_v27 }
 0x68c   : > { %v7658_v35 = vpop.eup %7657  ;;  %v7109_v47 = vmul.f32 -1.442695, %v4702_v19  ;;  %7663 = vrcp.f32 %v10398_v13  ;;  %v4554_v48 = vpop.f32.mrf.mxu3  ;;  %v4881_v63 = vadd.f32 %v10356_v16, %v4880_v2  ;;  %v4901_v62 = vand.u32 2147483647, %v10398_v13  ;;  %vm10458_vm10 = vmor %vm4867_vm1, %vm4868_vm4 }
 0x68d   : > { %v10414_v44 = vpop.eup %7659  ;;  %v10417_v20 = vadd.f32 1.0, %v7658_v35  ;;  %v4555_v60 = vadd.f32 %v4554_v48, %v10336_v24  ;;  %v4864_v19 = vsub.f32 1.0, %v4863_v8  ;;  %v4903_v29 = vand.u32 2147483648, %v10398_v13 }
 0x68e   : > { %7665 = vpow2.f32 %v7109_v47  ;;  %v4885_v28 = vsel %vm4884_vm5, %v10356_v16, %v4881_v63  ;;  %v4908_v2 = vmul.f32 %v10414_v44, %v10359_v22  ;;  %v4919_v63 = vor.u32 1.1754944e-38, %v4918_v40 }
 0x68f   : > { %7667 = vrcp.f32 %v10417_v20  ;;  %v4655_v35 = vpop.f32.mrf.mxu1  ;;  %v4604_v47 = vadd.f32 %v10345_v11, %v4555_v60  ;;  %v4865_v48 = vmul.f32 %v10396_v27, %v4864_v19  ;;  %v4890_v9 = vsel %vm10390_vm15, %v4889_v12, %v4885_v28 }
 0x690   : > { %v4656_v8 = vadd.f32 %v4655_v35, %v10333_v10  ;;  %5343 = vst [vmem:[%s10439_s11 + $0x8] sm:$0xff] %v4890_v9  ;;  %v4909_v16 = vsub.f32 1.0, %v4908_v2  ;;  %vm4897_vm7 = vweird.f32 %v10398_v13  ;;  %v5439_v40 = vsub.f32 %v4890_v9, %v5407_v54  ;;  %v10478_v54 = vpop.f32.mrf.mxu0 }
 0x691   : > { %v7662_v26 = vpop.eup %7661  ;;  %v7108_v11 = vmul.f32 -1.442695, %v4604_v47  ;;  %v4866_v19 = vadd.f32 %v10396_v27, %v4865_v48  ;;  %v4904_v35 = vor.u32 1.1754944e-38, %v4903_v29  ;;  %vm10469_vm11 = vcmp.eq.f32.partialorder %v4901_v62, 8.507059e+37 }
 0x692   : > { %v4705_v60 = vadd.f32 %v10347_v31, %v4656_v8  ;;  %v10450_v4 = vpop.eup %7663  ;;  %v10452_v12 = vadd.f32 1.0, %v7662_v26  ;;  %v5406_v31 = vld [vmem:[%s8465_s2] sm:$0xff]  ;;  %v4910_v55 = vmul.f32 %v10414_v44, %v4909_v16  ;;  %vm4913_vm14 = vweird.f32 %v10414_v44 }
 0x693   : > { %7669 = vpow2.f32 %v7108_v11  ;;  %v4870_v26 = vsel %vm10458_vm10, %v10396_v27, %v4866_v19  ;;  %v4893_v39 = vmul.f32 %v10450_v4, %v10398_v13  ;;  %v10483_v27 = vpop.f32.mrf.mxu2  ;;  %v5471_v37 = vmul.f32 %v5439_v40, %v5439_v40  ;;  %vm10497_vm1 = vmor %vm4912_vm6, %vm4913_vm14 }
 0x694   : > { %v7666_v2 = vpop.eup %7665  ;;  %v7111_v47 = vmul.f32 -1.442695, %v4705_v60  ;;  %7671 = vrcp.f32 %v10452_v12  ;;  %v4557_v9 = vpop.f32.mrf.mxu3  ;;  %v4875_v16 = vsel %vm10409_vm3, %v4874_v53, %v4870_v26  ;;  %vm4898_vm15 = vweird.f32 %v10450_v4 }
 0x695   : > { %v10473_v48 = vpop.eup %7667  ;;  %v10476_v29 = vadd.f32 1.0, %v7666_v2  ;;  %v4558_v62 = vadd.f32 %v4557_v9, %v10336_v24  ;;  %v5438_v11 = vsub.f32 %v4875_v16, %v5406_v31  ;;  %5342 = vst [vmem:[%s10439_s11] sm:$0xff] %v4875_v16  ;;  %v4894_v60 = vsub.f32 1.0, %v4893_v39  ;;  %vm10520_vm3 = vmor %vm4897_vm7, %vm4898_vm15  ;;  %v5408_v31 = vld [vmem:[%s8465_s2 + $0x10] sm:$0xff] }
 0x696   : > { %7673 = vpow2.f32 %v7111_v47  ;;  %v4911_v15 = vadd.f32 %v10414_v44, %v4910_v55  ;;  %v5409_v55 = vld [vmem:[%s8465_s2 + $0x18] sm:$0xff]  ;;  %v4933_v39 = vand.u32 2147483648, %v10452_v12  ;;  %v4938_v9 = vmul.f32 %v10473_v48, %v10417_v20 }
 0x697   : > { %7675 = vrcp.f32 %v10476_v29  ;;  %v4657_v19 = vpop.f32.mrf.mxu1  ;;  %v4607_v53 = vadd.f32 %v10400_v34, %v4558_v62  ;;  %v5470_v26 = vmul.f32 %v5438_v11, %v5438_v11  ;;  %v4895_v47 = vmul.f32 %v10450_v4, %v4894_v60 }
 0x698   : > { %v4658_v2 = vadd.f32 %v4657_v19, %v10333_v10  ;;  %v4915_v40 = vsel %vm10497_vm1, %v10414_v44, %v4911_v15  ;;  %v4931_v34 = vand.u32 2147483647, %v10452_v12  ;;  %vm4942_vm2 = vweird.f32 %v10417_v20 }
 0x699   : > { %v7670_v22 = vpop.eup %7669  ;;  %v7110_v16 = vmul.f32 -1.442695, %v4607_v53  ;;  %v5502_v11 = vadd.f32 %v5471_v37, %v5470_v26  ;;  %v4896_v60 = vadd.f32 %v10450_v4, %v4895_v47  ;;  %v4920_v53 = vsel %vm10446_vm8, %v4919_v63, %v4915_v40 }
 0x69a   : > { %v4707_v62 = vadd.f32 %v10405_v17, %v4658_v2  ;;  %v10512_v19 = vpop.eup %7671  ;;  %v10514_v44 = vadd.f32 1.0, %v7670_v22  ;;  %vm4927_vm4 = vweird.f32 %v10452_v12  ;;  %v4939_v17 = vsub.f32 1.0, %v4938_v9  ;;  %5345 = vst [vmem:[%s10439_s11 + $0x18] sm:$0xff] %v4920_v53 }
 0x69b   : > { %7677 = vpow2.f32 %v7110_v16  ;;  %5503 = vadd.xlane.f32.xlu1 %v5502_v11  ;;  %v4900_v13 = vsel %vm10520_vm3, %v10450_v4, %v4896_v60  ;;  %v5441_v26 = vsub.f32 %v4920_v53, %v5409_v55  ;;  %v4923_v40 = vmul.f32 %v10512_v19, %v10452_v12 }
 0x69c   : > { %v7674_v37 = vpop.eup %7673  ;;  %v7113_v2 = vmul.f32 -1.442695, %v4707_v62  ;;  %7679 = vrcp.f32 %v10514_v44  ;;  %v4559_v63 = vpop.f32.mrf.mxu3  ;;  %v4905_v28 = vsel %vm10469_vm11, %v4904_v35, %v4900_v13  ;;  %vm10539_vm5 = vcmp.eq.f32.partialorder %v4931_v34, 8.507059e+37 }
 0x69d   : > { %v10532_v47 = vpop.eup %7675  ;;  %v4934_v22 = vor.u32 1.1754944e-38, %v4933_v39  ;;  %v10543_v16 = vadd.f32 1.0, %v7674_v37  ;;  %v4560_v4 = vadd.f32 %v4559_v63, %v10336_v24  ;;  %5344 = vst [vmem:[%s10439_s11 + $0x10] sm:$0xff] %v4905_v28  ;;  %v5440_v55 = vsub.f32 %v4905_v28, %v5408_v31  ;;  %v4611_v62 = vpop.f32.mrf.mxu0 }
 0x69e   : > { %7681 = vpow2.f32 %v7113_v2  ;;  %v5473_v60 = vmul.f32 %v5441_v26, %v5441_v26  ;;  %v4924_v8 = vsub.f32 1.0, %v4923_v40  ;;  %vm4928_vm6 = vweird.f32 %v10512_v19  ;;  %v4711_v34 = vpop.f32.mrf.mxu2 }
 0x69f   : > { %v4660_v11 = vpop.f32.mrf.mxu1  ;;  %v4940_v35 = vmul.f32 %v10473_v48, %v4939_v17  ;;  %v4609_v15 = vadd.f32 %v10478_v54, %v4560_v4  ;;  %v5472_v53 = vmul.f32 %v5440_v55, %v5440_v55  ;;  %vm4943_vm7 = vweird.f32 %v10473_v48  ;;  %vm4929_vm14 = vmor %vm4927_vm4, %vm4928_vm6 }
 0x6a0   : > { %v4661_v39 = vadd.f32 %v4660_v11, %v10333_v10  ;;  %v4925_v37 = vmul.f32 %v10512_v19, %v4924_v8  ;;  %v4946_v2 = vand.u32 2147483647, %v10417_v20  ;;  %v4948_v13 = vand.u32 2147483648, %v10417_v20  ;;  %vm10560_vm8 = vmor %vm4942_vm2, %vm4943_vm7 }
 0x6a1   : > { %v4941_v31 = vadd.f32 %v10473_v48, %v4940_v35  ;;  %v7678_v26 = vpop.eup %7677  ;;  %7683 = vrcp.f32 %v10543_v16  ;;  %v7112_v17 = vmul.f32 -1.442695, %v4609_v15  ;;  %v5505_v63 = vadd.f32 %v5473_v60, %v5472_v53  ;;  %v5410_v35 = vld [vmem:[%s8465_s2 + $0x20] sm:$0xff]  ;;  %v5411_v15 = vld [vmem:[%s8465_s2 + $0x28] sm:$0xff] }
 0x6a2   : > { %v4710_v54 = vadd.f32 %v10483_v27, %v4661_v39  ;;  %v10564_v40 = vpop.eup %7679  ;;  %v10566_v4 = vadd.f32 1.0, %v7678_v26  ;;  %v4926_v55 = vadd.f32 %v10512_v19, %v4925_v37  ;;  %vm10572_vm10 = vcmp.eq.f32.partialorder %v4946_v2, 8.507059e+37 }
 0x6a3   : > { %v4945_v11 = vsel %vm10560_vm8, %v10473_v48, %v4941_v31  ;;  %vm4957_vm11 = vweird.f32 %v10514_v44  ;;  %7685 = vpow2.f32 %v7112_v17  ;;  %5506 = vadd.xlane.f32.xlu0 %v5505_v63  ;;  %v4949_v8 = vor.u32 1.1754944e-38, %v4948_v13 }
 0x6a4   : > { %v7682_v20 = vpop.eup %7681  ;;  %v7115_v60 = vmul.f32 -1.442695, %v4710_v54  ;;  %v4953_v48 = vmul.f32 %v10564_v40, %v10514_v44  ;;  %7687 = vrcp.f32 %v10566_v4  ;;  %v4562_v53 = vpop.f32.mrf.mxu3  ;;  %v4930_v37 = vsel %vm4929_vm14, %v10512_v19, %v4926_v55 }
 0x6a5   : > { %v10586_v39 = vadd.f32 1.0, %v7682_v20  ;;  %vm4958_vm15 = vweird.f32 %v10564_v40  ;;  %v4563_v12 = vadd.f32 %v4562_v53, %v10336_v24  ;;  %v4935_v31 = vsel %vm10539_vm5, %v4934_v22, %v4930_v37  ;;  %v4613_v22 = vpop.f32.mrf.mxu0 }
 0x6a6   : > { %7689 = vpow2.f32 %v7115_v60  ;;  %v4950_v2 = vsel %vm10572_vm10, %v4949_v8, %v4945_v11  ;;  %5346 = vst [vmem:[%s10439_s11 + $0x20] sm:$0xff] %v4935_v31  ;;  %v5442_v26 = vsub.f32 %v4935_v31, %v5410_v35  ;;  %v4954_v54 = vsub.f32 1.0, %v4953_v48  ;;  %v4714_v35 = vpop.f32.mrf.mxu2  ;;  %vm4959_vm2 = vmor %vm4957_vm11, %vm4958_vm15 }
 0x6a7   : > { %7691 = vrcp.f32 %v10586_v39  ;;  %v4662_v13 = vpop.f32.mrf.mxu1  ;;  %v5443_v17 = vsub.f32 %v4950_v2, %v5411_v15  ;;  %v10597_v63 = vpop.eup %7683  ;;  %v4612_v19 = vadd.f32 %v4611_v62, %v4563_v12  ;;  %5347 = vst [vmem:[%s10439_s11 + $0x28] sm:$0xff] %v4950_v2  ;;  %v4961_v55 = vand.u32 2147483647, %v10514_v44 }
 0x6a8   : > { %v4663_v28 = vadd.f32 %v4662_v13, %v10333_v10  ;;  %v4963_v9 = vand.u32 2147483648, %v10514_v44  ;;  %v5474_v27 = vmul.f32 %v5442_v26, %v5442_v26  ;;  %v4955_v20 = vmul.f32 %v10564_v40, %v4954_v54 }
 0x6a9   : > { %v5475_v11 = vmul.f32 %v5443_v17, %v5443_v17  ;;  %v4968_v60 = vmul.f32 %v10532_v47, %v10476_v29  ;;  %v7686_v8 = vpop.eup %7685  ;;  %v7114_v15 = vmul.f32 -1.442695, %v4612_v19  ;;  %vm10606_vm1 = vcmp.eq.f32.partialorder %v4961_v55, 8.507059e+37 }
 0x6aa   : > { %v4712_v62 = vadd.f32 %v4711_v34, %v4663_v28  ;;  %v4964_v53 = vor.u32 1.1754944e-38, %v4963_v9  ;;  %v10610_v37 = vpop.eup %7687  ;;  %v10612_v12 = vadd.f32 1.0, %v7686_v8  ;;  %v4956_v2 = vadd.f32 %v10564_v40, %v4955_v20  ;;  %v5412_v34 = vld [vmem:[%s8465_s2 + $0x30] sm:$0xff] }
 0x6ab   : > { %v5508_v31 = vadd.f32 %v5475_v11, %v5474_v27  ;;  %v4969_v13 = vsub.f32 1.0, %v4968_v60  ;;  %7693 = vpow2.f32 %v7114_v15  ;;  %vm4972_vm3 = vweird.f32 %v10476_v29 }
 0x6ac   : > { %v7690_v26 = vpop.eup %7689  ;;  %v7117_v17 = vmul.f32 -1.442695, %v4712_v62  ;;  %vm4973_vm4 = vweird.f32 %v10532_v47  ;;  %7695 = vrcp.f32 %v10612_v12  ;;  %v4564_v28 = vpop.f32.mrf.mxu3  ;;  %v4960_v55 = vsel %vm4959_vm2, %v10564_v40, %v4956_v2 }
 0x6ad   : > { %v10622_v54 = vpop.eup %7691  ;;  %v10625_v19 = vadd.f32 1.0, %v7690_v26  ;;  %5509 = vadd.xlane.f32.xlu2 %v5508_v31  ;;  %v4970_v9 = vmul.f32 %v10532_v47, %v4969_v13  ;;  %v4565_v44 = vadd.f32 %v4564_v28, %v10336_v24  ;;  %v4965_v27 = vsel %vm10606_vm1, %v4964_v53, %v4960_v55  ;;  %vm10642_vm5 = vmor %vm4972_vm3, %vm4973_vm4  ;;  %v4616_v55 = vpop.f32.mrf.mxu0 }
 0x6ae   : > { %7697 = vpow2.f32 %v7117_v17  ;;  %v4976_v11 = vand.u32 2147483647, %v10476_v29  ;;  %v4978_v8 = vand.u32 2147483648, %v10476_v29  ;;  %5348 = vst [vmem:[%s10439_s11 + $0x30] sm:$0xff] %v4965_v27  ;;  %v5444_v40 = vsub.f32 %v4965_v27, %v5412_v34 }
 0x6af   : > { %7699 = vrcp.f32 %v10625_v19  ;;  %v4665_v20 = vpop.f32.mrf.mxu1  ;;  %v4971_v60 = vadd.f32 %v10532_v47, %v4970_v9  ;;  %v4614_v15 = vadd.f32 %v4613_v22, %v4565_v44  ;;  %v4983_v53 = vmul.f32 %v10610_v37, %v10566_v4  ;;  %v5413_v22 = vld [vmem:[%s8465_s2 + $0x38] sm:$0xff] }
 0x6b0   : > { %v4666_v62 = vadd.f32 %v4665_v20, %v10333_v10  ;;  %vm4977_vm6 = vcmp.eq.f32.partialorder %v4976_v11, 8.507059e+37  ;;  %v4979_v2 = vor.u32 1.1754944e-38, %v4978_v8  ;;  %v5476_v13 = vmul.f32 %v5444_v40, %v5444_v40  ;;  %v4716_v20 = vpop.f32.mrf.mxu2 }
 0x6b1   : > { %v4975_v31 = vsel %vm10642_vm5, %v10532_v47, %v4971_v60  ;;  %vm4987_vm7 = vweird.f32 %v10566_v4  ;;  %v7694_v26 = vpop.eup %7693  ;;  %v7116_v29 = vmul.f32 -1.442695, %v4614_v15  ;;  %v4984_v34 = vsub.f32 1.0, %v4983_v53 }
 0x6b2   : > { %v4715_v17 = vadd.f32 %v4714_v35, %v4666_v62  ;;  %vm4988_vm8 = vweird.f32 %v10610_v37  ;;  %v10654_v28 = vpop.eup %7695  ;;  %v10656_v9 = vadd.f32 1.0, %v7694_v26  ;;  %v4980_v44 = vsel %vm4977_vm6, %v4979_v2, %v4975_v31 }
 0x6b3   : > { %v4991_v47 = vand.u32 2147483647, %v10566_v4  ;;  %v4993_v27 = vand.u32 2147483648, %v10566_v4  ;;  %7701 = vpow2.f32 %v7116_v29  ;;  %5349 = vst [vmem:[%s10439_s11 + $0x38] sm:$0xff] %v4980_v44  ;;  %v5445_v8 = vsub.f32 %v4980_v44, %v5413_v22  ;;  %vm4989_vm11 = vmor %vm4987_vm7, %vm4988_vm8 }
 0x6b4   : > { %v7698_v11 = vpop.eup %7697  ;;  %v7119_v60 = vmul.f32 -1.442695, %v4715_v17  ;;  %v4985_v35 = vmul.f32 %v10610_v37, %v4984_v34  ;;  %7703 = vrcp.f32 %v10656_v9  ;;  %v4567_v62 = vpop.f32.mrf.mxu3  ;;  %v4998_v29 = vmul.f32 %v10597_v63, %v10543_v16  ;;  %v5414_v17 = vld [vmem:[%s8465_s2 + $0x40] sm:$0xff] }
 0x6b5   : > { %v10662_v40 = vpop.eup %7699  ;;  %v10665_v15 = vadd.f32 1.0, %v7698_v11  ;;  %vm10667_vm10 = vcmp.eq.f32.partialorder %v4991_v47, 8.507059e+37  ;;  %v4994_v53 = vor.u32 1.1754944e-38, %v4993_v27  ;;  %v5477_v31 = vmul.f32 %v5445_v8, %v5445_v8 }
 0x6b6   : > { %7705 = vpow2.f32 %v7119_v60  ;;  %v4568_v2 = vadd.f32 %v4567_v62, %v10336_v24  ;;  %v4986_v22 = vadd.f32 %v10610_v37, %v4985_v35  ;;  %vm5002_vm14 = vweird.f32 %v10543_v16 }
 0x6b7   : > { %7707 = vrcp.f32 %v10665_v15  ;;  %v4667_v26 = vpop.f32.mrf.mxu1  ;;  %vm5003_vm15 = vweird.f32 %v10597_v63  ;;  %v5511_v34 = vadd.f32 %v5477_v31, %v5476_v13  ;;  %v4999_v4 = vsub.f32 1.0, %v4998_v29 }
 0x6b8   : > { %v4617_v44 = vadd.f32 %v4616_v55, %v4568_v2  ;;  %v4668_v47 = vadd.f32 %v4667_v26, %v10333_v10  ;;  %v4990_v27 = vsel %vm4989_vm11, %v10610_v37, %v4986_v22  ;;  %v5006_v60 = vand.u32 2147483647, %v10543_v16  ;;  %vm5004_vm3 = vmor %vm5002_vm14, %vm5003_vm15 }
 0x6b9   : > { %v4995_v11 = vsel %vm10667_vm10, %v4994_v53, %v4990_v27  ;;  %v5008_v8 = vand.u32 2147483648, %v10543_v16  ;;  %v7702_v35 = vpop.eup %7701  ;;  %5512 = vadd.xlane.f32.xlu1 %v5511_v34  ;;  %v5013_v13 = vmul.f32 %v10654_v28, %v10612_v12  ;;  %v5000_v48 = vmul.f32 %v10597_v63, %v4999_v4  ;;  %v4719_v27 = vpop.f32.mrf.mxu2 }
 0x6ba   : > { %v7118_v62 = vmul.f32 -1.442695, %v4617_v44  ;;  %v4717_v61 = vadd.f32 %v4716_v20, %v4668_v47  ;;  %5350 = vst [vmem:[%s10439_s11 + $0x40] sm:$0xff] %v4995_v11  ;;  %v5446_v14 = vsub.f32 %v4995_v11, %v5414_v17  ;;  %v10692_v55 = vpop.eup %7703  ;;  %v10694_v37 = vadd.f32 1.0, %v7702_v35  ;;  %v4618_v17 = vpop.f32.mrf.mxu0 }
 0x6bb   : > { %vm10697_vm1 = vcmp.eq.f32.partialorder %v5006_v60, 8.507059e+37  ;;  %v5009_v31 = vor.u32 1.1754944e-38, %v5008_v8  ;;  %v5014_v26 = vsub.f32 1.0, %v5013_v13  ;;  %v5001_v44 = vadd.f32 %v10597_v63, %v5000_v48 }
 0x6bc   : > { %v7706_v2 = vpop.eup %7705  ;;  %7709 = vpow2.f32 %v7118_v62  ;;  %v7121_v20 = vmul.f32 -1.442695, %v4717_v61  ;;  %v5478_v22 = vmul.f32 %v5446_v14, %v5446_v14  ;;  %v4569_v47 = vpop.f32.mrf.mxu3  ;;  %vm5017_vm2 = vweird.f32 %v10612_v12  ;;  %v5415_v61 = vld [vmem:[%s8465_s2 + $0x48] sm:$0xff] }
 0x6bd   : > { %v10701_v29 = vpop.eup %7707  ;;  %7711 = vrcp.f32 %v10694_v37  ;;  %v10704_v34 = vadd.f32 1.0, %v7706_v2  ;;  %v4570_v14 = vadd.f32 %v4569_v47, %v10336_v24  ;;  %v5015_v11 = vmul.f32 %v10654_v28, %v5014_v26 }
 0x6be   : > { %7713 = vpow2.f32 %v7121_v20  ;;  %vm5018_vm4 = vweird.f32 %v10654_v28  ;;  %v5005_v4 = vsel %vm5004_vm3, %v10597_v63, %v5001_v44  ;;  %v5021_v8 = vand.u32 2147483647, %v10612_v12 }
 0x6bf   : > { %7715 = vrcp.f32 %v10704_v34  ;;  %v4670_v60 = vpop.f32.mrf.mxu1  ;;  %v5023_v35 = vand.u32 2147483648, %v10612_v12  ;;  %v5010_v16 = vsel %vm10697_vm1, %v5009_v31, %v5005_v4  ;;  %v4619_v62 = vadd.f32 %v4618_v17, %v4570_v14  ;;  %vm5019_vm5 = vmor %vm5017_vm2, %vm5018_vm4 }
 0x6c0   : > { %v4671_v13 = vadd.f32 %v4670_v60, %v10333_v10  ;;  %v5016_v48 = vadd.f32 %v10654_v28, %v5015_v11  ;;  %5351 = vst [vmem:[%s10439_s11 + $0x48] sm:$0xff] %v5010_v16  ;;  %v5447_v2 = vsub.f32 %v5010_v16, %v5415_v61  ;;  %vm5022_vm6 = vcmp.eq.f32.partialorder %v5021_v8, 8.507059e+37  ;;  %v5416_v11 = vld [vmem:[%s8465_s2 + $0x50] sm:$0xff] }
 0x6c1   : > { %v5024_v63 = vor.u32 1.1754944e-38, %v5023_v35  ;;  %v5028_v20 = vmul.f32 %v10622_v54, %v10586_v39  ;;  %v7120_v53 = vmul.f32 -1.442695, %v4619_v62  ;;  %vm5032_vm7 = vweird.f32 %v10586_v39 }
 0x6c2   : > { %v7710_v26 = vpop.eup %7709  ;;  %v4720_v31 = vadd.f32 %v4719_v27, %v4671_v13  ;;  %v5020_v17 = vsel %vm5019_vm5, %v10654_v28, %v5016_v48  ;;  %v5479_v61 = vmul.f32 %v5447_v2, %v5447_v2  ;;  %vm5033_vm8 = vweird.f32 %v10622_v54 }
 0x6c3   : > { %v10731_v44 = vpop.eup %7711  ;;  %v10733_v47 = vadd.f32 1.0, %v7710_v26  ;;  %v5025_v12 = vsel %vm5022_vm6, %v5024_v63, %v5020_v17  ;;  %v5029_v14 = vsub.f32 1.0, %v5028_v20  ;;  %7717 = vpow2.f32 %v7120_v53  ;;  %v4621_v63 = vpop.f32.mrf.mxu0  ;;  %vm5034_vm11 = vmor %vm5032_vm7, %vm5033_vm8 }
 0x6c4   : > { %v7714_v4 = vpop.eup %7713  ;;  %v7123_v60 = vmul.f32 -1.442695, %v4720_v31  ;;  %v5036_v8 = vand.u32 2147483647, %v10586_v39  ;;  %5352 = vst [vmem:[%s10439_s11 + $0x50] sm:$0xff] %v5025_v12  ;;  %v5514_v35 = vadd.f32 %v5479_v61, %v5478_v22  ;;  %v4572_v62 = vpop.f32.mrf.mxu3  ;;  %v5038_v48 = vand.u32 2147483648, %v10586_v39 }
 0x6c5   : > { %v10739_v27 = vpop.eup %7715  ;;  %7719 = vrcp.f32 %v10733_v47  ;;  %v10742_v28 = vadd.f32 1.0, %v7714_v4  ;;  %v5030_v16 = vmul.f32 %v10622_v54, %v5029_v14  ;;  %v5448_v2 = vsub.f32 %v5025_v12, %v5416_v11  ;;  %v4721_v31 = vpop.f32.mrf.mxu2  ;;  %v5417_v61 = vld [vmem:[%s8465_s2 + $0x58] sm:$0xff] }
 0x6c6   : > { %7721 = vpow2.f32 %v7123_v60  ;;  %vm10745_vm10 = vcmp.eq.f32.partialorder %v5036_v8, 8.507059e+37  ;;  %5515 = vadd.xlane.f32.xlu0 %v5514_v35  ;;  %v4573_v22 = vadd.f32 %v4572_v62, %v10336_v24  ;;  %v5043_v53 = vmul.f32 %v10692_v55, %v10656_v9 }
 0x6c7   : > { %7723 = vrcp.f32 %v10742_v28  ;;  %v5031_v20 = vadd.f32 %v10622_v54, %v5030_v16  ;;  %v4672_v26 = vpop.f32.mrf.mxu1  ;;  %v5039_v17 = vor.u32 1.1754944e-38, %v5038_v48  ;;  %v5480_v12 = vmul.f32 %v5448_v2, %v5448_v2 }
 0x6c8   : > { %v4673_v14 = vadd.f32 %v4672_v26, %v10333_v10  ;;  %vm5047_vm14 = vweird.f32 %v10656_v9  ;;  %v4622_v4 = vadd.f32 %v4621_v63, %v4573_v22  ;;  %v5044_v60 = vsub.f32 1.0, %v5043_v53 }
 0x6c9   : > { %v5035_v11 = vsel %vm5034_vm11, %v10622_v54, %v5031_v20  ;;  %vm5048_vm15 = vweird.f32 %v10692_v55  ;;  %v7718_v8 = vpop.eup %7717  ;;  %v5051_v16 = vand.u32 2147483647, %v10656_v9  ;;  %v5053_v62 = vand.u32 2147483648, %v10656_v9 }
 0x6ca   : > { %v5040_v35 = vsel %vm10745_vm10, %v5039_v17, %v5035_v11  ;;  %v4722_v39 = vadd.f32 %v4721_v31, %v4673_v14  ;;  %v10770_v2 = vadd.f32 1.0, %v7718_v8  ;;  %v7122_v54 = vmul.f32 -1.442695, %v4622_v4  ;;  %vm5049_vm2 = vmor %vm5047_vm14, %vm5048_vm15  ;;  %v5418_v8 = vld [vmem:[%s8465_s2 + $0x60] sm:$0xff] }
 0x6cb   : > { %v10768_v48 = vpop.eup %7719  ;;  %5353 = vst [vmem:[%s10439_s11 + $0x58] sm:$0xff] %v5040_v35  ;;  %v5449_v26 = vsub.f32 %v5040_v35, %v5417_v61  ;;  %v5045_v63 = vmul.f32 %v10692_v55, %v5044_v60  ;;  %vm10774_vm1 = vcmp.eq.f32.partialorder %v5051_v16, 8.507059e+37  ;;  %v5054_v53 = vor.u32 1.1754944e-38, %v5053_v62 }
 0x6cc   : > { %v7722_v20 = vpop.eup %7721  ;;  %v7125_v22 = vmul.f32 -1.442695, %v4722_v39  ;;  %v5058_v31 = vmul.f32 %v10662_v40, %v10625_v19  ;;  %7725 = vrcp.f32 %v10770_v2  ;;  %v4574_v4 = vpop.f32.mrf.mxu3  ;;  %vm5062_vm3 = vweird.f32 %v10625_v19 }
 0x6cd   : > { %v10780_v17 = vpop.eup %7723  ;;  %v10783_v14 = vadd.f32 1.0, %v7722_v20  ;;  %v5481_v61 = vmul.f32 %v5449_v26, %v5449_v26  ;;  %v5046_v11 = vadd.f32 %v10692_v55, %v5045_v63  ;;  %7727 = vpow2.f32 %v7122_v54  ;;  %v4623_v63 = vpop.f32.mrf.mxu0 }
 0x6ce   : > { %v5059_v60 = vsub.f32 1.0, %v5058_v31  ;;  %vm5063_vm4 = vweird.f32 %v10662_v40  ;;  %v5066_v16 = vand.u32 2147483647, %v10625_v19  ;;  %v5068_v54 = vand.u32 2147483648, %v10625_v19  ;;  %v4724_v31 = vpop.f32.mrf.mxu2 }
 0x6cf   : > { %7729 = vrcp.f32 %v10783_v14  ;;  %v5517_v35 = vadd.f32 %v5481_v61, %v5480_v12  ;;  %v5050_v39 = vsel %vm5049_vm2, %v10692_v55, %v5046_v11  ;;  %v4675_v62 = vpop.f32.mrf.mxu1  ;;  %v4575_v12 = vadd.f32 %v4574_v4, %v10336_v24  ;;  %vm5064_vm7 = vmor %vm5062_vm3, %vm5063_vm4 }
 0x6d0   : > { %7731 = vpow2.f32 %v7125_v22  ;;  %v5055_v9 = vsel %vm10774_vm1, %v5054_v53, %v5050_v39  ;;  %v5060_v26 = vmul.f32 %v10662_v40, %v5059_v60  ;;  %vm10800_vm5 = vcmp.eq.f32.partialorder %v5066_v16, 8.507059e+37  ;;  %v5419_v60 = vld [vmem:[%s8465_s2 + $0x68] sm:$0xff] }
 0x6d1   : > { %5518 = vadd.xlane.f32.xlu2 %v5517_v35  ;;  %5354 = vst [vmem:[%s10439_s11 + $0x60] sm:$0xff] %v5055_v9  ;;  %v5450_v55 = vsub.f32 %v5055_v9, %v5418_v8  ;;  %v4676_v22 = vadd.f32 %v4675_v62, %v10333_v10  ;;  %v5069_v53 = vor.u32 1.1754944e-38, %v5068_v54  ;;  %v5073_v61 = vmul.f32 %v10731_v44, %v10694_v37 }
 0x6d2   : > { %v5061_v13 = vadd.f32 %v10662_v40, %v5060_v26  ;;  %vm5077_vm6 = vweird.f32 %v10694_v37  ;;  %v10811_v11 = vpop.eup %7725  ;;  %v4624_v8 = vadd.f32 %v4623_v63, %v4575_v12  ;;  %vm5078_vm8 = vweird.f32 %v10731_v44 }
 0x6d3   : > { %v5482_v4 = vmul.f32 %v5450_v55, %v5450_v55  ;;  %v4725_v35 = vadd.f32 %v4724_v31, %v4676_v22  ;;  %v7728_v39 = vpop.eup %7727  ;;  %v5074_v62 = vsub.f32 1.0, %v5073_v61  ;;  %v5081_v9 = vand.u32 2147483647, %v10694_v37  ;;  %vm5079_vm15 = vmor %vm5077_vm6, %vm5078_vm8 }
 0x6d4   : > { %v5065_v16 = vsel %vm5064_vm7, %v10662_v40, %v5061_v13  ;;  %v5083_v26 = vand.u32 2147483648, %v10694_v37  ;;  %v10824_v50 = vadd.f32 1.0, %v7728_v39  ;;  %v7124_v55 = vmul.f32 -1.442695, %v4624_v8 }
 0x6d5   : > { %v10822_v54 = vpop.eup %7729  ;;  %v5070_v19 = vsel %vm10800_vm5, %v5069_v53, %v5065_v16  ;;  %v7127_v63 = vmul.f32 -1.442695, %v4725_v35  ;;  %v5075_v31 = vmul.f32 %v10731_v44, %v5074_v62  ;;  %vm10830_vm10 = vcmp.eq.f32.partialorder %v5081_v9, 8.507059e+37  ;;  %v4577_v53 = vpop.f32.mrf.mxu3  ;;  %v5420_v9 = vld [vmem:[%s8465_s2 + $0x70] sm:$0xff] }
 0x6d6   : > { %v7732_v12 = vpop.eup %7731  ;;  %5355 = vst [vmem:[%s10439_s11 + $0x68] sm:$0xff] %v5070_v19  ;;  %v5451_v22 = vsub.f32 %v5070_v19, %v5419_v60  ;;  %v5084_v13 = vor.u32 1.1754944e-38, %v5083_v26  ;;  %7733 = vrcp.f32 %v10824_v50  ;;  %v5088_v20 = vmul.f32 %v10701_v29, %v10665_v15  ;;  %v4726_v40 = vpop.f32.mrf.mxu2 }
 0x6d7   : > { %v10835_v61 = vadd.f32 1.0, %v7732_v12  ;;  %vm5092_vm11 = vweird.f32 %v10665_v15  ;;  %v4677_v8 = vpop.f32.mrf.mxu1  ;;  %7735 = vpow2.f32 %v7124_v55  ;;  %v5076_v35 = vadd.f32 %v10731_v44, %v5075_v31  ;;  %v4626_v12 = vpop.f32.mrf.mxu0 }
 0x6d8   : > { %v5483_v60 = vmul.f32 %v5451_v22, %v5451_v22  ;;  %vm5093_vm14 = vweird.f32 %v10701_v29  ;;  %v5089_v39 = vsub.f32 1.0, %v5088_v20  ;;  %v5096_v16 = vand.u32 2147483647, %v10665_v15 }
 0x6d9   : > { %7737 = vrcp.f32 %v10835_v61  ;;  %v5098_v62 = vand.u32 2147483648, %v10665_v15  ;;  %v5080_v19 = vsel %vm5079_vm15, %v10731_v44, %v5076_v35  ;;  %v4578_v55 = vadd.f32 %v4577_v53, %v10336_v24  ;;  %vm5094_vm4 = vmor %vm5092_vm11, %vm5093_vm14 }
 0x6da   : > { %v5520_v26 = vadd.f32 %v5483_v60, %v5482_v4  ;;  %7739 = vpow2.f32 %v7127_v63  ;;  %v5085_v22 = vsel %vm10830_vm10, %v5084_v13, %v5080_v19  ;;  %v5090_v37 = vmul.f32 %v10701_v29, %v5089_v39 }
 0x6db   : > { %vm10855_vm1 = vcmp.eq.f32.partialorder %v5096_v16, 8.507059e+37  ;;  %v5099_v20 = vor.u32 1.1754944e-38, %v5098_v62  ;;  %5356 = vst [vmem:[%s10439_s11 + $0x70] sm:$0xff] %v5085_v22  ;;  %v5452_v4 = vsub.f32 %v5085_v22, %v5420_v9  ;;  %v4627_v63 = vadd.f32 %v4626_v12, %v4578_v55 }
 0x6dc   : > { %5521 = vadd.xlane.f32.xlu1 %v5520_v26  ;;  %v4678_v44 = vadd.f32 %v4677_v8, %v10333_v10  ;;  %vm5107_vm2 = vweird.f32 %v10733_v47  ;;  %v10862_v53 = vpop.eup %7733  ;;  %v5091_v13 = vadd.f32 %v10701_v29, %v5090_v37  ;;  %v5103_v60 = vmul.f32 %v10768_v48, %v10733_v47  ;;  %v5421_v8 = vld [vmem:[%s8465_s2 + $0x78] sm:$0xff] }
 0x6dd   : > { %vm5108_vm3 = vweird.f32 %v10768_v48  ;;  %v5111_v35 = vand.u32 2147483647, %v10733_v47  ;;  %v7736_v39 = vpop.eup %7735  ;;  %v5484_v16 = vmul.f32 %v5452_v4, %v5452_v4  ;;  %v7126_v62 = vmul.f32 -1.442695, %v4627_v63 }
 0x6de   : > { %v4727_v9 = vadd.f32 %v4726_v40, %v4678_v44  ;;  %v5113_v26 = vand.u32 2147483648, %v10733_v47  ;;  %v10877_v55 = vadd.f32 1.0, %v7736_v39  ;;  %v5095_v12 = vsel %vm5094_vm4, %v10701_v29, %v5091_v13  ;;  %v4579_v13 = vpop.f32.mrf.mxu3  ;;  %vm5109_vm8 = vmor %vm5107_vm2, %vm5108_vm3 }
 0x6df   : > { %v10875_v19 = vpop.eup %7737  ;;  %v5104_v22 = vsub.f32 1.0, %v5103_v60  ;;  %vm10880_vm5 = vcmp.eq.f32.partialorder %v5111_v35, 8.507059e+37  ;;  %v5100_v4 = vsel %vm10855_vm1, %v5099_v20, %v5095_v12  ;;  %7741 = vpow2.f32 %v7126_v62  ;;  %v4680_v60 = vpop.f32.mrf.mxu1 }
 0x6e0   : > { %v7740_v15 = vpop.eup %7739  ;;  %v7129_v63 = vmul.f32 -1.442695, %v4727_v9  ;;  %v5114_v44 = vor.u32 1.1754944e-38, %v5113_v26  ;;  %7743 = vrcp.f32 %v10877_v55  ;;  %5357 = vst [vmem:[%s10439_s11 + $0x78] sm:$0xff] %v5100_v4  ;;  %v5453_v39 = vsub.f32 %v5100_v4, %v5421_v8  ;;  %v5422_v26 = vld [vmem:[%s8465_s2 + $0x80] sm:$0xff] }
 0x6e1   : > { %v10887_v40 = vadd.f32 1.0, %v7740_v15  ;;  %v5105_v29 = vmul.f32 %v10768_v48, %v5104_v22  ;;  %v5118_v35 = vmul.f32 %v10739_v27, %v10704_v34  ;;  %vm5122_vm6 = vweird.f32 %v10704_v34  ;;  %v4628_v15 = vpop.f32.mrf.mxu0 }
 0x6e2   : > { %7745 = vpow2.f32 %v7129_v63  ;;  %vm5123_vm7 = vweird.f32 %v10739_v27  ;;  %v5485_v31 = vmul.f32 %v5453_v39, %v5453_v39  ;;  %v5126_v62 = vand.u32 2147483647, %v10704_v34 }
 0x6e3   : > { %7747 = vrcp.f32 %v10887_v40  ;;  %v5106_v20 = vadd.f32 %v10768_v48, %v5105_v29  ;;  %v5119_v8 = vsub.f32 1.0, %v5118_v35  ;;  %v5128_v9 = vand.u32 2147483648, %v10704_v34  ;;  %v4729_v35 = vpop.f32.mrf.mxu2  ;;  %vm5124_vm15 = vmor %vm5122_vm6, %vm5123_vm7 }
 0x6e4   : > { %v4580_v12 = vadd.f32 %v4579_v13, %v10336_v24  ;;  %v4681_v22 = vadd.f32 %v4680_v60, %v10333_v10  ;;  %v5523_v4 = vadd.f32 %v5485_v31, %v5484_v16  ;;  %vm10907_vm10 = vcmp.eq.f32.partialorder %v5126_v62, 8.507059e+37 }
 0x6e5   : > { %v5110_v63 = vsel %vm5109_vm8, %v10768_v48, %v5106_v20  ;;  %v5133_v47 = vmul.f32 %v10811_v11, %v10770_v2  ;;  %v7742_v29 = vpop.eup %7741  ;;  %v5120_v13 = vmul.f32 %v10739_v27, %v5119_v8  ;;  %v5129_v38 = vor.u32 1.1754944e-38, %v5128_v9 }
 0x6e6   : > { %v5115_v5 = vsel %vm10880_vm5, %v5114_v44, %v5110_v63  ;;  %v4629_v60 = vadd.f32 %v4628_v15, %v4580_v12  ;;  %v10916_v56 = vpop.eup %7743  ;;  %5524 = vadd.xlane.f32.xlu0 %v5523_v4  ;;  %v10918_v48 = vadd.f32 1.0, %v7742_v29  ;;  %v4730_v31 = vadd.f32 %v4729_v35, %v4681_v22  ;;  %v10937_v15 = vpop.xlane.xlu1 %5589  ;;  %v5424_v29 = vld [vmem:[%s8465_s2 + $0x90] sm:$0xff] }
 0x6e7   : > { %5358 = vst [vmem:[%s10439_s11 + $0x80] sm:$0xff] %v5115_v5  ;;  %v5454_v16 = vsub.f32 %v5115_v5, %v5422_v26  ;;  %v5134_v20 = vsub.f32 1.0, %v5133_v47  ;;  %v5121_v7 = vadd.f32 %v10739_v27, %v5120_v13  ;;  %vm5137_vm11 = vweird.f32 %v10770_v2  ;;  %v5423_v5 = vld [vmem:[%s8465_s2 + $0x88] sm:$0xff]  ;;  %v4682_v47 = vpop.f32.mrf.mxu1 }
 0x6e8   : > { %v7746_v62 = vpop.eup %7745  ;;  %v7128_v49 = vmul.f32 -1.442695, %v4629_v60  ;;  %vm5138_vm14 = vweird.f32 %v10811_v11  ;;  %7749 = vrcp.f32 %v10918_v48  ;;  %v7131_v9 = vmul.f32 -1.442695, %v4730_v31 }
 0x6e9   : > { %v10924_v37 = vpop.eup %7747  ;;  %v10927_v44 = vadd.f32 1.0, %v7746_v62  ;;  %v5486_v8 = vmul.f32 %v5454_v16, %v5454_v16  ;;  %v5125_v26 = vsel %vm5124_vm15, %v10739_v27, %v5121_v7  ;;  %v5135_v12 = vmul.f32 %v10811_v11, %v5134_v20  ;;  %v4582_v27 = vpop.f32.mrf.mxu3  ;;  %vm5139_vm2 = vmor %vm5137_vm11, %vm5138_vm14 }
 0x6ea   : > { %7751 = vpow2.f32 %v7128_v49  ;;  %v5141_v22 = vand.u32 2147483647, %v10770_v2  ;;  %v5130_v4 = vsel %vm10907_vm10, %v5129_v38, %v5125_v26  ;;  %v5143_v34 = vand.u32 2147483648, %v10770_v2  ;;  %v4631_v26 = vpop.f32.mrf.mxu0 }
 0x6eb   : > { %7753 = vrcp.f32 %v10927_v44  ;;  %v5148_v63 = vmul.f32 %v10780_v17, %v10742_v28  ;;  %5359 = vst [vmem:[%s10439_s11 + $0x88] sm:$0xff] %v5130_v4  ;;  %v5455_v7 = vsub.f32 %v5130_v4, %v5423_v5  ;;  %v5136_v49 = vadd.f32 %v10811_v11, %v5135_v12 }
 0x6ec   : > { %7755 = vpow2.f32 %v7131_v9  ;;  %vm5142_vm1 = vcmp.eq.f32.partialorder %v5141_v22, 8.507059e+37  ;;  %v5144_v39 = vor.u32 1.1754944e-38, %v5143_v34  ;;  %vm5152_vm3 = vweird.f32 %v10742_v28  ;;  %v4731_v22 = vpop.f32.mrf.mxu2 }
 0x6ed   : > { %v5149_v38 = vsub.f32 1.0, %v5148_v63  ;;  %vm5153_vm4 = vweird.f32 %v10780_v17  ;;  %v5487_v35 = vmul.f32 %v5455_v7, %v5455_v7  ;;  %v5140_v13 = vsel %vm5139_vm2, %v10811_v11, %v5136_v49  ;;  %v11003_v11 = vpop.xlane.xlu0 %5592 }
 0x6ee   : > { %v5156_v60 = vand.u32 2147483647, %v10742_v28  ;;  %v5158_v16 = vand.u32 2147483648, %v10742_v28  ;;  %v10957_v31 = vpop.eup %7749  ;;  %v5145_v20 = vsel %vm5142_vm1, %v5144_v39, %v5140_v13  ;;  %v4583_v62 = vadd.f32 %v4582_v27, %v10336_v24  ;;  %vm5154_vm6 = vmor %vm5152_vm3, %vm5153_vm4 }
 0x6ef   : > { %v5150_v2 = vmul.f32 %v10780_v17, %v5149_v38  ;;  %v4683_v5 = vadd.f32 %v4682_v47, %v10333_v10  ;;  %v5526_v12 = vadd.f32 %v5487_v35, %v5486_v8  ;;  %5360 = vst [vmem:[%s10439_s11 + $0x90] sm:$0xff] %v5145_v20  ;;  %v5456_v34 = vsub.f32 %v5145_v20, %v5424_v29  ;;  %v5425_v8 = vld [vmem:[%s8465_s2 + $0x98] sm:$0xff] }
 0x6f0   : > { %v7752_v9 = vpop.eup %7751  ;;  %vm10962_vm5 = vcmp.eq.f32.partialorder %v5156_v60, 8.507059e+37  ;;  %v5159_v4 = vor.u32 1.1754944e-38, %v5158_v16  ;;  %v4632_v27 = vadd.f32 %v4631_v26, %v4583_v62  ;;  %v5163_v38 = vmul.f32 %v10862_v53, %v10824_v50 }
 0x6f1   : > { %v10967_v63 = vpop.eup %7753  ;;  %v10969_v7 = vadd.f32 1.0, %v7752_v9  ;;  %v5151_v49 = vadd.f32 %v10780_v17, %v5150_v2  ;;  %v4732_v10 = vadd.f32 %v4731_v22, %v4683_v5  ;;  %5527 = vadd.xlane.f32.xlu2 %v5526_v12  ;;  %v5488_v39 = vmul.f32 %v5456_v34, %v5456_v34  ;;  %v10988_v2 = vpop.xlane.xlu2 %5586 }
 0x6f2   : > { %v7756_v47 = vpop.eup %7755  ;;  %vm5167_vm7 = vweird.f32 %v10824_v50  ;;  %vm5168_vm8 = vweird.f32 %v10862_v53  ;;  %v7130_v13 = vmul.f32 -1.442695, %v4632_v27  ;;  %v5164_v16 = vsub.f32 1.0, %v5163_v38  ;;  %v4584_v22 = vpop.f32.mrf.mxu3 }
 0x6f3   : > { %7757 = vrcp.f32 %v10969_v7  ;;  %v10982_v29 = vadd.f32 1.0, %v7756_v47  ;;  %v5155_v35 = vsel %vm5154_vm6, %v10780_v17, %v5151_v49  ;;  %v7133_v60 = vmul.f32 -1.442695, %v4732_v10  ;;  %v10995_v17 = vpop.xlane.xlu1 %5598  ;;  %vm5169_vm15 = vmor %vm5167_vm7, %vm5168_vm8 }
 0x6f4   : > { %v5160_v28 = vsel %vm10962_vm5, %v5159_v4, %v5155_v35  ;;  %v5171_v20 = vand.u32 2147483647, %v10824_v50  ;;  %v5173_v5 = vand.u32 2147483648, %v10824_v50  ;;  %v5178_v9 = vmul.f32 %v10822_v54, %v10783_v14 }
 0x6f5   : > { %7759 = vrcp.f32 %v10982_v29  ;;  %5361 = vst [vmem:[%s10439_s11 + $0x98] sm:$0xff] %v5160_v28  ;;  %v5457_v62 = vsub.f32 %v5160_v28, %v5425_v8  ;;  %v5165_v26 = vmul.f32 %v10862_v53, %v5164_v16  ;;  %vm5182_vm11 = vweird.f32 %v10783_v14  ;;  %v4633_v16 = vpop.f32.mrf.mxu0 }
 0x6f6   : > { %7761 = vpow2.f32 %v7130_v13  ;;  %vm10998_vm10 = vcmp.eq.f32.partialorder %v5171_v20, 8.507059e+37  ;;  %v5174_v34 = vor.u32 1.1754944e-38, %v5173_v5  ;;  %v5179_v49 = vsub.f32 1.0, %v5178_v9  ;;  %v5426_v13 = vld [vmem:[%s8465_s2 + $0xa0] sm:$0xff] }
 0x6f7   : > { %v5489_v4 = vmul.f32 %v5457_v62, %v5457_v62  ;;  %7763 = vpow2.f32 %v7133_v60  ;;  %v5166_v27 = vadd.f32 %v10862_v53, %v5165_v26  ;;  %vm5183_vm14 = vweird.f32 %v10822_v54 }
 0x6f8   : > { %v5186_v10 = vand.u32 2147483647, %v10783_v14  ;;  %v5188_v47 = vand.u32 2147483648, %v10783_v14  ;;  %v5180_v35 = vmul.f32 %v10822_v54, %v5179_v49  ;;  %v4585_v28 = vadd.f32 %v4584_v22, %v10336_v24  ;;  %vm5184_vm3 = vmor %vm5182_vm11, %vm5183_vm14 }
 0x6f9   : > { %v11009_v8 = vpop.eup %7757  ;;  %v5529_v38 = vadd.f32 %v5489_v4, %v5488_v39  ;;  %v5193_v60 = vmul.f32 %v10916_v56, %v10877_v55  ;;  %v5170_v20 = vsel %vm5169_vm15, %v10862_v53, %v5166_v27  ;;  %vm5197_vm2 = vweird.f32 %v10877_v55  ;;  %v5427_v53 = vld [vmem:[%s8465_s2 + $0xa8] sm:$0xff] }
 0x6fa   : > { %vm11021_vm1 = vcmp.eq.f32.partialorder %v5186_v10, 8.507059e+37  ;;  %v5189_v62 = vor.u32 1.1754944e-38, %v5188_v47  ;;  %v5175_v24 = vsel %vm10998_vm10, %v5174_v34, %v5170_v20  ;;  %v5181_v5 = vadd.f32 %v10822_v54, %v5180_v35 }
 0x6fb   : > { %v11026_v50 = vpop.eup %7759  ;;  %5530 = vadd.xlane.f32.xlu1 %v5529_v38  ;;  %v4634_v9 = vadd.f32 %v4633_v16, %v4585_v28  ;;  %v5194_v26 = vsub.f32 1.0, %v5193_v60  ;;  %5362 = vst [vmem:[%s10439_s11 + $0xa0] sm:$0xff] %v5175_v24  ;;  %v5458_v4 = vsub.f32 %v5175_v24, %v5426_v13  ;;  %vm5198_vm4 = vweird.f32 %v10916_v56  ;;  %v11044_v14 = vpop.xlane.xlu1 %5607 }
 0x6fc   : > { %v7762_v22 = vpop.eup %7761  ;;  %v5201_v49 = vand.u32 2147483647, %v10877_v55  ;;  %v5203_v12 = vand.u32 2147483648, %v10877_v55  ;;  %v5185_v10 = vsel %vm5184_vm3, %v10822_v54, %v5181_v5  ;;  %v11054_v16 = vpop.xlane.xlu0 %5601  ;;  %vm5199_vm6 = vmor %vm5197_vm2, %vm5198_vm4  ;;  %v5208_v39 = vmul.f32 %v10875_v19, %v10835_v61 }
 0x6fd   : > { %v7764_v34 = vpop.eup %7763  ;;  %v11040_v27 = vadd.f32 1.0, %v7762_v22  ;;  %v7132_v47 = vmul.f32 -1.442695, %v4634_v9  ;;  %v5195_v38 = vmul.f32 %v10916_v56, %v5194_v26  ;;  %v5190_v13 = vsel %vm11021_vm1, %v5189_v62, %v5185_v10  ;;  %v11059_v5 = vpop.xlane.xlu2 %5595  ;;  %v5428_v62 = vld [vmem:[%s8465_s2 + $0xb0] sm:$0xff] }
 0x6fe   : > { %v11046_v35 = vadd.f32 1.0, %v7764_v34  ;;  %v5490_v28 = vmul.f32 %v5458_v4, %v5458_v4  ;;  %vm11050_vm5 = vcmp.eq.f32.partialorder %v5201_v49, 8.507059e+37  ;;  %5363 = vst [vmem:[%s10439_s11 + $0xa8] sm:$0xff] %v5190_v13  ;;  %v5459_v54 = vsub.f32 %v5190_v13, %v5427_v53 }
 0x6ff   : > { %7765 = vrcp.f32 %v11040_v27  ;;  %v5196_v20 = vadd.f32 %v10916_v56, %v5195_v38  ;;  %v5204_v24 = vor.u32 1.1754944e-38, %v5203_v12  ;;  %vm5212_vm7 = vweird.f32 %v10835_v61 }
 0x700   : > { %7767 = vrcp.f32 %v11046_v35  ;;  %vm5213_vm8 = vweird.f32 %v10875_v19  ;;  %v5491_v9 = vmul.f32 %v5459_v54, %v5459_v54  ;;  %v5216_v22 = vand.u32 2147483647, %v10835_v61 }
 0x701   : > { %7769 = vpow2.f32 %v7132_v47  ;;  %v5200_v26 = vsel %vm5199_vm6, %v10916_v56, %v5196_v20  ;;  %v5209_v55 = vsub.f32 1.0, %v5208_v39  ;;  %v5218_v4 = vand.u32 2147483648, %v10835_v61  ;;  %vm5214_vm2 = vmor %vm5212_vm7, %vm5213_vm8 }
 0x702   : > { %v5205_v53 = vsel %vm11050_vm5, %v5204_v24, %v5200_v26  ;;  %v5223_v49 = vmul.f32 %v10957_v31, %v10918_v48  ;;  %v5532_v12 = vadd.f32 %v5491_v9, %v5490_v28  ;;  %vm11078_vm10 = vcmp.eq.f32.partialorder %v5216_v22, 8.507059e+37 }
 0x703   : > { %5364 = vst [vmem:[%s10439_s11 + $0xb0] sm:$0xff] %v5205_v53  ;;  %v5460_v10 = vsub.f32 %v5205_v53, %v5428_v62  ;;  %vm5227_vm11 = vweird.f32 %v10918_v48  ;;  %v5210_v56 = vmul.f32 %v10875_v19, %v5209_v55  ;;  %v5219_v47 = vor.u32 1.1754944e-38, %v5218_v4  ;;  %v11094_v39 = vpop.xlane.xlu1 %5616  ;;  %v5429_v55 = vld [vmem:[%s8465_s2 + $0xb8] sm:$0xff] }
 0x704   : > { %v5224_v38 = vsub.f32 1.0, %v5223_v49  ;;  %vm5228_vm14 = vweird.f32 %v10957_v31  ;;  %5533 = vadd.xlane.f32.xlu0 %v5532_v12  ;;  %v5231_v28 = vand.u32 2147483647, %v10918_v48  ;;  %v5233_v54 = vand.u32 2147483648, %v10918_v48  ;;  %11827 = vst [vmem:[#allocation76_spill] sm:$0xff] %v11094_v39  ;;  %v11100_v22 = vpop.xlane.xlu0 %5610 }
 0x705   : > { %v11086_v13 = vpop.eup %7765  ;;  %v5492_v60 = vmul.f32 %v5460_v10, %v5460_v10  ;;  %v5238_v20 = vmul.f32 %v10924_v37, %v10887_v40  ;;  %v5211_v62 = vadd.f32 %v10875_v19, %v5210_v56  ;;  %vm5242_vm15 = vweird.f32 %v10887_v40  ;;  %11828 = vst [vmem:[#allocation77_spill] sm:$0xff] %v11100_v22  ;;  %v11115_v10 = vpop.xlane.xlu2 %5604  ;;  %vm5229_vm4 = vmor %vm5227_vm11, %vm5228_vm14 }
 0x706   : > { %v11092_v24 = vpop.eup %7767  ;;  %v5225_v9 = vmul.f32 %v10957_v31, %v5224_v38  ;;  %vm5243_vm1 = vweird.f32 %v10924_v37  ;;  %vm11111_vm3 = vcmp.eq.f32.partialorder %v5231_v28, 8.507059e+37  ;;  %v5234_v49 = vor.u32 1.1754944e-38, %v5233_v54 }
 0x707   : > { %v7770_v26 = vpop.eup %7769  ;;  %v11104_v53 = vmul.f32 %v11092_v24, %v11046_v35  ;;  %v5239_v12 = vsub.f32 1.0, %v5238_v20  ;;  %v5215_v38 = vsel %vm5214_vm2, %v10875_v19, %v5211_v62  ;;  %v5246_v22 = vand.u32 2147483647, %v10887_v40  ;;  %v5430_v20 = vld [vmem:[%s8465_s2 + $0xc0] sm:$0xff]  ;;  %vm5244_vm6 = vmor %vm5242_vm15, %vm5243_vm1 }
 0x708   : > { %v11117_v56 = vadd.f32 1.0, %v7770_v26  ;;  %v5226_v39 = vadd.f32 %v10957_v31, %v5225_v9  ;;  %v5220_v61 = vsel %vm11078_vm10, %v5219_v47, %v5215_v38  ;;  %v5248_v54 = vand.u32 2147483648, %v10887_v40 }
 0x709   : > { %v5240_v28 = vmul.f32 %v10924_v37, %v5239_v12  ;;  %v5253_v19 = vmul.f32 %v11009_v8, %v10969_v7  ;;  %5365 = vst [vmem:[%s10439_s11 + $0xb8] sm:$0xff] %v5220_v61  ;;  %v5461_v34 = vsub.f32 %v5220_v61, %v5429_v55  ;;  %vm11136_vm5 = vcmp.eq.f32.partialorder %v5246_v22, 8.507059e+37 }
 0x70a   : > { %7771 = vrcp.f32 %v11117_v56  ;;  %v5230_v47 = vsel %vm5229_vm4, %v10957_v31, %v5226_v39  ;;  %v5249_v26 = vor.u32 1.1754944e-38, %v5248_v54  ;;  %v5431_v31 = vld [vmem:[%s8465_s2 + $0xc8] sm:$0xff]  ;;  %vm5257_vm7 = vweird.f32 %v10969_v7 }
 0x70b   : > { %v5235_v48 = vsel %vm11111_vm3, %v5234_v49, %v5230_v47  ;;  %v5241_v9 = vadd.f32 %v10924_v37, %v5240_v28  ;;  %v5254_v12 = vsub.f32 1.0, %v5253_v19  ;;  %v5493_v38 = vmul.f32 %v5461_v34, %v5461_v34  ;;  %v11155_v61 = vpop.xlane.xlu1 %5625 }
 0x70c   : > { %5366 = vst [vmem:[%s10439_s11 + $0xc0] sm:$0xff] %v5235_v48  ;;  %v5462_v39 = vsub.f32 %v5235_v48, %v5430_v20  ;;  %vm5258_vm8 = vweird.f32 %v11009_v8  ;;  %v5261_v4 = vand.u32 2147483647, %v10969_v7  ;;  %v5263_v49 = vand.u32 2147483648, %v10969_v7  ;;  %v11161_v19 = vpop.xlane.xlu0 %5619 }
 0x70d   : > { %v5245_v22 = vsel %vm5244_vm6, %v10924_v37, %v5241_v9  ;;  %v5255_v55 = vmul.f32 %v11009_v8, %v5254_v12  ;;  %v5535_v40 = vadd.f32 %v5493_v38, %v5492_v60  ;;  %v5268_v20 = vmul.f32 %v10967_v63, %v10927_v44  ;;  %v11167_v9 = vpop.xlane.xlu2 %5613  ;;  %vm5259_vm11 = vmor %vm5257_vm7, %vm5258_vm8 }
 0x70e   : > { %v5250_v28 = vsel %vm11136_vm5, %v5249_v26, %v5245_v22  ;;  %v5494_v54 = vmul.f32 %v5462_v39, %v5462_v39  ;;  %vm5262_vm10 = vcmp.eq.f32.partialorder %v5261_v4, 8.507059e+37  ;;  %v5264_v47 = vor.u32 1.1754944e-38, %v5263_v49  ;;  %v5432_v26 = vld [vmem:[%s8465_s2 + $0xd0] sm:$0xff] }
 0x70f   : > { %5367 = vst [vmem:[%s10439_s11 + $0xc8] sm:$0xff] %v5250_v28  ;;  %v5463_v37 = vsub.f32 %v5250_v28, %v5431_v31  ;;  %v5256_v34 = vadd.f32 %v11009_v8, %v5255_v55  ;;  %5536 = vadd.xlane.f32.xlu2 %v5535_v40  ;;  %v5269_v60 = vsub.f32 1.0, %v5268_v20  ;;  %vm5272_vm14 = vweird.f32 %v10927_v44 }
 0x710   : > { %v11165_v48 = vpop.eup %7771  ;;  %vm5273_vm15 = vweird.f32 %v10967_v63  ;;  %v5276_v62 = vand.u32 2147483647, %v10927_v44  ;;  %v5278_v39 = vand.u32 2147483648, %v10927_v44  ;;  %v5283_v4 = vmul.f32 %v11086_v13, %v11040_v27 }
 0x711   : > { %v5313_v12 = vmul.f32 %v11165_v48, %v11117_v56  ;;  %v5495_v38 = vmul.f32 %v5463_v37, %v5463_v37  ;;  %v5260_v31 = vsel %vm5259_vm11, %v11009_v8, %v5256_v34  ;;  %v5270_v22 = vmul.f32 %v10967_v63, %v5269_v60  ;;  %vm5274_vm4 = vmor %vm5272_vm14, %vm5273_vm15  ;;  %v5433_v34 = vld [vmem:[%s8465_s2 + $0xd8] sm:$0xff] }
 0x712   : > { %v5265_v7 = vsel %vm5262_vm10, %v5264_v47, %v5260_v31  ;;  %vm11182_vm1 = vcmp.eq.f32.partialorder %v5276_v62, 8.507059e+37  ;;  %v5279_v40 = vor.u32 1.1754944e-38, %v5278_v39  ;;  %vm5287_vm2 = vweird.f32 %v11040_v27 }
 0x713   : > { %v5538_v49 = vadd.f32 %v5495_v38, %v5494_v54  ;;  %5368 = vst [vmem:[%s10439_s11 + $0xd0] sm:$0xff] %v5265_v7  ;;  %v5464_v28 = vsub.f32 %v5265_v7, %v5432_v26  ;;  %v5271_v8 = vadd.f32 %v10967_v63, %v5270_v22  ;;  %v5284_v20 = vsub.f32 1.0, %v5283_v4  ;;  %v5504_v44 = vpop.xlane.xlu1 %5503 }
 0x714   : > { %vm5288_vm3 = vweird.f32 %v11086_v13  ;;  %v5291_v37 = vand.u32 2147483647, %v11040_v27  ;;  %v5293_v47 = vand.u32 2147483648, %v11040_v27  ;;  %v5298_v60 = vmul.f32 %v11026_v50, %v10982_v29  ;;  %v11209_v31 = vpop.xlane.xlu0 %5628 }
 0x715   : > { %5539 = vadd.xlane.f32.xlu1 %v5538_v49  ;;  %v5496_v54 = vmul.f32 %v5464_v28, %v5464_v28  ;;  %vm5302_vm5 = vweird.f32 %v10982_v29  ;;  %v5275_v62 = vsel %vm5274_vm4, %v10967_v63, %v5271_v8  ;;  %v5285_v26 = vmul.f32 %v11086_v13, %v5284_v20  ;;  %v11214_v63 = vpop.xlane.xlu2 %5622  ;;  %vm5289_vm10 = vmor %vm5287_vm2, %vm5288_vm3  ;;  %v5434_v20 = vld [vmem:[%s8465_s2 + $0xe0] sm:$0xff] }
 0x716   : > { %vm11204_vm6 = vcmp.eq.f32.partialorder %v5291_v37, 8.507059e+37  ;;  %vm5303_vm7 = vweird.f32 %v11026_v50  ;;  %v5280_v39 = vsel %vm11182_vm1, %v5279_v40, %v5275_v62  ;;  %v5294_v7 = vor.u32 1.1754944e-38, %v5293_v47 }
 0x717   : > { %v5299_v22 = vsub.f32 1.0, %v5298_v60  ;;  %v5306_v4 = vand.u32 2147483647, %v10982_v29  ;;  %5369 = vst [vmem:[%s10439_s11 + $0xd8] sm:$0xff] %v5280_v39  ;;  %v5465_v49 = vsub.f32 %v5280_v39, %v5433_v34  ;;  %v5286_v28 = vadd.f32 %v11086_v13, %v5285_v26  ;;  %vm5304_vm15 = vmor %vm5302_vm5, %vm5303_vm7 }
 0x718   : > { %v5308_v8 = vand.u32 2147483648, %v10982_v29  ;;  %vm5825_vm8 = vcmp.eq.s32.totalorder %v10244_v59, 49  ;;  %v5314_v34 = vsub.f32 1.0, %v5313_v12  ;;  %vm5317_vm14 = vweird.f32 %v11117_v56 }
 0x719   : > { %v5300_v55 = vmul.f32 %v11026_v50, %v5299_v22  ;;  %vm11225_vm11 = vcmp.eq.f32.partialorder %v5306_v4, 8.507059e+37  ;;  %v5826_v37 = vsel %vm5825_vm8, %v5504_v44, 0.0  ;;  %v5497_v47 = vmul.f32 %v5465_v49, %v5465_v49 }
 0x71a   : > { %v5290_v60 = vsel %vm5289_vm10, %v11086_v13, %v5286_v28  ;;  %v5309_v62 = vor.u32 1.1754944e-38, %v5308_v8  ;;  %v5842_v27 = vadd.f32 %v5826_v37, %v10380_v43  ;;  %v5315_v22 = vmul.f32 %v11165_v48, %v5314_v34  ;;  %v5435_v13 = vld [vmem:[%s8465_s2 + $0xe8] sm:$0xff] }
 0x71b   : > { %v5295_v26 = vsel %vm11204_vm6, %v5294_v7, %v5290_v60  ;;  %v5301_v39 = vadd.f32 %v11026_v50, %v5300_v55  ;;  %v5541_v4 = vadd.f32 %v5497_v47, %v5496_v54  ;;  %vm5318_vm1 = vweird.f32 %v11165_v48 }
 0x71c   : > { %5370 = vst [vmem:[%s10439_s11 + $0xe0] sm:$0xff] %v5295_v26  ;;  %v5466_v12 = vsub.f32 %v5295_v26, %v5434_v20  ;;  %v5875_v43 = vadd.f32 %v10387_v0, %v5842_v27  ;;  %v5316_v44 = vadd.f32 %v11165_v48, %v5315_v22  ;;  %v5321_v54 = vand.u32 2147483647, %v11117_v56  ;;  %vm11256_vm2 = vmor %vm5317_vm14, %vm5318_vm1  ;;  %v5436_v20 = vld [vmem:[%s8465_s2 + $0xf0] sm:$0xff]  ;;  %v5507_v37 = vpop.xlane.xlu0 %5506 }
 0x71d   : > { %v5305_v38 = vsel %vm5304_vm15, %v11026_v50, %v5301_v39  ;;  %v5323_v7 = vand.u32 2147483648, %v11117_v56  ;;  %5542 = vadd.xlane.f32.xlu0 %v5541_v4  ;;  %v5329_v50 = vsub.f32 1.0, %v11104_v53  ;;  %vm5332_vm4 = vweird.f32 %v11046_v35 }
 0x71e   : > { %v5310_v29 = vsel %vm11225_vm11, %v5309_v62, %v5305_v38  ;;  %v5498_v49 = vmul.f32 %v5466_v12, %v5466_v12  ;;  %v5908_v28 = vadd.f32 %v10370_v46, %v5875_v43  ;;  %v5320_v55 = vsel %vm11256_vm2, %v11165_v48, %v5316_v44 }
 0x71f   : > { %5371 = vst [vmem:[%s10439_s11 + $0xe8] sm:$0xff] %v5310_v29  ;;  %v5467_v8 = vsub.f32 %v5310_v29, %v5435_v13  ;;  %vm5322_vm3 = vcmp.eq.f32.partialorder %v5321_v54, 8.507059e+37  ;;  %v5324_v40 = vor.u32 1.1754944e-38, %v5323_v7  ;;  %v5330_v56 = vmul.f32 %v11092_v24, %v5329_v50  ;;  %v5437_v13 = vld [vmem:[%s8465_s2 + $0xf8] sm:$0xff]  ;;  %s7353_s2 = sshll.u32 %s8310_s27, 8 }
 0x720   : > { %v5940_v46 = vadd.f32 %v10354_v25, %v5908_v28  ;;  %vm5333_vm5 = vweird.f32 %v11092_v24  ;;  %v5510_v53 = vpop.xlane.xlu2 %5509  ;;  %v5336_v60 = vand.u32 2147483647, %v11046_v35  ;;  %v5338_v48 = vand.u32 2147483648, %v11046_v35  ;;  %s6013_s26 = scalar_lea.hbm %s11841_s20, %s7353_s2 }
 0x721   : > { %v5499_v34 = vmul.f32 %v5467_v8, %v5467_v8  ;;  %v5325_v47 = vsel %vm5322_vm3, %v5324_v40, %v5320_v55  ;;  %v5331_v25 = vadd.f32 %v11092_v24, %v5330_v56  ;;  %v5827_v27 = vsel %vm5825_vm8, %v5507_v37, 0.0  ;;  %vm5334_vm6 = vmor %vm5332_vm4, %vm5333_vm5  ;;  %s6016_s17 = sshll.u32 %s6013_s26, 4  ;;  %s6017_s17 = int_to_ptr.hbm [resolvable:$true] %s6016_s17 }
 0x722   : > { %5956 = vst [vmem:[%s11274_s3] sm:$0xff] %v5940_v46  ;;  %v5468_v62 = vsub.f32 %v5325_v47, %v5436_v20  ;;  %v5828_v26 = vsel %vm5825_vm8, %v5510_v53, 0.0  ;;  %v5811_v39 = vsel %vm5808_vm9, %v10201_v23, 0.0  ;;  %v5339_v4 = vor.u32 1.1754944e-38, %v5338_v48  ;;  %s8030_s4 = sshra.s32 %s6017_s17, 4  ;;  %s8031_s4 = int_to_ptr.hbm [resolvable:$true] %s8030_s4 }
 0x723   : > { %v5544_v22 = vadd.f32 %v5499_v34, %v5498_v49  ;;  %5372 = vst [vmem:[%s10439_s11 + $0xf0] sm:$0xff] %v5325_v47  ;;  %v5843_v12 = vadd.f32 %v5827_v27, %v10375_v42  ;;  %v5860_v43 = vsel %vm5858_vm13, %v10988_v2, 0.0  ;;  %v5335_v38 = vsel %vm5334_vm6, %v11092_v24, %v5331_v25  ;;  %s8032_s16 = scalar_lea.hbm %s8031_s4, 256  ;;  %p8037_p7 = scmp.lt.s32.totalorder %s8031_s4, %s11841_s20 }
 0x724   : > { %vm5337_vm7 = vcmp.eq.f32.partialorder %v5336_v60, 8.507059e+37  ;;  %v5844_v44 = vadd.f32 %v5828_v26, %v5811_v39  ;;  %v5861_v23 = vsel %vm5858_vm13, %v10937_v15, 0.0  ;;  %v5800_v35 = vsel %vm3599_vm0, %v10147_v30, 0.0  ;;  %p8033_p1 = scmp.ne.s32.totalorder %s8031_s4, %s8032_s16 }
 0x725   : > { %5545 = vadd.xlane.f32.xlu2 %v5544_v22  ;;  %v5340_v54 = vsel %vm5337_vm7, %v5339_v4, %v5335_v38  ;;  %v5876_v7 = vadd.f32 %v5860_v43, %v5843_v12  ;;  %v5893_v42 = vsel %vm5891_vm12, %v10151_v58, 0.0  ;;  %5801 = vadd.xlane.f32.xlu0 %v5800_v35  ;;  %v5500_v24 = vmul.f32 %v5468_v62, %v5468_v62 }
 0x726   : > { %5373 = vst [vmem:[%s10439_s11 + $0xf8] sm:$0xff] %v5340_v54  ;;  %v5469_v2 = vsub.f32 %v5340_v54, %v5437_v13  ;;  %v5877_v29 = vadd.f32 %v5861_v23, %v5844_v44  ;;  %v5894_v15 = vsel %vm5891_vm12, %v10181_v1, 0.0  ;;  %v5925_v30 = vadd.f32 %v9549_v21, %v11743_v3  ;;  %p8034_p3 = pnand %p8033_p1, %p8399_p4  ;;  %s8036_s11 = scalar_lea.hbm %s11841_s20, 512 }
 0x727   : > { %v5909_v49 = vadd.f32 %v5893_v42, %v5876_v7  ;;  %v5926_v58 = vadd.f32 %v9730_v6, %v11741_v32  ;;  %v5803_v1 = vsel %vm3599_vm0, %v10167_v18, 0.0  ;;  %v5812_v6 = vsel %vm5808_vm9, %v10211_v41, 0.0  ;;  %p8038_p9 = scmp.lt.s32.totalorder %s8036_s11, %s8032_s16 }
 0x728   : > { %v5501_v28 = vmul.f32 %v5469_v2, %v5469_v2  ;;  %v5910_v0 = vadd.f32 %v5894_v15, %v5877_v29  ;;  %v5862_v18 = vsel %vm5858_vm13, %v11003_v11, 0.0  ;;  %p8035_p12 = pneg %p8034_p3 }
 0x729   : > { %v5941_v50 = vadd.f32 %v5925_v30, %v5909_v49  ;;  %p8039_p5 = por %p8038_p9, %p8037_p7 }
 0x72a   : > { %v5547_v8 = vadd.f32 %v5501_v28, %v5500_v24  ;;  %v5942_v55 = vadd.f32 %v5926_v58, %v5910_v0 }
 0x72b   : > { %5957 = vst [vmem:[%s11274_s3 + $0x8] sm:$0xff] %v5941_v50  ;;  %p8040_p8 = pnand %p8039_p5, %p8035_p12 }
 0x72c   : > { %5548 = vadd.xlane.f32.xlu1 %v5547_v8  ;;  %5958 = vst [vmem:[%s11274_s3 + $0x10] sm:$0xff] %v5942_v55  ;;  %v5513_v21 = vpop.xlane.xlu1 %5512 }
 0x72d   : > { %5804 = vadd.xlane.f32.xlu2 %v5803_v1  ;;  %v5829_v32 = vsel %vm5825_vm8, %v5513_v21, 0.0 }
 0x72e   : > { %v5845_v3 = vadd.f32 %v5829_v32, %v5812_v6 }
 0x730   : > { %v5878_v40 = vadd.f32 %v5862_v18, %v5845_v3 }
 0x731   : > { %8043 = shalt.err (!%p8040_p8)
}
 0x732   : > { %s11640_s6 = smov 256   ;;  %v5895_v41 = vsel %vm5891_vm12, %v10192_v57, 0.0  ;;  %s11842_s16 = sld [smem:[#allocation91_spill]]  ;;  %v5797_v11 = vsel %vm3599_vm0, %v10173_v45, 0.0  ;;  %v5927_v20 = vadd.f32 %v9733_v51, %v11742_v36 }
 0x733   : > { %7410 = dma.vmem_to_hbm [thread:$0]  (%p8399_p4), %s6015_s30, 4096, %s6017_s17, %s11331_s23, %s11640_s6, %s11640_s6, %s8176_s13   ;;  %v5911_v37 = vadd.f32 %v5895_v41, %v5878_v40 }
 0x734   : > { %s5996_s8 = sshll.u32 %s9011_s19, 4  ;;  %5798 = vadd.xlane.f32.xlu1 %v5797_v11  ;;  %s5973_s30 = scalar_lea.sflag [#allocation4], %s8458_s1  ;;  %s5997_s8 = int_to_ptr.vmem [resolvable:$true] %s5996_s8 }
 0x735   : > { %v5943_v46 = vadd.f32 %v5927_v20, %v5911_v37 }
 0x738   : > { %s5995_s0 = scalar_lea.hbm %s11842_s16, %s7353_s2  ;;  %s8064_s26 = scalar_lea.hbm %s11842_s16, 512 }
 0x739   : > { %s5998_s11 = sshll.u32 %s5995_s0, 4  ;;  %s5999_s11 = int_to_ptr.hbm [resolvable:$true] %s5998_s11 }
 0x73a   : > { %s8058_s17 = sshra.s32 %s5999_s11, 4  ;;  %s8059_s17 = int_to_ptr.hbm [resolvable:$true] %s8058_s17 }
 0x73b   : > { %s8060_s28 = scalar_lea.hbm %s8059_s17, 256  ;;  %p8065_p0 = scmp.lt.s32.totalorder %s8059_s17, %s11842_s16 }
 0x73c   : > { %p8061_p10 = scmp.ne.s32.totalorder %s8059_s17, %s8060_s28  ;;  %p8066_p2 = scmp.lt.s32.totalorder %s8064_s26, %s8060_s28 }
 0x73e   : > { %p8062_p13 = pnand %p8061_p10, %p8399_p4  ;;  %p8067_p1 = por %p8066_p2, %p8065_p0 }
 0x740   : > { %p8063_p11 = pneg %p8062_p13 }
 0x742   : > { %p8068_p3 = pnand %p8067_p1, %p8063_p11 }
 0x744   : > { %8071 = shalt.err (!%p8068_p3)
}
 0x745   : > { %s11843_s1 = smov 256   ;;  %5959 = vst [vmem:[%s11274_s3 + $0x18] sm:$0xff] %v5943_v46  ;;  %v5516_v51 = vpop.xlane.xlu0 %5515  ;;  %v5813_v36 = vsel %vm5808_vm9, %v10233_v52, 0.0  ;;  %v5863_v56 = vsel %vm5858_vm13, %v11059_v5, 0.0  ;;  %v5896_v34 = vsel %vm5891_vm12, %v10160_v33, 0.0  ;;  %v11844_v47 = vld [vmem:[#allocation38_spill] sm:$0xff]  ;;  %v5519_v52 = vpop.xlane.xlu2 %5518 }
 0x746   : > { %7409 = dma.vmem_to_hbm [thread:$0]  (%p8399_p4), %s5997_s8, 4096, %s5999_s11, %s5973_s30, %s11843_s1, %s11843_s1, %s8176_s13   ;;  %v5830_v45 = vsel %vm5825_vm8, %v5516_v51, 0.0  ;;  %v11845_v60 = vld [vmem:[#allocation51_spill] sm:$0xff]  ;;  %v11846_v27 = vld [vmem:[#allocation65_spill] sm:$0xff]  ;;  %v5831_v5 = vsel %vm5825_vm8, %v5519_v52, 0.0  ;;  %v5864_v22 = vsel %vm5858_vm13, %v10995_v17, 0.0 }
 0x747   : > { %v5846_v57 = vadd.f32 %v5830_v45, %v5813_v36  ;;  %v5928_v48 = vadd.f32 %v11845_v60, %v11844_v47  ;;  %v5814_v26 = vsel %vm5808_vm9, %v11846_v27, 0.0  ;;  %v11847_v4 = vld [vmem:[#allocation35_spill] sm:$0xff]  ;;  %v11848_v12 = vld [vmem:[#allocation37_spill] sm:$0xff]  ;;  %v11849_v43 = vld [vmem:[#allocation50_spill] sm:$0xff]  ;;  %v5865_v2 = vsel %vm5858_vm13, %v11054_v16, 0.0  ;;  %s7356_s19 = sshll.u32 %s8310_s27, 7 }
 0x748   : > { %v5847_v39 = vadd.f32 %v5831_v5, %v5814_v26  ;;  %v5897_v13 = vsel %vm5891_vm12, %v11847_v4, 0.0  ;;  %v5929_v38 = vadd.f32 %v11849_v43, %v11848_v12  ;;  %v11850_v54 = vld [vmem:[#allocation66_spill] sm:$0xff]  ;;  %v11852_v30 = vld [vmem:[#allocation41_spill] sm:$0xff]  ;;  %v11853_v49 = vld [vmem:[#allocation52_spill] sm:$0xff]  ;;  %v5866_v16 = vsel %vm5858_vm13, %v11115_v10, 0.0  ;;  %s11887_s0 = sld [smem:[#allocation93_spill]] }
 0x749   : > { %v5879_v53 = vadd.f32 %v5863_v56, %v5846_v57  ;;  %v5815_v7 = vsel %vm5808_vm9, %v11850_v54, 0.0  ;;  %v11851_v29 = vld [vmem:[#allocation34_spill] sm:$0xff]  ;;  %v5930_v28 = vadd.f32 %v11853_v49, %v11852_v30  ;;  %v11854_v55 = vld [vmem:[#allocation68_spill] sm:$0xff]  ;;  %v11855_v6 = vld [vmem:[#allocation33_spill] sm:$0xff]  ;;  %v5867_v10 = vsel %vm5858_vm13, %v11044_v14, 0.0  ;;  %s6031_s27 = sshll.u32 %s11274_s3, 4  ;;  %s6032_s27 = int_to_ptr.vmem [resolvable:$true] %s6031_s27 }
 0x74a   : > { %v5880_v33 = vadd.f32 %v5864_v22, %v5847_v39  ;;  %v5898_v15 = vsel %vm5891_vm12, %v11851_v29, 0.0  ;;  %v5899_v32 = vsel %vm5891_vm12, %v11855_v6, 0.0  ;;  %v11856_v3 = vld [vmem:[#allocation40_spill] sm:$0xff]  ;;  %v11857_v18 = vld [vmem:[#allocation53_spill] sm:$0xff]  ;;  %v11858_v46 = vld [vmem:[#allocation67_spill] sm:$0xff] }
 0x74b   : > { %v5912_v25 = vadd.f32 %v5896_v34, %v5879_v53  ;;  %v5931_v40 = vadd.f32 %v11857_v18, %v11856_v3  ;;  %v11859_v45 = vld [vmem:[#allocation36_spill] sm:$0xff]  ;;  %v11860_v56 = vld [vmem:[#allocation42_spill] sm:$0xff]  ;;  %v11863_v27 = vld [vmem:[#allocation77_spill] sm:$0xff] }
 0x74c   : > { %v5913_v44 = vadd.f32 %v5897_v13, %v5880_v33  ;;  %v5900_v57 = vsel %vm5891_vm12, %v11859_v45, 0.0  ;;  %v11861_v53 = vld [vmem:[#allocation54_spill] sm:$0xff]  ;;  %v5868_v14 = vsel %vm5858_vm13, %v11863_v27, 0.0  ;;  %v11864_v5 = vld [vmem:[#allocation63_spill] sm:$0xff]  ;;  %v11876_v18 = vld [vmem:[#allocation73_spill] sm:$0xff] }
 0x74d   : > { %v5944_v62 = vadd.f32 %v5928_v48, %v5912_v25  ;;  %v5932_v34 = vadd.f32 %v11861_v53, %v11860_v56  ;;  %v5901_v39 = vsel %vm5891_vm12, %v11864_v5, 0.0  ;;  %v11865_v22 = vld [vmem:[#allocation46_spill] sm:$0xff]  ;;  %v11866_v33 = vld [vmem:[#allocation55_spill] sm:$0xff]  ;;  %v11882_v27 = vld [vmem:[#allocation60_spill] sm:$0xff] }
 0x74e   : > { %v5945_v23 = vadd.f32 %v5929_v38, %v5913_v44  ;;  %v5933_v4 = vadd.f32 %v11866_v33, %v11865_v22  ;;  %v11867_v44 = vld [vmem:[#allocation71_spill] sm:$0xff]  ;;  %s6030_s8 = scalar_lea.hbm %s11887_s0, %s7356_s19  ;;  %s8092_s14 = scalar_lea.hbm %s11887_s0, 256 }
 0x74f   : > { %5960 = vst [vmem:[%s11274_s3 + $0x20] sm:$0xff] %v5944_v62  ;;  %v5522_v35 = vpop.xlane.xlu1 %5521  ;;  %v11862_v62 = vld [vmem:[#allocation70_spill] sm:$0xff]  ;;  %s6033_s11 = sshll.u32 %s6030_s8, 4  ;;  %s6034_s11 = int_to_ptr.hbm [resolvable:$true] %s6033_s11 }
 0x750   : > { %5961 = vst [vmem:[%s11274_s3 + $0x28] sm:$0xff] %v5945_v23  ;;  %v5832_v17 = vsel %vm5825_vm8, %v5522_v35, 0.0  ;;  %v5869_v35 = vsel %vm5858_vm13, %v11167_v9, 0.0  ;;  %s8086_s30 = sshra.s32 %s6034_s11, 4  ;;  %s8087_s30 = int_to_ptr.hbm [resolvable:$true] %s8086_s30 }
 0x751   : > { %v5848_v42 = vadd.f32 %v5832_v17, %v5815_v7  ;;  %v11868_v7 = vld [vmem:[#allocation48_spill] sm:$0xff]  ;;  %s8088_s17 = scalar_lea.hbm %s8087_s30, 128  ;;  %p8093_p5 = scmp.lt.s32.totalorder %s8087_s30, %s11887_s0 }
 0x752   : > { %v5902_v17 = vsel %vm5891_vm12, %v11868_v7, 0.0  ;;  %p8089_p12 = scmp.ne.s32.totalorder %s8087_s30, %s8088_s17  ;;  %p8094_p8 = scmp.lt.s32.totalorder %s8092_s14, %s8088_s17 }
 0x753   : > { %v5881_v24 = vadd.f32 %v5865_v2, %v5848_v42  ;;  %v11869_v42 = vld [vmem:[#allocation39_spill] sm:$0xff]  ;;  %v11870_v2 = vld [vmem:[#allocation56_spill] sm:$0xff] }
 0x754   : > { %p8090_p7 = pnand %p8089_p12, %p8399_p4  ;;  %p8095_p10 = por %p8094_p8, %p8093_p5 }
 0x755   : > { %v5914_v58 = vadd.f32 %v5898_v15, %v5881_v24  ;;  %v5934_v24 = vadd.f32 %v11870_v2, %v11869_v42 }
 0x756   : > { %p8091_p9 = pneg %p8090_p7 }
 0x757   : > { %v5946_v0 = vadd.f32 %v5930_v28, %v5914_v58  ;;  %v11871_v28 = vld [vmem:[#allocation69_spill] sm:$0xff] }
 0x758   : > { %p8096_p13 = pnand %p8095_p10, %p8091_p9 }
 0x759   : > { %5962 = vst [vmem:[%s11274_s3 + $0x30] sm:$0xff] %v5946_v0  ;;  %v5525_v50 = vpop.xlane.xlu0 %5524  ;;  %v11872_v0 = vld [vmem:[#allocation76_spill] sm:$0xff] }
 0x75a   : > { %v5833_v8 = vsel %vm5825_vm8, %v5525_v50, 0.0  ;;  %v5870_v9 = vsel %vm5858_vm13, %v11872_v0, 0.0 }
 0x75b   : > { %v5849_v1 = vadd.f32 %v5833_v8, %v11854_v55  ;;  %v11873_v8 = vld [vmem:[#allocation62_spill] sm:$0xff] }
 0x75c   : > { %v5903_v55 = vsel %vm5891_vm12, %v11873_v8, 0.0 }
 0x75d   : > { %v5882_v21 = vadd.f32 %v5866_v16, %v5849_v1  ;;  %v11874_v16 = vld [vmem:[#allocation43_spill] sm:$0xff] }
 0x75f   : > { %v5915_v41 = vadd.f32 %v5899_v32, %v5882_v21  ;;  %v11875_v21 = vld [vmem:[#allocation57_spill] sm:$0xff] }
 0x760   : > { %v5935_v6 = vadd.f32 %v11875_v21, %v11874_v16 }
 0x761   : > { %v5947_v11 = vadd.f32 %v5931_v40, %v5915_v41  ;;  %v5871_v41 = vsel %vm5858_vm13, %v11161_v19, 0.0  ;;  %v11880_v19 = vld [vmem:[#allocation72_spill] sm:$0xff] }
 0x763   : > { %5963 = vst [vmem:[%s11274_s3 + $0x38] sm:$0xff] %v5947_v11 }
 0x764   : > { %v5528_v20 = vpop.xlane.xlu2 %5527 }
 0x765   : > { %v5834_v37 = vsel %vm5825_vm8, %v5528_v20, 0.0 }
 0x766   : > { %v5850_v51 = vadd.f32 %v5834_v37, %v11858_v46  ;;  %v11877_v37 = vld [vmem:[#allocation64_spill] sm:$0xff] }
 0x767   : > { %v5904_v46 = vsel %vm5891_vm12, %v11877_v37, 0.0 }
 0x768   : > { %v5883_v36 = vadd.f32 %v5867_v10, %v5850_v51  ;;  %v11878_v51 = vld [vmem:[#allocation44_spill] sm:$0xff]  ;;  %v11879_v10 = vld [vmem:[#allocation59_spill] sm:$0xff] }
 0x76a   : > { %v5916_v47 = vadd.f32 %v5900_v57, %v5883_v36  ;;  %v5936_v36 = vadd.f32 %v11879_v10, %v11878_v51 }
 0x76c   : > { %v5948_v60 = vadd.f32 %v5932_v34, %v5916_v47 }
 0x76e   : > { %v5531_v48 = vpop.xlane.xlu1 %5530  ;;  %5964 = vst [vmem:[%s11274_s3 + $0x40] sm:$0xff] %v5948_v60 }
 0x76f   : > { %v5835_v25 = vsel %vm5825_vm8, %v5531_v48, 0.0  ;;  %v5873_v48 = vsel %vm5858_vm13, %v11155_v61, 0.0 }
 0x770   : > { %v5851_v52 = vadd.f32 %v5835_v25, %v11862_v62 }
 0x772   : > { %v5884_v26 = vadd.f32 %v5868_v14, %v5851_v52  ;;  %v11881_v52 = vld [vmem:[#allocation47_spill] sm:$0xff] }
 0x773   : > { %v5938_v14 = vadd.f32 %v11882_v27, %v11881_v52 }
 0x774   : > { %v5917_v13 = vadd.f32 %v5901_v39, %v5884_v26 }
 0x776   : > { %v5949_v12 = vadd.f32 %v5933_v4, %v5917_v13  ;;  %v11883_v4 = vld [vmem:[#allocation75_spill] sm:$0xff] }
 0x777   : > { %v5534_v43 = vpop.xlane.xlu0 %5533 }
 0x778   : > { %5965 = vst [vmem:[%s11274_s3 + $0x48] sm:$0xff] %v5949_v12  ;;  %v5836_v38 = vsel %vm5825_vm8, %v5534_v43, 0.0  ;;  %v5874_v12 = vsel %vm5858_vm13, %v11209_v31, 0.0  ;;  %v11884_v43 = vld [vmem:[#allocation74_spill] sm:$0xff]  ;;  %v5872_v31 = vsel %vm5858_vm13, %v11214_v63, 0.0 }
 0x779   : > { %v5852_v23 = vadd.f32 %v5836_v38, %v11867_v44 }
 0x77b   : > { %v5885_v54 = vadd.f32 %v5869_v35, %v5852_v23  ;;  %v11885_v35 = vld [vmem:[#allocation49_spill] sm:$0xff] }
 0x77d   : > { %v5918_v29 = vadd.f32 %v5902_v17, %v5885_v54  ;;  %v11886_v54 = vld [vmem:[#allocation61_spill] sm:$0xff] }
 0x77e   : > { %v5939_v7 = vadd.f32 %v11886_v54, %v11885_v35 }
 0x77f   : > { %v5950_v15 = vadd.f32 %v5934_v24, %v5918_v29 }
 0x781   : > { %5966 = vst [vmem:[%s11274_s3 + $0x50] sm:$0xff] %v5950_v15  ;;  %v11888_v15 = vld [vmem:[#allocation45_spill] sm:$0xff] }
 0x782   : > { %v5537_v30 = vpop.xlane.xlu2 %5536 }
 0x783   : > { %v5837_v49 = vsel %vm5825_vm8, %v5537_v30, 0.0  ;;  %v11889_v30 = vld [vmem:[#allocation58_spill] sm:$0xff] }
 0x784   : > { %v5853_v58 = vadd.f32 %v5837_v49, %v11871_v28  ;;  %v5937_v49 = vadd.f32 %v11889_v30, %v11888_v15 }
 0x786   : > { %v5886_v50 = vadd.f32 %v5870_v9, %v5853_v58 }
 0x788   : > { %v5540_v1 = vpop.xlane.xlu1 %5539  ;;  %v5919_v32 = vadd.f32 %v5903_v55, %v5886_v50 }
 0x789   : > { %v5838_v3 = vsel %vm5825_vm8, %v5540_v1, 0.0 }
 0x78a   : > { %v5854_v40 = vadd.f32 %v5838_v3, %v11876_v18  ;;  %v5951_v11 = vadd.f32 %v5935_v6, %v5919_v32 }
 0x78c   : > { %v5887_v20 = vadd.f32 %v5871_v41, %v5854_v40  ;;  %5967 = vst [vmem:[%s11274_s3 + $0x58] sm:$0xff] %v5951_v11 }
 0x78e   : > { %v5920_v45 = vadd.f32 %v5904_v46, %v5887_v20 }
 0x790   : > { %v5952_v57 = vadd.f32 %v5936_v36, %v5920_v45  ;;  %v5543_v56 = vpop.xlane.xlu0 %5542 }
 0x791   : > { %v5839_v39 = vsel %vm5825_vm8, %v5543_v56, 0.0 }
 0x792   : > { %5968 = vst [vmem:[%s11274_s3 + $0x60] sm:$0xff] %v5952_v57  ;;  %v5855_v38 = vadd.f32 %v5839_v39, %v11884_v43 }
 0x794   : > { %v5888_v24 = vadd.f32 %v5872_v31, %v5855_v38 }
 0x798   : > { %v5546_v53 = vpop.xlane.xlu2 %5545  ;;  %v5802_v60 = vpop.xlane.xlu0 %5801 }
 0x799   : > { %v5840_v34 = vsel %vm5825_vm8, %v5546_v53, 0.0  ;;  %v5906_v62 = vsel %vm5891_vm12, %v5802_v60, 0.0 }
 0x79a   : > { %v5856_v47 = vadd.f32 %v5840_v34, %v11880_v19 }
 0x79c   : > { %v5889_v25 = vadd.f32 %v5873_v48, %v5856_v47 }
 0x79e   : > { %v5922_v26 = vadd.f32 %v5906_v62, %v5889_v25 }
 0x79f   : > { %v5549_v5 = vpop.xlane.xlu1 %5548 }
 0x7a0   : > { %v5954_v22 = vadd.f32 %v5938_v14, %v5922_v26  ;;  %v5841_v33 = vsel %vm5825_vm8, %v5549_v5, 0.0  ;;  %v5805_v61 = vpop.xlane.xlu2 %5804 }
 0x7a1   : > { %v5857_v13 = vadd.f32 %v5841_v33, %v11883_v4  ;;  %v5907_v23 = vsel %vm5891_vm12, %v5805_v61, 0.0 }
 0x7a2   : > { %5970 = vst [vmem:[%s11274_s3 + $0x70] sm:$0xff] %v5954_v22 }
 0x7a3   : > { %v5890_v44 = vadd.f32 %v5874_v12, %v5857_v13 }
 0x7a5   : > { %v5923_v17 = vadd.f32 %v5907_v23, %v5890_v44 }
 0x7a7   : > { %v5955_v42 = vadd.f32 %v5939_v7, %v5923_v17  ;;  %v5799_v2 = vpop.xlane.xlu1 %5798 }
 0x7a8   : > { %v5905_v29 = vsel %vm5891_vm12, %v5799_v2, 0.0 }
 0x7a9   : > { %5971 = vst [vmem:[%s11274_s3 + $0x78] sm:$0xff] %v5955_v42  ;;  %v5921_v28 = vadd.f32 %v5905_v29, %v5888_v24 }
 0x7ab   : > { %v5953_v58 = vadd.f32 %v5937_v49, %v5921_v28 }
 0x7ad   : > { %5969 = vst [vmem:[%s11274_s3 + $0x68] sm:$0xff] %v5953_v58 }
 0x7ae   : > { %8099 = shalt.err (!%p8096_p13)
}
 0x7af   : > { %s8179_s3 = smov 128   ;;  %s8180_s1 = smov 8  }
 0x7b0   : > { %7411 = dma.vmem_to_hbm [thread:$0]  (%p8399_p4), %s6032_s27, 2048, %s6034_s11, %s11331_s23, %s8179_s3, %s8179_s3, %s8180_s1  }
 0x7b1 PF: > { %s11890_s19 = sld [smem:[#allocation28_spill]]  ;;  %p11892_p11 = scmp.ge.s32.totalorder %s8162_s24, 2 }
 0x7b3   : > { %p7442_p0 = pnand %p11892_p11, %p8403_p6 }
 0x7b5   : > { %p7443_p2 = pneg %p7442_p0 }
 0x7b7   : > { %s6048_s6 = sand.u32 1, %s11890_s19  }
 0x7b8   : > { %s6049_s8 = scalar_lea.sflag [#allocation4], %s6048_s6 }
 0x7b9   : > { %8141 = dma.done.wait (%p7443_p2), %s6049_s8, 4096  }
 0x7ba   : > { %8143 = vsyncadd (%p7443_p2), %s6049_s8, 4294963200  ;;  %s11893_s30 = sadd.s32 4294967294, %s8162_s24  }
 0x7bb   : > { %s6058_s17 = sand.u32 1, %s11893_s30  }
 0x7bc   : > { %s6059_s28 = scalar_lea.sflag [#allocation18], %s6058_s17 }
 0x7bd   : > { %8145 = dma.done.wait (%p7443_p2), %s6059_s28, 6144  }
 0x7be   : > { %8147 = vsyncadd (%p7443_p2), %s6059_s28, 4294961152  ;;  %s11894_s24 = sld [smem:[#allocation30_spill]]  ;;  %s11897_s1 = smov %s8154_s22 }
 0x7bf   : > { %s11895_s15 = sld [smem:[#allocation29_spill]] }
 0x7c0   : > { %s11896_s23 = sld [smem:[#allocation31_spill]] }
 0x7c4   : > { %p43_p4 = scmp.ge.s32.totalorder %s11894_s24, 4  }
 0x7c5   : > { %s11898_s22 = smov %s11895_s15 }
 0x7c6   :  { %45 = sbr.rel (!%p43_p4) target bundleno = 29 (0x1d), region = 206 }
 0x7cb   :  { %6075 = vsyncpa [#allocation3], 1 }
 0x7cc   :  { %6077 = vsyncpa [#allocation3 + $0x1], 1 }
 0x7cd   :  { %6078 = vsyncpa [#allocation6], 1 }
 0x7ce   :  { %6080 = vsyncpa [#allocation6 + $0x1], 1 }
 0x7cf   :  { %6081 = vsyncpa [#allocation9], 1 }
 0x7d0   :  { %6082 = vsyncpa [#allocation12], 1 }
 0x7d1   :  { %6083 = vsyncpa [#allocation15], 1 }
 0x7d2   :  { %6084 = vsyncpa [#allocation4], 1 }
 0x7d3   :  { %6086 = vsyncpa [#allocation4 + $0x1], 1 }
 0x7d4   :  { %6087 = vsyncpa [#allocation18], 1 }
 0x7d5   :  { %6089 = vsyncpa [#allocation18 + $0x1], 1 }

</bundles_post_ra>
